<compile_context>
chip_gen: v7x
topology: tpu7x:2x2x1
jax: 0.10.0
libtpu: 0.0.40
codegen_flags: <defaults>
</compile_context>

<pallas_src>
import functools

import jax
import jax.numpy as jnp
from jax.experimental import pallas as pl
from jax.experimental.pallas import tpu as pltpu


# ----------------------------- small helpers --------------------------------

def _round_up(x, m):
    return (x + m - 1) // m * m


def _pick_tile(dim, pref, align):
    """Largest tile <= pref that is a multiple of `align` and evenly divides
    the (align-rounded) dimension.  Returns (tile, padded_dim)."""
    dp = _round_up(max(dim, align), align)
    best = align
    t = align
    while t <= min(pref, dp):
        if dp % t == 0:
            best = t
        t += align
    return best, dp


# ----------------------------- Pallas kernels -------------------------------

def _matmul_bias_kernel(x_ref, w_ref, b_ref, o_ref, acc_ref, *, relu):
    # One 3x3-conv tile as im2col matmul: x (tm, tk) bf16, w (tk, tn) bf16,
    # b (1, tn) f32, o (tm, tn) bf16, acc (tm, tn) f32 scratch.
    @pl.when(pl.program_id(2) == 0)
    def _():
        acc_ref[...] = jnp.zeros_like(acc_ref)

    acc_ref[...] += jnp.dot(x_ref[...], w_ref[...],
                            preferred_element_type=jnp.float32)

    @pl.when(pl.program_id(2) == pl.num_programs(2) - 1)
    def _():
        r = acc_ref[...] + b_ref[...].astype(jnp.float32)
        if relu:
            r = jnp.maximum(r, 0.0)
        o_ref[...] = r.astype(o_ref.dtype)


def _l1_sum_kernel(a_ref, b_ref, o_ref):
    # a, b: (rb, LANE) slabs; o: resident (1, 1) f32 accumulator.
    @pl.when(pl.program_id(0) == 0)
    def _():
        o_ref[...] = jnp.zeros_like(o_ref)
    d = a_ref[...].astype(jnp.float32) - b_ref[...].astype(jnp.float32)
    o_ref[...] += jnp.sum(jnp.abs(d))


def _edge_map(x, W):
    # x: (rb, H*W) f32, each row = one zero-padded-conv channel image
    # flattened row-major.  Implements Get_gradient:
    #   v = x[h+1, w] - x[h-1, w] ; h = x[h, w+1] - x[h, w-1]  (zero pad)
    #   edge = sqrt(v^2 + h^2 + 1e-6)
    rb, HW = x.shape
    zW = jnp.zeros((rb, W), jnp.float32)
    z1 = jnp.zeros((rb, 1), jnp.float32)
    down = jnp.concatenate([x[:, W:], zW], axis=1)          # x[h+1, w]
    up = jnp.concatenate([zW, x[:, :HW - W]], axis=1)       # x[h-1, w]
    right = jnp.concatenate([x[:, 1:], z1], axis=1)         # x[h, w+1]
    left = jnp.concatenate([z1, x[:, :HW - 1]], axis=1)     # x[h, w-1]
    col = jax.lax.broadcasted_iota(jnp.int32, (rb, HW), 1) % W
    right = jnp.where(col == W - 1, 0.0, right)              # zero pad at w=W-1
    left = jnp.where(col == 0, 0.0, left)                    # zero pad at w=0
    v = down - up
    h = right - left
    return jnp.sqrt(v * v + h * h + 1e-6)


def _edge_l1_kernel(a_ref, b_ref, o_ref, *, W, n_valid, edge_a, edge_b):
    # Fused Get_gradient + L1: sum | maybe_edge(a) - maybe_edge(b) | over
    # lane-dense (rb, H*W) channel-image blocks, no edge maps written to HBM.
    @pl.when(pl.program_id(0) == 0)
    def _():
        o_ref[...] = jnp.zeros_like(o_ref)
    a = a_ref[...].astype(jnp.float32)
    b = b_ref[...].astype(jnp.float32)
    ea = _edge_map(a, W) if edge_a else a
    eb = _edge_map(b, W) if edge_b else b
    rb = a.shape[0]
    rid = pl.program_id(0) * rb + jax.lax.broadcasted_iota(jnp.int32, a.shape, 0)
    d = jnp.where(rid < n_valid, jnp.abs(ea - eb), 0.0)   # mask padded rows
    o_ref[...] += jnp.sum(d)


# ----------------------------- Pallas wrappers ------------------------------

def conv3x3_matmul(cols, w, b, relu):
    """Tiled bf16 MXU matmul with fused bias(+ReLU): (M,K)@(K,N) + b."""
    M, K = cols.shape
    N = w.shape[1]
    tm, Mp = _pick_tile(M, 512, 16)    # sublane tiles, bf16-friendly
    tn, Np = _pick_tile(N, 256, 128)   # lane tiles, multiples of 128 (v5e MXU)
    tk, Kp = _pick_tile(K, 512, 128)
    cols_p = cols if (Mp == M and Kp == K) else jnp.pad(cols, ((0, Mp - M), (0, Kp - K)))
    w_p = w if (Kp == K and Np == N) else jnp.pad(w, ((0, Kp - K), (0, Np - N)))
    b_p = (b if Np == N else jnp.pad(b, (0, Np - N))).reshape(1, Np)

    out = pl.pallas_call(
        functools.partial(_matmul_bias_kernel, relu=relu),
        grid=(Mp // tm, Np // tn, Kp // tk),                   # K reduction last
        in_specs=[pl.BlockSpec((tm, tk), lambda i, j, k: (i, k)),
                  pl.BlockSpec((tk, tn), lambda i, j, k: (k, j)),
                  pl.BlockSpec((1, tn), lambda i, j, k: (0, j))],
        out_specs=pl.BlockSpec((tm, tn), lambda i, j, k: (i, j)),
        out_shape=jax.ShapeDtypeStruct((Mp, Np), jnp.bfloat16),
        scratch_shapes=[pltpu.VMEM((tm, tn), jnp.float32)],
        compiler_params=pltpu.CompilerParams(
            dimension_semantics=("parallel", "parallel", "arbitrary"),
            vmem_limit_bytes=48 * 1024 * 1024),                # headroom on v7x 64MiB
    )(cols_p, w_p, b_p)
    return out[:M, :N]


def l1_loss(a, b):
    """nn.L1Loss() (mean reduction), gridded over (rows, 512) slabs."""
    n = a.size
    af = a.reshape(-1)
    bf = b.reshape(-1)
    lane = 512
    pad = (-n) % lane
    if pad:  # zero padding contributes |0-0| = 0
        af = jnp.pad(af, (0, pad))
        bf = jnp.pad(bf, (0, pad))
    R = af.size // lane
    rb, Rp = _pick_tile(R, 256, 16)
    if Rp != R:
        af = jnp.pad(af, (0, (Rp - R) * lane))
        bf = jnp.pad(bf, (0, (Rp - R) * lane))
    a2 = af.reshape(Rp, lane)
    b2 = bf.reshape(Rp, lane)
    s = pl.pallas_call(
        _l1_sum_kernel,
        grid=(Rp // rb,),
        in_specs=[pl.BlockSpec((rb, lane), lambda i: (i, 0)),
                  pl.BlockSpec((rb, lane), lambda i: (i, 0))],
        out_specs=pl.BlockSpec((1, 1), lambda i: (0, 0)),      # resident accumulator
        out_shape=jax.ShapeDtypeStruct((1, 1), jnp.float32),
        compiler_params=pltpu.CompilerParams(dimension_semantics=("arbitrary",)),
    )(a2, b2)
    return s[0, 0] / n


def edge_l1_loss(a, b, *, edge_a, edge_b):
    """mean | maybe_edge(a) - maybe_edge(b) | with Get_gradient fused in."""
    B, C, H, W = a.shape
    N = B * C
    HW = H * W
    a2 = a.reshape(N, HW).astype(jnp.float32)
    b2 = b.reshape(N, HW).astype(jnp.float32)
    rb_pref = max(8, min(256, (2 * 1024 * 1024) // (4 * HW)))   # ~2MB/block
    rb_pref = max(8, rb_pref - rb_pref % 8)
    rb, Np = _pick_tile(N, rb_pref, 8)
    if Np != N:
        a2 = jnp.pad(a2, ((0, Np - N), (0, 0)))
        b2 = jnp.pad(b2, ((0, Np - N), (0, 0)))
    kern = functools.partial(_edge_l1_kernel, W=W, n_valid=N,
                             edge_a=edge_a, edge_b=edge_b)
    s = pl.pallas_call(
        kern,
        grid=(Np // rb,),
        in_specs=[pl.BlockSpec((rb, HW), lambda i: (i, 0)),
                  pl.BlockSpec((rb, HW), lambda i: (i, 0))],
        out_specs=pl.BlockSpec((1, 1), lambda i: (0, 0)),
        out_shape=jax.ShapeDtypeStruct((1, 1), jnp.float32),
        compiler_params=pltpu.CompilerParams(dimension_semantics=("arbitrary",)),
    )(a2, b2)
    return s[0, 0] / (N * HW)


# ----------------------------- VGG19[:22] (ContentLoss) ---------------------

IMAGENET_MEAN = jnp.array([0.485, 0.456, 0.406], jnp.float32)
IMAGENET_STD = jnp.array([0.229, 0.224, 0.225], jnp.float32)

# (cin, cout, relu_after, pool_after) == torchvision vgg19.features[:22]
VGG_CFG = [
    (3, 64, True, False), (64, 64, True, True),
    (64, 128, True, False), (128, 128, True, True),
    (128, 256, True, False), (256, 256, True, False),
    (256, 256, True, False), (256, 256, True, True),
    (256, 512, True, False), (512, 512, False, False),
]


def init_vgg_params(key):
    # TODO(synk): pretrained VGG19 weights replaced by deterministic He-init
    # synthetic weights (no checkpoint loading here); if real weights are
    # loaded later, their reshape must match the (tap-major, cin-minor)
    # im2col column order used below.
    params = []
    for cin, cout, _, _ in VGG_CFG:
        key, kw, kb = jax.random.split(key, 3)
        fan_in = 9 * cin
        w = (jax.random.normal(kw, (fan_in, cout), jnp.float32)
             * jnp.sqrt(2.0 / fan_in)).astype(jnp.bfloat16)     # bf16 at MXU boundary
        b = jax.random.normal(kb, (cout,), jnp.float32) * 0.01
        params.append((w, b))
    return params


def _im2col_3x3(x):
    # x: (B, H, W, C) bf16 -> (B*H*W, 9*C); column order = (dy, dx, cin).
    # TODO(synk): im2col is still materialized in HBM (in bf16, halving the
    # traffic vs f32); fusing the 9 shifted taps into the matmul via shifted
    # in-kernel loads is the remaining bandwidth optimization.
    B, H, W, C = x.shape
    xp = jnp.pad(x, ((0, 0), (1, 1), (1, 1), (0, 0)))
    cols = [xp[:, dy:dy + H, dx:dx + W, :] for dy in range(3) for dx in range(3)]
    return jnp.concatenate(cols, axis=-1).reshape(B * H * W, 9 * C)


def _maxpool2(x):
    # TODO(synk): 2x2 max-pool kept as plain-JAX glue (tiny, fuses in XLA);
    # assumes even H and W.
    B, H, W, C = x.shape
    return jnp.max(x.reshape(B, H // 2, 2, W // 2, 2, C), axis=(2, 4))


def vgg_features(x_nchw, params):
    x = jnp.transpose(x_nchw, (0, 2, 3, 1)).astype(jnp.float32)   # NCHW -> NHWC
    # TODO(synk): normalization kept in JAX (it fuses with the im2col pad/concat);
    # exact folding into the first conv changes border semantics (zero padding).
    x = (x - IMAGENET_MEAN) / IMAGENET_STD
    x = x.astype(jnp.bfloat16)
    for (w, b), (cin, cout, relu, pool) in zip(params, VGG_CFG):
        B, H, W, _ = x.shape
        y = conv3x3_matmul(_im2col_3x3(x), w, b, relu)            # Pallas MXU matmul
        x = y.reshape(B, H, W, cout)
        if pool:
            x = _maxpool2(x)
    return x


def content_loss(pred, gt, params):
    return l1_loss(vgg_features(pred, params), vgg_features(gt, params))


# ----------------------------- DualGradLoss.forward -------------------------

def dual_grad_loss(pred_desnow, gt_desnow, gt_mask, pred_mask, pred_edge, vgg_params):
    l1 = l1_loss(pred_desnow, gt_desnow) * 10.0                   # reconstruction * 10
    l2 = content_loss(pred_desnow, gt_desnow, vgg_params)         # perceptual
    l3 = edge_l1_loss(pred_desnow, gt_desnow,                     # edge loss (fused)
                      edge_a=True, edge_b=True)
    l4 = l1_loss(pred_mask, gt_mask) * 10.0                       # snow mask * 10
    l5 = edge_l1_loss(pred_edge, gt_mask,                         # mask-edge refine * 10
                      edge_a=False, edge_b=True) * 10.0
    loss = l1 + l2 + l3 + l4 + l5
    return loss, (l1, l2, l3, l4, l5)


if __name__ == "__main__":
    key = jax.random.PRNGKey(0)
    kp, kg, km, kpm, kpe, kw = jax.random.split(key, 6)
    B, H, W = 2, 16, 16
    pred_desnow = jax.random.uniform(kp, (B, 3, H, W), jnp.float32)
    gt_desnow = jax.random.uniform(kg, (B, 3, H, W), jnp.float32)
    gt_mask = jax.random.uniform(km, (B, 1, H, W), jnp.float32)
    pred_mask = jax.random.uniform(kpm, (B, 1, H, W), jnp.float32)
    pred_edge = jax.random.uniform(kpe, (B, 1, H, W), jnp.float32)
    vgg_params = init_vgg_params(kw)

    fn = jax.jit(dual_grad_loss)
    loss, parts = fn(pred_desnow, gt_desnow, gt_mask, pred_mask, pred_edge, vgg_params)
    jax.block_until_ready((loss, parts))
    print("KERNEL_OK")
</pallas_src>

<mosaic_0001>
module attributes {stable_mosaic.version = 11 : i64} {
  func.func @_matmul_bias_kernel(%arg0: i32, %arg1: i32, %arg2: i32, %arg3: memref<512x128xbf16, #tpu.memory_space<vmem>>, %arg4: memref<128x128xbf16, #tpu.memory_space<vmem>>, %arg5: memref<1x128xf32, #tpu.memory_space<vmem>>, %arg6: memref<512x128xbf16, #tpu.memory_space<vmem>>, %arg7: memref<512x128xf32, #tpu.memory_space<vmem>>) attributes {dimension_semantics = [#tpu.dimension_semantics<parallel>, #tpu.dimension_semantics<parallel>, #tpu.dimension_semantics<arbitrary>], iteration_bounds = array<i64: 1, 1, 1>, scalar_prefetch = 0 : i64, scratch_operands = 1 : i64, tpu.core_type = #tpu.core_type<tc>, window_params = [{transform_indices = @transform_0, window_bounds = array<i64: 512, 128>}, {transform_indices = @transform_1, window_bounds = array<i64: 128, 128>}, {transform_indices = @transform_2, window_bounds = array<i64: 1, 128>}, {transform_indices = @transform_3, window_bounds = array<i64: 512, 128>}]} {
    %c0_i32 = arith.constant 0 : i32
    %0 = arith.cmpi eq, %arg2, %c0_i32 : i32
    %1 = arith.extui %0 : i1 to i32
    %c0_i32_0 = arith.constant 0 : i32
    %2 = arith.cmpi ne, %1, %c0_i32_0 : i32
    scf.if %2 {
      %cst_10 = arith.constant 0.000000e+00 : f32
      %12 = vector.broadcast %cst_10 : f32 to vector<512x128xf32>
      %c0_11 = arith.constant 0 : index
      %c0_12 = arith.constant 0 : index
      %13 = vector.load %arg7[%c0_11, %c0_12] : memref<512x128xf32, #tpu.memory_space<vmem>>, vector<512x128xf32>
      tpu.vector_store %arg7[%c0_11, %c0_12], %12 {strides = array<i32>} : memref<512x128xf32, #tpu.memory_space<vmem>>, vector<512x128xf32>,
    } else {
    }
    %c0 = arith.constant 0 : index
    %c0_1 = arith.constant 0 : index
    %3 = vector.load %arg7[%c0, %c0_1] : memref<512x128xf32, #tpu.memory_space<vmem>>, vector<512x128xf32>
    %c0_2 = arith.constant 0 : index
    %c0_3 = arith.constant 0 : index
    %4 = vector.load %arg3[%c0_2, %c0_3] : memref<512x128xbf16, #tpu.memory_space<vmem>>, vector<512x128xbf16>
    %c0_4 = arith.constant 0 : index
    %c0_5 = arith.constant 0 : index
    %5 = vector.load %arg4[%c0_4, %c0_5] : memref<128x128xbf16, #tpu.memory_space<vmem>>, vector<128x128xbf16>
    %cst = arith.constant dense<0.000000e+00> : vector<512x128xf32>
    %6 = tpu.matmul %4, %5, %cst {dimension_numbers = #tpu.dot_dimension_numbers<[1], [0], [0], [1], [0, 0, 1, 1], [], []>} : vector<512x128xbf16>, vector<128x128xbf16>, vector<512x128xf32> -> vector<512x128xf32>
    %7 = arith.addf %3, %6 : vector<512x128xf32>
    %c0_6 = arith.constant 0 : index
    %c0_7 = arith.constant 0 : index
    %8 = vector.load %arg7[%c0_6, %c0_7] : memref<512x128xf32, #tpu.memory_space<vmem>>, vector<512x128xf32>
    tpu.vector_store %arg7[%c0_6, %c0_7], %7 {strides = array<i32>} : memref<512x128xf32, #tpu.memory_space<vmem>>, vector<512x128xf32>,
    %c0_i32_8 = arith.constant 0 : i32
    %9 = arith.cmpi eq, %arg2, %c0_i32_8 : i32
    %10 = arith.extui %9 : i1 to i32
    %c0_i32_9 = arith.constant 0 : i32
    %11 = arith.cmpi ne, %10, %c0_i32_9 : i32
    scf.if %11 {
      %c0_10 = arith.constant 0 : index
      %c0_11 = arith.constant 0 : index
      %12 = vector.load %arg7[%c0_10, %c0_11] : memref<512x128xf32, #tpu.memory_space<vmem>>, vector<512x128xf32>
      %c0_12 = arith.constant 0 : index
      %c0_13 = arith.constant 0 : index
      %13 = vector.load %arg5[%c0_12, %c0_13] : memref<1x128xf32, #tpu.memory_space<vmem>>, vector<1x128xf32>
      %14 = vector.broadcast %13 : vector<1x128xf32> to vector<512x128xf32>
      %15 = arith.addf %12, %14 : vector<512x128xf32>
      %cst_14 = arith.constant 0.000000e+00 : f32
      %16 = vector.broadcast %cst_14 : f32 to vector<512x128xf32>
      %17 = arith.maximumf %15, %16 : vector<512x128xf32>
      %18 = arith.truncf %17 : vector<512x128xf32> to vector<512x128xbf16>
      %c0_15 = arith.constant 0 : index
      %c0_16 = arith.constant 0 : index
      %19 = vector.load %arg6[%c0_15, %c0_16] : memref<512x128xbf16, #tpu.memory_space<vmem>>, vector<512x128xbf16>
      tpu.vector_store %arg6[%c0_15, %c0_16], %18 {strides = array<i32>} : memref<512x128xbf16, #tpu.memory_space<vmem>>, vector<512x128xbf16>,
    } else {
    }
    return
  }
  func.func @transform_0(%arg0: i32, %arg1: i32, %arg2: i32) -> (i32, i32) {
    %c0_i32 = arith.constant 0 : i32
    return %arg0, %arg2 : i32, i32
  }
  func.func @transform_1(%arg0: i32, %arg1: i32, %arg2: i32) -> (i32, i32) {
    %c0_i32 = arith.constant 0 : i32
    return %arg2, %arg1 : i32, i32
  }
  func.func @transform_2(%arg0: i32, %arg1: i32, %arg2: i32) -> (i32, i32) {
    %c0_i32 = arith.constant 0 : i32
    %c0_i32_0 = arith.constant 0 : i32
    return %c0_i32, %arg1 : i32, i32
  }
  func.func @transform_3(%arg0: i32, %arg1: i32, %arg2: i32) -> (i32, i32) {
    %c0_i32 = arith.constant 0 : i32
    return %arg0, %arg1 : i32, i32
  }
}

module attributes {stable_mosaic.version = 11 : i64} {
  func.func @_matmul_bias_kernel(%arg0: i32, %arg1: i32, %arg2: i32, %arg3: memref<512x128xbf16, #tpu.memory_space<vmem>>, %arg4: memref<128x128xbf16, #tpu.memory_space<vmem>>, %arg5: memref<1x128xf32, #tpu.memory_space<vmem>>, %arg6: memref<512x128xbf16, #tpu.memory_space<vmem>>, %arg7: memref<512x128xf32, #tpu.memory_space<vmem>>) attributes {dimension_semantics = [#tpu.dimension_semantics<parallel>, #tpu.dimension_semantics<parallel>, #tpu.dimension_semantics<arbitrary>], iteration_bounds = array<i64: 1, 1, 5>, scalar_prefetch = 0 : i64, scratch_operands = 1 : i64, tpu.core_type = #tpu.core_type<tc>, window_params = [{transform_indices = @transform_0, window_bounds = array<i64: 512, 128>}, {transform_indices = @transform_1, window_bounds = array<i64: 128, 128>}, {transform_indices = @transform_2, window_bounds = array<i64: 1, 128>}, {transform_indices = @transform_3, window_bounds = array<i64: 512, 128>}]} {
    %c0_i32 = arith.constant 0 : i32
    %0 = arith.cmpi eq, %arg2, %c0_i32 : i32
    %1 = arith.extui %0 : i1 to i32
    %c0_i32_0 = arith.constant 0 : i32
    %2 = arith.cmpi ne, %1, %c0_i32_0 : i32
    scf.if %2 {
      %cst_9 = arith.constant 0.000000e+00 : f32
      %12 = vector.broadcast %cst_9 : f32 to vector<512x128xf32>
      %c0_10 = arith.constant 0 : index
      %c0_11 = arith.constant 0 : index
      %13 = vector.load %arg7[%c0_10, %c0_11] : memref<512x128xf32, #tpu.memory_space<vmem>>, vector<512x128xf32>
      tpu.vector_store %arg7[%c0_10, %c0_11], %12 {strides = array<i32>} : memref<512x128xf32, #tpu.memory_space<vmem>>, vector<512x128xf32>,
    } else {
    }
    %c0 = arith.constant 0 : index
    %c0_1 = arith.constant 0 : index
    %3 = vector.load %arg7[%c0, %c0_1] : memref<512x128xf32, #tpu.memory_space<vmem>>, vector<512x128xf32>
    %c0_2 = arith.constant 0 : index
    %c0_3 = arith.constant 0 : index
    %4 = vector.load %arg3[%c0_2, %c0_3] : memref<512x128xbf16, #tpu.memory_space<vmem>>, vector<512x128xbf16>
    %c0_4 = arith.constant 0 : index
    %c0_5 = arith.constant 0 : index
    %5 = vector.load %arg4[%c0_4, %c0_5] : memref<128x128xbf16, #tpu.memory_space<vmem>>, vector<128x128xbf16>
    %cst = arith.constant dense<0.000000e+00> : vector<512x128xf32>
    %6 = tpu.matmul %4, %5, %cst {dimension_numbers = #tpu.dot_dimension_numbers<[1], [0], [0], [1], [0, 0, 1, 1], [], []>} : vector<512x128xbf16>, vector<128x128xbf16>, vector<512x128xf32> -> vector<512x128xf32>
    %7 = arith.addf %3, %6 : vector<512x128xf32>
    %c0_6 = arith.constant 0 : index
    %c0_7 = arith.constant 0 : index
    %8 = vector.load %arg7[%c0_6, %c0_7] : memref<512x128xf32, #tpu.memory_space<vmem>>, vector<512x128xf32>
    tpu.vector_store %arg7[%c0_6, %c0_7], %7 {strides = array<i32>} : memref<512x128xf32, #tpu.memory_space<vmem>>, vector<512x128xf32>,
    %c4_i32 = arith.constant 4 : i32
    %9 = arith.cmpi eq, %arg2, %c4_i32 : i32
    %10 = arith.extui %9 : i1 to i32
    %c0_i32_8 = arith.constant 0 : i32
    %11 = arith.cmpi ne, %10, %c0_i32_8 : i32
    scf.if %11 {
      %c0_9 = arith.constant 0 : index
      %c0_10 = arith.constant 0 : index
      %12 = vector.load %arg7[%c0_9, %c0_10] : memref<512x128xf32, #tpu.memory_space<vmem>>, vector<512x128xf32>
      %c0_11 = arith.constant 0 : index
      %c0_12 = arith.constant 0 : index
      %13 = vector.load %arg5[%c0_11, %c0_12] : memref<1x128xf32, #tpu.memory_space<vmem>>, vector<1x128xf32>
      %14 = vector.broadcast %13 : vector<1x128xf32> to vector<512x128xf32>
      %15 = arith.addf %12, %14 : vector<512x128xf32>
      %cst_13 = arith.constant 0.000000e+00 : f32
      %16 = vector.broadcast %cst_13 : f32 to vector<512x128xf32>
      %17 = arith.maximumf %15, %16 : vector<512x128xf32>
      %18 = arith.truncf %17 : vector<512x128xf32> to vector<512x128xbf16>
      %c0_14 = arith.constant 0 : index
      %c0_15 = arith.constant 0 : index
      %19 = vector.load %arg6[%c0_14, %c0_15] : memref<512x128xbf16, #tpu.memory_space<vmem>>, vector<512x128xbf16>
      tpu.vector_store %arg6[%c0_14, %c0_15], %18 {strides = array<i32>} : memref<512x128xbf16, #tpu.memory_space<vmem>>, vector<512x128xbf16>,
    } else {
    }
    return
  }
  func.func @transform_0(%arg0: i32, %arg1: i32, %arg2: i32) -> (i32, i32) {
    %c0_i32 = arith.constant 0 : i32
    return %arg0, %arg2 : i32, i32
  }
  func.func @transform_1(%arg0: i32, %arg1: i32, %arg2: i32) -> (i32, i32) {
    %c0_i32 = arith.constant 0 : i32
    return %arg2, %arg1 : i32, i32
  }
  func.func @transform_2(%arg0: i32, %arg1: i32, %arg2: i32) -> (i32, i32) {
    %c0_i32 = arith.constant 0 : i32
    %c0_i32_0 = arith.constant 0 : i32
    return %c0_i32, %arg1 : i32, i32
  }
  func.func @transform_3(%arg0: i32, %arg1: i32, %arg2: i32) -> (i32, i32) {
    %c0_i32 = arith.constant 0 : i32
    return %arg0, %arg1 : i32, i32
  }
}

module attributes {stable_mosaic.version = 11 : i64} {
  func.func @_matmul_bias_kernel(%arg0: i32, %arg1: i32, %arg2: i32, %arg3: memref<128x128xbf16, #tpu.memory_space<vmem>>, %arg4: memref<128x128xbf16, #tpu.memory_space<vmem>>, %arg5: memref<1x128xf32, #tpu.memory_space<vmem>>, %arg6: memref<128x128xbf16, #tpu.memory_space<vmem>>, %arg7: memref<128x128xf32, #tpu.memory_space<vmem>>) attributes {dimension_semantics = [#tpu.dimension_semantics<parallel>, #tpu.dimension_semantics<parallel>, #tpu.dimension_semantics<arbitrary>], iteration_bounds = array<i64: 1, 1, 5>, scalar_prefetch = 0 : i64, scratch_operands = 1 : i64, tpu.core_type = #tpu.core_type<tc>, window_params = [{transform_indices = @transform_0, window_bounds = array<i64: 128, 128>}, {transform_indices = @transform_1, window_bounds = array<i64: 128, 128>}, {transform_indices = @transform_2, window_bounds = array<i64: 1, 128>}, {transform_indices = @transform_3, window_bounds = array<i64: 128, 128>}]} {
    %c0_i32 = arith.constant 0 : i32
    %0 = arith.cmpi eq, %arg2, %c0_i32 : i32
    %1 = arith.extui %0 : i1 to i32
    %c0_i32_0 = arith.constant 0 : i32
    %2 = arith.cmpi ne, %1, %c0_i32_0 : i32
    scf.if %2 {
      %cst_9 = arith.constant 0.000000e+00 : f32
      %12 = vector.broadcast %cst_9 : f32 to vector<128x128xf32>
      %c0_10 = arith.constant 0 : index
      %c0_11 = arith.constant 0 : index
      %13 = vector.load %arg7[%c0_10, %c0_11] : memref<128x128xf32, #tpu.memory_space<vmem>>, vector<128x128xf32>
      tpu.vector_store %arg7[%c0_10, %c0_11], %12 {strides = array<i32>} : memref<128x128xf32, #tpu.memory_space<vmem>>, vector<128x128xf32>,
    } else {
    }
    %c0 = arith.constant 0 : index
    %c0_1 = arith.constant 0 : index
    %3 = vector.load %arg7[%c0, %c0_1] : memref<128x128xf32, #tpu.memory_space<vmem>>, vector<128x128xf32>
    %c0_2 = arith.constant 0 : index
    %c0_3 = arith.constant 0 : index
    %4 = vector.load %arg3[%c0_2, %c0_3] : memref<128x128xbf16, #tpu.memory_space<vmem>>, vector<128x128xbf16>
    %c0_4 = arith.constant 0 : index
    %c0_5 = arith.constant 0 : index
    %5 = vector.load %arg4[%c0_4, %c0_5] : memref<128x128xbf16, #tpu.memory_space<vmem>>, vector<128x128xbf16>
    %cst = arith.constant dense<0.000000e+00> : vector<128x128xf32>
    %6 = tpu.matmul %4, %5, %cst {dimension_numbers = #tpu.dot_dimension_numbers<[1], [0], [0], [1], [0, 0, 1, 1], [], []>} : vector<128x128xbf16>, vector<128x128xbf16>, vector<128x128xf32> -> vector<128x128xf32>
    %7 = arith.addf %3, %6 : vector<128x128xf32>
    %c0_6 = arith.constant 0 : index
    %c0_7 = arith.constant 0 : index
    %8 = vector.load %arg7[%c0_6, %c0_7] : memref<128x128xf32, #tpu.memory_space<vmem>>, vector<128x128xf32>
    tpu.vector_store %arg7[%c0_6, %c0_7], %7 {strides = array<i32>} : memref<128x128xf32, #tpu.memory_space<vmem>>, vector<128x128xf32>,
    %c4_i32 = arith.constant 4 : i32
    %9 = arith.cmpi eq, %arg2, %c4_i32 : i32
    %10 = arith.extui %9 : i1 to i32
    %c0_i32_8 = arith.constant 0 : i32
    %11 = arith.cmpi ne, %10, %c0_i32_8 : i32
    scf.if %11 {
      %c0_9 = arith.constant 0 : index
      %c0_10 = arith.constant 0 : index
      %12 = vector.load %arg7[%c0_9, %c0_10] : memref<128x128xf32, #tpu.memory_space<vmem>>, vector<128x128xf32>
      %c0_11 = arith.constant 0 : index
      %c0_12 = arith.constant 0 : index
      %13 = vector.load %arg5[%c0_11, %c0_12] : memref<1x128xf32, #tpu.memory_space<vmem>>, vector<1x128xf32>
      %14 = vector.broadcast %13 : vector<1x128xf32> to vector<128x128xf32>
      %15 = arith.addf %12, %14 : vector<128x128xf32>
      %cst_13 = arith.constant 0.000000e+00 : f32
      %16 = vector.broadcast %cst_13 : f32 to vector<128x128xf32>
      %17 = arith.maximumf %15, %16 : vector<128x128xf32>
      %18 = arith.truncf %17 : vector<128x128xf32> to vector<128x128xbf16>
      %c0_14 = arith.constant 0 : index
      %c0_15 = arith.constant 0 : index
      %19 = vector.load %arg6[%c0_14, %c0_15] : memref<128x128xbf16, #tpu.memory_space<vmem>>, vector<128x128xbf16>
      tpu.vector_store %arg6[%c0_14, %c0_15], %18 {strides = array<i32>} : memref<128x128xbf16, #tpu.memory_space<vmem>>, vector<128x128xbf16>,
    } else {
    }
    return
  }
  func.func @transform_0(%arg0: i32, %arg1: i32, %arg2: i32) -> (i32, i32) {
    %c0_i32 = arith.constant 0 : i32
    return %arg0, %arg2 : i32, i32
  }
  func.func @transform_1(%arg0: i32, %arg1: i32, %arg2: i32) -> (i32, i32) {
    %c0_i32 = arith.constant 0 : i32
    return %arg2, %arg1 : i32, i32
  }
  func.func @transform_2(%arg0: i32, %arg1: i32, %arg2: i32) -> (i32, i32) {
    %c0_i32 = arith.constant 0 : i32
    %c0_i32_0 = arith.constant 0 : i32
    return %c0_i32, %arg1 : i32, i32
  }
  func.func @transform_3(%arg0: i32, %arg1: i32, %arg2: i32) -> (i32, i32) {
    %c0_i32 = arith.constant 0 : i32
    return %arg0, %arg1 : i32, i32
  }
}

module attributes {stable_mosaic.version = 11 : i64} {
  func.func @_matmul_bias_kernel(%arg0: i32, %arg1: i32, %arg2: i32, %arg3: memref<128x384xbf16, #tpu.memory_space<vmem>>, %arg4: memref<384x128xbf16, #tpu.memory_space<vmem>>, %arg5: memref<1x128xf32, #tpu.memory_space<vmem>>, %arg6: memref<128x128xbf16, #tpu.memory_space<vmem>>, %arg7: memref<128x128xf32, #tpu.memory_space<vmem>>) attributes {dimension_semantics = [#tpu.dimension_semantics<parallel>, #tpu.dimension_semantics<parallel>, #tpu.dimension_semantics<arbitrary>], iteration_bounds = array<i64: 1, 1, 3>, scalar_prefetch = 0 : i64, scratch_operands = 1 : i64, tpu.core_type = #tpu.core_type<tc>, window_params = [{transform_indices = @transform_0, window_bounds = array<i64: 128, 384>}, {transform_indices = @transform_1, window_bounds = array<i64: 384, 128>}, {transform_indices = @transform_2, window_bounds = array<i64: 1, 128>}, {transform_indices = @transform_3, window_bounds = array<i64: 128, 128>}]} {
    %c0_i32 = arith.constant 0 : i32
    %0 = arith.cmpi eq, %arg2, %c0_i32 : i32
    %1 = arith.extui %0 : i1 to i32
    %c0_i32_0 = arith.constant 0 : i32
    %2 = arith.cmpi ne, %1, %c0_i32_0 : i32
    scf.if %2 {
      %cst_9 = arith.constant 0.000000e+00 : f32
      %12 = vector.broadcast %cst_9 : f32 to vector<128x128xf32>
      %c0_10 = arith.constant 0 : index
      %c0_11 = arith.constant 0 : index
      %13 = vector.load %arg7[%c0_10, %c0_11] : memref<128x128xf32, #tpu.memory_space<vmem>>, vector<128x128xf32>
      tpu.vector_store %arg7[%c0_10, %c0_11], %12 {strides = array<i32>} : memref<128x128xf32, #tpu.memory_space<vmem>>, vector<128x128xf32>,
    } else {
    }
    %c0 = arith.constant 0 : index
    %c0_1 = arith.constant 0 : index
    %3 = vector.load %arg7[%c0, %c0_1] : memref<128x128xf32, #tpu.memory_space<vmem>>, vector<128x128xf32>
    %c0_2 = arith.constant 0 : index
    %c0_3 = arith.constant 0 : index
    %4 = vector.load %arg3[%c0_2, %c0_3] : memref<128x384xbf16, #tpu.memory_space<vmem>>, vector<128x384xbf16>
    %c0_4 = arith.constant 0 : index
    %c0_5 = arith.constant 0 : index
    %5 = vector.load %arg4[%c0_4, %c0_5] : memref<384x128xbf16, #tpu.memory_space<vmem>>, vector<384x128xbf16>
    %cst = arith.constant dense<0.000000e+00> : vector<128x128xf32>
    %6 = tpu.matmul %4, %5, %cst {dimension_numbers = #tpu.dot_dimension_numbers<[1], [0], [0], [1], [0, 0, 1, 1], [], []>} : vector<128x384xbf16>, vector<384x128xbf16>, vector<128x128xf32> -> vector<128x128xf32>
    %7 = arith.addf %3, %6 : vector<128x128xf32>
    %c0_6 = arith.constant 0 : index
    %c0_7 = arith.constant 0 : index
    %8 = vector.load %arg7[%c0_6, %c0_7] : memref<128x128xf32, #tpu.memory_space<vmem>>, vector<128x128xf32>
    tpu.vector_store %arg7[%c0_6, %c0_7], %7 {strides = array<i32>} : memref<128x128xf32, #tpu.memory_space<vmem>>, vector<128x128xf32>,
    %c2_i32 = arith.constant 2 : i32
    %9 = arith.cmpi eq, %arg2, %c2_i32 : i32
    %10 = arith.extui %9 : i1 to i32
    %c0_i32_8 = arith.constant 0 : i32
    %11 = arith.cmpi ne, %10, %c0_i32_8 : i32
    scf.if %11 {
      %c0_9 = arith.constant 0 : index
      %c0_10 = arith.constant 0 : index
      %12 = vector.load %arg7[%c0_9, %c0_10] : memref<128x128xf32, #tpu.memory_space<vmem>>, vector<128x128xf32>
      %c0_11 = arith.constant 0 : index
      %c0_12 = arith.constant 0 : index
      %13 = vector.load %arg5[%c0_11, %c0_12] : memref<1x128xf32, #tpu.memory_space<vmem>>, vector<1x128xf32>
      %14 = vector.broadcast %13 : vector<1x128xf32> to vector<128x128xf32>
      %15 = arith.addf %12, %14 : vector<128x128xf32>
      %cst_13 = arith.constant 0.000000e+00 : f32
      %16 = vector.broadcast %cst_13 : f32 to vector<128x128xf32>
      %17 = arith.maximumf %15, %16 : vector<128x128xf32>
      %18 = arith.truncf %17 : vector<128x128xf32> to vector<128x128xbf16>
      %c0_14 = arith.constant 0 : index
      %c0_15 = arith.constant 0 : index
      %19 = vector.load %arg6[%c0_14, %c0_15] : memref<128x128xbf16, #tpu.memory_space<vmem>>, vector<128x128xbf16>
      tpu.vector_store %arg6[%c0_14, %c0_15], %18 {strides = array<i32>} : memref<128x128xbf16, #tpu.memory_space<vmem>>, vector<128x128xbf16>,
    } else {
    }
    return
  }
  func.func @transform_0(%arg0: i32, %arg1: i32, %arg2: i32) -> (i32, i32) {
    %c0_i32 = arith.constant 0 : i32
    return %arg0, %arg2 : i32, i32
  }
  func.func @transform_1(%arg0: i32, %arg1: i32, %arg2: i32) -> (i32, i32) {
    %c0_i32 = arith.constant 0 : i32
    return %arg2, %arg1 : i32, i32
  }
  func.func @transform_2(%arg0: i32, %arg1: i32, %arg2: i32) -> (i32, i32) {
    %c0_i32 = arith.constant 0 : i32
    %c0_i32_0 = arith.constant 0 : i32
    return %c0_i32, %arg1 : i32, i32
  }
  func.func @transform_3(%arg0: i32, %arg1: i32, %arg2: i32) -> (i32, i32) {
    %c0_i32 = arith.constant 0 : i32
    return %arg0, %arg1 : i32, i32
  }
}

module attributes {stable_mosaic.version = 11 : i64} {
  func.func @_matmul_bias_kernel(%arg0: i32, %arg1: i32, %arg2: i32, %arg3: memref<32x384xbf16, #tpu.memory_space<vmem>>, %arg4: memref<384x256xbf16, #tpu.memory_space<vmem>>, %arg5: memref<1x256xf32, #tpu.memory_space<vmem>>, %arg6: memref<32x256xbf16, #tpu.memory_space<vmem>>, %arg7: memref<32x256xf32, #tpu.memory_space<vmem>>) attributes {dimension_semantics = [#tpu.dimension_semantics<parallel>, #tpu.dimension_semantics<parallel>, #tpu.dimension_semantics<arbitrary>], iteration_bounds = array<i64: 1, 1, 3>, scalar_prefetch = 0 : i64, scratch_operands = 1 : i64, tpu.core_type = #tpu.core_type<tc>, window_params = [{transform_indices = @transform_0, window_bounds = array<i64: 32, 384>}, {transform_indices = @transform_1, window_bounds = array<i64: 384, 256>}, {transform_indices = @transform_2, window_bounds = array<i64: 1, 256>}, {transform_indices = @transform_3, window_bounds = array<i64: 32, 256>}]} {
    %c0_i32 = arith.constant 0 : i32
    %0 = arith.cmpi eq, %arg2, %c0_i32 : i32
    %1 = arith.extui %0 : i1 to i32
    %c0_i32_0 = arith.constant 0 : i32
    %2 = arith.cmpi ne, %1, %c0_i32_0 : i32
    scf.if %2 {
      %cst_9 = arith.constant 0.000000e+00 : f32
      %12 = vector.broadcast %cst_9 : f32 to vector<32x256xf32>
      %c0_10 = arith.constant 0 : index
      %c0_11 = arith.constant 0 : index
      %13 = vector.load %arg7[%c0_10, %c0_11] : memref<32x256xf32, #tpu.memory_space<vmem>>, vector<32x256xf32>
      tpu.vector_store %arg7[%c0_10, %c0_11], %12 {strides = array<i32>} : memref<32x256xf32, #tpu.memory_space<vmem>>, vector<32x256xf32>,
    } else {
    }
    %c0 = arith.constant 0 : index
    %c0_1 = arith.constant 0 : index
    %3 = vector.load %arg7[%c0, %c0_1] : memref<32x256xf32, #tpu.memory_space<vmem>>, vector<32x256xf32>
    %c0_2 = arith.constant 0 : index
    %c0_3 = arith.constant 0 : index
    %4 = vector.load %arg3[%c0_2, %c0_3] : memref<32x384xbf16, #tpu.memory_space<vmem>>, vector<32x384xbf16>
    %c0_4 = arith.constant 0 : index
    %c0_5 = arith.constant 0 : index
    %5 = vector.load %arg4[%c0_4, %c0_5] : memref<384x256xbf16, #tpu.memory_space<vmem>>, vector<384x256xbf16>
    %cst = arith.constant dense<0.000000e+00> : vector<32x256xf32>
    %6 = tpu.matmul %4, %5, %cst {dimension_numbers = #tpu.dot_dimension_numbers<[1], [0], [0], [1], [0, 0, 1, 1], [], []>} : vector<32x384xbf16>, vector<384x256xbf16>, vector<32x256xf32> -> vector<32x256xf32>
    %7 = arith.addf %3, %6 : vector<32x256xf32>
    %c0_6 = arith.constant 0 : index
    %c0_7 = arith.constant 0 : index
    %8 = vector.load %arg7[%c0_6, %c0_7] : memref<32x256xf32, #tpu.memory_space<vmem>>, vector<32x256xf32>
    tpu.vector_store %arg7[%c0_6, %c0_7], %7 {strides = array<i32>} : memref<32x256xf32, #tpu.memory_space<vmem>>, vector<32x256xf32>,
    %c2_i32 = arith.constant 2 : i32
    %9 = arith.cmpi eq, %arg2, %c2_i32 : i32
    %10 = arith.extui %9 : i1 to i32
    %c0_i32_8 = arith.constant 0 : i32
    %11 = arith.cmpi ne, %10, %c0_i32_8 : i32
    scf.if %11 {
      %c0_9 = arith.constant 0 : index
      %c0_10 = arith.constant 0 : index
      %12 = vector.load %arg7[%c0_9, %c0_10] : memref<32x256xf32, #tpu.memory_space<vmem>>, vector<32x256xf32>
      %c0_11 = arith.constant 0 : index
      %c0_12 = arith.constant 0 : index
      %13 = vector.load %arg5[%c0_11, %c0_12] : memref<1x256xf32, #tpu.memory_space<vmem>>, vector<1x256xf32>
      %14 = vector.broadcast %13 : vector<1x256xf32> to vector<32x256xf32>
      %15 = arith.addf %12, %14 : vector<32x256xf32>
      %cst_13 = arith.constant 0.000000e+00 : f32
      %16 = vector.broadcast %cst_13 : f32 to vector<32x256xf32>
      %17 = arith.maximumf %15, %16 : vector<32x256xf32>
      %18 = arith.truncf %17 : vector<32x256xf32> to vector<32x256xbf16>
      %c0_14 = arith.constant 0 : index
      %c0_15 = arith.constant 0 : index
      %19 = vector.load %arg6[%c0_14, %c0_15] : memref<32x256xbf16, #tpu.memory_space<vmem>>, vector<32x256xbf16>
      tpu.vector_store %arg6[%c0_14, %c0_15], %18 {strides = array<i32>} : memref<32x256xbf16, #tpu.memory_space<vmem>>, vector<32x256xbf16>,
    } else {
    }
    return
  }
  func.func @transform_0(%arg0: i32, %arg1: i32, %arg2: i32) -> (i32, i32) {
    %c0_i32 = arith.constant 0 : i32
    return %arg0, %arg2 : i32, i32
  }
  func.func @transform_1(%arg0: i32, %arg1: i32, %arg2: i32) -> (i32, i32) {
    %c0_i32 = arith.constant 0 : i32
    return %arg2, %arg1 : i32, i32
  }
  func.func @transform_2(%arg0: i32, %arg1: i32, %arg2: i32) -> (i32, i32) {
    %c0_i32 = arith.constant 0 : i32
    %c0_i32_0 = arith.constant 0 : i32
    return %c0_i32, %arg1 : i32, i32
  }
  func.func @transform_3(%arg0: i32, %arg1: i32, %arg2: i32) -> (i32, i32) {
    %c0_i32 = arith.constant 0 : i32
    return %arg0, %arg1 : i32, i32
  }
}

module attributes {stable_mosaic.version = 11 : i64} {
  func.func @_matmul_bias_kernel(%arg0: i32, %arg1: i32, %arg2: i32, %arg3: memref<32x384xbf16, #tpu.memory_space<vmem>>, %arg4: memref<384x256xbf16, #tpu.memory_space<vmem>>, %arg5: memref<1x256xf32, #tpu.memory_space<vmem>>, %arg6: memref<32x256xbf16, #tpu.memory_space<vmem>>, %arg7: memref<32x256xf32, #tpu.memory_space<vmem>>) attributes {dimension_semantics = [#tpu.dimension_semantics<parallel>, #tpu.dimension_semantics<parallel>, #tpu.dimension_semantics<arbitrary>], iteration_bounds = array<i64: 1, 1, 6>, scalar_prefetch = 0 : i64, scratch_operands = 1 : i64, tpu.core_type = #tpu.core_type<tc>, window_params = [{transform_indices = @transform_0, window_bounds = array<i64: 32, 384>}, {transform_indices = @transform_1, window_bounds = array<i64: 384, 256>}, {transform_indices = @transform_2, window_bounds = array<i64: 1, 256>}, {transform_indices = @transform_3, window_bounds = array<i64: 32, 256>}]} {
    %c0_i32 = arith.constant 0 : i32
    %0 = arith.cmpi eq, %arg2, %c0_i32 : i32
    %1 = arith.extui %0 : i1 to i32
    %c0_i32_0 = arith.constant 0 : i32
    %2 = arith.cmpi ne, %1, %c0_i32_0 : i32
    scf.if %2 {
      %cst_9 = arith.constant 0.000000e+00 : f32
      %12 = vector.broadcast %cst_9 : f32 to vector<32x256xf32>
      %c0_10 = arith.constant 0 : index
      %c0_11 = arith.constant 0 : index
      %13 = vector.load %arg7[%c0_10, %c0_11] : memref<32x256xf32, #tpu.memory_space<vmem>>, vector<32x256xf32>
      tpu.vector_store %arg7[%c0_10, %c0_11], %12 {strides = array<i32>} : memref<32x256xf32, #tpu.memory_space<vmem>>, vector<32x256xf32>,
    } else {
    }
    %c0 = arith.constant 0 : index
    %c0_1 = arith.constant 0 : index
    %3 = vector.load %arg7[%c0, %c0_1] : memref<32x256xf32, #tpu.memory_space<vmem>>, vector<32x256xf32>
    %c0_2 = arith.constant 0 : index
    %c0_3 = arith.constant 0 : index
    %4 = vector.load %arg3[%c0_2, %c0_3] : memref<32x384xbf16, #tpu.memory_space<vmem>>, vector<32x384xbf16>
    %c0_4 = arith.constant 0 : index
    %c0_5 = arith.constant 0 : index
    %5 = vector.load %arg4[%c0_4, %c0_5] : memref<384x256xbf16, #tpu.memory_space<vmem>>, vector<384x256xbf16>
    %cst = arith.constant dense<0.000000e+00> : vector<32x256xf32>
    %6 = tpu.matmul %4, %5, %cst {dimension_numbers = #tpu.dot_dimension_numbers<[1], [0], [0], [1], [0, 0, 1, 1], [], []>} : vector<32x384xbf16>, vector<384x256xbf16>, vector<32x256xf32> -> vector<32x256xf32>
    %7 = arith.addf %3, %6 : vector<32x256xf32>
    %c0_6 = arith.constant 0 : index
    %c0_7 = arith.constant 0 : index
    %8 = vector.load %arg7[%c0_6, %c0_7] : memref<32x256xf32, #tpu.memory_space<vmem>>, vector<32x256xf32>
    tpu.vector_store %arg7[%c0_6, %c0_7], %7 {strides = array<i32>} : memref<32x256xf32, #tpu.memory_space<vmem>>, vector<32x256xf32>,
    %c5_i32 = arith.constant 5 : i32
    %9 = arith.cmpi eq, %arg2, %c5_i32 : i32
    %10 = arith.extui %9 : i1 to i32
    %c0_i32_8 = arith.constant 0 : i32
    %11 = arith.cmpi ne, %10, %c0_i32_8 : i32
    scf.if %11 {
      %c0_9 = arith.constant 0 : index
      %c0_10 = arith.constant 0 : index
      %12 = vector.load %arg7[%c0_9, %c0_10] : memref<32x256xf32, #tpu.memory_space<vmem>>, vector<32x256xf32>
      %c0_11 = arith.constant 0 : index
      %c0_12 = arith.constant 0 : index
      %13 = vector.load %arg5[%c0_11, %c0_12] : memref<1x256xf32, #tpu.memory_space<vmem>>, vector<1x256xf32>
      %14 = vector.broadcast %13 : vector<1x256xf32> to vector<32x256xf32>
      %15 = arith.addf %12, %14 : vector<32x256xf32>
      %cst_13 = arith.constant 0.000000e+00 : f32
      %16 = vector.broadcast %cst_13 : f32 to vector<32x256xf32>
      %17 = arith.maximumf %15, %16 : vector<32x256xf32>
      %18 = arith.truncf %17 : vector<32x256xf32> to vector<32x256xbf16>
      %c0_14 = arith.constant 0 : index
      %c0_15 = arith.constant 0 : index
      %19 = vector.load %arg6[%c0_14, %c0_15] : memref<32x256xbf16, #tpu.memory_space<vmem>>, vector<32x256xbf16>
      tpu.vector_store %arg6[%c0_14, %c0_15], %18 {strides = array<i32>} : memref<32x256xbf16, #tpu.memory_space<vmem>>, vector<32x256xbf16>,
    } else {
    }
    return
  }
  func.func @transform_0(%arg0: i32, %arg1: i32, %arg2: i32) -> (i32, i32) {
    %c0_i32 = arith.constant 0 : i32
    return %arg0, %arg2 : i32, i32
  }
  func.func @transform_1(%arg0: i32, %arg1: i32, %arg2: i32) -> (i32, i32) {
    %c0_i32 = arith.constant 0 : i32
    return %arg2, %arg1 : i32, i32
  }
  func.func @transform_2(%arg0: i32, %arg1: i32, %arg2: i32) -> (i32, i32) {
    %c0_i32 = arith.constant 0 : i32
    %c0_i32_0 = arith.constant 0 : i32
    return %c0_i32, %arg1 : i32, i32
  }
  func.func @transform_3(%arg0: i32, %arg1: i32, %arg2: i32) -> (i32, i32) {
    %c0_i32 = arith.constant 0 : i32
    return %arg0, %arg1 : i32, i32
  }
}

module attributes {stable_mosaic.version = 11 : i64} {
  func.func @_matmul_bias_kernel(%arg0: i32, %arg1: i32, %arg2: i32, %arg3: memref<16x384xbf16, #tpu.memory_space<vmem>>, %arg4: memref<384x256xbf16, #tpu.memory_space<vmem>>, %arg5: memref<1x256xf32, #tpu.memory_space<vmem>>, %arg6: memref<16x256xbf16, #tpu.memory_space<vmem>>, %arg7: memref<16x256xf32, #tpu.memory_space<vmem>>) attributes {dimension_semantics = [#tpu.dimension_semantics<parallel>, #tpu.dimension_semantics<parallel>, #tpu.dimension_semantics<arbitrary>], iteration_bounds = array<i64: 1, 2, 6>, scalar_prefetch = 0 : i64, scratch_operands = 1 : i64, tpu.core_type = #tpu.core_type<tc>, window_params = [{transform_indices = @transform_0, window_bounds = array<i64: 16, 384>}, {transform_indices = @transform_1, window_bounds = array<i64: 384, 256>}, {transform_indices = @transform_2, window_bounds = array<i64: 1, 256>}, {transform_indices = @transform_3, window_bounds = array<i64: 16, 256>}]} {
    %c0_i32 = arith.constant 0 : i32
    %0 = arith.cmpi eq, %arg2, %c0_i32 : i32
    %1 = arith.extui %0 : i1 to i32
    %c0_i32_0 = arith.constant 0 : i32
    %2 = arith.cmpi ne, %1, %c0_i32_0 : i32
    scf.if %2 {
      %cst_9 = arith.constant 0.000000e+00 : f32
      %12 = vector.broadcast %cst_9 : f32 to vector<16x256xf32>
      %c0_10 = arith.constant 0 : index
      %c0_11 = arith.constant 0 : index
      %13 = vector.load %arg7[%c0_10, %c0_11] : memref<16x256xf32, #tpu.memory_space<vmem>>, vector<16x256xf32>
      tpu.vector_store %arg7[%c0_10, %c0_11], %12 {strides = array<i32>} : memref<16x256xf32, #tpu.memory_space<vmem>>, vector<16x256xf32>,
    } else {
    }
    %c0 = arith.constant 0 : index
    %c0_1 = arith.constant 0 : index
    %3 = vector.load %arg7[%c0, %c0_1] : memref<16x256xf32, #tpu.memory_space<vmem>>, vector<16x256xf32>
    %c0_2 = arith.constant 0 : index
    %c0_3 = arith.constant 0 : index
    %4 = vector.load %arg3[%c0_2, %c0_3] : memref<16x384xbf16, #tpu.memory_space<vmem>>, vector<16x384xbf16>
    %c0_4 = arith.constant 0 : index
    %c0_5 = arith.constant 0 : index
    %5 = vector.load %arg4[%c0_4, %c0_5] : memref<384x256xbf16, #tpu.memory_space<vmem>>, vector<384x256xbf16>
    %cst = arith.constant dense<0.000000e+00> : vector<16x256xf32>
    %6 = tpu.matmul %4, %5, %cst {dimension_numbers = #tpu.dot_dimension_numbers<[1], [0], [0], [1], [0, 0, 1, 1], [], []>} : vector<16x384xbf16>, vector<384x256xbf16>, vector<16x256xf32> -> vector<16x256xf32>
    %7 = arith.addf %3, %6 : vector<16x256xf32>
    %c0_6 = arith.constant 0 : index
    %c0_7 = arith.constant 0 : index
    %8 = vector.load %arg7[%c0_6, %c0_7] : memref<16x256xf32, #tpu.memory_space<vmem>>, vector<16x256xf32>
    tpu.vector_store %arg7[%c0_6, %c0_7], %7 {strides = array<i32>} : memref<16x256xf32, #tpu.memory_space<vmem>>, vector<16x256xf32>,
    %c5_i32 = arith.constant 5 : i32
    %9 = arith.cmpi eq, %arg2, %c5_i32 : i32
    %10 = arith.extui %9 : i1 to i32
    %c0_i32_8 = arith.constant 0 : i32
    %11 = arith.cmpi ne, %10, %c0_i32_8 : i32
    scf.if %11 {
      %c0_9 = arith.constant 0 : index
      %c0_10 = arith.constant 0 : index
      %12 = vector.load %arg7[%c0_9, %c0_10] : memref<16x256xf32, #tpu.memory_space<vmem>>, vector<16x256xf32>
      %c0_11 = arith.constant 0 : index
      %c0_12 = arith.constant 0 : index
      %13 = vector.load %arg5[%c0_11, %c0_12] : memref<1x256xf32, #tpu.memory_space<vmem>>, vector<1x256xf32>
      %14 = vector.broadcast %13 : vector<1x256xf32> to vector<16x256xf32>
      %15 = arith.addf %12, %14 : vector<16x256xf32>
      %cst_13 = arith.constant 0.000000e+00 : f32
      %16 = vector.broadcast %cst_13 : f32 to vector<16x256xf32>
      %17 = arith.maximumf %15, %16 : vector<16x256xf32>
      %18 = arith.truncf %17 : vector<16x256xf32> to vector<16x256xbf16>
      %c0_14 = arith.constant 0 : index
      %c0_15 = arith.constant 0 : index
      %19 = vector.load %arg6[%c0_14, %c0_15] : memref<16x256xbf16, #tpu.memory_space<vmem>>, vector<16x256xbf16>
      tpu.vector_store %arg6[%c0_14, %c0_15], %18 {strides = array<i32>} : memref<16x256xbf16, #tpu.memory_space<vmem>>, vector<16x256xbf16>,
    } else {
    }
    return
  }
  func.func @transform_0(%arg0: i32, %arg1: i32, %arg2: i32) -> (i32, i32) {
    %c0_i32 = arith.constant 0 : i32
    return %arg0, %arg2 : i32, i32
  }
  func.func @transform_1(%arg0: i32, %arg1: i32, %arg2: i32) -> (i32, i32) {
    %c0_i32 = arith.constant 0 : i32
    return %arg2, %arg1 : i32, i32
  }
  func.func @transform_2(%arg0: i32, %arg1: i32, %arg2: i32) -> (i32, i32) {
    %c0_i32 = arith.constant 0 : i32
    %c0_i32_0 = arith.constant 0 : i32
    return %c0_i32, %arg1 : i32, i32
  }
  func.func @transform_3(%arg0: i32, %arg1: i32, %arg2: i32) -> (i32, i32) {
    %c0_i32 = arith.constant 0 : i32
    return %arg0, %arg1 : i32, i32
  }
}

module attributes {stable_mosaic.version = 11 : i64} {
  func.func @_l1_sum_kernel(%arg0: i32, %arg1: memref<16x512xbf16, #tpu.memory_space<vmem>>, %arg2: memref<16x512xbf16, #tpu.memory_space<vmem>>, %arg3: memref<1x1xf32, #tpu.memory_space<vmem>>) attributes {dimension_semantics = [#tpu.dimension_semantics<arbitrary>], iteration_bounds = array<i64: 1>, scalar_prefetch = 0 : i64, scratch_operands = 0 : i64, tpu.core_type = #tpu.core_type<tc>, window_params = [{transform_indices = @transform_0, window_bounds = array<i64: 16, 512>}, {transform_indices = @transform_1, window_bounds = array<i64: 16, 512>}, {pipeline_mode = #tpu.pipeline_mode<synchronous>, transform_indices = @transform_2, window_bounds = array<i64: 1, 1>}]} {
    %c0_i32 = arith.constant 0 : i32
    %0 = arith.cmpi eq, %arg0, %c0_i32 : i32
    %1 = arith.extui %0 : i1 to i32
    %c0_i32_0 = arith.constant 0 : i32
    %2 = arith.cmpi ne, %1, %c0_i32_0 : i32
    scf.if %2 {
      %cst_8 = arith.constant 0.000000e+00 : f32
      %17 = vector.broadcast %cst_8 : f32 to vector<1x1xf32>
      %c0_9 = arith.constant 0 : index
      %c0_10 = arith.constant 0 : index
      %18 = vector.load %arg3[%c0_9, %c0_10] : memref<1x1xf32, #tpu.memory_space<vmem>>, vector<1x1xf32>
      tpu.vector_store %arg3[%c0_9, %c0_10], %17 {strides = array<i32>} : memref<1x1xf32, #tpu.memory_space<vmem>>, vector<1x1xf32>,
    } else {
    }
    %c0 = arith.constant 0 : index
    %c0_1 = arith.constant 0 : index
    %3 = vector.load %arg1[%c0, %c0_1] : memref<16x512xbf16, #tpu.memory_space<vmem>>, vector<16x512xbf16>
    %4 = arith.extf %3 : vector<16x512xbf16> to vector<16x512xf32>
    %c0_2 = arith.constant 0 : index
    %c0_3 = arith.constant 0 : index
    %5 = vector.load %arg2[%c0_2, %c0_3] : memref<16x512xbf16, #tpu.memory_space<vmem>>, vector<16x512xbf16>
    %6 = arith.extf %5 : vector<16x512xbf16> to vector<16x512xf32>
    %7 = arith.subf %4, %6 : vector<16x512xf32>
    %c0_4 = arith.constant 0 : index
    %c0_5 = arith.constant 0 : index
    %8 = vector.load %arg3[%c0_4, %c0_5] : memref<1x1xf32, #tpu.memory_space<vmem>>, vector<1x1xf32>
    %9 = math.absf %7 : vector<16x512xf32>
    %10 = vector.shape_cast %9 : vector<16x512xf32> to vector<1x16x512xf32>
    %cst = arith.constant dense<0.000000e+00> : vector<1xf32>
    %11 = vector.multi_reduction <add>, %10, %cst [1, 2] : vector<1x16x512xf32> to vector<1xf32>
    %12 = vector.shape_cast %11 : vector<1xf32> to vector<1x1x1xf32>
    %13 = vector.extract %12[0, 0, 0] : f32 from vector<1x1x1xf32>
    %14 = vector.broadcast %13 : f32 to vector<1x1xf32>
    %15 = arith.addf %8, %14 : vector<1x1xf32>
    %c0_6 = arith.constant 0 : index
    %c0_7 = arith.constant 0 : index
    %16 = vector.load %arg3[%c0_6, %c0_7] : memref<1x1xf32, #tpu.memory_space<vmem>>, vector<1x1xf32>
    tpu.vector_store %arg3[%c0_6, %c0_7], %15 {strides = array<i32>} : memref<1x1xf32, #tpu.memory_space<vmem>>, vector<1x1xf32>,
    return
  }
  func.func @transform_0(%arg0: i32) -> (i32, i32) {
    %c0_i32 = arith.constant 0 : i32
    %c0_i32_0 = arith.constant 0 : i32
    return %arg0, %c0_i32 : i32, i32
  }
  func.func @transform_1(%arg0: i32) -> (i32, i32) {
    %c0_i32 = arith.constant 0 : i32
    %c0_i32_0 = arith.constant 0 : i32
    return %arg0, %c0_i32 : i32, i32
  }
  func.func @transform_2(%arg0: i32) -> (i32, i32) {
    %c0_i32 = arith.constant 0 : i32
    %c0_i32_0 = arith.constant 0 : i32
    %c0_i32_1 = arith.constant 0 : i32
    return %c0_i32, %c0_i32_0 : i32, i32
  }
}

module attributes {stable_mosaic.version = 11 : i64} {
  func.func @_matmul_bias_kernel(%arg0: i32, %arg1: i32, %arg2: i32, %arg3: memref<16x512xbf16, #tpu.memory_space<vmem>>, %arg4: memref<512x256xbf16, #tpu.memory_space<vmem>>, %arg5: memref<1x256xf32, #tpu.memory_space<vmem>>, %arg6: memref<16x256xbf16, #tpu.memory_space<vmem>>, %arg7: memref<16x256xf32, #tpu.memory_space<vmem>>) attributes {dimension_semantics = [#tpu.dimension_semantics<parallel>, #tpu.dimension_semantics<parallel>, #tpu.dimension_semantics<arbitrary>], iteration_bounds = array<i64: 1, 2, 9>, scalar_prefetch = 0 : i64, scratch_operands = 1 : i64, tpu.core_type = #tpu.core_type<tc>, window_params = [{transform_indices = @transform_0, window_bounds = array<i64: 16, 512>}, {transform_indices = @transform_1, window_bounds = array<i64: 512, 256>}, {transform_indices = @transform_2, window_bounds = array<i64: 1, 256>}, {transform_indices = @transform_3, window_bounds = array<i64: 16, 256>}]} {
    %c0_i32 = arith.constant 0 : i32
    %0 = arith.cmpi eq, %arg2, %c0_i32 : i32
    %1 = arith.extui %0 : i1 to i32
    %c0_i32_0 = arith.constant 0 : i32
    %2 = arith.cmpi ne, %1, %c0_i32_0 : i32
    scf.if %2 {
      %cst_9 = arith.constant 0.000000e+00 : f32
      %12 = vector.broadcast %cst_9 : f32 to vector<16x256xf32>
      %c0_10 = arith.constant 0 : index
      %c0_11 = arith.constant 0 : index
      %13 = vector.load %arg7[%c0_10, %c0_11] : memref<16x256xf32, #tpu.memory_space<vmem>>, vector<16x256xf32>
      tpu.vector_store %arg7[%c0_10, %c0_11], %12 {strides = array<i32>} : memref<16x256xf32, #tpu.memory_space<vmem>>, vector<16x256xf32>,
    } else {
    }
    %c0 = arith.constant 0 : index
    %c0_1 = arith.constant 0 : index
    %3 = vector.load %arg7[%c0, %c0_1] : memref<16x256xf32, #tpu.memory_space<vmem>>, vector<16x256xf32>
    %c0_2 = arith.constant 0 : index
    %c0_3 = arith.constant 0 : index
    %4 = vector.load %arg3[%c0_2, %c0_3] : memref<16x512xbf16, #tpu.memory_space<vmem>>, vector<16x512xbf16>
    %c0_4 = arith.constant 0 : index
    %c0_5 = arith.constant 0 : index
    %5 = vector.load %arg4[%c0_4, %c0_5] : memref<512x256xbf16, #tpu.memory_space<vmem>>, vector<512x256xbf16>
    %cst = arith.constant dense<0.000000e+00> : vector<16x256xf32>
    %6 = tpu.matmul %4, %5, %cst {dimension_numbers = #tpu.dot_dimension_numbers<[1], [0], [0], [1], [0, 0, 1, 1], [], []>} : vector<16x512xbf16>, vector<512x256xbf16>, vector<16x256xf32> -> vector<16x256xf32>
    %7 = arith.addf %3, %6 : vector<16x256xf32>
    %c0_6 = arith.constant 0 : index
    %c0_7 = arith.constant 0 : index
    %8 = vector.load %arg7[%c0_6, %c0_7] : memref<16x256xf32, #tpu.memory_space<vmem>>, vector<16x256xf32>
    tpu.vector_store %arg7[%c0_6, %c0_7], %7 {strides = array<i32>} : memref<16x256xf32, #tpu.memory_space<vmem>>, vector<16x256xf32>,
    %c8_i32 = arith.constant 8 : i32
    %9 = arith.cmpi eq, %arg2, %c8_i32 : i32
    %10 = arith.extui %9 : i1 to i32
    %c0_i32_8 = arith.constant 0 : i32
    %11 = arith.cmpi ne, %10, %c0_i32_8 : i32
    scf.if %11 {
      %c0_9 = arith.constant 0 : index
      %c0_10 = arith.constant 0 : index
      %12 = vector.load %arg7[%c0_9, %c0_10] : memref<16x256xf32, #tpu.memory_space<vmem>>, vector<16x256xf32>
      %c0_11 = arith.constant 0 : index
      %c0_12 = arith.constant 0 : index
      %13 = vector.load %arg5[%c0_11, %c0_12] : memref<1x256xf32, #tpu.memory_space<vmem>>, vector<1x256xf32>
      %14 = vector.broadcast %13 : vector<1x256xf32> to vector<16x256xf32>
      %15 = arith.addf %12, %14 : vector<16x256xf32>
      %16 = arith.truncf %15 : vector<16x256xf32> to vector<16x256xbf16>
      %c0_13 = arith.constant 0 : index
      %c0_14 = arith.constant 0 : index
      %17 = vector.load %arg6[%c0_13, %c0_14] : memref<16x256xbf16, #tpu.memory_space<vmem>>, vector<16x256xbf16>
      tpu.vector_store %arg6[%c0_13, %c0_14], %16 {strides = array<i32>} : memref<16x256xbf16, #tpu.memory_space<vmem>>, vector<16x256xbf16>,
    } else {
    }
    return
  }
  func.func @transform_0(%arg0: i32, %arg1: i32, %arg2: i32) -> (i32, i32) {
    %c0_i32 = arith.constant 0 : i32
    return %arg0, %arg2 : i32, i32
  }
  func.func @transform_1(%arg0: i32, %arg1: i32, %arg2: i32) -> (i32, i32) {
    %c0_i32 = arith.constant 0 : i32
    return %arg2, %arg1 : i32, i32
  }
  func.func @transform_2(%arg0: i32, %arg1: i32, %arg2: i32) -> (i32, i32) {
    %c0_i32 = arith.constant 0 : i32
    %c0_i32_0 = arith.constant 0 : i32
    return %c0_i32, %arg1 : i32, i32
  }
  func.func @transform_3(%arg0: i32, %arg1: i32, %arg2: i32) -> (i32, i32) {
    %c0_i32 = arith.constant 0 : i32
    return %arg0, %arg1 : i32, i32
  }
}

module attributes {stable_mosaic.version = 11 : i64} {
  func.func @_l1_sum_kernel(%arg0: i32, %arg1: memref<16x512xf32, #tpu.memory_space<vmem>>, %arg2: memref<16x512xf32, #tpu.memory_space<vmem>>, %arg3: memref<1x1xf32, #tpu.memory_space<vmem>>) attributes {dimension_semantics = [#tpu.dimension_semantics<arbitrary>], iteration_bounds = array<i64: 1>, scalar_prefetch = 0 : i64, scratch_operands = 0 : i64, tpu.core_type = #tpu.core_type<tc>, window_params = [{transform_indices = @transform_0, window_bounds = array<i64: 16, 512>}, {transform_indices = @transform_1, window_bounds = array<i64: 16, 512>}, {pipeline_mode = #tpu.pipeline_mode<synchronous>, transform_indices = @transform_2, window_bounds = array<i64: 1, 1>}]} {
    %c0_i32 = arith.constant 0 : i32
    %0 = arith.cmpi eq, %arg0, %c0_i32 : i32
    %1 = arith.extui %0 : i1 to i32
    %c0_i32_0 = arith.constant 0 : i32
    %2 = arith.cmpi ne, %1, %c0_i32_0 : i32
    scf.if %2 {
      %cst_8 = arith.constant 0.000000e+00 : f32
      %15 = vector.broadcast %cst_8 : f32 to vector<1x1xf32>
      %c0_9 = arith.constant 0 : index
      %c0_10 = arith.constant 0 : index
      %16 = vector.load %arg3[%c0_9, %c0_10] : memref<1x1xf32, #tpu.memory_space<vmem>>, vector<1x1xf32>
      tpu.vector_store %arg3[%c0_9, %c0_10], %15 {strides = array<i32>} : memref<1x1xf32, #tpu.memory_space<vmem>>, vector<1x1xf32>,
    } else {
    }
    %c0 = arith.constant 0 : index
    %c0_1 = arith.constant 0 : index
    %3 = vector.load %arg1[%c0, %c0_1] : memref<16x512xf32, #tpu.memory_space<vmem>>, vector<16x512xf32>
    %c0_2 = arith.constant 0 : index
    %c0_3 = arith.constant 0 : index
    %4 = vector.load %arg2[%c0_2, %c0_3] : memref<16x512xf32, #tpu.memory_space<vmem>>, vector<16x512xf32>
    %5 = arith.subf %3, %4 : vector<16x512xf32>
    %c0_4 = arith.constant 0 : index
    %c0_5 = arith.constant 0 : index
    %6 = vector.load %arg3[%c0_4, %c0_5] : memref<1x1xf32, #tpu.memory_space<vmem>>, vector<1x1xf32>
    %7 = math.absf %5 : vector<16x512xf32>
    %8 = vector.shape_cast %7 : vector<16x512xf32> to vector<1x16x512xf32>
    %cst = arith.constant dense<0.000000e+00> : vector<1xf32>
    %9 = vector.multi_reduction <add>, %8, %cst [1, 2] : vector<1x16x512xf32> to vector<1xf32>
    %10 = vector.shape_cast %9 : vector<1xf32> to vector<1x1x1xf32>
    %11 = vector.extract %10[0, 0, 0] : f32 from vector<1x1x1xf32>
    %12 = vector.broadcast %11 : f32 to vector<1x1xf32>
    %13 = arith.addf %6, %12 : vector<1x1xf32>
    %c0_6 = arith.constant 0 : index
    %c0_7 = arith.constant 0 : index
    %14 = vector.load %arg3[%c0_6, %c0_7] : memref<1x1xf32, #tpu.memory_space<vmem>>, vector<1x1xf32>
    tpu.vector_store %arg3[%c0_6, %c0_7], %13 {strides = array<i32>} : memref<1x1xf32, #tpu.memory_space<vmem>>, vector<1x1xf32>,
    return
  }
  func.func @transform_0(%arg0: i32) -> (i32, i32) {
    %c0_i32 = arith.constant 0 : i32
    %c0_i32_0 = arith.constant 0 : i32
    return %arg0, %c0_i32 : i32, i32
  }
  func.func @transform_1(%arg0: i32) -> (i32, i32) {
    %c0_i32 = arith.constant 0 : i32
    %c0_i32_0 = arith.constant 0 : i32
    return %arg0, %c0_i32 : i32, i32
  }
  func.func @transform_2(%arg0: i32) -> (i32, i32) {
    %c0_i32 = arith.constant 0 : i32
    %c0_i32_0 = arith.constant 0 : i32
    %c0_i32_1 = arith.constant 0 : i32
    return %c0_i32, %c0_i32_0 : i32, i32
  }
}

module attributes {stable_mosaic.version = 11 : i64} {
  func.func @_edge_l1_kernel(%arg0: i32, %arg1: memref<8x256xf32, #tpu.memory_space<vmem>>, %arg2: memref<8x256xf32, #tpu.memory_space<vmem>>, %arg3: memref<1x1xf32, #tpu.memory_space<vmem>>) attributes {dimension_semantics = [#tpu.dimension_semantics<arbitrary>], iteration_bounds = array<i64: 1>, scalar_prefetch = 0 : i64, scratch_operands = 0 : i64, tpu.core_type = #tpu.core_type<tc>, window_params = [{transform_indices = @transform_0, window_bounds = array<i64: 8, 256>}, {transform_indices = @transform_1, window_bounds = array<i64: 8, 256>}, {pipeline_mode = #tpu.pipeline_mode<synchronous>, transform_indices = @transform_2, window_bounds = array<i64: 1, 1>}]} {
    %c0_i32 = arith.constant 0 : i32
    %0 = arith.cmpi eq, %arg0, %c0_i32 : i32
    %1 = arith.extui %0 : i1 to i32
    %c0_i32_0 = arith.constant 0 : i32
    %2 = arith.cmpi ne, %1, %c0_i32_0 : i32
    scf.if %2 {
      %cst_32 = arith.constant 0.000000e+00 : f32
      %109 = vector.broadcast %cst_32 : f32 to vector<1x1xf32>
      %c0_33 = arith.constant 0 : index
      %c0_34 = arith.constant 0 : index
      %110 = vector.load %arg3[%c0_33, %c0_34] : memref<1x1xf32, #tpu.memory_space<vmem>>, vector<1x1xf32>
      tpu.vector_store %arg3[%c0_33, %c0_34], %109 {strides = array<i32>} : memref<1x1xf32, #tpu.memory_space<vmem>>, vector<1x1xf32>,
    } else {
    }
    %c0 = arith.constant 0 : index
    %c0_1 = arith.constant 0 : index
    %3 = vector.load %arg1[%c0, %c0_1] : memref<8x256xf32, #tpu.memory_space<vmem>>, vector<8x256xf32>
    %c0_2 = arith.constant 0 : index
    %c0_3 = arith.constant 0 : index
    %4 = vector.load %arg2[%c0_2, %c0_3] : memref<8x256xf32, #tpu.memory_space<vmem>>, vector<8x256xf32>
    %cst = arith.constant 0.000000e+00 : f32
    %5 = vector.broadcast %cst : f32 to vector<8x16xf32>
    %cst_4 = arith.constant 0.000000e+00 : f32
    %6 = vector.broadcast %cst_4 : f32 to vector<8x1xf32>
    %7 = vector.extract_strided_slice %3 {offsets = [0, 16], sizes = [8, 240], strides = [1, 1]} : vector<8x256xf32> to vector<8x240xf32>
    %8 = tpu.concatenate %7, %5 in 1 : vector<8x240xf32>, vector<8x16xf32> -> vector<8x256xf32>
    %9 = vector.extract_strided_slice %3 {offsets = [0, 0], sizes = [8, 240], strides = [1, 1]} : vector<8x256xf32> to vector<8x240xf32>
    %10 = tpu.concatenate %5, %9 in 1 : vector<8x16xf32>, vector<8x240xf32> -> vector<8x256xf32>
    %11 = vector.extract_strided_slice %3 {offsets = [0, 1], sizes = [8, 255], strides = [1, 1]} : vector<8x256xf32> to vector<8x255xf32>
    %12 = tpu.concatenate %11, %6 in 1 : vector<8x255xf32>, vector<8x1xf32> -> vector<8x256xf32>
    %13 = vector.extract_strided_slice %3 {offsets = [0, 0], sizes = [8, 255], strides = [1, 1]} : vector<8x256xf32> to vector<8x255xf32>
    %14 = tpu.concatenate %6, %13 in 1 : vector<8x1xf32>, vector<8x255xf32> -> vector<8x256xf32>
    %15 = tpu.iota {dimensions = array<i32: 1>} : vector<8x256xi32>
    %c16_i32 = arith.constant 16 : i32
    %c0_i32_5 = arith.constant 0 : i32
    %16 = arith.cmpi eq, %c16_i32, %c0_i32_5 : i32
    %c1_i32 = arith.constant 1 : i32
    %17 = arith.select %16, %c1_i32, %c16_i32 : i32
    %18 = vector.broadcast %17 : i32 to vector<8x256xi32>
    %19 = arith.remsi %15, %18 : vector<8x256xi32>
    %c0_i32_6 = arith.constant 0 : i32
    %20 = vector.broadcast %c0_i32_6 : i32 to vector<8x256xi32>
    %21 = arith.cmpi ne, %19, %20 : vector<8x256xi32>
    %c0_i32_7 = arith.constant 0 : i32
    %22 = vector.broadcast %c0_i32_7 : i32 to vector<8x256xi32>
    %23 = arith.cmpi slt, %19, %22 : vector<8x256xi32>
    %c0_i32_8 = arith.constant 0 : i32
    %24 = arith.cmpi slt, %17, %c0_i32_8 : i32
    %25 = vector.broadcast %24 : i1 to vector<8x256xi1>
    %26 = vector.broadcast %25 : vector<8x256xi1> to vector<8x256xi1>
    %27 = arith.xori %23, %26 : vector<8x256xi1>
    %28 = arith.andi %27, %21 : vector<8x256xi1>
    %29 = vector.broadcast %17 : i32 to vector<8x256xi32>
    %30 = arith.addi %19, %29 : vector<8x256xi32>
    %31 = arith.select %28, %30, %19 : vector<8x256xi1>, vector<8x256xi32>
    %c15_i32 = arith.constant 15 : i32
    %32 = vector.broadcast %c15_i32 : i32 to vector<8x256xi32>
    %33 = arith.cmpi eq, %31, %32 : vector<8x256xi32>
    %cst_9 = arith.constant 0.000000e+00 : f32
    %34 = vector.broadcast %cst_9 : f32 to vector<8x256xf32>
    %35 = arith.select %33, %34, %12 : vector<8x256xi1>, vector<8x256xf32>
    %c0_i32_10 = arith.constant 0 : i32
    %36 = vector.broadcast %c0_i32_10 : i32 to vector<8x256xi32>
    %37 = arith.cmpi eq, %31, %36 : vector<8x256xi32>
    %cst_11 = arith.constant 0.000000e+00 : f32
    %38 = vector.broadcast %cst_11 : f32 to vector<8x256xf32>
    %39 = arith.select %37, %38, %14 : vector<8x256xi1>, vector<8x256xf32>
    %40 = arith.subf %8, %10 : vector<8x256xf32>
    %41 = arith.subf %35, %39 : vector<8x256xf32>
    %42 = arith.mulf %40, %40 : vector<8x256xf32>
    %43 = arith.mulf %41, %41 : vector<8x256xf32>
    %44 = arith.addf %42, %43 : vector<8x256xf32>
    %cst_12 = arith.constant 9.99999997E-7 : f32
    %45 = vector.broadcast %cst_12 : f32 to vector<8x256xf32>
    %46 = arith.addf %44, %45 : vector<8x256xf32>
    %47 = math.sqrt %46 : vector<8x256xf32>
    %cst_13 = arith.constant 0.000000e+00 : f32
    %48 = vector.broadcast %cst_13 : f32 to vector<8x16xf32>
    %cst_14 = arith.constant 0.000000e+00 : f32
    %49 = vector.broadcast %cst_14 : f32 to vector<8x1xf32>
    %50 = vector.extract_strided_slice %4 {offsets = [0, 16], sizes = [8, 240], strides = [1, 1]} : vector<8x256xf32> to vector<8x240xf32>
    %51 = tpu.concatenate %50, %48 in 1 : vector<8x240xf32>, vector<8x16xf32> -> vector<8x256xf32>
    %52 = vector.extract_strided_slice %4 {offsets = [0, 0], sizes = [8, 240], strides = [1, 1]} : vector<8x256xf32> to vector<8x240xf32>
    %53 = tpu.concatenate %48, %52 in 1 : vector<8x16xf32>, vector<8x240xf32> -> vector<8x256xf32>
    %54 = vector.extract_strided_slice %4 {offsets = [0, 1], sizes = [8, 255], strides = [1, 1]} : vector<8x256xf32> to vector<8x255xf32>
    %55 = tpu.concatenate %54, %49 in 1 : vector<8x255xf32>, vector<8x1xf32> -> vector<8x256xf32>
    %56 = vector.extract_strided_slice %4 {offsets = [0, 0], sizes = [8, 255], strides = [1, 1]} : vector<8x256xf32> to vector<8x255xf32>
    %57 = tpu.concatenate %49, %56 in 1 : vector<8x1xf32>, vector<8x255xf32> -> vector<8x256xf32>
    %58 = tpu.iota {dimensions = array<i32: 1>} : vector<8x256xi32>
    %c16_i32_15 = arith.constant 16 : i32
    %c0_i32_16 = arith.constant 0 : i32
    %59 = arith.cmpi eq, %c16_i32_15, %c0_i32_16 : i32
    %c1_i32_17 = arith.constant 1 : i32
    %60 = arith.select %59, %c1_i32_17, %c16_i32_15 : i32
    %61 = vector.broadcast %60 : i32 to vector<8x256xi32>
    %62 = arith.remsi %58, %61 : vector<8x256xi32>
    %c0_i32_18 = arith.constant 0 : i32
    %63 = vector.broadcast %c0_i32_18 : i32 to vector<8x256xi32>
    %64 = arith.cmpi ne, %62, %63 : vector<8x256xi32>
    %c0_i32_19 = arith.constant 0 : i32
    %65 = vector.broadcast %c0_i32_19 : i32 to vector<8x256xi32>
    %66 = arith.cmpi slt, %62, %65 : vector<8x256xi32>
    %c0_i32_20 = arith.constant 0 : i32
    %67 = arith.cmpi slt, %60, %c0_i32_20 : i32
    %68 = vector.broadcast %67 : i1 to vector<8x256xi1>
    %69 = vector.broadcast %68 : vector<8x256xi1> to vector<8x256xi1>
    %70 = arith.xori %66, %69 : vector<8x256xi1>
    %71 = arith.andi %70, %64 : vector<8x256xi1>
    %72 = vector.broadcast %60 : i32 to vector<8x256xi32>
    %73 = arith.addi %62, %72 : vector<8x256xi32>
    %74 = arith.select %71, %73, %62 : vector<8x256xi1>, vector<8x256xi32>
    %c15_i32_21 = arith.constant 15 : i32
    %75 = vector.broadcast %c15_i32_21 : i32 to vector<8x256xi32>
    %76 = arith.cmpi eq, %74, %75 : vector<8x256xi32>
    %cst_22 = arith.constant 0.000000e+00 : f32
    %77 = vector.broadcast %cst_22 : f32 to vector<8x256xf32>
    %78 = arith.select %76, %77, %55 : vector<8x256xi1>, vector<8x256xf32>
    %c0_i32_23 = arith.constant 0 : i32
    %79 = vector.broadcast %c0_i32_23 : i32 to vector<8x256xi32>
    %80 = arith.cmpi eq, %74, %79 : vector<8x256xi32>
    %cst_24 = arith.constant 0.000000e+00 : f32
    %81 = vector.broadcast %cst_24 : f32 to vector<8x256xf32>
    %82 = arith.select %80, %81, %57 : vector<8x256xi1>, vector<8x256xf32>
    %83 = arith.subf %51, %53 : vector<8x256xf32>
    %84 = arith.subf %78, %82 : vector<8x256xf32>
    %85 = arith.mulf %83, %83 : vector<8x256xf32>
    %86 = arith.mulf %84, %84 : vector<8x256xf32>
    %87 = arith.addf %85, %86 : vector<8x256xf32>
    %cst_25 = arith.constant 9.99999997E-7 : f32
    %88 = vector.broadcast %cst_25 : f32 to vector<8x256xf32>
    %89 = arith.addf %87, %88 : vector<8x256xf32>
    %90 = math.sqrt %89 : vector<8x256xf32>
    %c8_i32 = arith.constant 8 : i32
    %91 = arith.muli %arg0, %c8_i32 : i32
    %92 = tpu.iota {dimensions = array<i32: 0>} : vector<8x256xi32>
    %93 = vector.broadcast %91 : i32 to vector<8x256xi32>
    %94 = arith.addi %93, %92 : vector<8x256xi32>
    %c6_i32 = arith.constant 6 : i32
    %95 = vector.broadcast %c6_i32 : i32 to vector<8x256xi32>
    %96 = arith.cmpi slt, %94, %95 : vector<8x256xi32>
    %97 = arith.subf %47, %90 : vector<8x256xf32>
    %98 = math.absf %97 : vector<8x256xf32>
    %cst_26 = arith.constant 0.000000e+00 : f32
    %99 = vector.broadcast %cst_26 : f32 to vector<8x256xf32>
    %100 = arith.select %96, %98, %99 : vector<8x256xi1>, vector<8x256xf32>
    %c0_27 = arith.constant 0 : index
    %c0_28 = arith.constant 0 : index
    %101 = vector.load %arg3[%c0_27, %c0_28] : memref<1x1xf32, #tpu.memory_space<vmem>>, vector<1x1xf32>
    %102 = vector.shape_cast %100 : vector<8x256xf32> to vector<1x8x256xf32>
    %cst_29 = arith.constant dense<0.000000e+00> : vector<1xf32>
    %103 = vector.multi_reduction <add>, %102, %cst_29 [1, 2] : vector<1x8x256xf32> to vector<1xf32>
    %104 = vector.shape_cast %103 : vector<1xf32> to vector<1x1x1xf32>
    %105 = vector.extract %104[0, 0, 0] : f32 from vector<1x1x1xf32>
    %106 = vector.broadcast %105 : f32 to vector<1x1xf32>
    %107 = arith.addf %101, %106 : vector<1x1xf32>
    %c0_30 = arith.constant 0 : index
    %c0_31 = arith.constant 0 : index
    %108 = vector.load %arg3[%c0_30, %c0_31] : memref<1x1xf32, #tpu.memory_space<vmem>>, vector<1x1xf32>
    tpu.vector_store %arg3[%c0_30, %c0_31], %107 {strides = array<i32>} : memref<1x1xf32, #tpu.memory_space<vmem>>, vector<1x1xf32>,
    return
  }
  func.func @transform_0(%arg0: i32) -> (i32, i32) {
    %c0_i32 = arith.constant 0 : i32
    %c0_i32_0 = arith.constant 0 : i32
    return %arg0, %c0_i32 : i32, i32
  }
  func.func @transform_1(%arg0: i32) -> (i32, i32) {
    %c0_i32 = arith.constant 0 : i32
    %c0_i32_0 = arith.constant 0 : i32
    return %arg0, %c0_i32 : i32, i32
  }
  func.func @transform_2(%arg0: i32) -> (i32, i32) {
    %c0_i32 = arith.constant 0 : i32
    %c0_i32_0 = arith.constant 0 : i32
    %c0_i32_1 = arith.constant 0 : i32
    return %c0_i32, %c0_i32_0 : i32, i32
  }
}

module attributes {stable_mosaic.version = 11 : i64} {
  func.func @_edge_l1_kernel(%arg0: i32, %arg1: memref<8x256xf32, #tpu.memory_space<vmem>>, %arg2: memref<8x256xf32, #tpu.memory_space<vmem>>, %arg3: memref<1x1xf32, #tpu.memory_space<vmem>>) attributes {dimension_semantics = [#tpu.dimension_semantics<arbitrary>], iteration_bounds = array<i64: 1>, scalar_prefetch = 0 : i64, scratch_operands = 0 : i64, tpu.core_type = #tpu.core_type<tc>, window_params = [{transform_indices = @transform_0, window_bounds = array<i64: 8, 256>}, {transform_indices = @transform_1, window_bounds = array<i64: 8, 256>}, {pipeline_mode = #tpu.pipeline_mode<synchronous>, transform_indices = @transform_2, window_bounds = array<i64: 1, 1>}]} {
    %c0_i32 = arith.constant 0 : i32
    %0 = arith.cmpi eq, %arg0, %c0_i32 : i32
    %1 = arith.extui %0 : i1 to i32
    %c0_i32_0 = arith.constant 0 : i32
    %2 = arith.cmpi ne, %1, %c0_i32_0 : i32
    scf.if %2 {
      %cst_19 = arith.constant 0.000000e+00 : f32
      %66 = vector.broadcast %cst_19 : f32 to vector<1x1xf32>
      %c0_20 = arith.constant 0 : index
      %c0_21 = arith.constant 0 : index
      %67 = vector.load %arg3[%c0_20, %c0_21] : memref<1x1xf32, #tpu.memory_space<vmem>>, vector<1x1xf32>
      tpu.vector_store %arg3[%c0_20, %c0_21], %66 {strides = array<i32>} : memref<1x1xf32, #tpu.memory_space<vmem>>, vector<1x1xf32>,
    } else {
    }
    %c0 = arith.constant 0 : index
    %c0_1 = arith.constant 0 : index
    %3 = vector.load %arg1[%c0, %c0_1] : memref<8x256xf32, #tpu.memory_space<vmem>>, vector<8x256xf32>
    %c0_2 = arith.constant 0 : index
    %c0_3 = arith.constant 0 : index
    %4 = vector.load %arg2[%c0_2, %c0_3] : memref<8x256xf32, #tpu.memory_space<vmem>>, vector<8x256xf32>
    %cst = arith.constant 0.000000e+00 : f32
    %5 = vector.broadcast %cst : f32 to vector<8x16xf32>
    %cst_4 = arith.constant 0.000000e+00 : f32
    %6 = vector.broadcast %cst_4 : f32 to vector<8x1xf32>
    %7 = vector.extract_strided_slice %4 {offsets = [0, 16], sizes = [8, 240], strides = [1, 1]} : vector<8x256xf32> to vector<8x240xf32>
    %8 = tpu.concatenate %7, %5 in 1 : vector<8x240xf32>, vector<8x16xf32> -> vector<8x256xf32>
    %9 = vector.extract_strided_slice %4 {offsets = [0, 0], sizes = [8, 240], strides = [1, 1]} : vector<8x256xf32> to vector<8x240xf32>
    %10 = tpu.concatenate %5, %9 in 1 : vector<8x16xf32>, vector<8x240xf32> -> vector<8x256xf32>
    %11 = vector.extract_strided_slice %4 {offsets = [0, 1], sizes = [8, 255], strides = [1, 1]} : vector<8x256xf32> to vector<8x255xf32>
    %12 = tpu.concatenate %11, %6 in 1 : vector<8x255xf32>, vector<8x1xf32> -> vector<8x256xf32>
    %13 = vector.extract_strided_slice %4 {offsets = [0, 0], sizes = [8, 255], strides = [1, 1]} : vector<8x256xf32> to vector<8x255xf32>
    %14 = tpu.concatenate %6, %13 in 1 : vector<8x1xf32>, vector<8x255xf32> -> vector<8x256xf32>
    %15 = tpu.iota {dimensions = array<i32: 1>} : vector<8x256xi32>
    %c16_i32 = arith.constant 16 : i32
    %c0_i32_5 = arith.constant 0 : i32
    %16 = arith.cmpi eq, %c16_i32, %c0_i32_5 : i32
    %c1_i32 = arith.constant 1 : i32
    %17 = arith.select %16, %c1_i32, %c16_i32 : i32
    %18 = vector.broadcast %17 : i32 to vector<8x256xi32>
    %19 = arith.remsi %15, %18 : vector<8x256xi32>
    %c0_i32_6 = arith.constant 0 : i32
    %20 = vector.broadcast %c0_i32_6 : i32 to vector<8x256xi32>
    %21 = arith.cmpi ne, %19, %20 : vector<8x256xi32>
    %c0_i32_7 = arith.constant 0 : i32
    %22 = vector.broadcast %c0_i32_7 : i32 to vector<8x256xi32>
    %23 = arith.cmpi slt, %19, %22 : vector<8x256xi32>
    %c0_i32_8 = arith.constant 0 : i32
    %24 = arith.cmpi slt, %17, %c0_i32_8 : i32
    %25 = vector.broadcast %24 : i1 to vector<8x256xi1>
    %26 = vector.broadcast %25 : vector<8x256xi1> to vector<8x256xi1>
    %27 = arith.xori %23, %26 : vector<8x256xi1>
    %28 = arith.andi %27, %21 : vector<8x256xi1>
    %29 = vector.broadcast %17 : i32 to vector<8x256xi32>
    %30 = arith.addi %19, %29 : vector<8x256xi32>
    %31 = arith.select %28, %30, %19 : vector<8x256xi1>, vector<8x256xi32>
    %c15_i32 = arith.constant 15 : i32
    %32 = vector.broadcast %c15_i32 : i32 to vector<8x256xi32>
    %33 = arith.cmpi eq, %31, %32 : vector<8x256xi32>
    %cst_9 = arith.constant 0.000000e+00 : f32
    %34 = vector.broadcast %cst_9 : f32 to vector<8x256xf32>
    %35 = arith.select %33, %34, %12 : vector<8x256xi1>, vector<8x256xf32>
    %c0_i32_10 = arith.constant 0 : i32
    %36 = vector.broadcast %c0_i32_10 : i32 to vector<8x256xi32>
    %37 = arith.cmpi eq, %31, %36 : vector<8x256xi32>
    %cst_11 = arith.constant 0.000000e+00 : f32
    %38 = vector.broadcast %cst_11 : f32 to vector<8x256xf32>
    %39 = arith.select %37, %38, %14 : vector<8x256xi1>, vector<8x256xf32>
    %40 = arith.subf %8, %10 : vector<8x256xf32>
    %41 = arith.subf %35, %39 : vector<8x256xf32>
    %42 = arith.mulf %40, %40 : vector<8x256xf32>
    %43 = arith.mulf %41, %41 : vector<8x256xf32>
    %44 = arith.addf %42, %43 : vector<8x256xf32>
    %cst_12 = arith.constant 9.99999997E-7 : f32
    %45 = vector.broadcast %cst_12 : f32 to vector<8x256xf32>
    %46 = arith.addf %44, %45 : vector<8x256xf32>
    %47 = math.sqrt %46 : vector<8x256xf32>
    %c8_i32 = arith.constant 8 : i32
    %48 = arith.muli %arg0, %c8_i32 : i32
    %49 = tpu.iota {dimensions = array<i32: 0>} : vector<8x256xi32>
    %50 = vector.broadcast %48 : i32 to vector<8x256xi32>
    %51 = arith.addi %50, %49 : vector<8x256xi32>
    %c2_i32 = arith.constant 2 : i32
    %52 = vector.broadcast %c2_i32 : i32 to vector<8x256xi32>
    %53 = arith.cmpi slt, %51, %52 : vector<8x256xi32>
    %54 = arith.subf %3, %47 : vector<8x256xf32>
    %55 = math.absf %54 : vector<8x256xf32>
    %cst_13 = arith.constant 0.000000e+00 : f32
    %56 = vector.broadcast %cst_13 : f32 to vector<8x256xf32>
    %57 = arith.select %53, %55, %56 : vector<8x256xi1>, vector<8x256xf32>
    %c0_14 = arith.constant 0 : index
    %c0_15 = arith.constant 0 : index
    %58 = vector.load %arg3[%c0_14, %c0_15] : memref<1x1xf32, #tpu.memory_space<vmem>>, vector<1x1xf32>
    %59 = vector.shape_cast %57 : vector<8x256xf32> to vector<1x8x256xf32>
    %cst_16 = arith.constant dense<0.000000e+00> : vector<1xf32>
    %60 = vector.multi_reduction <add>, %59, %cst_16 [1, 2] : vector<1x8x256xf32> to vector<1xf32>
    %61 = vector.shape_cast %60 : vector<1xf32> to vector<1x1x1xf32>
    %62 = vector.extract %61[0, 0, 0] : f32 from vector<1x1x1xf32>
    %63 = vector.broadcast %62 : f32 to vector<1x1xf32>
    %64 = arith.addf %58, %63 : vector<1x1xf32>
    %c0_17 = arith.constant 0 : index
    %c0_18 = arith.constant 0 : index
    %65 = vector.load %arg3[%c0_17, %c0_18] : memref<1x1xf32, #tpu.memory_space<vmem>>, vector<1x1xf32>
    tpu.vector_store %arg3[%c0_17, %c0_18], %64 {strides = array<i32>} : memref<1x1xf32, #tpu.memory_space<vmem>>, vector<1x1xf32>,
    return
  }
  func.func @transform_0(%arg0: i32) -> (i32, i32) {
    %c0_i32 = arith.constant 0 : i32
    %c0_i32_0 = arith.constant 0 : i32
    return %arg0, %c0_i32 : i32, i32
  }
  func.func @transform_1(%arg0: i32) -> (i32, i32) {
    %c0_i32 = arith.constant 0 : i32
    %c0_i32_0 = arith.constant 0 : i32
    return %arg0, %c0_i32 : i32, i32
  }
  func.func @transform_2(%arg0: i32) -> (i32, i32) {
    %c0_i32 = arith.constant 0 : i32
    %c0_i32_0 = arith.constant 0 : i32
    %c0_i32_1 = arith.constant 0 : i32
    return %c0_i32, %c0_i32_0 : i32, i32
  }
}

</mosaic_0001>

<bundles_post_ra>
// kernel: dual_grad_loss.36
= control target key start
LH: loop header
LB: loop body
LE: loop exit
PB: predicated region body
PF: predicated region fallthrough
CT: control target
= control target key end

     0   :  { %s2251_s1 = inlined_call_operand.vmem [shape: bf16[128,128], index: 1, kind: input, shape index: {}]   ;;  %s2252_s0 = inlined_call_operand.vmem [shape: bf16[512,128], index: 0, kind: input, shape index: {}]   ;;  %s2253_s2 = inlined_call_operand.vmem [shape: f32[1,128], index: 2, kind: input, shape index: {}]   ;;  %s2254_s3 = inlined_call_operand.vmem [shape: bf16[512,128], index: 3, kind: output, shape index: {}]  }
   0x1   :  { %v1906_v0 = vld [vmem:[%s2251_s1] sm:$0xff]   ;;  %v1907_v1 = vld [vmem:[%s2251_s1 + $0x8] sm:$0xff]   ;;  %v1908_v2 = vld [vmem:[%s2251_s1 + $0x10] sm:$0xff]  }
   0x2   :  { %1810 = vmatprep.subr.bf16.mxu0 %v1906_v0  ;;  %1890 = vmatprep.subr.bf16.mxu1 %v1906_v0  ;;  %v1909_v3 = vld [vmem:[%s2251_s1 + $0x18] sm:$0xff]   ;;  %v1914_v4 = vld [vmem:[%s2252_s0] sm:$0xff]   ;;  %v1911_v7 = vld [vmem:[%s2251_s1 + $0x28] sm:$0xff]  }
   0x3   :  { %1811 = vmatpush3.bf16.msra.mxu0 %v1906_v0  ;;  %1898 = vmatpush3.bf16.msra.mxu1 %v1906_v0  ;;  %v1915_v5 = vld [vmem:[%s2252_s0 + $0x80] sm:$0xff]   ;;  %v1912_v8 = vld [vmem:[%s2251_s1 + $0x30] sm:$0xff]   ;;  %v1913_v9 = vld [vmem:[%s2251_s1 + $0x38] sm:$0xff]  }
   0x4   :  { %1812 = vmatprep.subr.bf16.mxu0 %v1907_v1  ;;  %1891 = vmatprep.subr.bf16.mxu1 %v1907_v1  ;;  %v1910_v6 = vld [vmem:[%s2251_s1 + $0x20] sm:$0xff]   ;;  %v1916_v10 = vld [vmem:[%s2252_s0 + $0x8] sm:$0xff]   ;;  %v1918_v12 = vld [vmem:[%s2252_s0 + $0x10] sm:$0xff]  }
   0x5   :  { %1826 = vmatprep.mubr.bf16.mxu0 %v1914_v4  ;;  %1858 = vmatprep.mubr.bf16.mxu1 %v1915_v5  ;;  %v1917_v11 = vld [vmem:[%s2252_s0 + $0x88] sm:$0xff]   ;;  %v1919_v13 = vld [vmem:[%s2252_s0 + $0x90] sm:$0xff]   ;;  %v1920_v14 = vld [vmem:[%s2252_s0 + $0x18] sm:$0xff]  }
   0x6   :  { %v1921_v15 = vld [vmem:[%s2252_s0 + $0x98] sm:$0xff]   ;;  %v1922_v16 = vld [vmem:[%s2252_s0 + $0x20] sm:$0xff]   ;;  %v1924_v18 = vld [vmem:[%s2252_s0 + $0x28] sm:$0xff]  }
   0x7   :  { %1813 = vmatpush3.bf16.msra.mxu0 %v1907_v1  ;;  %1899 = vmatpush3.bf16.msra.mxu1 %v1907_v1  ;;  %v1923_v17 = vld [vmem:[%s2252_s0 + $0xa0] sm:$0xff]   ;;  %v1925_v19 = vld [vmem:[%s2252_s0 + $0xa8] sm:$0xff]   ;;  %v1926_v20 = vld [vmem:[%s2252_s0 + $0x30] sm:$0xff]  }
   0x8   :  { %1814 = vmatprep.subr.bf16.mxu0 %v1908_v2  ;;  %1892 = vmatprep.subr.bf16.mxu1 %v1908_v2  ;;  %v1927_v21 = vld [vmem:[%s2252_s0 + $0xb0] sm:$0xff]   ;;  %v1928_v22 = vld [vmem:[%s2252_s0 + $0x38] sm:$0xff]   ;;  %v1930_v24 = vld [vmem:[%s2252_s0 + $0x40] sm:$0xff]  }
   0x9   :  { %v1929_v23 = vld [vmem:[%s2252_s0 + $0xb8] sm:$0xff]   ;;  %v1931_v25 = vld [vmem:[%s2252_s0 + $0xc0] sm:$0xff]   ;;  %v1932_v26 = vld [vmem:[%s2252_s0 + $0x48] sm:$0xff]  }
   0xa   :  { %v1933_v27 = vld [vmem:[%s2252_s0 + $0xc8] sm:$0xff]   ;;  %v1934_v28 = vld [vmem:[%s2252_s0 + $0x50] sm:$0xff]   ;;  %v1936_v30 = vld [vmem:[%s2252_s0 + $0x58] sm:$0xff]  }
   0xb   :  { %1815 = vmatpush3.bf16.msra.mxu0 %v1908_v2  ;;  %1900 = vmatpush3.bf16.msra.mxu1 %v1908_v2  ;;  %v1935_v29 = vld [vmem:[%s2252_s0 + $0xd0] sm:$0xff]   ;;  %v1937_v31 = vld [vmem:[%s2252_s0 + $0xd8] sm:$0xff]   ;;  %v1938_v32 = vld [vmem:[%s2252_s0 + $0x60] sm:$0xff]  }
   0xc   :  { %1816 = vmatprep.subr.bf16.mxu0 %v1909_v3  ;;  %1893 = vmatprep.subr.bf16.mxu1 %v1909_v3  ;;  %v1939_v33 = vld [vmem:[%s2252_s0 + $0xe0] sm:$0xff]   ;;  %v1940_v34 = vld [vmem:[%s2252_s0 + $0x68] sm:$0xff]   ;;  %v1942_v36 = vld [vmem:[%s2252_s0 + $0x70] sm:$0xff]  }
   0xd   :  { %v1941_v35 = vld [vmem:[%s2252_s0 + $0xe8] sm:$0xff]   ;;  %v1943_v37 = vld [vmem:[%s2252_s0 + $0xf0] sm:$0xff]   ;;  %v1944_v38 = vld [vmem:[%s2252_s0 + $0x78] sm:$0xff]  }
   0xe   :  { %v1945_v39 = vld [vmem:[%s2252_s0 + $0xf8] sm:$0xff]   ;;  %v2089_v40 = vld [vmem:[%s2253_s2] ss:$0 sm:$0xff] }
   0xf   :  { %1817 = vmatpush3.bf16.msra.mxu0 %v1909_v3  ;;  %1901 = vmatpush3.bf16.msra.mxu1 %v1909_v3 }
  0x10   :  { %1818 = vmatprep.subr.bf16.mxu0 %v1910_v6  ;;  %1894 = vmatprep.subr.bf16.mxu1 %v1910_v6 }
  0x13   :  { %1819 = vmatpush3.bf16.msra.mxu0 %v1910_v6  ;;  %1902 = vmatpush3.bf16.msra.mxu1 %v1910_v6 }
  0x14   :  { %1820 = vmatprep.subr.bf16.mxu0 %v1911_v7  ;;  %1895 = vmatprep.subr.bf16.mxu1 %v1911_v7 }
  0x17   :  { %1821 = vmatpush3.bf16.msra.mxu0 %v1911_v7  ;;  %1903 = vmatpush3.bf16.msra.mxu1 %v1911_v7 }
  0x18   :  { %1822 = vmatprep.subr.bf16.mxu0 %v1912_v8  ;;  %1896 = vmatprep.subr.bf16.mxu1 %v1912_v8 }
  0x1b   :  { %1823 = vmatpush3.bf16.msra.mxu0 %v1912_v8  ;;  %1904 = vmatpush3.bf16.msra.mxu1 %v1912_v8 }
  0x1c   :  { %1824 = vmatprep.subr.bf16.mxu0 %v1913_v9  ;;  %1897 = vmatprep.subr.bf16.mxu1 %v1913_v9 }
  0x1f   :  { %1825 = vmatpush3.bf16.msra.mxu0 %v1913_v9  ;;  %1905 = vmatpush3.bf16.msra.mxu1 %v1913_v9 }
  0x22   :  { %1827 = vmatmul.mubr.bf16.vlgmr.msra.gmra.mrb[0].mxu0 %v1916_v10  ;;  %1859 = vmatmul.mubr.bf16.vlgmr.msra.gmra.mrb[0].mxu1 %v1917_v11 }
  0x23   :  { %1830 = vmatprep.mubr.bf16.mxu0 %v1918_v12  ;;  %1862 = vmatprep.mubr.bf16.mxu1 %v1919_v13 }
  0x2a   :  { %1831 = vmatmul.mubr.bf16.gmra.mrb[4].mxu0 %v1920_v14  ;;  %1863 = vmatmul.mubr.bf16.gmra.mrb[4].mxu1 %v1921_v15 }
  0x2b   :  { %1834 = vmatprep.mubr.bf16.mxu0 %v1922_v16  ;;  %1866 = vmatprep.mubr.bf16.mxu1 %v1923_v17 }
  0x32   :  { %1835 = vmatmul.mubr.bf16.gmra.mrb[8].mxu0 %v1924_v18  ;;  %1867 = vmatmul.mubr.bf16.gmra.mrb[8].mxu1 %v1925_v19 }
  0x33   :  { %1838 = vmatprep.mubr.bf16.mxu0 %v1926_v20  ;;  %1870 = vmatprep.mubr.bf16.mxu1 %v1927_v21 }
  0x3a   :  { %1839 = vmatmul.mubr.bf16.gmra.mrb[12].mxu0 %v1928_v22  ;;  %1871 = vmatmul.mubr.bf16.gmra.mrb[12].mxu1 %v1929_v23 }
  0x3b   :  { %1842 = vmatprep.mubr.bf16.mxu0 %v1930_v24  ;;  %1874 = vmatprep.mubr.bf16.mxu1 %v1931_v25 }
  0x42   :  { %1843 = vmatmul.mubr.bf16.gmra.mrb[16].mxu0 %v1932_v26  ;;  %1875 = vmatmul.mubr.bf16.gmra.mrb[16].mxu1 %v1933_v27 }
  0x43   :  { %1846 = vmatprep.mubr.bf16.mxu0 %v1934_v28  ;;  %1878 = vmatprep.mubr.bf16.mxu1 %v1935_v29 }
  0x4a   :  { %1847 = vmatmul.mubr.bf16.gmra.mrb[20].mxu0 %v1936_v30  ;;  %1879 = vmatmul.mubr.bf16.gmra.mrb[20].mxu1 %v1937_v31 }
  0x4b   :  { %1850 = vmatprep.mubr.bf16.mxu0 %v1938_v32  ;;  %1882 = vmatprep.mubr.bf16.mxu1 %v1939_v33 }
  0x52   :  { %1851 = vmatmul.mubr.bf16.gmra.mrb[24].mxu0 %v1940_v34  ;;  %1883 = vmatmul.mubr.bf16.gmra.mrb[24].mxu1 %v1941_v35 }
  0x53   :  { %1854 = vmatprep.mubr.bf16.mxu0 %v1942_v36  ;;  %1886 = vmatprep.mubr.bf16.mxu1 %v1943_v37 }
  0x5a   :  { %1855 = vmatmul.mubr.bf16.gmra.mrb[28].mxu0 %v1944_v38  ;;  %1887 = vmatmul.mubr.bf16.gmra.mrb[28].mxu1 %v1945_v39 }
  0xf5   :  { %v1828_v41 = vpop.f32.mrb[0].mxu0  ;;  %v1860_v42 = vpop.f32.mrb[0].mxu1 }
  0xf6   :  { %v960_v43 = vadd.f32 %v1828_v41, %v2089_v40  ;;  %v992_v44 = vadd.f32 %v1860_v42, %v2089_v40  ;;  %v501_v45 = vpop.f32.mrb[1].mxu0  ;;  %v629_v46 = vpop.f32.mrb[1].mxu1 }
  0xf7   :  { %v958_v47 = vadd.f32 %v2089_v40, %v501_v45  ;;  %v990_v48 = vadd.f32 %v2089_v40, %v629_v46  ;;  %v1829_v49 = vpop.f32.mrb[2].mxu0  ;;  %v1861_v50 = vpop.f32.mrb[2].mxu1 }
  0xf8   :  { %v961_v51 = vadd.f32 %v1829_v49, %v2089_v40  ;;  %v993_v52 = vadd.f32 %v1861_v50, %v2089_v40  ;;  %v504_v53 = vpop.f32.mrb[3].mxu0  ;;  %v632_v54 = vpop.f32.mrb[3].mxu1  ;;  %v1024_v57 = vmax.f32 %v960_v43, 0.0  ;;  %v1056_v58 = vmax.f32 %v992_v44, 0.0 }
  0xf9   :  { %v959_v55 = vadd.f32 %v2089_v40, %v504_v53  ;;  %v991_v56 = vadd.f32 %v2089_v40, %v632_v54  ;;  %v1022_v61 = vmax.f32 %v958_v47, 0.0  ;;  %v1054_v62 = vmax.f32 %v990_v48, 0.0 }
  0xfa   :  { %v1025_v59 = vmax.f32 %v961_v51, 0.0  ;;  %v1057_v60 = vmax.f32 %v993_v52, 0.0 }
  0xfb   :  { %v1023_v63 = vmax.f32 %v959_v55, 0.0  ;;  %v1055_v0 = vmax.f32 %v991_v56, 0.0 }
  0xfc   :  { %v1587_v1 = vpack.c.bf16 %v1025_v59, %v1024_v57  ;;  %v1667_v2 = vpack.c.bf16 %v1057_v60, %v1056_v58 }
  0xfd   :  { %v1582_v3 = vpack.c.bf16 %v1023_v63, %v1022_v61  ;;  %v1662_v4 = vpack.c.bf16 %v1055_v0, %v1054_v62  ;;  %v1832_v5 = vpop.f32.mrb[4].mxu0  ;;  %v1864_v6 = vpop.f32.mrb[4].mxu1 }
  0xfe   :  { %1739 = vst [vmem:[%s2254_s3 + $0x8] sm:$0xff] %v1587_v1   ;;  %1755 = vst [vmem:[%s2254_s3 + $0x88] sm:$0xff] %v1667_v2   ;;  %v964_v7 = vadd.f32 %v1832_v5, %v2089_v40  ;;  %v996_v8 = vadd.f32 %v1864_v6, %v2089_v40  ;;  %v517_v9 = vpop.f32.mrb[5].mxu0  ;;  %v645_v10 = vpop.f32.mrb[5].mxu1 }
  0xff   :  { %1583 = vst [vmem:[%s2254_s3] sm:$0xff] %v1582_v3   ;;  %1754 = vst [vmem:[%s2254_s3 + $0x80] sm:$0xff] %v1662_v4   ;;  %v962_v11 = vadd.f32 %v2089_v40, %v517_v9  ;;  %v994_v12 = vadd.f32 %v2089_v40, %v645_v10  ;;  %v1833_v13 = vpop.f32.mrb[6].mxu0  ;;  %v1865_v14 = vpop.f32.mrb[6].mxu1 }
 0x100   :  { %v965_v15 = vadd.f32 %v1833_v13, %v2089_v40  ;;  %v997_v16 = vadd.f32 %v1865_v14, %v2089_v40  ;;  %v520_v17 = vpop.f32.mrb[7].mxu0  ;;  %v648_v18 = vpop.f32.mrb[7].mxu1  ;;  %v1028_v21 = vmax.f32 %v964_v7, 0.0  ;;  %v1060_v22 = vmax.f32 %v996_v8, 0.0 }
 0x101   :  { %v963_v19 = vadd.f32 %v2089_v40, %v520_v17  ;;  %v995_v20 = vadd.f32 %v2089_v40, %v648_v18  ;;  %v1026_v25 = vmax.f32 %v962_v11, 0.0  ;;  %v1058_v26 = vmax.f32 %v994_v12, 0.0 }
 0x102   :  { %v1029_v23 = vmax.f32 %v965_v15, 0.0  ;;  %v1061_v24 = vmax.f32 %v997_v16, 0.0 }
 0x103   :  { %v1027_v27 = vmax.f32 %v963_v19, 0.0  ;;  %v1059_v28 = vmax.f32 %v995_v20, 0.0 }
 0x104   :  { %v1597_v29 = vpack.c.bf16 %v1029_v23, %v1028_v21  ;;  %v1677_v30 = vpack.c.bf16 %v1061_v24, %v1060_v22 }
 0x105   :  { %v1592_v31 = vpack.c.bf16 %v1027_v27, %v1026_v25  ;;  %v1672_v32 = vpack.c.bf16 %v1059_v28, %v1058_v26  ;;  %v1836_v33 = vpop.f32.mrb[8].mxu0  ;;  %v1868_v34 = vpop.f32.mrb[8].mxu1 }
 0x106   :  { %1741 = vst [vmem:[%s2254_s3 + $0x18] sm:$0xff] %v1597_v29   ;;  %1757 = vst [vmem:[%s2254_s3 + $0x98] sm:$0xff] %v1677_v30   ;;  %v968_v35 = vadd.f32 %v1836_v33, %v2089_v40  ;;  %v1000_v36 = vadd.f32 %v1868_v34, %v2089_v40  ;;  %v533_v37 = vpop.f32.mrb[9].mxu0  ;;  %v661_v38 = vpop.f32.mrb[9].mxu1 }
 0x107   :  { %1740 = vst [vmem:[%s2254_s3 + $0x10] sm:$0xff] %v1592_v31   ;;  %1756 = vst [vmem:[%s2254_s3 + $0x90] sm:$0xff] %v1672_v32   ;;  %v966_v39 = vadd.f32 %v2089_v40, %v533_v37  ;;  %v998_v41 = vadd.f32 %v2089_v40, %v661_v38  ;;  %v1837_v42 = vpop.f32.mrb[10].mxu0  ;;  %v1869_v43 = vpop.f32.mrb[10].mxu1 }
 0x108   :  { %v969_v44 = vadd.f32 %v1837_v42, %v2089_v40  ;;  %v1001_v45 = vadd.f32 %v1869_v43, %v2089_v40  ;;  %v536_v46 = vpop.f32.mrb[11].mxu0  ;;  %v664_v47 = vpop.f32.mrb[11].mxu1  ;;  %v1032_v50 = vmax.f32 %v968_v35, 0.0  ;;  %v1064_v51 = vmax.f32 %v1000_v36, 0.0 }
 0x109   :  { %v967_v48 = vadd.f32 %v2089_v40, %v536_v46  ;;  %v999_v49 = vadd.f32 %v2089_v40, %v664_v47  ;;  %v1030_v54 = vmax.f32 %v966_v39, 0.0  ;;  %v1062_v55 = vmax.f32 %v998_v41, 0.0 }
 0x10a   :  { %v1033_v52 = vmax.f32 %v969_v44, 0.0  ;;  %v1065_v53 = vmax.f32 %v1001_v45, 0.0 }
 0x10b   :  { %v1031_v56 = vmax.f32 %v967_v48, 0.0  ;;  %v1063_v57 = vmax.f32 %v999_v49, 0.0 }
 0x10c   :  { %v1607_v58 = vpack.c.bf16 %v1033_v52, %v1032_v50  ;;  %v1687_v59 = vpack.c.bf16 %v1065_v53, %v1064_v51 }
 0x10d   :  { %v1602_v60 = vpack.c.bf16 %v1031_v56, %v1030_v54  ;;  %v1682_v61 = vpack.c.bf16 %v1063_v57, %v1062_v55  ;;  %v1840_v62 = vpop.f32.mrb[12].mxu0  ;;  %v1872_v63 = vpop.f32.mrb[12].mxu1 }
 0x10e   :  { %1743 = vst [vmem:[%s2254_s3 + $0x28] sm:$0xff] %v1607_v58   ;;  %1759 = vst [vmem:[%s2254_s3 + $0xa8] sm:$0xff] %v1687_v59   ;;  %v972_v0 = vadd.f32 %v1840_v62, %v2089_v40  ;;  %v1004_v1 = vadd.f32 %v1872_v63, %v2089_v40  ;;  %v549_v2 = vpop.f32.mrb[13].mxu0  ;;  %v677_v3 = vpop.f32.mrb[13].mxu1 }
 0x10f   :  { %1742 = vst [vmem:[%s2254_s3 + $0x20] sm:$0xff] %v1602_v60   ;;  %1758 = vst [vmem:[%s2254_s3 + $0xa0] sm:$0xff] %v1682_v61   ;;  %v970_v4 = vadd.f32 %v2089_v40, %v549_v2  ;;  %v1002_v5 = vadd.f32 %v2089_v40, %v677_v3  ;;  %v1841_v6 = vpop.f32.mrb[14].mxu0  ;;  %v1873_v7 = vpop.f32.mrb[14].mxu1 }
 0x110   :  { %v973_v8 = vadd.f32 %v1841_v6, %v2089_v40  ;;  %v1005_v9 = vadd.f32 %v1873_v7, %v2089_v40  ;;  %v552_v10 = vpop.f32.mrb[15].mxu0  ;;  %v680_v11 = vpop.f32.mrb[15].mxu1  ;;  %v1036_v14 = vmax.f32 %v972_v0, 0.0  ;;  %v1068_v15 = vmax.f32 %v1004_v1, 0.0 }
 0x111   :  { %v971_v12 = vadd.f32 %v2089_v40, %v552_v10  ;;  %v1003_v13 = vadd.f32 %v2089_v40, %v680_v11  ;;  %v1034_v18 = vmax.f32 %v970_v4, 0.0  ;;  %v1066_v19 = vmax.f32 %v1002_v5, 0.0 }
 0x112   :  { %v1037_v16 = vmax.f32 %v973_v8, 0.0  ;;  %v1069_v17 = vmax.f32 %v1005_v9, 0.0 }
 0x113   :  { %v1035_v20 = vmax.f32 %v971_v12, 0.0  ;;  %v1067_v21 = vmax.f32 %v1003_v13, 0.0 }
 0x114   :  { %v1617_v22 = vpack.c.bf16 %v1037_v16, %v1036_v14  ;;  %v1697_v23 = vpack.c.bf16 %v1069_v17, %v1068_v15 }
 0x115   :  { %v1612_v24 = vpack.c.bf16 %v1035_v20, %v1034_v18  ;;  %v1692_v25 = vpack.c.bf16 %v1067_v21, %v1066_v19  ;;  %v1844_v26 = vpop.f32.mrb[16].mxu0  ;;  %v1876_v27 = vpop.f32.mrb[16].mxu1 }
 0x116   :  { %1745 = vst [vmem:[%s2254_s3 + $0x38] sm:$0xff] %v1617_v22   ;;  %1761 = vst [vmem:[%s2254_s3 + $0xb8] sm:$0xff] %v1697_v23   ;;  %v976_v28 = vadd.f32 %v1844_v26, %v2089_v40  ;;  %v1008_v29 = vadd.f32 %v1876_v27, %v2089_v40  ;;  %v565_v30 = vpop.f32.mrb[17].mxu0  ;;  %v693_v31 = vpop.f32.mrb[17].mxu1 }
 0x117   :  { %1744 = vst [vmem:[%s2254_s3 + $0x30] sm:$0xff] %v1612_v24   ;;  %1760 = vst [vmem:[%s2254_s3 + $0xb0] sm:$0xff] %v1692_v25   ;;  %v974_v32 = vadd.f32 %v2089_v40, %v565_v30  ;;  %v1006_v33 = vadd.f32 %v2089_v40, %v693_v31  ;;  %v1845_v34 = vpop.f32.mrb[18].mxu0  ;;  %v1877_v35 = vpop.f32.mrb[18].mxu1 }
 0x118   :  { %v977_v36 = vadd.f32 %v1845_v34, %v2089_v40  ;;  %v1009_v37 = vadd.f32 %v1877_v35, %v2089_v40  ;;  %v568_v38 = vpop.f32.mrb[19].mxu0  ;;  %v696_v39 = vpop.f32.mrb[19].mxu1  ;;  %v1040_v43 = vmax.f32 %v976_v28, 0.0  ;;  %v1072_v44 = vmax.f32 %v1008_v29, 0.0 }
 0x119   :  { %v975_v41 = vadd.f32 %v2089_v40, %v568_v38  ;;  %v1007_v42 = vadd.f32 %v2089_v40, %v696_v39  ;;  %v1038_v47 = vmax.f32 %v974_v32, 0.0  ;;  %v1070_v48 = vmax.f32 %v1006_v33, 0.0 }
 0x11a   :  { %v1041_v45 = vmax.f32 %v977_v36, 0.0  ;;  %v1073_v46 = vmax.f32 %v1009_v37, 0.0 }
 0x11b   :  { %v1039_v49 = vmax.f32 %v975_v41, 0.0  ;;  %v1071_v50 = vmax.f32 %v1007_v42, 0.0 }
 0x11c   :  { %v1627_v51 = vpack.c.bf16 %v1041_v45, %v1040_v43  ;;  %v1707_v52 = vpack.c.bf16 %v1073_v46, %v1072_v44 }
 0x11d   :  { %v1622_v53 = vpack.c.bf16 %v1039_v49, %v1038_v47  ;;  %v1702_v54 = vpack.c.bf16 %v1071_v50, %v1070_v48  ;;  %v1848_v55 = vpop.f32.mrb[20].mxu0  ;;  %v1880_v56 = vpop.f32.mrb[20].mxu1 }
 0x11e   :  { %1747 = vst [vmem:[%s2254_s3 + $0x48] sm:$0xff] %v1627_v51   ;;  %1763 = vst [vmem:[%s2254_s3 + $0xc8] sm:$0xff] %v1707_v52   ;;  %v980_v57 = vadd.f32 %v1848_v55, %v2089_v40  ;;  %v1012_v58 = vadd.f32 %v1880_v56, %v2089_v40  ;;  %v581_v59 = vpop.f32.mrb[21].mxu0  ;;  %v709_v60 = vpop.f32.mrb[21].mxu1 }
 0x11f   :  { %1746 = vst [vmem:[%s2254_s3 + $0x40] sm:$0xff] %v1622_v53   ;;  %1762 = vst [vmem:[%s2254_s3 + $0xc0] sm:$0xff] %v1702_v54   ;;  %v978_v61 = vadd.f32 %v2089_v40, %v581_v59  ;;  %v1010_v62 = vadd.f32 %v2089_v40, %v709_v60  ;;  %v1849_v63 = vpop.f32.mrb[22].mxu0  ;;  %v1881_v0 = vpop.f32.mrb[22].mxu1 }
 0x120   :  { %v981_v1 = vadd.f32 %v1849_v63, %v2089_v40  ;;  %v1013_v2 = vadd.f32 %v1881_v0, %v2089_v40  ;;  %v584_v3 = vpop.f32.mrb[23].mxu0  ;;  %v712_v4 = vpop.f32.mrb[23].mxu1  ;;  %v1044_v7 = vmax.f32 %v980_v57, 0.0  ;;  %v1076_v8 = vmax.f32 %v1012_v58, 0.0 }
 0x121   :  { %v979_v5 = vadd.f32 %v2089_v40, %v584_v3  ;;  %v1011_v6 = vadd.f32 %v2089_v40, %v712_v4  ;;  %v1042_v11 = vmax.f32 %v978_v61, 0.0  ;;  %v1074_v12 = vmax.f32 %v1010_v62, 0.0 }
 0x122   :  { %v1045_v9 = vmax.f32 %v981_v1, 0.0  ;;  %v1077_v10 = vmax.f32 %v1013_v2, 0.0 }
 0x123   :  { %v1043_v13 = vmax.f32 %v979_v5, 0.0  ;;  %v1075_v14 = vmax.f32 %v1011_v6, 0.0 }
 0x124   :  { %v1637_v15 = vpack.c.bf16 %v1045_v9, %v1044_v7  ;;  %v1717_v16 = vpack.c.bf16 %v1077_v10, %v1076_v8 }
 0x125   :  { %v1632_v17 = vpack.c.bf16 %v1043_v13, %v1042_v11  ;;  %v1712_v18 = vpack.c.bf16 %v1075_v14, %v1074_v12  ;;  %v1852_v19 = vpop.f32.mrb[24].mxu0  ;;  %v1884_v20 = vpop.f32.mrb[24].mxu1 }
 0x126   :  { %1749 = vst [vmem:[%s2254_s3 + $0x58] sm:$0xff] %v1637_v15   ;;  %1765 = vst [vmem:[%s2254_s3 + $0xd8] sm:$0xff] %v1717_v16   ;;  %v984_v21 = vadd.f32 %v1852_v19, %v2089_v40  ;;  %v1016_v22 = vadd.f32 %v1884_v20, %v2089_v40  ;;  %v597_v23 = vpop.f32.mrb[25].mxu0  ;;  %v725_v24 = vpop.f32.mrb[25].mxu1 }
 0x127   :  { %1748 = vst [vmem:[%s2254_s3 + $0x50] sm:$0xff] %v1632_v17   ;;  %1764 = vst [vmem:[%s2254_s3 + $0xd0] sm:$0xff] %v1712_v18   ;;  %v982_v25 = vadd.f32 %v2089_v40, %v597_v23  ;;  %v1014_v26 = vadd.f32 %v2089_v40, %v725_v24  ;;  %v1853_v27 = vpop.f32.mrb[26].mxu0  ;;  %v1885_v28 = vpop.f32.mrb[26].mxu1 }
 0x128   :  { %v985_v29 = vadd.f32 %v1853_v27, %v2089_v40  ;;  %v1017_v30 = vadd.f32 %v1885_v28, %v2089_v40  ;;  %v600_v31 = vpop.f32.mrb[27].mxu0  ;;  %v728_v32 = vpop.f32.mrb[27].mxu1  ;;  %v1048_v35 = vmax.f32 %v984_v21, 0.0  ;;  %v1080_v36 = vmax.f32 %v1016_v22, 0.0 }
 0x129   :  { %v983_v33 = vadd.f32 %v2089_v40, %v600_v31  ;;  %v1015_v34 = vadd.f32 %v2089_v40, %v728_v32  ;;  %v1046_v39 = vmax.f32 %v982_v25, 0.0  ;;  %v1078_v41 = vmax.f32 %v1014_v26, 0.0 }
 0x12a   :  { %v1049_v37 = vmax.f32 %v985_v29, 0.0  ;;  %v1081_v38 = vmax.f32 %v1017_v30, 0.0 }
 0x12b   :  { %v1047_v42 = vmax.f32 %v983_v33, 0.0  ;;  %v1079_v43 = vmax.f32 %v1015_v34, 0.0 }
 0x12c   :  { %v1647_v44 = vpack.c.bf16 %v1049_v37, %v1048_v35  ;;  %v1727_v45 = vpack.c.bf16 %v1081_v38, %v1080_v36 }
 0x12d   :  { %v1642_v46 = vpack.c.bf16 %v1047_v42, %v1046_v39  ;;  %v1722_v47 = vpack.c.bf16 %v1079_v43, %v1078_v41  ;;  %v1856_v48 = vpop.f32.mrb[28].mxu0  ;;  %v1888_v49 = vpop.f32.mrb[28].mxu1 }
 0x12e   :  { %1751 = vst [vmem:[%s2254_s3 + $0x68] sm:$0xff] %v1647_v44   ;;  %1767 = vst [vmem:[%s2254_s3 + $0xe8] sm:$0xff] %v1727_v45   ;;  %v988_v50 = vadd.f32 %v1856_v48, %v2089_v40  ;;  %v1020_v51 = vadd.f32 %v1888_v49, %v2089_v40  ;;  %v613_v52 = vpop.f32.mrb[29].mxu0  ;;  %v741_v53 = vpop.f32.mrb[29].mxu1 }
 0x12f   :  { %1750 = vst [vmem:[%s2254_s3 + $0x60] sm:$0xff] %v1642_v46   ;;  %1766 = vst [vmem:[%s2254_s3 + $0xe0] sm:$0xff] %v1722_v47   ;;  %v986_v54 = vadd.f32 %v2089_v40, %v613_v52  ;;  %v1018_v55 = vadd.f32 %v2089_v40, %v741_v53  ;;  %v1857_v56 = vpop.f32.mrb[30].mxu0  ;;  %v1889_v57 = vpop.f32.mrb[30].mxu1 }
 0x130   :  { %v989_v58 = vadd.f32 %v1857_v56, %v2089_v40  ;;  %v1021_v59 = vadd.f32 %v1889_v57, %v2089_v40  ;;  %v616_v60 = vpop.f32.mrb[31].mxu0  ;;  %v744_v61 = vpop.f32.mrb[31].mxu1  ;;  %v1052_v0 = vmax.f32 %v988_v50, 0.0  ;;  %v1084_v1 = vmax.f32 %v1020_v51, 0.0 }
 0x131   :  { %v987_v62 = vadd.f32 %v2089_v40, %v616_v60  ;;  %v1019_v63 = vadd.f32 %v2089_v40, %v744_v61  ;;  %v1050_v4 = vmax.f32 %v986_v54, 0.0  ;;  %v1082_v5 = vmax.f32 %v1018_v55, 0.0 }
 0x132   :  { %v1053_v2 = vmax.f32 %v989_v58, 0.0  ;;  %v1085_v3 = vmax.f32 %v1021_v59, 0.0 }
 0x133   :  { %v1051_v6 = vmax.f32 %v987_v62, 0.0  ;;  %v1083_v7 = vmax.f32 %v1019_v63, 0.0 }
 0x134   :  { %v1657_v8 = vpack.c.bf16 %v1053_v2, %v1052_v0  ;;  %v1737_v9 = vpack.c.bf16 %v1085_v3, %v1084_v1 }
 0x135   :  { %v1652_v10 = vpack.c.bf16 %v1051_v6, %v1050_v4  ;;  %v1732_v11 = vpack.c.bf16 %v1083_v7, %v1082_v5 }
 0x136   :  { %1753 = vst [vmem:[%s2254_s3 + $0x78] sm:$0xff] %v1657_v8   ;;  %1769 = vst [vmem:[%s2254_s3 + $0xf8] sm:$0xff] %v1737_v9  }
 0x137   :  { %1752 = vst [vmem:[%s2254_s3 + $0x70] sm:$0xff] %v1652_v10   ;;  %1768 = vst [vmem:[%s2254_s3 + $0xf0] sm:$0xff] %v1732_v11  }

// kernel: dual_grad_loss.37
= control target key start
LH: loop header
LB: loop body
LE: loop exit
PB: predicated region body
PF: predicated region fallthrough
CT: control target
= control target key end

     0   :  { %s2702_s12 = smov 0   ;;  %s2704_s13 = smov 0   ;;  %s3174_s0 = inlined_call_operand.vmem [shape: bf16[512,640], index: 0, kind: input, shape index: {}]   ;;  %s3175_s1 = inlined_call_operand.vmem [shape: bf16[640,128], index: 1, kind: input, shape index: {}]   ;;  %s3176_s2 = inlined_call_operand.vmem [shape: f32[1,128], index: 2, kind: input, shape index: {}]   ;;  %s3177_s3 = inlined_call_operand.vmem [shape: bf16[512,128], index: 3, kind: output, shape index: {}]  }
   0x1   :  { %s2706_s14 = smov 0   ;;  %s2708_s15 = smov 0  }
   0x2   :  { %s2710_s16 = smov 0  }
   0x3 LB: > { %s25_s17 = sadd.s32 1, %s2675_s15  ;;  %p48_p1 = scmp.ne.s32.totalorder %s2667_s13, %s2663_s12  ;;  %s2679_s16 = sphi %s2710_s16, %s13_s16   ;;  %s2675_s15 = sphi %s2708_s15, %s3181_s15   ;;  %s2671_s14 = sphi %s2706_s14, %s3180_s14   ;;  %s2667_s13 = sphi %s2704_s13, %s3179_s13   ;;  %s2663_s12 = sphi %s2702_s12, %s3178_s12  }
   0x4   : > { %p26_p0 = scmp.ge.s32.totalorder %s25_s17, 5  ;;  %p49_p2 = scmp.eq.s32.totalorder %s2679_s16, 0 }
   0x5   : > { %s41_s19 = sadd.s32 1, %s2667_s13  ;;  %p2051_p5 = scmp.ge.s32.totalorder %s2679_s16, 5 }
   0x6   : > { %s3183_s17 = smov (%p26_p0, %s25_s17), 0  ;;  %p50_p3 = por %p49_p2, %p48_p1 }
   0x7   : > { %s37_s18 = ssub.s32 %s2675_s15, %s3183_s17  ;;  %162 = sbr.rel (%p2051_p5) target bundleno = 60 (0x3c), region = 20 }
   0x8   : > { %p39_p4 = scmp.eq.s32.totalorder %s37_s18, 0 }
   0xa   : > { %s2737_s20 = scalar_select %p39_p4, %s2667_s13, %s41_s19  }
   0xe   : > { %165 = sbr.rel (!%p50_p3) target bundleno = 60 (0x3c), region = 24  ;;  %s167_s21 = sand.u32 (%p50_p3), 1, %s2667_s13  }
   0xf   : > { %s2053_s22 = sshll.u32 (%p50_p3), %s2675_s15, 2  ;;  %s2052_s23 = sshll.u32 (%p50_p3), %s167_s21, 8 }
  0x10   : > { %s2745_s26 = scalar_lea.vmem (%p50_p3), %s3174_s0, %s2053_s22  ;;  %s2749_s27 = scalar_lea.vmem (%p50_p3), [#allocation3], %s2052_s23 }
  0x11   : > { %v190_v0 = vld [vmem:[%s2745_s26] sm:$0xf] (%p50_p3)  ;;  %v192_v1 = vld [vmem:[%s2745_s26 + $0x14] sm:$0xf] (%p50_p3)  ;;  %v194_v2 = vld [vmem:[%s2745_s26 + $0x28] sm:$0xf] (%p50_p3) }
  0x12   : > { %191 = vst [vmem:[%s2749_s27] sm:$0xf] (%p50_p3), %v190_v0  ;;  %193 = vst [vmem:[%s2749_s27 + $0x4] sm:$0xf] (%p50_p3), %v192_v1  ;;  %v196_v3 = vld [vmem:[%s2745_s26 + $0x3c] sm:$0xf] (%p50_p3) }
  0x13   : > { %v198_v4 = vld [vmem:[%s2745_s26 + $0x50] sm:$0xf] (%p50_p3)  ;;  %195 = vst [vmem:[%s2749_s27 + $0x8] sm:$0xf] (%p50_p3), %v194_v2  ;;  %197 = vst [vmem:[%s2749_s27 + $0xc] sm:$0xf] (%p50_p3), %v196_v3 }
  0x14   : > { %199 = vst [vmem:[%s2749_s27 + $0x10] sm:$0xf] (%p50_p3), %v198_v4  ;;  %v200_v5 = vld [vmem:[%s2745_s26 + $0x64] sm:$0xf] (%p50_p3)  ;;  %v202_v6 = vld [vmem:[%s2745_s26 + $0x78] sm:$0xf] (%p50_p3) }
  0x15   : > { %v204_v7 = vld [vmem:[%s2745_s26 + $0x8c] sm:$0xf]  ;;  %201 = vst [vmem:[%s2749_s27 + $0x14] sm:$0xf] %v200_v5  ;;  %203 = vst [vmem:[%s2749_s27 + $0x18] sm:$0xf] %v202_v6 }
  0x16   : > { %205 = vst [vmem:[%s2749_s27 + $0x1c] sm:$0xf] %v204_v7  ;;  %v206_v8 = vld [vmem:[%s2745_s26 + $0xa0] sm:$0xf]  ;;  %v208_v9 = vld [vmem:[%s2745_s26 + $0xb4] sm:$0xf] }
  0x17   : > { %v210_v10 = vld [vmem:[%s2745_s26 + $0xc8] sm:$0xf]  ;;  %207 = vst [vmem:[%s2749_s27 + $0x20] sm:$0xf] %v206_v8  ;;  %209 = vst [vmem:[%s2749_s27 + $0x24] sm:$0xf] %v208_v9 }
  0x18   : > { %211 = vst [vmem:[%s2749_s27 + $0x28] sm:$0xf] %v210_v10  ;;  %v212_v11 = vld [vmem:[%s2745_s26 + $0xdc] sm:$0xf]  ;;  %v214_v12 = vld [vmem:[%s2745_s26 + $0xf0] sm:$0xf] }
  0x19   : > { %v216_v13 = vld [vmem:[%s2745_s26 + $0x104] sm:$0xf]  ;;  %213 = vst [vmem:[%s2749_s27 + $0x2c] sm:$0xf] %v212_v11  ;;  %215 = vst [vmem:[%s2749_s27 + $0x30] sm:$0xf] %v214_v12 }
  0x1a   : > { %217 = vst [vmem:[%s2749_s27 + $0x34] sm:$0xf] %v216_v13  ;;  %v218_v14 = vld [vmem:[%s2745_s26 + $0x118] sm:$0xf]  ;;  %v220_v15 = vld [vmem:[%s2745_s26 + $0x12c] sm:$0xf] }
  0x1b   : > { %v222_v16 = vld [vmem:[%s2745_s26 + $0x140] sm:$0xf]  ;;  %219 = vst [vmem:[%s2749_s27 + $0x38] sm:$0xf] %v218_v14  ;;  %221 = vst [vmem:[%s2749_s27 + $0x3c] sm:$0xf] %v220_v15 }
  0x1c   : > { %223 = vst [vmem:[%s2749_s27 + $0x40] sm:$0xf] %v222_v16  ;;  %v224_v17 = vld [vmem:[%s2745_s26 + $0x154] sm:$0xf]  ;;  %v226_v18 = vld [vmem:[%s2745_s26 + $0x168] sm:$0xf] }
  0x1d   : > { %v228_v19 = vld [vmem:[%s2745_s26 + $0x17c] sm:$0xf]  ;;  %225 = vst [vmem:[%s2749_s27 + $0x44] sm:$0xf] %v224_v17  ;;  %227 = vst [vmem:[%s2749_s27 + $0x48] sm:$0xf] %v226_v18 }
  0x1e   : > { %229 = vst [vmem:[%s2749_s27 + $0x4c] sm:$0xf] %v228_v19  ;;  %v230_v20 = vld [vmem:[%s2745_s26 + $0x190] sm:$0xf]  ;;  %v232_v21 = vld [vmem:[%s2745_s26 + $0x1a4] sm:$0xf] }
  0x1f   : > { %v234_v22 = vld [vmem:[%s2745_s26 + $0x1b8] sm:$0xf]  ;;  %231 = vst [vmem:[%s2749_s27 + $0x50] sm:$0xf] %v230_v20  ;;  %233 = vst [vmem:[%s2749_s27 + $0x54] sm:$0xf] %v232_v21 }
  0x20   : > { %235 = vst [vmem:[%s2749_s27 + $0x58] sm:$0xf] %v234_v22  ;;  %v236_v23 = vld [vmem:[%s2745_s26 + $0x1cc] sm:$0xf]  ;;  %v238_v24 = vld [vmem:[%s2745_s26 + $0x1e0] sm:$0xf] }
  0x21   : > { %v240_v25 = vld [vmem:[%s2745_s26 + $0x1f4] sm:$0xf]  ;;  %237 = vst [vmem:[%s2749_s27 + $0x5c] sm:$0xf] %v236_v23  ;;  %239 = vst [vmem:[%s2749_s27 + $0x60] sm:$0xf] %v238_v24 }
  0x22   : > { %241 = vst [vmem:[%s2749_s27 + $0x64] sm:$0xf] %v240_v25  ;;  %v242_v26 = vld [vmem:[%s2745_s26 + $0x208] sm:$0xf]  ;;  %v244_v27 = vld [vmem:[%s2745_s26 + $0x21c] sm:$0xf] }
  0x23   : > { %v246_v28 = vld [vmem:[%s2745_s26 + $0x230] sm:$0xf]  ;;  %243 = vst [vmem:[%s2749_s27 + $0x68] sm:$0xf] %v242_v26  ;;  %245 = vst [vmem:[%s2749_s27 + $0x6c] sm:$0xf] %v244_v27 }
  0x24   : > { %247 = vst [vmem:[%s2749_s27 + $0x70] sm:$0xf] %v246_v28  ;;  %v248_v29 = vld [vmem:[%s2745_s26 + $0x244] sm:$0xf]  ;;  %v250_v30 = vld [vmem:[%s2745_s26 + $0x258] sm:$0xf] }
  0x25   : > { %v252_v31 = vld [vmem:[%s2745_s26 + $0x26c] sm:$0xf]  ;;  %249 = vst [vmem:[%s2749_s27 + $0x74] sm:$0xf] %v248_v29  ;;  %251 = vst [vmem:[%s2749_s27 + $0x78] sm:$0xf] %v250_v30 }
  0x26   : > { %253 = vst [vmem:[%s2749_s27 + $0x7c] sm:$0xf] %v252_v31  ;;  %v254_v32 = vld [vmem:[%s2745_s26 + $0x280] sm:$0xf]  ;;  %v256_v33 = vld [vmem:[%s2745_s26 + $0x294] sm:$0xf] }
  0x27   : > { %v258_v34 = vld [vmem:[%s2745_s26 + $0x2a8] sm:$0xf]  ;;  %255 = vst [vmem:[%s2749_s27 + $0x80] sm:$0xf] %v254_v32  ;;  %257 = vst [vmem:[%s2749_s27 + $0x84] sm:$0xf] %v256_v33 }
  0x28   : > { %259 = vst [vmem:[%s2749_s27 + $0x88] sm:$0xf] %v258_v34  ;;  %v260_v35 = vld [vmem:[%s2745_s26 + $0x2bc] sm:$0xf]  ;;  %v262_v36 = vld [vmem:[%s2745_s26 + $0x2d0] sm:$0xf] }
  0x29   : > { %v264_v37 = vld [vmem:[%s2745_s26 + $0x2e4] sm:$0xf]  ;;  %261 = vst [vmem:[%s2749_s27 + $0x8c] sm:$0xf] %v260_v35  ;;  %263 = vst [vmem:[%s2749_s27 + $0x90] sm:$0xf] %v262_v36 }
  0x2a   : > { %265 = vst [vmem:[%s2749_s27 + $0x94] sm:$0xf] %v264_v37  ;;  %v266_v38 = vld [vmem:[%s2745_s26 + $0x2f8] sm:$0xf]  ;;  %v268_v39 = vld [vmem:[%s2745_s26 + $0x30c] sm:$0xf] }
  0x2b   : > { %v270_v40 = vld [vmem:[%s2745_s26 + $0x320] sm:$0xf]  ;;  %267 = vst [vmem:[%s2749_s27 + $0x98] sm:$0xf] %v266_v38  ;;  %269 = vst [vmem:[%s2749_s27 + $0x9c] sm:$0xf] %v268_v39 }
  0x2c   : > { %271 = vst [vmem:[%s2749_s27 + $0xa0] sm:$0xf] %v270_v40  ;;  %v272_v41 = vld [vmem:[%s2745_s26 + $0x334] sm:$0xf]  ;;  %v274_v42 = vld [vmem:[%s2745_s26 + $0x348] sm:$0xf] }
  0x2d   : > { %v276_v43 = vld [vmem:[%s2745_s26 + $0x35c] sm:$0xf]  ;;  %273 = vst [vmem:[%s2749_s27 + $0xa4] sm:$0xf] %v272_v41  ;;  %275 = vst [vmem:[%s2749_s27 + $0xa8] sm:$0xf] %v274_v42 }
  0x2e   : > { %277 = vst [vmem:[%s2749_s27 + $0xac] sm:$0xf] %v276_v43  ;;  %v278_v44 = vld [vmem:[%s2745_s26 + $0x370] sm:$0xf]  ;;  %v280_v45 = vld [vmem:[%s2745_s26 + $0x384] sm:$0xf] }
  0x2f   : > { %v282_v46 = vld [vmem:[%s2745_s26 + $0x398] sm:$0xf]  ;;  %279 = vst [vmem:[%s2749_s27 + $0xb0] sm:$0xf] %v278_v44  ;;  %281 = vst [vmem:[%s2749_s27 + $0xb4] sm:$0xf] %v280_v45 }
  0x30   : > { %283 = vst [vmem:[%s2749_s27 + $0xb8] sm:$0xf] %v282_v46  ;;  %v284_v47 = vld [vmem:[%s2745_s26 + $0x3ac] sm:$0xf]  ;;  %v286_v48 = vld [vmem:[%s2745_s26 + $0x3c0] sm:$0xf] }
  0x31   : > { %v288_v49 = vld [vmem:[%s2745_s26 + $0x3d4] sm:$0xf]  ;;  %285 = vst [vmem:[%s2749_s27 + $0xbc] sm:$0xf] %v284_v47  ;;  %287 = vst [vmem:[%s2749_s27 + $0xc0] sm:$0xf] %v286_v48 }
  0x32   : > { %289 = vst [vmem:[%s2749_s27 + $0xc4] sm:$0xf] %v288_v49  ;;  %v290_v50 = vld [vmem:[%s2745_s26 + $0x3e8] sm:$0xf]  ;;  %v292_v51 = vld [vmem:[%s2745_s26 + $0x3fc] sm:$0xf] }
  0x33   : > { %v294_v52 = vld [vmem:[%s2745_s26 + $0x410] sm:$0xf]  ;;  %291 = vst [vmem:[%s2749_s27 + $0xc8] sm:$0xf] %v290_v50  ;;  %293 = vst [vmem:[%s2749_s27 + $0xcc] sm:$0xf] %v292_v51 }
  0x34   : > { %295 = vst [vmem:[%s2749_s27 + $0xd0] sm:$0xf] %v294_v52  ;;  %v296_v53 = vld [vmem:[%s2745_s26 + $0x424] sm:$0xf]  ;;  %v298_v54 = vld [vmem:[%s2745_s26 + $0x438] sm:$0xf] }
  0x35   : > { %v300_v55 = vld [vmem:[%s2745_s26 + $0x44c] sm:$0xf]  ;;  %297 = vst [vmem:[%s2749_s27 + $0xd4] sm:$0xf] %v296_v53  ;;  %299 = vst [vmem:[%s2749_s27 + $0xd8] sm:$0xf] %v298_v54 }
  0x36   : > { %301 = vst [vmem:[%s2749_s27 + $0xdc] sm:$0xf] %v300_v55  ;;  %v302_v56 = vld [vmem:[%s2745_s26 + $0x460] sm:$0xf]  ;;  %v304_v57 = vld [vmem:[%s2745_s26 + $0x474] sm:$0xf] }
  0x37   : > { %v306_v58 = vld [vmem:[%s2745_s26 + $0x488] sm:$0xf]  ;;  %303 = vst [vmem:[%s2749_s27 + $0xe0] sm:$0xf] %v302_v56  ;;  %305 = vst [vmem:[%s2749_s27 + $0xe4] sm:$0xf] %v304_v57 }
  0x38   : > { %307 = vst [vmem:[%s2749_s27 + $0xe8] sm:$0xf] %v306_v58  ;;  %v308_v59 = vld [vmem:[%s2745_s26 + $0x49c] sm:$0xf]  ;;  %v310_v60 = vld [vmem:[%s2745_s26 + $0x4b0] sm:$0xf] }
  0x39   : > { %v312_v61 = vld [vmem:[%s2745_s26 + $0x4c4] sm:$0xf]  ;;  %309 = vst [vmem:[%s2749_s27 + $0xec] sm:$0xf] %v308_v59  ;;  %311 = vst [vmem:[%s2749_s27 + $0xf0] sm:$0xf] %v310_v60 }
  0x3a   : > { %313 = vst [vmem:[%s2749_s27 + $0xf4] sm:$0xf] %v312_v61  ;;  %v314_v62 = vld [vmem:[%s2745_s26 + $0x4d8] sm:$0xf]  ;;  %v316_v63 = vld [vmem:[%s2745_s26 + $0x4ec] sm:$0xf] }
  0x3b   : > { %315 = vst [vmem:[%s2749_s27 + $0xf8] sm:$0xf] %v314_v62  ;;  %317 = vst [vmem:[%s2749_s27 + $0xfc] sm:$0xf] %v316_v63 }
  0x3c PF: > { %p2054_p6 = scmp.ge.s32.totalorder %s2679_s16, 1  ;;  %p479_p7 = scmp.lt.s32.totalorder %s2679_s16, 6 }
  0x3e   : > { %p480_p8 = pnand %p2054_p6, %p479_p7 }
  0x3f   : > { %s486_s28 = sand.u32 (!%p480_p8), 1, %s2663_s12   ;;  %s2056_s29 = sshll.u32 (!%p480_p8), %s2671_s14, 4 }
  0x40   : > { %483 = sbr.rel (%p480_p8) target bundleno = 446 (0x1be), region = 69  ;;  %s2055_s30 = sshll.u32 (!%p480_p8), %s486_s28, 8 }
  0x41   : > { %p525_p9 = scmp.lt.s32.totalorder (!%p480_p8), %s2056_s29, 79  ;;  %s2886_s8 = scalar_lea.vmem (!%p480_p8), [#allocation3], %s2055_s30 }
  0x42   : > { %p2058_p10 = scmp.ne.s32.totalorder (!%p480_p8), %s2671_s14, 0 }
  0x47   : > { %s3185_s29 = smov (!%p525_p9, %s2056_s29), 79  ;;  %549 = sbr.rel (%p2058_p10) target bundleno = 105 (0x69), region = 77 }
  0x48   : > { %s2057_s4 = sshll.u32 %s3185_s29, 2  ;;  %v2681_v0 = vmov (!%p2058_p10), 0.0  }
  0x49   : > { %s2884_s7 = scalar_lea.vmem %s3175_s1, %s2057_s4  ;;  %550 = vst [vmem:[#allocation2] sm:$0xff] (!%p2058_p10), %v2681_v0  ;;  %551 = vst [vmem:[#allocation2 + $0x8] sm:$0xff] (!%p2058_p10), %v2681_v0 }
  0x4a   : > { %552 = vst [vmem:[#allocation2 + $0x10] sm:$0xff] (!%p2058_p10), %v2681_v0  ;;  %553 = vst [vmem:[#allocation2 + $0x18] sm:$0xff] (!%p2058_p10), %v2681_v0 }
  0x4b   : > { %554 = vst [vmem:[#allocation2 + $0x20] sm:$0xff] (!%p2058_p10), %v2681_v0  ;;  %555 = vst [vmem:[#allocation2 + $0x28] sm:$0xff] (!%p2058_p10), %v2681_v0 }
  0x4c   : > { %556 = vst [vmem:[#allocation2 + $0x30] sm:$0xff] (!%p2058_p10), %v2681_v0  ;;  %557 = vst [vmem:[#allocation2 + $0x38] sm:$0xff] (!%p2058_p10), %v2681_v0 }
  0x4d   : > { %558 = vst [vmem:[#allocation2 + $0x40] sm:$0xff] (!%p2058_p10), %v2681_v0  ;;  %559 = vst [vmem:[#allocation2 + $0x48] sm:$0xff] (!%p2058_p10), %v2681_v0 }
  0x4e   : > { %560 = vst [vmem:[#allocation2 + $0x50] sm:$0xff] %v2681_v0  ;;  %561 = vst [vmem:[#allocation2 + $0x58] sm:$0xff] %v2681_v0 }
  0x4f   : > { %562 = vst [vmem:[#allocation2 + $0x60] sm:$0xff] %v2681_v0  ;;  %563 = vst [vmem:[#allocation2 + $0x68] sm:$0xff] %v2681_v0 }
  0x50   : > { %564 = vst [vmem:[#allocation2 + $0x70] sm:$0xff] %v2681_v0  ;;  %565 = vst [vmem:[#allocation2 + $0x78] sm:$0xff] %v2681_v0 }
  0x51   : > { %566 = vst [vmem:[#allocation2 + $0x80] sm:$0xff] %v2681_v0  ;;  %567 = vst [vmem:[#allocation2 + $0x88] sm:$0xff] %v2681_v0 }
  0x52   : > { %568 = vst [vmem:[#allocation2 + $0x90] sm:$0xff] %v2681_v0  ;;  %569 = vst [vmem:[#allocation2 + $0x98] sm:$0xff] %v2681_v0 }
  0x53   : > { %570 = vst [vmem:[#allocation2 + $0xa0] sm:$0xff] %v2681_v0  ;;  %571 = vst [vmem:[#allocation2 + $0xa8] sm:$0xff] %v2681_v0 }
  0x54   : > { %572 = vst [vmem:[#allocation2 + $0xb0] sm:$0xff] %v2681_v0  ;;  %573 = vst [vmem:[#allocation2 + $0xb8] sm:$0xff] %v2681_v0 }
  0x55   : > { %574 = vst [vmem:[#allocation2 + $0xc0] sm:$0xff] %v2681_v0  ;;  %575 = vst [vmem:[#allocation2 + $0xc8] sm:$0xff] %v2681_v0 }
  0x56   : > { %576 = vst [vmem:[#allocation2 + $0xd0] sm:$0xff] %v2681_v0  ;;  %577 = vst [vmem:[#allocation2 + $0xd8] sm:$0xff] %v2681_v0 }
  0x57   : > { %578 = vst [vmem:[#allocation2 + $0xe0] sm:$0xff] %v2681_v0  ;;  %579 = vst [vmem:[#allocation2 + $0xe8] sm:$0xff] %v2681_v0 }
  0x58   : > { %580 = vst [vmem:[#allocation2 + $0xf0] sm:$0xff] %v2681_v0  ;;  %581 = vst [vmem:[#allocation2 + $0xf8] sm:$0xff] %v2681_v0 }
  0x59   : > { %582 = vst [vmem:[#allocation2 + $0x100] sm:$0xff] %v2681_v0  ;;  %583 = vst [vmem:[#allocation2 + $0x108] sm:$0xff] %v2681_v0 }
  0x5a   : > { %584 = vst [vmem:[#allocation2 + $0x110] sm:$0xff] %v2681_v0  ;;  %585 = vst [vmem:[#allocation2 + $0x118] sm:$0xff] %v2681_v0 }
  0x5b   : > { %586 = vst [vmem:[#allocation2 + $0x120] sm:$0xff] %v2681_v0  ;;  %587 = vst [vmem:[#allocation2 + $0x128] sm:$0xff] %v2681_v0 }
  0x5c   : > { %588 = vst [vmem:[#allocation2 + $0x130] sm:$0xff] %v2681_v0  ;;  %589 = vst [vmem:[#allocation2 + $0x138] sm:$0xff] %v2681_v0 }
  0x5d   : > { %590 = vst [vmem:[#allocation2 + $0x140] sm:$0xff] %v2681_v0  ;;  %591 = vst [vmem:[#allocation2 + $0x148] sm:$0xff] %v2681_v0 }
  0x5e   : > { %592 = vst [vmem:[#allocation2 + $0x150] sm:$0xff] %v2681_v0  ;;  %593 = vst [vmem:[#allocation2 + $0x158] sm:$0xff] %v2681_v0 }
  0x5f   : > { %594 = vst [vmem:[#allocation2 + $0x160] sm:$0xff] %v2681_v0  ;;  %595 = vst [vmem:[#allocation2 + $0x168] sm:$0xff] %v2681_v0 }
  0x60   : > { %596 = vst [vmem:[#allocation2 + $0x170] sm:$0xff] %v2681_v0  ;;  %597 = vst [vmem:[#allocation2 + $0x178] sm:$0xff] %v2681_v0 }
  0x61   : > { %598 = vst [vmem:[#allocation2 + $0x180] sm:$0xff] %v2681_v0  ;;  %599 = vst [vmem:[#allocation2 + $0x188] sm:$0xff] %v2681_v0 }
  0x62   : > { %600 = vst [vmem:[#allocation2 + $0x190] sm:$0xff] %v2681_v0  ;;  %601 = vst [vmem:[#allocation2 + $0x198] sm:$0xff] %v2681_v0 }
  0x63   : > { %602 = vst [vmem:[#allocation2 + $0x1a0] sm:$0xff] %v2681_v0  ;;  %603 = vst [vmem:[#allocation2 + $0x1a8] sm:$0xff] %v2681_v0 }
  0x64   : > { %604 = vst [vmem:[#allocation2 + $0x1b0] sm:$0xff] %v2681_v0  ;;  %605 = vst [vmem:[#allocation2 + $0x1b8] sm:$0xff] %v2681_v0 }
  0x65   : > { %606 = vst [vmem:[#allocation2 + $0x1c0] sm:$0xff] %v2681_v0  ;;  %607 = vst [vmem:[#allocation2 + $0x1c8] sm:$0xff] %v2681_v0 }
  0x66   : > { %608 = vst [vmem:[#allocation2 + $0x1d0] sm:$0xff] %v2681_v0  ;;  %609 = vst [vmem:[#allocation2 + $0x1d8] sm:$0xff] %v2681_v0 }
  0x67   : > { %610 = vst [vmem:[#allocation2 + $0x1e0] sm:$0xff] %v2681_v0  ;;  %611 = vst [vmem:[#allocation2 + $0x1e8] sm:$0xff] %v2681_v0 }
  0x68   : > { %612 = vst [vmem:[#allocation2 + $0x1f0] sm:$0xff] %v2681_v0  ;;  %613 = vst [vmem:[#allocation2 + $0x1f8] sm:$0xff] %v2681_v0 }
  0x69 PF: > { %v2601_v1 = vld [vmem:[%s2884_s7] sm:$0xff]   ;;  %v2602_v2 = vld [vmem:[%s2884_s7 + $0x8] sm:$0xff]   ;;  %v2603_v3 = vld [vmem:[%s2884_s7 + $0x10] sm:$0xff]   ;;  %p2099_p11 = scmp.ne.s32.totalorder %s2671_s14, 4 }
  0x6a   : > { %2464 = vmatprep.subr.bf16.mxu0 %v2601_v1  ;;  %2544 = vmatprep.subr.bf16.mxu1 %v2601_v1  ;;  %v2604_v4 = vld [vmem:[%s2884_s7 + $0x18] sm:$0xff]   ;;  %v2609_v5 = vld [vmem:[%s2886_s8] sm:$0xff]   ;;  %v2606_v8 = vld [vmem:[%s2884_s7 + $0x28] sm:$0xff]  }
  0x6b   : > { %2465 = vmatpush3.bf16.msra.mxu0 %v2601_v1  ;;  %2552 = vmatpush3.bf16.msra.mxu1 %v2601_v1  ;;  %v2610_v6 = vld [vmem:[%s2886_s8 + $0x80] sm:$0xff]   ;;  %v2607_v9 = vld [vmem:[%s2884_s7 + $0x30] sm:$0xff]   ;;  %v2608_v10 = vld [vmem:[%s2884_s7 + $0x38] sm:$0xff]  }
  0x6c   : > { %2466 = vmatprep.subr.bf16.mxu0 %v2602_v2  ;;  %2545 = vmatprep.subr.bf16.mxu1 %v2602_v2  ;;  %v2605_v7 = vld [vmem:[%s2884_s7 + $0x20] sm:$0xff]   ;;  %v2611_v11 = vld [vmem:[%s2886_s8 + $0x8] sm:$0xff]   ;;  %v2613_v13 = vld [vmem:[%s2886_s8 + $0x10] sm:$0xff]  }
  0x6d   : > { %2480 = vmatprep.mubr.bf16.mxu0 %v2609_v5  ;;  %2512 = vmatprep.mubr.bf16.mxu1 %v2610_v6  ;;  %v2612_v12 = vld [vmem:[%s2886_s8 + $0x88] sm:$0xff]   ;;  %v2614_v14 = vld [vmem:[%s2886_s8 + $0x90] sm:$0xff]   ;;  %v2615_v15 = vld [vmem:[%s2886_s8 + $0x18] sm:$0xff]  }
  0x6e   : > { %v2616_v16 = vld [vmem:[%s2886_s8 + $0x98] sm:$0xff]   ;;  %v2617_v17 = vld [vmem:[%s2886_s8 + $0x20] sm:$0xff]   ;;  %v2619_v19 = vld [vmem:[%s2886_s8 + $0x28] sm:$0xff]  }
  0x6f   : > { %2467 = vmatpush3.bf16.msra.mxu0 %v2602_v2  ;;  %2553 = vmatpush3.bf16.msra.mxu1 %v2602_v2  ;;  %v2618_v18 = vld [vmem:[%s2886_s8 + $0xa0] sm:$0xff]   ;;  %v2620_v20 = vld [vmem:[%s2886_s8 + $0xa8] sm:$0xff]   ;;  %v2621_v21 = vld [vmem:[%s2886_s8 + $0x30] sm:$0xff]  }
  0x70   : > { %2468 = vmatprep.subr.bf16.mxu0 %v2603_v3  ;;  %2546 = vmatprep.subr.bf16.mxu1 %v2603_v3  ;;  %v2622_v22 = vld [vmem:[%s2886_s8 + $0xb0] sm:$0xff]   ;;  %v2623_v23 = vld [vmem:[%s2886_s8 + $0x38] sm:$0xff]   ;;  %v2625_v25 = vld [vmem:[%s2886_s8 + $0x40] sm:$0xff]  }
  0x71   : > { %v2624_v24 = vld [vmem:[%s2886_s8 + $0xb8] sm:$0xff]   ;;  %v2626_v26 = vld [vmem:[%s2886_s8 + $0xc0] sm:$0xff]   ;;  %v2627_v27 = vld [vmem:[%s2886_s8 + $0x48] sm:$0xff]  }
  0x72   : > { %v2628_v28 = vld [vmem:[%s2886_s8 + $0xc8] sm:$0xff]   ;;  %v2629_v29 = vld [vmem:[%s2886_s8 + $0x50] sm:$0xff]   ;;  %v2631_v31 = vld [vmem:[%s2886_s8 + $0x58] sm:$0xff]  }
  0x73   : > { %2469 = vmatpush3.bf16.msra.mxu0 %v2603_v3  ;;  %2554 = vmatpush3.bf16.msra.mxu1 %v2603_v3  ;;  %v2630_v30 = vld [vmem:[%s2886_s8 + $0xd0] sm:$0xff]   ;;  %v2632_v32 = vld [vmem:[%s2886_s8 + $0xd8] sm:$0xff]   ;;  %v2633_v33 = vld [vmem:[%s2886_s8 + $0x60] sm:$0xff]  }
  0x74   : > { %2470 = vmatprep.subr.bf16.mxu0 %v2604_v4  ;;  %2547 = vmatprep.subr.bf16.mxu1 %v2604_v4  ;;  %v2634_v34 = vld [vmem:[%s2886_s8 + $0xe0] sm:$0xff]   ;;  %v2635_v35 = vld [vmem:[%s2886_s8 + $0x68] sm:$0xff]   ;;  %v2637_v37 = vld [vmem:[%s2886_s8 + $0x70] sm:$0xff]  }
  0x75   : > { %v2636_v36 = vld [vmem:[%s2886_s8 + $0xe8] sm:$0xff]   ;;  %v2638_v38 = vld [vmem:[%s2886_s8 + $0xf0] sm:$0xff]   ;;  %v2639_v39 = vld [vmem:[%s2886_s8 + $0x78] sm:$0xff]  }
  0x76   : > { %v2640_v40 = vld [vmem:[%s2886_s8 + $0xf8] sm:$0xff]   ;;  %v616_v41 = vld [vmem:[#allocation2 + $0x10] sm:$0xff]  ;;  %v614_v43 = vld [vmem:[#allocation2] sm:$0xff] }
  0x77   : > { %2471 = vmatpush3.bf16.msra.mxu0 %v2604_v4  ;;  %2555 = vmatpush3.bf16.msra.mxu1 %v2604_v4  ;;  %v648_v42 = vld [vmem:[#allocation2 + $0x110] sm:$0xff]  ;;  %v646_v44 = vld [vmem:[#allocation2 + $0x100] sm:$0xff]  ;;  %v617_v47 = vld [vmem:[#allocation2 + $0x18] sm:$0xff] }
  0x78   : > { %2472 = vmatprep.subr.bf16.mxu0 %v2605_v7  ;;  %2548 = vmatprep.subr.bf16.mxu1 %v2605_v7  ;;  %v649_v48 = vld [vmem:[#allocation2 + $0x118] sm:$0xff]  ;;  %v615_v53 = vld [vmem:[#allocation2 + $0x8] sm:$0xff]  ;;  %v620_v1 = vld [vmem:[#allocation2 + $0x30] sm:$0xff] }
  0x79   : > { %v647_v54 = vld [vmem:[#allocation2 + $0x108] sm:$0xff]  ;;  %v652_v2 = vld [vmem:[#allocation2 + $0x130] sm:$0xff]  ;;  %v618_v3 = vld [vmem:[#allocation2 + $0x20] sm:$0xff] }
  0x7a   : > { %v650_v4 = vld [vmem:[#allocation2 + $0x120] sm:$0xff] }
  0x7b   : > { %2473 = vmatpush3.bf16.msra.mxu0 %v2605_v7  ;;  %2556 = vmatpush3.bf16.msra.mxu1 %v2605_v7  ;;  %v621_v7 = vld [vmem:[#allocation2 + $0x38] sm:$0xff] }
  0x7c   : > { %2474 = vmatprep.subr.bf16.mxu0 %v2606_v8  ;;  %2549 = vmatprep.subr.bf16.mxu1 %v2606_v8 }
  0x7f   : > { %2475 = vmatpush3.bf16.msra.mxu0 %v2606_v8  ;;  %2557 = vmatpush3.bf16.msra.mxu1 %v2606_v8  ;;  %v653_v8 = vld [vmem:[#allocation2 + $0x138] sm:$0xff] }
  0x80   : > { %2476 = vmatprep.subr.bf16.mxu0 %v2607_v9  ;;  %2550 = vmatprep.subr.bf16.mxu1 %v2607_v9 }
  0x83   : > { %2477 = vmatpush3.bf16.msra.mxu0 %v2607_v9  ;;  %2558 = vmatpush3.bf16.msra.mxu1 %v2607_v9 }
  0x84   : > { %2478 = vmatprep.subr.bf16.mxu0 %v2608_v10  ;;  %2551 = vmatprep.subr.bf16.mxu1 %v2608_v10 }
  0x87   : > { %2479 = vmatpush3.bf16.msra.mxu0 %v2608_v10  ;;  %2559 = vmatpush3.bf16.msra.mxu1 %v2608_v10 }
  0x8a   : > { %2481 = vmatmul.mubr.bf16.vlgmr.msra.gmra.mrb[0].mxu0 %v2611_v11  ;;  %2513 = vmatmul.mubr.bf16.vlgmr.msra.gmra.mrb[0].mxu1 %v2612_v12 }
  0x8b   : > { %2484 = vmatprep.mubr.bf16.mxu0 %v2613_v13  ;;  %2516 = vmatprep.mubr.bf16.mxu1 %v2614_v14  ;;  %v619_v13 = vld [vmem:[#allocation2 + $0x28] sm:$0xff] }
  0x8c   : > { %v651_v14 = vld [vmem:[#allocation2 + $0x128] sm:$0xff] }
  0x92   : > { %2485 = vmatmul.mubr.bf16.gmra.mrb[4].mxu0 %v2615_v15  ;;  %2517 = vmatmul.mubr.bf16.gmra.mrb[4].mxu1 %v2616_v16 }
  0x93   : > { %2488 = vmatprep.mubr.bf16.mxu0 %v2617_v17  ;;  %2520 = vmatprep.mubr.bf16.mxu1 %v2618_v18 }
  0x9a   : > { %2489 = vmatmul.mubr.bf16.gmra.mrb[8].mxu0 %v2619_v19  ;;  %2521 = vmatmul.mubr.bf16.gmra.mrb[8].mxu1 %v2620_v20 }
  0x9b   : > { %2492 = vmatprep.mubr.bf16.mxu0 %v2621_v21  ;;  %2524 = vmatprep.mubr.bf16.mxu1 %v2622_v22 }
  0xa2   : > { %2493 = vmatmul.mubr.bf16.gmra.mrb[12].mxu0 %v2623_v23  ;;  %2525 = vmatmul.mubr.bf16.gmra.mrb[12].mxu1 %v2624_v24 }
  0xa3   : > { %2496 = vmatprep.mubr.bf16.mxu0 %v2625_v25  ;;  %2528 = vmatprep.mubr.bf16.mxu1 %v2626_v26  ;;  %v624_v25 = vld [vmem:[#allocation2 + $0x50] sm:$0xff] }
  0xa4   : > { %v656_v26 = vld [vmem:[#allocation2 + $0x150] sm:$0xff] }
  0xaa   : > { %2497 = vmatmul.mubr.bf16.gmra.mrb[16].mxu0 %v2627_v27  ;;  %2529 = vmatmul.mubr.bf16.gmra.mrb[16].mxu1 %v2628_v28  ;;  %v622_v27 = vld [vmem:[#allocation2 + $0x40] sm:$0xff] }
  0xab   : > { %2500 = vmatprep.mubr.bf16.mxu0 %v2629_v29  ;;  %2532 = vmatprep.mubr.bf16.mxu1 %v2630_v30  ;;  %v654_v28 = vld [vmem:[#allocation2 + $0x140] sm:$0xff] }
  0xb2   : > { %2501 = vmatmul.mubr.bf16.gmra.mrb[20].mxu0 %v2631_v31  ;;  %2533 = vmatmul.mubr.bf16.gmra.mrb[20].mxu1 %v2632_v32  ;;  %v625_v31 = vld [vmem:[#allocation2 + $0x58] sm:$0xff] }
  0xb3   : > { %2504 = vmatprep.mubr.bf16.mxu0 %v2633_v33  ;;  %2536 = vmatprep.mubr.bf16.mxu1 %v2634_v34  ;;  %v657_v32 = vld [vmem:[#allocation2 + $0x158] sm:$0xff] }
  0xba   : > { %2505 = vmatmul.mubr.bf16.gmra.mrb[24].mxu0 %v2635_v35  ;;  %2537 = vmatmul.mubr.bf16.gmra.mrb[24].mxu1 %v2636_v36 }
  0xbb   : > { %2508 = vmatprep.mubr.bf16.mxu0 %v2637_v37  ;;  %2540 = vmatprep.mubr.bf16.mxu1 %v2638_v38  ;;  %v623_v37 = vld [vmem:[#allocation2 + $0x48] sm:$0xff] }
  0xbc   : > { %v655_v38 = vld [vmem:[#allocation2 + $0x148] sm:$0xff] }
  0xc2   : > { %2509 = vmatmul.mubr.bf16.gmra.mrb[28].mxu0 %v2639_v39  ;;  %2541 = vmatmul.mubr.bf16.gmra.mrb[28].mxu1 %v2640_v40 }
 0x15d   : > { %v2482_v45 = vpop.f32.mrb[0].mxu0  ;;  %v2514_v46 = vpop.f32.mrb[0].mxu1 }
 0x15e   : > { %v1289_v49 = vadd.f32 %v2482_v45, %v616_v41  ;;  %v1321_v50 = vadd.f32 %v2514_v46, %v648_v42  ;;  %v1032_v51 = vpop.f32.mrb[1].mxu0  ;;  %v1160_v52 = vpop.f32.mrb[1].mxu1 }
 0x15f   : > { %v1287_v55 = vadd.f32 %v1032_v51, %v614_v43  ;;  %v1319_v56 = vadd.f32 %v1160_v52, %v646_v44  ;;  %v2483_v57 = vpop.f32.mrb[2].mxu0  ;;  %v2515_v58 = vpop.f32.mrb[2].mxu1  ;;  %v626_v51 = vld [vmem:[#allocation2 + $0x60] sm:$0xff] }
 0x160   : > { %1353 = vst [vmem:[#allocation2 + $0x10] sm:$0xff] %v1289_v49  ;;  %1385 = vst [vmem:[#allocation2 + $0x110] sm:$0xff] %v1321_v50  ;;  %v1290_v59 = vadd.f32 %v2483_v57, %v617_v47  ;;  %v1322_v60 = vadd.f32 %v2515_v58, %v649_v48  ;;  %v1035_v61 = vpop.f32.mrb[3].mxu0  ;;  %v1163_v62 = vpop.f32.mrb[3].mxu1  ;;  %v628_v49 = vld [vmem:[#allocation2 + $0x70] sm:$0xff]  ;;  %v658_v52 = vld [vmem:[#allocation2 + $0x160] sm:$0xff] }
 0x161   : > { %1351 = vst [vmem:[#allocation2] sm:$0xff] %v1287_v55  ;;  %1383 = vst [vmem:[#allocation2 + $0x100] sm:$0xff] %v1319_v56  ;;  %v1288_v63 = vadd.f32 %v1035_v61, %v615_v53  ;;  %v1320_v0 = vadd.f32 %v1163_v62, %v647_v54  ;;  %v660_v50 = vld [vmem:[#allocation2 + $0x170] sm:$0xff]  ;;  %v629_v55 = vld [vmem:[#allocation2 + $0x78] sm:$0xff] }
 0x162   : > { %1354 = vst [vmem:[#allocation2 + $0x18] sm:$0xff] %v1290_v59  ;;  %1386 = vst [vmem:[#allocation2 + $0x118] sm:$0xff] %v1322_v60  ;;  %v661_v56 = vld [vmem:[#allocation2 + $0x178] sm:$0xff]  ;;  %v627_v61 = vld [vmem:[#allocation2 + $0x68] sm:$0xff] }
 0x163   : > { %1352 = vst [vmem:[#allocation2 + $0x8] sm:$0xff] %v1288_v63  ;;  %1384 = vst [vmem:[#allocation2 + $0x108] sm:$0xff] %v1320_v0  ;;  %v659_v62 = vld [vmem:[#allocation2 + $0x168] sm:$0xff] }
 0x165   : > { %v2486_v5 = vpop.f32.mrb[4].mxu0  ;;  %v2518_v6 = vpop.f32.mrb[4].mxu1 }
 0x166   : > { %v1293_v9 = vadd.f32 %v2486_v5, %v620_v1  ;;  %v1325_v10 = vadd.f32 %v2518_v6, %v652_v2  ;;  %v1048_v11 = vpop.f32.mrb[5].mxu0  ;;  %v1176_v12 = vpop.f32.mrb[5].mxu1 }
 0x167   : > { %v1291_v15 = vadd.f32 %v1048_v11, %v618_v3  ;;  %v1323_v16 = vadd.f32 %v1176_v12, %v650_v4  ;;  %v2487_v17 = vpop.f32.mrb[6].mxu0  ;;  %v2519_v18 = vpop.f32.mrb[6].mxu1  ;;  %v630_v11 = vld [vmem:[#allocation2 + $0x80] sm:$0xff] }
 0x168   : > { %1357 = vst [vmem:[#allocation2 + $0x30] sm:$0xff] %v1293_v9  ;;  %1389 = vst [vmem:[#allocation2 + $0x130] sm:$0xff] %v1325_v10  ;;  %v1294_v19 = vadd.f32 %v2487_v17, %v621_v7  ;;  %v1326_v20 = vadd.f32 %v2519_v18, %v653_v8  ;;  %v1051_v21 = vpop.f32.mrb[7].mxu0  ;;  %v1179_v22 = vpop.f32.mrb[7].mxu1  ;;  %v632_v9 = vld [vmem:[#allocation2 + $0x90] sm:$0xff]  ;;  %v662_v12 = vld [vmem:[#allocation2 + $0x180] sm:$0xff] }
 0x169   : > { %1355 = vst [vmem:[#allocation2 + $0x20] sm:$0xff] %v1291_v15  ;;  %1387 = vst [vmem:[#allocation2 + $0x120] sm:$0xff] %v1323_v16  ;;  %v1292_v23 = vadd.f32 %v1051_v21, %v619_v13  ;;  %v1324_v24 = vadd.f32 %v1179_v22, %v651_v14  ;;  %v664_v10 = vld [vmem:[#allocation2 + $0x190] sm:$0xff]  ;;  %v633_v15 = vld [vmem:[#allocation2 + $0x98] sm:$0xff] }
 0x16a   : > { %1358 = vst [vmem:[#allocation2 + $0x38] sm:$0xff] %v1294_v19  ;;  %1390 = vst [vmem:[#allocation2 + $0x138] sm:$0xff] %v1326_v20  ;;  %v665_v16 = vld [vmem:[#allocation2 + $0x198] sm:$0xff]  ;;  %v631_v21 = vld [vmem:[#allocation2 + $0x88] sm:$0xff] }
 0x16b   : > { %1356 = vst [vmem:[#allocation2 + $0x28] sm:$0xff] %v1292_v23  ;;  %1388 = vst [vmem:[#allocation2 + $0x128] sm:$0xff] %v1324_v24  ;;  %v663_v22 = vld [vmem:[#allocation2 + $0x188] sm:$0xff] }
 0x16d   : > { %v2490_v29 = vpop.f32.mrb[8].mxu0  ;;  %v2522_v30 = vpop.f32.mrb[8].mxu1 }
 0x16e   : > { %v1297_v33 = vadd.f32 %v2490_v29, %v624_v25  ;;  %v1329_v34 = vadd.f32 %v2522_v30, %v656_v26  ;;  %v1064_v35 = vpop.f32.mrb[9].mxu0  ;;  %v1192_v36 = vpop.f32.mrb[9].mxu1 }
 0x16f   : > { %v1295_v39 = vadd.f32 %v1064_v35, %v622_v27  ;;  %v1327_v40 = vadd.f32 %v1192_v36, %v654_v28  ;;  %v2491_v41 = vpop.f32.mrb[10].mxu0  ;;  %v2523_v42 = vpop.f32.mrb[10].mxu1  ;;  %v634_v35 = vld [vmem:[#allocation2 + $0xa0] sm:$0xff] }
 0x170   : > { %1361 = vst [vmem:[#allocation2 + $0x50] sm:$0xff] %v1297_v33  ;;  %1393 = vst [vmem:[#allocation2 + $0x150] sm:$0xff] %v1329_v34  ;;  %v1298_v43 = vadd.f32 %v2491_v41, %v625_v31  ;;  %v1330_v44 = vadd.f32 %v2523_v42, %v657_v32  ;;  %v1067_v45 = vpop.f32.mrb[11].mxu0  ;;  %v1195_v46 = vpop.f32.mrb[11].mxu1  ;;  %v636_v33 = vld [vmem:[#allocation2 + $0xb0] sm:$0xff]  ;;  %v666_v36 = vld [vmem:[#allocation2 + $0x1a0] sm:$0xff] }
 0x171   : > { %1359 = vst [vmem:[#allocation2 + $0x40] sm:$0xff] %v1295_v39  ;;  %1391 = vst [vmem:[#allocation2 + $0x140] sm:$0xff] %v1327_v40  ;;  %v1296_v47 = vadd.f32 %v1067_v45, %v623_v37  ;;  %v1328_v48 = vadd.f32 %v1195_v46, %v655_v38  ;;  %v668_v34 = vld [vmem:[#allocation2 + $0x1b0] sm:$0xff]  ;;  %v637_v39 = vld [vmem:[#allocation2 + $0xb8] sm:$0xff] }
 0x172   : > { %1362 = vst [vmem:[#allocation2 + $0x58] sm:$0xff] %v1298_v43  ;;  %1394 = vst [vmem:[#allocation2 + $0x158] sm:$0xff] %v1330_v44  ;;  %v669_v40 = vld [vmem:[#allocation2 + $0x1b8] sm:$0xff]  ;;  %v635_v45 = vld [vmem:[#allocation2 + $0xa8] sm:$0xff] }
 0x173   : > { %1360 = vst [vmem:[#allocation2 + $0x48] sm:$0xff] %v1296_v47  ;;  %1392 = vst [vmem:[#allocation2 + $0x148] sm:$0xff] %v1328_v48  ;;  %v667_v46 = vld [vmem:[#allocation2 + $0x1a8] sm:$0xff] }
 0x175   : > { %v2494_v53 = vpop.f32.mrb[12].mxu0  ;;  %v2526_v54 = vpop.f32.mrb[12].mxu1 }
 0x176   : > { %v1301_v57 = vadd.f32 %v2494_v53, %v628_v49  ;;  %v1333_v58 = vadd.f32 %v2526_v54, %v660_v50  ;;  %v1080_v59 = vpop.f32.mrb[13].mxu0  ;;  %v1208_v60 = vpop.f32.mrb[13].mxu1 }
 0x177   : > { %v1299_v63 = vadd.f32 %v1080_v59, %v626_v51  ;;  %v1331_v0 = vadd.f32 %v1208_v60, %v658_v52  ;;  %v2495_v1 = vpop.f32.mrb[14].mxu0  ;;  %v2527_v2 = vpop.f32.mrb[14].mxu1  ;;  %v638_v59 = vld [vmem:[#allocation2 + $0xc0] sm:$0xff] }
 0x178   : > { %1365 = vst [vmem:[#allocation2 + $0x70] sm:$0xff] %v1301_v57  ;;  %1397 = vst [vmem:[#allocation2 + $0x170] sm:$0xff] %v1333_v58  ;;  %v1302_v3 = vadd.f32 %v2495_v1, %v629_v55  ;;  %v1334_v4 = vadd.f32 %v2527_v2, %v661_v56  ;;  %v1083_v5 = vpop.f32.mrb[15].mxu0  ;;  %v1211_v6 = vpop.f32.mrb[15].mxu1  ;;  %v640_v57 = vld [vmem:[#allocation2 + $0xd0] sm:$0xff]  ;;  %v670_v60 = vld [vmem:[#allocation2 + $0x1c0] sm:$0xff] }
 0x179   : > { %1363 = vst [vmem:[#allocation2 + $0x60] sm:$0xff] %v1299_v63  ;;  %1395 = vst [vmem:[#allocation2 + $0x160] sm:$0xff] %v1331_v0  ;;  %v1300_v7 = vadd.f32 %v1083_v5, %v627_v61  ;;  %v1332_v8 = vadd.f32 %v1211_v6, %v659_v62  ;;  %v672_v58 = vld [vmem:[#allocation2 + $0x1d0] sm:$0xff]  ;;  %v641_v63 = vld [vmem:[#allocation2 + $0xd8] sm:$0xff] }
 0x17a   : > { %1366 = vst [vmem:[#allocation2 + $0x78] sm:$0xff] %v1302_v3  ;;  %1398 = vst [vmem:[#allocation2 + $0x178] sm:$0xff] %v1334_v4  ;;  %v673_v0 = vld [vmem:[#allocation2 + $0x1d8] sm:$0xff]  ;;  %v639_v5 = vld [vmem:[#allocation2 + $0xc8] sm:$0xff] }
 0x17b   : > { %1364 = vst [vmem:[#allocation2 + $0x68] sm:$0xff] %v1300_v7  ;;  %1396 = vst [vmem:[#allocation2 + $0x168] sm:$0xff] %v1332_v8  ;;  %v671_v6 = vld [vmem:[#allocation2 + $0x1c8] sm:$0xff] }
 0x17d   : > { %v2498_v13 = vpop.f32.mrb[16].mxu0  ;;  %v2530_v14 = vpop.f32.mrb[16].mxu1 }
 0x17e   : > { %v1305_v17 = vadd.f32 %v2498_v13, %v632_v9  ;;  %v1337_v18 = vadd.f32 %v2530_v14, %v664_v10  ;;  %v1096_v19 = vpop.f32.mrb[17].mxu0  ;;  %v1224_v20 = vpop.f32.mrb[17].mxu1 }
 0x17f   : > { %v1303_v23 = vadd.f32 %v1096_v19, %v630_v11  ;;  %v1335_v24 = vadd.f32 %v1224_v20, %v662_v12  ;;  %v2499_v25 = vpop.f32.mrb[18].mxu0  ;;  %v2531_v26 = vpop.f32.mrb[18].mxu1  ;;  %v642_v19 = vld [vmem:[#allocation2 + $0xe0] sm:$0xff] }
 0x180   : > { %1369 = vst [vmem:[#allocation2 + $0x90] sm:$0xff] %v1305_v17  ;;  %1401 = vst [vmem:[#allocation2 + $0x190] sm:$0xff] %v1337_v18  ;;  %v1306_v27 = vadd.f32 %v2499_v25, %v633_v15  ;;  %v1338_v28 = vadd.f32 %v2531_v26, %v665_v16  ;;  %v1099_v29 = vpop.f32.mrb[19].mxu0  ;;  %v1227_v30 = vpop.f32.mrb[19].mxu1  ;;  %v644_v17 = vld [vmem:[#allocation2 + $0xf0] sm:$0xff]  ;;  %v674_v20 = vld [vmem:[#allocation2 + $0x1e0] sm:$0xff] }
 0x181   : > { %1367 = vst [vmem:[#allocation2 + $0x80] sm:$0xff] %v1303_v23  ;;  %1399 = vst [vmem:[#allocation2 + $0x180] sm:$0xff] %v1335_v24  ;;  %v1304_v31 = vadd.f32 %v1099_v29, %v631_v21  ;;  %v1336_v32 = vadd.f32 %v1227_v30, %v663_v22  ;;  %v676_v18 = vld [vmem:[#allocation2 + $0x1f0] sm:$0xff]  ;;  %v645_v23 = vld [vmem:[#allocation2 + $0xf8] sm:$0xff] }
 0x182   : > { %1370 = vst [vmem:[#allocation2 + $0x98] sm:$0xff] %v1306_v27  ;;  %1402 = vst [vmem:[#allocation2 + $0x198] sm:$0xff] %v1338_v28  ;;  %v677_v24 = vld [vmem:[#allocation2 + $0x1f8] sm:$0xff]  ;;  %v643_v29 = vld [vmem:[#allocation2 + $0xe8] sm:$0xff] }
 0x183   : > { %1368 = vst [vmem:[#allocation2 + $0x88] sm:$0xff] %v1304_v31  ;;  %1400 = vst [vmem:[#allocation2 + $0x188] sm:$0xff] %v1336_v32  ;;  %v675_v30 = vld [vmem:[#allocation2 + $0x1e8] sm:$0xff] }
 0x185   : > { %v2502_v37 = vpop.f32.mrb[20].mxu0  ;;  %v2534_v38 = vpop.f32.mrb[20].mxu1 }
 0x186   : > { %v1309_v41 = vadd.f32 %v2502_v37, %v636_v33  ;;  %v1341_v42 = vadd.f32 %v2534_v38, %v668_v34  ;;  %v1112_v43 = vpop.f32.mrb[21].mxu0  ;;  %v1240_v44 = vpop.f32.mrb[21].mxu1 }
 0x187   : > { %v1307_v47 = vadd.f32 %v1112_v43, %v634_v35  ;;  %v1339_v48 = vadd.f32 %v1240_v44, %v666_v36  ;;  %v2503_v49 = vpop.f32.mrb[22].mxu0  ;;  %v2535_v50 = vpop.f32.mrb[22].mxu1  ;;  %v2997_v43 = vld [vmem:[%s3176_s2] ss:$0 sm:$0xff] (!%p2099_p11) }
 0x188   : > { %1373 = vst [vmem:[#allocation2 + $0xb0] sm:$0xff] %v1309_v41  ;;  %1405 = vst [vmem:[#allocation2 + $0x1b0] sm:$0xff] %v1341_v42  ;;  %v1310_v51 = vadd.f32 %v2503_v49, %v637_v39  ;;  %v1342_v52 = vadd.f32 %v2535_v50, %v669_v40  ;;  %v1115_v53 = vpop.f32.mrb[23].mxu0  ;;  %v1243_v54 = vpop.f32.mrb[23].mxu1  ;;  %v1419_v41 = vld [vmem:[#allocation2] sm:$0xff] (!%p2099_p11)  ;;  %v1420_v42 = vld [vmem:[#allocation2 + $0x8] sm:$0xff] (!%p2099_p11) }
 0x189   : > { %1371 = vst [vmem:[#allocation2 + $0xa0] sm:$0xff] %v1307_v47  ;;  %1403 = vst [vmem:[#allocation2 + $0x1a0] sm:$0xff] %v1339_v48  ;;  %v1308_v55 = vadd.f32 %v1115_v53, %v635_v45  ;;  %v1340_v56 = vadd.f32 %v1243_v54, %v667_v46  ;;  %v1490_v44 = vadd.f32 (!%p2099_p11), %v2997_v43, %v1419_v41  ;;  %v1421_v46 = vld [vmem:[#allocation2 + $0x10] sm:$0xff] (!%p2099_p11)  ;;  %v1422_v47 = vld [vmem:[#allocation2 + $0x18] sm:$0xff] (!%p2099_p11) }
 0x18a   : > { %1374 = vst [vmem:[#allocation2 + $0xb8] sm:$0xff] %v1310_v51  ;;  %1406 = vst [vmem:[#allocation2 + $0x1b8] sm:$0xff] %v1342_v52  ;;  %v1491_v45 = vadd.f32 (!%p2099_p11), %v2997_v43, %v1420_v42  ;;  %v1423_v48 = vld [vmem:[#allocation2 + $0x20] sm:$0xff] (!%p2099_p11)  ;;  %v1492_v49 = vadd.f32 (!%p2099_p11), %v2997_v43, %v1421_v46  ;;  %v1493_v50 = vadd.f32 (!%p2099_p11), %v2997_v43, %v1422_v47  ;;  %v1424_v51 = vld [vmem:[#allocation2 + $0x28] sm:$0xff] (!%p2099_p11) }
 0x18b   : > { %1372 = vst [vmem:[#allocation2 + $0xa8] sm:$0xff] %v1308_v55  ;;  %1404 = vst [vmem:[#allocation2 + $0x1a8] sm:$0xff] %v1340_v56  ;;  %v1494_v52 = vadd.f32 (!%p2099_p11), %v2997_v43, %v1423_v48  ;;  %v1425_v53 = vld [vmem:[#allocation2 + $0x30] sm:$0xff] (!%p2099_p11)  ;;  %v1426_v54 = vld [vmem:[#allocation2 + $0x38] sm:$0xff] (!%p2099_p11)  ;;  %v1554_v55 = vmax.f32 (!%p2099_p11), %v1490_v44, 0.0 }
 0x18c   : > { %v1555_v56 = vmax.f32 (!%p2099_p11), %v1491_v45, 0.0 }
 0x18d   : > { %v2506_v61 = vpop.f32.mrb[24].mxu0  ;;  %v2538_v62 = vpop.f32.mrb[24].mxu1 }
 0x18e   : > { %v1313_v1 = vadd.f32 %v2506_v61, %v640_v57  ;;  %v1345_v2 = vadd.f32 %v2538_v62, %v672_v58  ;;  %v1128_v3 = vpop.f32.mrb[25].mxu0  ;;  %v1256_v4 = vpop.f32.mrb[25].mxu1  ;;  %v1495_v57 = vadd.f32 (!%p2099_p11), %v2997_v43, %v1424_v51  ;;  %v1496_v58 = vadd.f32 (!%p2099_p11), %v2997_v43, %v1425_v53  ;;  %v1429_v61 = vld [vmem:[#allocation2 + $0x50] sm:$0xff] (!%p2099_p11) }
 0x18f   : > { %v1311_v7 = vadd.f32 %v1128_v3, %v638_v59  ;;  %v1343_v8 = vadd.f32 %v1256_v4, %v670_v60  ;;  %v2507_v9 = vpop.f32.mrb[26].mxu0  ;;  %v2539_v10 = vpop.f32.mrb[26].mxu1  ;;  %v1427_v59 = vld [vmem:[#allocation2 + $0x40] sm:$0xff] (!%p2099_p11)  ;;  %v1428_v60 = vld [vmem:[#allocation2 + $0x48] sm:$0xff] (!%p2099_p11)  ;;  %v1556_v62 = vmax.f32 (!%p2099_p11), %v1492_v49, 0.0  ;;  %v2236_v4 = vpack.c.bf16 (!%p2099_p11), %v1555_v56, %v1554_v55  ;;  %v1441_v41 = vld [vmem:[#allocation2 + $0xb0] sm:$0xff] (!%p2099_p11) }
 0x190   : > { %1377 = vst [vmem:[#allocation2 + $0xd0] sm:$0xff] %v1313_v1  ;;  %1409 = vst [vmem:[#allocation2 + $0x1d0] sm:$0xff] %v1345_v2  ;;  %v1314_v11 = vadd.f32 %v2507_v9, %v641_v63  ;;  %v1346_v12 = vadd.f32 %v2539_v10, %v673_v0  ;;  %v1131_v13 = vpop.f32.mrb[27].mxu0  ;;  %v1259_v14 = vpop.f32.mrb[27].mxu1  ;;  %v1557_v63 = vmax.f32 (!%p2099_p11), %v1493_v50, 0.0  ;;  %v1558_v0 = vmax.f32 (!%p2099_p11), %v1494_v52, 0.0 }
 0x191   : > { %1375 = vst [vmem:[#allocation2 + $0xc0] sm:$0xff] %v1311_v7  ;;  %1407 = vst [vmem:[#allocation2 + $0x1c0] sm:$0xff] %v1343_v8  ;;  %v1312_v15 = vadd.f32 %v1131_v13, %v639_v5  ;;  %v1344_v16 = vadd.f32 %v1259_v14, %v671_v6  ;;  %v1497_v1 = vadd.f32 (!%p2099_p11), %v2997_v43, %v1426_v54  ;;  %v1430_v2 = vld [vmem:[#allocation2 + $0x58] sm:$0xff] (!%p2099_p11)  ;;  %v1431_v3 = vld [vmem:[#allocation2 + $0x60] sm:$0xff] (!%p2099_p11)  ;;  %v1559_v5 = vmax.f32 (!%p2099_p11), %v1495_v57, 0.0 }
 0x192   : > { %1378 = vst [vmem:[#allocation2 + $0xd8] sm:$0xff] %v1314_v11  ;;  %1410 = vst [vmem:[#allocation2 + $0x1d8] sm:$0xff] %v1346_v12  ;;  %v1560_v6 = vmax.f32 (!%p2099_p11), %v1496_v58, 0.0  ;;  %v1498_v7 = vadd.f32 (!%p2099_p11), %v2997_v43, %v1427_v59  ;;  %v1432_v8 = vld [vmem:[#allocation2 + $0x68] sm:$0xff] (!%p2099_p11)  ;;  %v2241_v9 = vpack.c.bf16 (!%p2099_p11), %v1557_v63, %v1556_v62  ;;  %v1499_v11 = vadd.f32 (!%p2099_p11), %v2997_v43, %v1428_v60  ;;  %v1433_v13 = vld [vmem:[#allocation2 + $0x70] sm:$0xff] (!%p2099_p11) }
 0x193   : > { %1376 = vst [vmem:[#allocation2 + $0xc8] sm:$0xff] %v1312_v15  ;;  %1408 = vst [vmem:[#allocation2 + $0x1c8] sm:$0xff] %v1344_v16  ;;  %v1561_v10 = vmax.f32 (!%p2099_p11), %v1497_v1, 0.0  ;;  %v1500_v12 = vadd.f32 (!%p2099_p11), %v2997_v43, %v1429_v61  ;;  %v1434_v14 = vld [vmem:[#allocation2 + $0x78] sm:$0xff] (!%p2099_p11)  ;;  %v2246_v15 = vpack.c.bf16 (!%p2099_p11), %v1559_v5, %v1558_v0  ;;  %v1512_v57 = vadd.f32 (!%p2099_p11), %v2997_v43, %v1441_v41  ;;  %v1460_v41 = vld [vmem:[#allocation2 + $0x148] sm:$0xff] (!%p2099_p11) }
 0x194   : > { %2237 = vst [vmem:[%s3177_s3] sm:$0xff] (!%p2099_p11), %v2236_v4   ;;  %v1562_v16 = vmax.f32 (!%p2099_p11), %v1498_v7, 0.0  ;;  %2393 = vst [vmem:[%s3177_s3 + $0x8] sm:$0xff] (!%p2099_p11), %v2241_v9   ;;  %v1442_v42 = vld [vmem:[#allocation2 + $0xb8] sm:$0xff] (!%p2099_p11) }
 0x195   : > { %v2510_v21 = vpop.f32.mrb[28].mxu0  ;;  %v2542_v22 = vpop.f32.mrb[28].mxu1  ;;  %1418 = sbr.rel (%p2099_p11) target bundleno = 446 (0x1be), region = 81  ;;  %2394 = vst [vmem:[%s3177_s3 + $0x10] sm:$0xff] (!%p2099_p11), %v2246_v15   ;;  %v1513_v58 = vadd.f32 (!%p2099_p11), %v2997_v43, %v1442_v42 }
 0x196   : > { %v1317_v25 = vadd.f32 %v2510_v21, %v644_v17  ;;  %v1349_v26 = vadd.f32 %v2542_v22, %v676_v18  ;;  %v1144_v27 = vpop.f32.mrb[29].mxu0  ;;  %v1272_v28 = vpop.f32.mrb[29].mxu1  ;;  %v1501_v17 = vadd.f32 (!%p2099_p11), %v2997_v43, %v1430_v2  ;;  %v1502_v18 = vadd.f32 (!%p2099_p11), %v2997_v43, %v1431_v3 }
 0x197   : > { %v1315_v31 = vadd.f32 %v1144_v27, %v642_v19  ;;  %v1347_v32 = vadd.f32 %v1272_v28, %v674_v20  ;;  %v2511_v33 = vpop.f32.mrb[30].mxu0  ;;  %v2543_v34 = vpop.f32.mrb[30].mxu1  ;;  %v1435_v19 = vld [vmem:[#allocation2 + $0x80] sm:$0xff] (!%p2099_p11)  ;;  %v1436_v20 = vld [vmem:[#allocation2 + $0x88] sm:$0xff] (!%p2099_p11)  ;;  %v2251_v21 = vpack.c.bf16 (!%p2099_p11), %v1561_v10, %v1560_v6  ;;  %v1563_v22 = vmax.f32 (!%p2099_p11), %v1499_v11, 0.0  ;;  %v1445_v54 = vld [vmem:[#allocation2 + $0xd0] sm:$0xff] (!%p2099_p11) }
 0x198   : > { %1381 = vst [vmem:[#allocation2 + $0xf0] sm:$0xff] %v1317_v25  ;;  %1413 = vst [vmem:[#allocation2 + $0x1f0] sm:$0xff] %v1349_v26  ;;  %v1318_v35 = vadd.f32 %v2511_v33, %v645_v23  ;;  %v1350_v36 = vadd.f32 %v2543_v34, %v677_v24  ;;  %v1147_v37 = vpop.f32.mrb[31].mxu0  ;;  %v1275_v38 = vpop.f32.mrb[31].mxu1  ;;  %v1564_v23 = vmax.f32 (!%p2099_p11), %v1500_v12, 0.0  ;;  %v1503_v24 = vadd.f32 (!%p2099_p11), %v2997_v43, %v1432_v8  ;;  %v1437_v25 = vld [vmem:[#allocation2 + $0x90] sm:$0xff] (!%p2099_p11) }
 0x199   : > { %1379 = vst [vmem:[#allocation2 + $0xe0] sm:$0xff] %v1315_v31  ;;  %1411 = vst [vmem:[#allocation2 + $0x1e0] sm:$0xff] %v1347_v32  ;;  %v1316_v39 = vadd.f32 %v1147_v37, %v643_v29  ;;  %v1348_v40 = vadd.f32 %v1275_v38, %v675_v30  ;;  %v1565_v26 = vmax.f32 (!%p2099_p11), %v1501_v17, 0.0  ;;  %v1566_v27 = vmax.f32 (!%p2099_p11), %v1502_v18, 0.0  ;;  %v1438_v30 = vld [vmem:[#allocation2 + $0x98] sm:$0xff] (!%p2099_p11)  ;;  %v1443_v48 = vld [vmem:[#allocation2 + $0xc0] sm:$0xff] (!%p2099_p11) }
 0x19a   : > { %1382 = vst [vmem:[#allocation2 + $0xf8] sm:$0xff] %v1318_v35  ;;  %1414 = vst [vmem:[#allocation2 + $0x1f8] sm:$0xff] %v1350_v36  ;;  %v1504_v28 = vadd.f32 (!%p2099_p11), %v2997_v43, %v1433_v13  ;;  %v1505_v29 = vadd.f32 (!%p2099_p11), %v2997_v43, %v1434_v14  ;;  %v2256_v31 = vpack.c.bf16 (!%p2099_p11), %v1563_v22, %v1562_v16  ;;  %v1567_v32 = vmax.f32 (!%p2099_p11), %v1503_v24, 0.0  ;;  %v1439_v35 = vld [vmem:[#allocation2 + $0xa0] sm:$0xff] (!%p2099_p11)  ;;  %v1440_v36 = vld [vmem:[#allocation2 + $0xa8] sm:$0xff] (!%p2099_p11) }
 0x19b   : > { %1380 = vst [vmem:[#allocation2 + $0xe8] sm:$0xff] %v1316_v39  ;;  %1412 = vst [vmem:[#allocation2 + $0x1e8] sm:$0xff] %v1348_v40  ;;  %v1506_v33 = vadd.f32 (!%p2099_p11), %v2997_v43, %v1435_v19  ;;  %v1507_v34 = vadd.f32 (!%p2099_p11), %v2997_v43, %v1436_v20  ;;  %v2261_v37 = vpack.c.bf16 (!%p2099_p11), %v1565_v26, %v1564_v23  ;;  %v1444_v49 = vld [vmem:[#allocation2 + $0xc8] sm:$0xff] (!%p2099_p11)  ;;  %v1446_v59 = vld [vmem:[#allocation2 + $0xd8] sm:$0xff] (!%p2099_p11)  ;;  %v1576_v3 = vmax.f32 (!%p2099_p11), %v1512_v57, 0.0 }
 0x19c   : > { %2395 = vst [vmem:[%s3177_s3 + $0x18] sm:$0xff] %v2251_v21   ;;  %v1568_v38 = vmax.f32 %v1504_v28, 0.0  ;;  %v1569_v39 = vmax.f32 %v1505_v29, 0.0  ;;  %v1508_v40 = vadd.f32 %v2997_v43, %v1437_v25  ;;  %2396 = vst [vmem:[%s3177_s3 + $0x20] sm:$0xff] %v2256_v31   ;;  %v2266_v44 = vpack.c.bf16 %v1567_v32, %v1566_v27  ;;  %v1451_v12 = vld [vmem:[#allocation2 + $0x100] sm:$0xff]  ;;  %v1452_v13 = vld [vmem:[#allocation2 + $0x108] sm:$0xff] }
 0x19d   : > { %v1570_v45 = vmax.f32 %v1506_v33, 0.0  ;;  %v1571_v46 = vmax.f32 %v1507_v34, 0.0  ;;  %v1509_v47 = vadd.f32 %v2997_v43, %v1438_v30  ;;  %2397 = vst [vmem:[%s3177_s3 + $0x28] sm:$0xff] %v2261_v37   ;;  %v1510_v52 = vadd.f32 %v2997_v43, %v1439_v35  ;;  %v1453_v18 = vld [vmem:[#allocation2 + $0x110] sm:$0xff]  ;;  %v1454_v23 = vld [vmem:[#allocation2 + $0x118] sm:$0xff]  ;;  %v1455_v28 = vld [vmem:[#allocation2 + $0x120] sm:$0xff] }
 0x19e   : > { %v2271_v50 = vpack.c.bf16 %v1569_v39, %v1568_v38  ;;  %v1572_v51 = vmax.f32 %v1508_v40, 0.0  ;;  %v1511_v53 = vadd.f32 %v2997_v43, %v1440_v36  ;;  %2398 = vst [vmem:[%s3177_s3 + $0x30] sm:$0xff] %v2266_v44   ;;  %v1514_v62 = vadd.f32 %v2997_v43, %v1443_v48  ;;  %v1456_v29 = vld [vmem:[#allocation2 + $0x128] sm:$0xff]  ;;  %v1457_v34 = vld [vmem:[#allocation2 + $0x130] sm:$0xff]  ;;  %v1458_v35 = vld [vmem:[#allocation2 + $0x138] sm:$0xff] }
 0x19f   : > { %v2276_v55 = vpack.c.bf16 %v1571_v46, %v1570_v45  ;;  %v1573_v56 = vmax.f32 %v1509_v47, 0.0  ;;  %v1574_v60 = vmax.f32 %v1510_v52, 0.0  ;;  %v1515_v63 = vadd.f32 %v2997_v43, %v1444_v49  ;;  %v1449_v6 = vld [vmem:[#allocation2 + $0xf0] sm:$0xff]  ;;  %v1459_v40 = vld [vmem:[#allocation2 + $0x140] sm:$0xff]  ;;  %v1462_v52 = vld [vmem:[#allocation2 + $0x158] sm:$0xff] }
 0x1a0   : > { %2399 = vst [vmem:[%s3177_s3 + $0x38] sm:$0xff] %v2271_v50   ;;  %v1575_v61 = vmax.f32 %v1511_v53, 0.0  ;;  %v1447_v0 = vld [vmem:[#allocation2 + $0xe0] sm:$0xff]  ;;  %v1577_v4 = vmax.f32 %v1513_v58, 0.0  ;;  %v1516_v5 = vadd.f32 %v2997_v43, %v1445_v54  ;;  %v1578_v9 = vmax.f32 %v1514_v62, 0.0  ;;  %v1461_v47 = vld [vmem:[#allocation2 + $0x150] sm:$0xff] }
 0x1a1   : > { %2400 = vst [vmem:[%s3177_s3 + $0x40] sm:$0xff] %v2276_v55   ;;  %v2281_v2 = vpack.c.bf16 %v1573_v56, %v1572_v51  ;;  %v1450_v7 = vld [vmem:[#allocation2 + $0xf8] sm:$0xff]  ;;  %v1579_v10 = vmax.f32 %v1515_v63, 0.0  ;;  %v1517_v11 = vadd.f32 %v2997_v43, %v1446_v59  ;;  %v1518_v16 = vadd.f32 %v2997_v43, %v1447_v0  ;;  %v1463_v57 = vld [vmem:[#allocation2 + $0x160] sm:$0xff]  ;;  %v1464_v58 = vld [vmem:[#allocation2 + $0x168] sm:$0xff] }
 0x1a2   : > { %v1448_v1 = vld [vmem:[#allocation2 + $0xe8] sm:$0xff]  ;;  %v2286_v8 = vpack.c.bf16 %v1575_v61, %v1574_v60  ;;  %v2291_v14 = vpack.c.bf16 %v1577_v4, %v1576_v3  ;;  %v1580_v15 = vmax.f32 %v1516_v5, 0.0  ;;  %v1520_v21 = vadd.f32 %v2997_v43, %v1449_v6  ;;  %v1465_v63 = vld [vmem:[#allocation2 + $0x170] sm:$0xff]  ;;  %v1466_v0 = vld [vmem:[#allocation2 + $0x178] sm:$0xff] }
 0x1a3   : > { %2401 = vst [vmem:[%s3177_s3 + $0x48] sm:$0xff] %v2281_v2   ;;  %v1519_v17 = vadd.f32 %v2997_v43, %v1448_v1  ;;  %v2296_v19 = vpack.c.bf16 %v1579_v10, %v1578_v9  ;;  %v1581_v20 = vmax.f32 %v1517_v11, 0.0  ;;  %v1521_v22 = vadd.f32 %v2997_v43, %v1450_v7  ;;  %v1467_v5 = vld [vmem:[#allocation2 + $0x180] sm:$0xff]  ;;  %v1468_v6 = vld [vmem:[#allocation2 + $0x188] sm:$0xff]  ;;  %v1469_v11 = vld [vmem:[#allocation2 + $0x190] sm:$0xff] }
 0x1a4   : > { %2402 = vst [vmem:[%s3177_s3 + $0x50] sm:$0xff] %v2286_v8   ;;  %2403 = vst [vmem:[%s3177_s3 + $0x58] sm:$0xff] %v2291_v14   ;;  %v1582_v24 = vmax.f32 %v1518_v16, 0.0  ;;  %v1522_v26 = vadd.f32 %v2997_v43, %v1451_v12  ;;  %v1523_v27 = vadd.f32 %v2997_v43, %v1452_v13  ;;  %v1584_v31 = vmax.f32 %v1520_v21, 0.0  ;;  %v1470_v16 = vld [vmem:[#allocation2 + $0x198] sm:$0xff]  ;;  %v1471_v21 = vld [vmem:[#allocation2 + $0x1a0] sm:$0xff] }
 0x1a5   : > { %v1583_v25 = vmax.f32 %v1519_v17, 0.0  ;;  %2404 = vst [vmem:[%s3177_s3 + $0x60] sm:$0xff] %v2296_v19   ;;  %v2301_v30 = vpack.c.bf16 %v1581_v20, %v1580_v15  ;;  %v1585_v32 = vmax.f32 %v1521_v22, 0.0  ;;  %v1524_v33 = vadd.f32 %v2997_v43, %v1453_v18  ;;  %v1472_v22 = vld [vmem:[#allocation2 + $0x1a8] sm:$0xff] }
 0x1a6   : > { %v1586_v37 = vmax.f32 %v1522_v26, 0.0  ;;  %v1587_v38 = vmax.f32 %v1523_v27, 0.0  ;;  %v1525_v39 = vadd.f32 %v2997_v43, %v1454_v23  ;;  %v1526_v45 = vadd.f32 %v2997_v43, %v1455_v28  ;;  %v1473_v27 = vld [vmem:[#allocation2 + $0x1b0] sm:$0xff]  ;;  %v1474_v28 = vld [vmem:[#allocation2 + $0x1b8] sm:$0xff] }
 0x1a7   : > { %v2306_v36 = vpack.c.bf16 %v1583_v25, %v1582_v24  ;;  %2405 = vst [vmem:[%s3177_s3 + $0x68] sm:$0xff] %v2301_v30   ;;  %v2311_v42 = vpack.c.bf16 %v1585_v32, %v1584_v31  ;;  %v1588_v44 = vmax.f32 %v1524_v33, 0.0  ;;  %v1527_v46 = vadd.f32 %v2997_v43, %v1456_v29  ;;  %v1475_v33 = vld [vmem:[#allocation2 + $0x1c0] sm:$0xff] }
 0x1a8   : > { %v2316_v48 = vpack.c.bf16 %v1587_v38, %v1586_v37  ;;  %v1589_v49 = vmax.f32 %v1525_v39, 0.0  ;;  %v1528_v50 = vadd.f32 %v2997_v43, %v1457_v34  ;;  %v1529_v51 = vadd.f32 %v2997_v43, %v1458_v35  ;;  %v1476_v34 = vld [vmem:[#allocation2 + $0x1c8] sm:$0xff]  ;;  %v1477_v39 = vld [vmem:[#allocation2 + $0x1d0] sm:$0xff] }
 0x1a9   : > { %2406 = vst [vmem:[%s3177_s3 + $0x70] sm:$0xff] %v2306_v36   ;;  %2407 = vst [vmem:[%s3177_s3 + $0x78] sm:$0xff] %v2311_v42   ;;  %v1590_v53 = vmax.f32 %v1526_v45, 0.0  ;;  %v1591_v54 = vmax.f32 %v1527_v46, 0.0  ;;  %v1530_v55 = vadd.f32 %v2997_v43, %v1459_v40  ;;  %v1531_v56 = vadd.f32 %v2997_v43, %v1460_v41  ;;  %v1478_v45 = vld [vmem:[#allocation2 + $0x1d8] sm:$0xff] }
 0x1aa   : > { %2408 = vst [vmem:[%s3177_s3 + $0x80] sm:$0xff] %v2316_v48   ;;  %v2321_v59 = vpack.c.bf16 %v1589_v49, %v1588_v44  ;;  %v1592_v60 = vmax.f32 %v1528_v50, 0.0  ;;  %v1593_v61 = vmax.f32 %v1529_v51, 0.0  ;;  %v1532_v62 = vadd.f32 %v2997_v43, %v1461_v47  ;;  %v1479_v50 = vld [vmem:[#allocation2 + $0x1e0] sm:$0xff]  ;;  %v1480_v51 = vld [vmem:[#allocation2 + $0x1e8] sm:$0xff] }
 0x1ab   : > { %v2326_v1 = vpack.c.bf16 %v1591_v54, %v1590_v53  ;;  %v1594_v2 = vmax.f32 %v1530_v55, 0.0  ;;  %v1595_v3 = vmax.f32 %v1531_v56, 0.0  ;;  %v1533_v4 = vadd.f32 %v2997_v43, %v1462_v52  ;;  %v1481_v56 = vld [vmem:[#allocation2 + $0x1f0] sm:$0xff] }
 0x1ac   : > { %2409 = vst [vmem:[%s3177_s3 + $0x88] sm:$0xff] %v2321_v59   ;;  %v2331_v7 = vpack.c.bf16 %v1593_v61, %v1592_v60  ;;  %v1596_v8 = vmax.f32 %v1532_v62, 0.0  ;;  %v1534_v9 = vadd.f32 %v2997_v43, %v1463_v57  ;;  %v1535_v10 = vadd.f32 %v2997_v43, %v1464_v58  ;;  %v1482_v57 = vld [vmem:[#allocation2 + $0x1f8] sm:$0xff] }
 0x1ad   : > { %2410 = vst [vmem:[%s3177_s3 + $0x90] sm:$0xff] %v2326_v1   ;;  %v2336_v12 = vpack.c.bf16 %v1595_v3, %v1594_v2  ;;  %v1597_v13 = vmax.f32 %v1533_v4, 0.0  ;;  %v1536_v14 = vadd.f32 %v2997_v43, %v1465_v63  ;;  %v1537_v15 = vadd.f32 %v2997_v43, %v1466_v0 }
 0x1ae   : > { %2411 = vst [vmem:[%s3177_s3 + $0x98] sm:$0xff] %v2331_v7   ;;  %v1598_v17 = vmax.f32 %v1534_v9, 0.0  ;;  %v1599_v18 = vmax.f32 %v1535_v10, 0.0  ;;  %v1538_v19 = vadd.f32 %v2997_v43, %v1467_v5  ;;  %v1539_v20 = vadd.f32 %v2997_v43, %v1468_v6 }
 0x1af   : > { %2412 = vst [vmem:[%s3177_s3 + $0xa0] sm:$0xff] %v2336_v12   ;;  %v2341_v23 = vpack.c.bf16 %v1597_v13, %v1596_v8  ;;  %v1600_v24 = vmax.f32 %v1536_v14, 0.0  ;;  %v1601_v25 = vmax.f32 %v1537_v15, 0.0  ;;  %v1540_v26 = vadd.f32 %v2997_v43, %v1469_v11 }
 0x1b0   : > { %v2346_v29 = vpack.c.bf16 %v1599_v18, %v1598_v17  ;;  %v1602_v30 = vmax.f32 %v1538_v19, 0.0  ;;  %v1603_v31 = vmax.f32 %v1539_v20, 0.0  ;;  %v1541_v32 = vadd.f32 %v2997_v43, %v1470_v16 }
 0x1b1   : > { %2413 = vst [vmem:[%s3177_s3 + $0xa8] sm:$0xff] %v2341_v23   ;;  %v2351_v35 = vpack.c.bf16 %v1601_v25, %v1600_v24  ;;  %v1604_v36 = vmax.f32 %v1540_v26, 0.0  ;;  %v1542_v37 = vadd.f32 %v2997_v43, %v1471_v21  ;;  %v1543_v38 = vadd.f32 %v2997_v43, %v1472_v22 }
 0x1b2   : > { %2414 = vst [vmem:[%s3177_s3 + $0xb0] sm:$0xff] %v2346_v29   ;;  %v2356_v40 = vpack.c.bf16 %v1603_v31, %v1602_v30  ;;  %v1605_v41 = vmax.f32 %v1541_v32, 0.0  ;;  %v1544_v42 = vadd.f32 %v2997_v43, %v1473_v27  ;;  %v1545_v44 = vadd.f32 %v2997_v43, %v1474_v28 }
 0x1b3   : > { %2415 = vst [vmem:[%s3177_s3 + $0xb8] sm:$0xff] %v2351_v35   ;;  %v1606_v46 = vmax.f32 %v1542_v37, 0.0  ;;  %v1607_v47 = vmax.f32 %v1543_v38, 0.0  ;;  %v1546_v48 = vadd.f32 %v2997_v43, %v1475_v33  ;;  %v1547_v49 = vadd.f32 %v2997_v43, %v1476_v34 }
 0x1b4   : > { %2416 = vst [vmem:[%s3177_s3 + $0xc0] sm:$0xff] %v2356_v40   ;;  %v2361_v52 = vpack.c.bf16 %v1605_v41, %v1604_v36  ;;  %v1608_v53 = vmax.f32 %v1544_v42, 0.0  ;;  %v1609_v54 = vmax.f32 %v1545_v44, 0.0  ;;  %v1548_v55 = vadd.f32 %v2997_v43, %v1477_v39 }
 0x1b5   : > { %v2366_v58 = vpack.c.bf16 %v1607_v47, %v1606_v46  ;;  %v1610_v59 = vmax.f32 %v1546_v48, 0.0  ;;  %v1611_v60 = vmax.f32 %v1547_v49, 0.0  ;;  %v1549_v61 = vadd.f32 %v2997_v43, %v1478_v45 }
 0x1b6   : > { %2417 = vst [vmem:[%s3177_s3 + $0xc8] sm:$0xff] %v2361_v52   ;;  %v2371_v62 = vpack.c.bf16 %v1609_v54, %v1608_v53  ;;  %v1612_v63 = vmax.f32 %v1548_v55, 0.0  ;;  %v1550_v0 = vadd.f32 %v2997_v43, %v1479_v50  ;;  %v1551_v1 = vadd.f32 %v2997_v43, %v1480_v51 }
 0x1b7   : > { %2418 = vst [vmem:[%s3177_s3 + $0xd0] sm:$0xff] %v2366_v58   ;;  %v2376_v2 = vpack.c.bf16 %v1611_v60, %v1610_v59  ;;  %v1613_v3 = vmax.f32 %v1549_v61, 0.0  ;;  %v1552_v4 = vadd.f32 %v2997_v43, %v1481_v56  ;;  %v1553_v5 = vadd.f32 %v2997_v43, %v1482_v57 }
 0x1b8   : > { %2419 = vst [vmem:[%s3177_s3 + $0xd8] sm:$0xff] %v2371_v62   ;;  %v1614_v6 = vmax.f32 %v1550_v0, 0.0  ;;  %v1615_v7 = vmax.f32 %v1551_v1, 0.0 }
 0x1b9   : > { %2420 = vst [vmem:[%s3177_s3 + $0xe0] sm:$0xff] %v2376_v2   ;;  %v2381_v8 = vpack.c.bf16 %v1613_v3, %v1612_v63  ;;  %v1616_v9 = vmax.f32 %v1552_v4, 0.0  ;;  %v1617_v10 = vmax.f32 %v1553_v5, 0.0 }
 0x1ba   : > { %v2386_v11 = vpack.c.bf16 %v1615_v7, %v1614_v6 }
 0x1bb   : > { %2421 = vst [vmem:[%s3177_s3 + $0xe8] sm:$0xff] %v2381_v8   ;;  %v2391_v12 = vpack.c.bf16 %v1617_v10, %v1616_v9 }
 0x1bc   : > { %2422 = vst [vmem:[%s3177_s3 + $0xf0] sm:$0xff] %v2386_v11  }
 0x1bd   : > { %2423 = vst [vmem:[%s3177_s3 + $0xf8] sm:$0xff] %v2391_v12  }
 0x1be PF: > { %s13_s16 = sadd.s32 1, %s2679_s16   ;;  %s3178_s12 = smov %s2667_s13 }
 0x1bf   : > { %p10_p12 = scmp.ge.s32.totalorder %s13_s16, 7   ;;  %s3179_s13 = smov %s2737_s20 }
 0x1c0   : > { %s3180_s14 = smov %s2675_s15  ;;  %s3181_s15 = smov %s3183_s17 }
 0x1c1   :  { %12 = sbr.rel (!%p10_p12) target bundleno = 3 (0x3), region = 122 }

// kernel: dual_grad_loss.38
= control target key start
LH: loop header
LB: loop body
LE: loop exit
PB: predicated region body
PF: predicated region fallthrough
CT: control target
= control target key end

     0   :  { %s1190_s12 = smov 0   ;;  %s1192_s13 = smov 0   ;;  %s1322_s0 = inlined_call_operand.vmem [shape: bf16[128,640], index: 0, kind: input, shape index: {}]   ;;  %s1323_s1 = inlined_call_operand.vmem [shape: bf16[640,128], index: 1, kind: input, shape index: {}]   ;;  %s1324_s2 = inlined_call_operand.vmem [shape: f32[1,128], index: 2, kind: input, shape index: {}]   ;;  %s1325_s3 = inlined_call_operand.vmem [shape: bf16[128,128], index: 3, kind: output, shape index: {}]  }
   0x1   :  { %s1194_s14 = smov 0   ;;  %s1196_s15 = smov 0  }
   0x2   :  { %s1198_s16 = smov 0  }
   0x3 LB: > { %s25_s17 = sadd.s32 1, %s1163_s15  ;;  %p48_p1 = scmp.ne.s32.totalorder %s1155_s13, %s1151_s12  ;;  %s1167_s16 = sphi %s1198_s16, %s13_s16   ;;  %s1163_s15 = sphi %s1196_s15, %s1329_s15   ;;  %s1159_s14 = sphi %s1194_s14, %s1328_s14   ;;  %s1155_s13 = sphi %s1192_s13, %s1327_s13   ;;  %s1151_s12 = sphi %s1190_s12, %s1326_s12  }
   0x4   : > { %p26_p0 = scmp.ge.s32.totalorder %s25_s17, 5  ;;  %p49_p2 = scmp.eq.s32.totalorder %s1167_s16, 0 }
   0x5   : > { %s41_s19 = sadd.s32 1, %s1155_s13  ;;  %p899_p5 = scmp.ge.s32.totalorder %s1167_s16, 5 }
   0x6   : > { %s1331_s17 = smov (%p26_p0, %s25_s17), 0  ;;  %p50_p3 = por %p49_p2, %p48_p1 }
   0x7   : > { %s37_s18 = ssub.s32 %s1163_s15, %s1331_s17  ;;  %162 = sbr.rel (%p899_p5) target bundleno = 28 (0x1c), region = 20 }
   0x8   : > { %p39_p4 = scmp.eq.s32.totalorder %s37_s18, 0 }
   0xa   : > { %s1225_s20 = scalar_select %p39_p4, %s1155_s13, %s41_s19  }
   0xe   : > { %165 = sbr.rel (!%p50_p3) target bundleno = 28 (0x1c), region = 24  ;;  %s167_s21 = sand.u32 (%p50_p3), 1, %s1155_s13  }
   0xf   : > { %s901_s22 = sshll.u32 (%p50_p3), %s1163_s15, 2  ;;  %s900_s23 = sshll.u32 (%p50_p3), %s167_s21, 6 }
  0x10   : > { %s1233_s26 = scalar_lea.vmem (%p50_p3), %s1322_s0, %s901_s22  ;;  %s169_s27 = scalar_lea.vmem (%p50_p3), [#allocation3], %s900_s23 }
  0x11   : > { %v190_v0 = vld [vmem:[%s1233_s26] sm:$0xf] (%p50_p3)  ;;  %v192_v1 = vld [vmem:[%s1233_s26 + $0x14] sm:$0xf] (%p50_p3)  ;;  %v194_v2 = vld [vmem:[%s1233_s26 + $0x28] sm:$0xf] (%p50_p3) }
  0x12   : > { %191 = vst [vmem:[%s169_s27] sm:$0xf] (%p50_p3), %v190_v0  ;;  %193 = vst [vmem:[%s169_s27 + $0x4] sm:$0xf] (%p50_p3), %v192_v1  ;;  %v196_v3 = vld [vmem:[%s1233_s26 + $0x3c] sm:$0xf] (%p50_p3) }
  0x13   : > { %v198_v4 = vld [vmem:[%s1233_s26 + $0x50] sm:$0xf] (%p50_p3)  ;;  %195 = vst [vmem:[%s169_s27 + $0x8] sm:$0xf] (%p50_p3), %v194_v2  ;;  %197 = vst [vmem:[%s169_s27 + $0xc] sm:$0xf] (%p50_p3), %v196_v3 }
  0x14   : > { %199 = vst [vmem:[%s169_s27 + $0x10] sm:$0xf] (%p50_p3), %v198_v4  ;;  %v200_v5 = vld [vmem:[%s1233_s26 + $0x64] sm:$0xf] (%p50_p3)  ;;  %v202_v6 = vld [vmem:[%s1233_s26 + $0x78] sm:$0xf] (%p50_p3) }
  0x15   : > { %v204_v7 = vld [vmem:[%s1233_s26 + $0x8c] sm:$0xf]  ;;  %201 = vst [vmem:[%s169_s27 + $0x14] sm:$0xf] %v200_v5  ;;  %203 = vst [vmem:[%s169_s27 + $0x18] sm:$0xf] %v202_v6 }
  0x16   : > { %205 = vst [vmem:[%s169_s27 + $0x1c] sm:$0xf] %v204_v7  ;;  %v206_v8 = vld [vmem:[%s1233_s26 + $0xa0] sm:$0xf]  ;;  %v208_v9 = vld [vmem:[%s1233_s26 + $0xb4] sm:$0xf] }
  0x17   : > { %v210_v10 = vld [vmem:[%s1233_s26 + $0xc8] sm:$0xf]  ;;  %207 = vst [vmem:[%s169_s27 + $0x20] sm:$0xf] %v206_v8  ;;  %209 = vst [vmem:[%s169_s27 + $0x24] sm:$0xf] %v208_v9 }
  0x18   : > { %211 = vst [vmem:[%s169_s27 + $0x28] sm:$0xf] %v210_v10  ;;  %v212_v11 = vld [vmem:[%s1233_s26 + $0xdc] sm:$0xf]  ;;  %v214_v12 = vld [vmem:[%s1233_s26 + $0xf0] sm:$0xf] }
  0x19   : > { %v216_v13 = vld [vmem:[%s1233_s26 + $0x104] sm:$0xf]  ;;  %213 = vst [vmem:[%s169_s27 + $0x2c] sm:$0xf] %v212_v11  ;;  %215 = vst [vmem:[%s169_s27 + $0x30] sm:$0xf] %v214_v12 }
  0x1a   : > { %217 = vst [vmem:[%s169_s27 + $0x34] sm:$0xf] %v216_v13  ;;  %v218_v14 = vld [vmem:[%s1233_s26 + $0x118] sm:$0xf]  ;;  %v220_v15 = vld [vmem:[%s1233_s26 + $0x12c] sm:$0xf] }
  0x1b   : > { %219 = vst [vmem:[%s169_s27 + $0x38] sm:$0xf] %v218_v14  ;;  %221 = vst [vmem:[%s169_s27 + $0x3c] sm:$0xf] %v220_v15 }
  0x1c PF: > { %p902_p6 = scmp.ge.s32.totalorder %s1167_s16, 1  ;;  %p287_p7 = scmp.lt.s32.totalorder %s1167_s16, 6 }
  0x1e   : > { %p288_p8 = pnand %p902_p6, %p287_p7 }
  0x1f   : > { %s294_s28 = sand.u32 (!%p288_p8), 1, %s1151_s12   ;;  %s904_s29 = sshll.u32 (!%p288_p8), %s1159_s14, 4 }
  0x20   : > { %291 = sbr.rel (%p288_p8) target bundleno = 323 (0x143), region = 69  ;;  %s903_s30 = sshll.u32 (!%p288_p8), %s294_s28, 6 }
  0x21   : > { %p333_p9 = scmp.lt.s32.totalorder (!%p288_p8), %s904_s29, 79  ;;  %s1260_s8 = scalar_lea.vmem (!%p288_p8), [#allocation3], %s903_s30 }
  0x22   : > { %p906_p10 = scmp.ne.s32.totalorder (!%p288_p8), %s1159_s14, 0 }
  0x27   : > { %s1333_s29 = smov (!%p333_p9, %s904_s29), 79  ;;  %357 = sbr.rel (%p906_p10) target bundleno = 49 (0x31), region = 77 }
  0x28   : > { %s905_s4 = sshll.u32 %s1333_s29, 2  ;;  %v1169_v16 = vmov (!%p906_p10), 0.0  }
  0x29   : > { %s1258_s7 = scalar_lea.vmem %s1323_s1, %s905_s4  ;;  %358 = vst [vmem:[#allocation2] sm:$0xff] (!%p906_p10), %v1169_v16  ;;  %359 = vst [vmem:[#allocation2 + $0x8] sm:$0xff] (!%p906_p10), %v1169_v16 }
  0x2a   : > { %360 = vst [vmem:[#allocation2 + $0x10] sm:$0xff] (!%p906_p10), %v1169_v16  ;;  %361 = vst [vmem:[#allocation2 + $0x18] sm:$0xff] (!%p906_p10), %v1169_v16 }
  0x2b   : > { %362 = vst [vmem:[#allocation2 + $0x20] sm:$0xff] (!%p906_p10), %v1169_v16  ;;  %363 = vst [vmem:[#allocation2 + $0x28] sm:$0xff] (!%p906_p10), %v1169_v16 }
  0x2c   : > { %364 = vst [vmem:[#allocation2 + $0x30] sm:$0xff] (!%p906_p10), %v1169_v16  ;;  %365 = vst [vmem:[#allocation2 + $0x38] sm:$0xff] (!%p906_p10), %v1169_v16 }
  0x2d   : > { %366 = vst [vmem:[#allocation2 + $0x40] sm:$0xff] (!%p906_p10), %v1169_v16  ;;  %367 = vst [vmem:[#allocation2 + $0x48] sm:$0xff] (!%p906_p10), %v1169_v16 }
  0x2e   : > { %368 = vst [vmem:[#allocation2 + $0x50] sm:$0xff] %v1169_v16  ;;  %369 = vst [vmem:[#allocation2 + $0x58] sm:$0xff] %v1169_v16 }
  0x2f   : > { %370 = vst [vmem:[#allocation2 + $0x60] sm:$0xff] %v1169_v16  ;;  %371 = vst [vmem:[#allocation2 + $0x68] sm:$0xff] %v1169_v16 }
  0x30   : > { %372 = vst [vmem:[#allocation2 + $0x70] sm:$0xff] %v1169_v16  ;;  %373 = vst [vmem:[#allocation2 + $0x78] sm:$0xff] %v1169_v16 }
  0x31 PF: > { %v1113_v17 = vld [vmem:[%s1258_s7] sm:$0xff]   ;;  %v1114_v18 = vld [vmem:[%s1258_s7 + $0x8] sm:$0xff]   ;;  %v1115_v19 = vld [vmem:[%s1258_s7 + $0x10] sm:$0xff]   ;;  %p923_p11 = scmp.ne.s32.totalorder %s1159_s14, 4 }
  0x32   : > { %1024 = vmatprep.subr.bf16.mxu0 %v1113_v17  ;;  %1056 = vmatprep.subr.bf16.mxu1 %v1113_v17  ;;  %v1116_v20 = vld [vmem:[%s1258_s7 + $0x18] sm:$0xff]   ;;  %v1121_v21 = vld [vmem:[%s1260_s8] sm:$0xff]   ;;  %v1118_v24 = vld [vmem:[%s1258_s7 + $0x28] sm:$0xff]  }
  0x33   : > { %1025 = vmatpush3.bf16.msra.mxu0 %v1113_v17  ;;  %1064 = vmatpush3.bf16.msra.mxu1 %v1113_v17  ;;  %v1122_v22 = vld [vmem:[%s1260_s8 + $0x20] sm:$0xff]   ;;  %v1119_v25 = vld [vmem:[%s1258_s7 + $0x30] sm:$0xff]   ;;  %v1120_v26 = vld [vmem:[%s1258_s7 + $0x38] sm:$0xff]  }
  0x34   : > { %1026 = vmatprep.subr.bf16.mxu0 %v1114_v18  ;;  %1057 = vmatprep.subr.bf16.mxu1 %v1114_v18  ;;  %v1117_v23 = vld [vmem:[%s1258_s7 + $0x20] sm:$0xff]   ;;  %v1123_v27 = vld [vmem:[%s1260_s8 + $0x8] sm:$0xff]   ;;  %v1125_v29 = vld [vmem:[%s1260_s8 + $0x10] sm:$0xff]  }
  0x35   : > { %1040 = vmatprep.mubr.bf16.mxu0 %v1121_v21  ;;  %1048 = vmatprep.mubr.bf16.mxu1 %v1122_v22  ;;  %v1124_v28 = vld [vmem:[%s1260_s8 + $0x28] sm:$0xff]   ;;  %v1126_v30 = vld [vmem:[%s1260_s8 + $0x30] sm:$0xff]   ;;  %v1127_v31 = vld [vmem:[%s1260_s8 + $0x18] sm:$0xff]  }
  0x36   : > { %v1128_v32 = vld [vmem:[%s1260_s8 + $0x38] sm:$0xff]   ;;  %v376_v33 = vld [vmem:[#allocation2 + $0x10] sm:$0xff]  ;;  %v374_v35 = vld [vmem:[#allocation2] sm:$0xff] }
  0x37   : > { %1027 = vmatpush3.bf16.msra.mxu0 %v1114_v18  ;;  %1065 = vmatpush3.bf16.msra.mxu1 %v1114_v18  ;;  %v384_v34 = vld [vmem:[#allocation2 + $0x50] sm:$0xff]  ;;  %v382_v36 = vld [vmem:[#allocation2 + $0x40] sm:$0xff]  ;;  %v377_v39 = vld [vmem:[#allocation2 + $0x18] sm:$0xff] }
  0x38   : > { %1028 = vmatprep.subr.bf16.mxu0 %v1115_v19  ;;  %1058 = vmatprep.subr.bf16.mxu1 %v1115_v19  ;;  %v385_v40 = vld [vmem:[#allocation2 + $0x58] sm:$0xff]  ;;  %v375_v45 = vld [vmem:[#allocation2 + $0x8] sm:$0xff]  ;;  %v380_v57 = vld [vmem:[#allocation2 + $0x30] sm:$0xff] }
  0x39   : > { %v383_v46 = vld [vmem:[#allocation2 + $0x48] sm:$0xff]  ;;  %v388_v58 = vld [vmem:[#allocation2 + $0x70] sm:$0xff]  ;;  %v378_v59 = vld [vmem:[#allocation2 + $0x20] sm:$0xff] }
  0x3a   : > { %v386_v60 = vld [vmem:[#allocation2 + $0x60] sm:$0xff]  ;;  %v381_v63 = vld [vmem:[#allocation2 + $0x38] sm:$0xff]  ;;  %v379_v5 = vld [vmem:[#allocation2 + $0x28] sm:$0xff] }
  0x3b   : > { %1029 = vmatpush3.bf16.msra.mxu0 %v1115_v19  ;;  %1066 = vmatpush3.bf16.msra.mxu1 %v1115_v19  ;;  %v389_v0 = vld [vmem:[#allocation2 + $0x78] sm:$0xff]  ;;  %v387_v6 = vld [vmem:[#allocation2 + $0x68] sm:$0xff]  ;;  %v924_v19 = vld [vmem:[%s1324_s2] ss:$0 sm:$0xff] (!%p923_p11) }
  0x3c   : > { %1030 = vmatprep.subr.bf16.mxu0 %v1116_v20  ;;  %1059 = vmatprep.subr.bf16.mxu1 %v1116_v20 }
  0x3f   : > { %1031 = vmatpush3.bf16.msra.mxu0 %v1116_v20  ;;  %1067 = vmatpush3.bf16.msra.mxu1 %v1116_v20 }
  0x40   : > { %1032 = vmatprep.subr.bf16.mxu0 %v1117_v23  ;;  %1060 = vmatprep.subr.bf16.mxu1 %v1117_v23 }
  0x43   : > { %1033 = vmatpush3.bf16.msra.mxu0 %v1117_v23  ;;  %1068 = vmatpush3.bf16.msra.mxu1 %v1117_v23 }
  0x44   : > { %1034 = vmatprep.subr.bf16.mxu0 %v1118_v24  ;;  %1061 = vmatprep.subr.bf16.mxu1 %v1118_v24 }
  0x47   : > { %1035 = vmatpush3.bf16.msra.mxu0 %v1118_v24  ;;  %1069 = vmatpush3.bf16.msra.mxu1 %v1118_v24 }
  0x48   : > { %1036 = vmatprep.subr.bf16.mxu0 %v1119_v25  ;;  %1062 = vmatprep.subr.bf16.mxu1 %v1119_v25 }
  0x4b   : > { %1037 = vmatpush3.bf16.msra.mxu0 %v1119_v25  ;;  %1070 = vmatpush3.bf16.msra.mxu1 %v1119_v25 }
  0x4c   : > { %1038 = vmatprep.subr.bf16.mxu0 %v1120_v26  ;;  %1063 = vmatprep.subr.bf16.mxu1 %v1120_v26 }
  0x4f   : > { %1039 = vmatpush3.bf16.msra.mxu0 %v1120_v26  ;;  %1071 = vmatpush3.bf16.msra.mxu1 %v1120_v26 }
  0x52   : > { %1041 = vmatmul.mubr.bf16.vlgmr.msra.gmra.mrb[0].mxu0 %v1123_v27  ;;  %1049 = vmatmul.mubr.bf16.vlgmr.msra.gmra.mrb[0].mxu1 %v1124_v28 }
  0x53   : > { %1044 = vmatprep.mubr.bf16.mxu0 %v1125_v29  ;;  %1052 = vmatprep.mubr.bf16.mxu1 %v1126_v30 }
  0x5a   : > { %1045 = vmatmul.mubr.bf16.gmra.mrb[4].mxu0 %v1127_v31  ;;  %1053 = vmatmul.mubr.bf16.gmra.mrb[4].mxu1 %v1128_v32 }
 0x125   : > { %v1042_v37 = vpop.f32.mrb[0].mxu0  ;;  %v1050_v38 = vpop.f32.mrb[0].mxu1 }
 0x126   : > { %v617_v41 = vadd.f32 %v1042_v37, %v376_v33  ;;  %v625_v42 = vadd.f32 %v1050_v38, %v384_v34  ;;  %v552_v43 = vpop.f32.mrb[1].mxu0  ;;  %v584_v44 = vpop.f32.mrb[1].mxu1 }
 0x127   : > { %v615_v47 = vadd.f32 %v552_v43, %v374_v35  ;;  %v623_v48 = vadd.f32 %v584_v44, %v382_v36  ;;  %v1043_v49 = vpop.f32.mrb[2].mxu0  ;;  %v1051_v50 = vpop.f32.mrb[2].mxu1 }
 0x128   : > { %633 = vst [vmem:[#allocation2 + $0x10] sm:$0xff] %v617_v41  ;;  %641 = vst [vmem:[#allocation2 + $0x50] sm:$0xff] %v625_v42  ;;  %v618_v51 = vadd.f32 %v1043_v49, %v377_v39  ;;  %v626_v52 = vadd.f32 %v1051_v50, %v385_v40  ;;  %v555_v53 = vpop.f32.mrb[3].mxu0  ;;  %v587_v54 = vpop.f32.mrb[3].mxu1 }
 0x129   : > { %631 = vst [vmem:[#allocation2] sm:$0xff] %v615_v47  ;;  %639 = vst [vmem:[#allocation2 + $0x40] sm:$0xff] %v623_v48  ;;  %v616_v55 = vadd.f32 %v555_v53, %v375_v45  ;;  %v624_v56 = vadd.f32 %v587_v54, %v383_v46 }
 0x12a   : > { %634 = vst [vmem:[#allocation2 + $0x18] sm:$0xff] %v618_v51  ;;  %642 = vst [vmem:[#allocation2 + $0x58] sm:$0xff] %v626_v52 }
 0x12b   : > { %632 = vst [vmem:[#allocation2 + $0x8] sm:$0xff] %v616_v55  ;;  %640 = vst [vmem:[#allocation2 + $0x48] sm:$0xff] %v624_v56 }
 0x12d   : > { %v1046_v61 = vpop.f32.mrb[4].mxu0  ;;  %v1054_v62 = vpop.f32.mrb[4].mxu1  ;;  %650 = sbr.rel (%p923_p11) target bundleno = 323 (0x143), region = 81 }
 0x12e   : > { %v621_v1 = vadd.f32 %v1046_v61, %v380_v57  ;;  %v629_v2 = vadd.f32 %v1054_v62, %v388_v58  ;;  %v568_v3 = vpop.f32.mrb[5].mxu0  ;;  %v600_v4 = vpop.f32.mrb[5].mxu1 }
 0x12f   : > { %v619_v7 = vadd.f32 %v568_v3, %v378_v59  ;;  %v627_v8 = vadd.f32 %v600_v4, %v386_v60  ;;  %v1047_v9 = vpop.f32.mrb[6].mxu0  ;;  %v1055_v10 = vpop.f32.mrb[6].mxu1  ;;  %v653_v22 = vld [vmem:[#allocation2 + $0x10] sm:$0xff] (!%p923_p11) }
 0x130   : > { %637 = vst [vmem:[#allocation2 + $0x30] sm:$0xff] %v621_v1  ;;  %645 = vst [vmem:[#allocation2 + $0x70] sm:$0xff] %v629_v2  ;;  %v622_v11 = vadd.f32 %v1047_v9, %v381_v63  ;;  %v630_v12 = vadd.f32 %v1055_v10, %v389_v0  ;;  %v571_v13 = vpop.f32.mrb[7].mxu0  ;;  %v603_v14 = vpop.f32.mrb[7].mxu1  ;;  %v651_v17 = vld [vmem:[#allocation2] sm:$0xff] (!%p923_p11)  ;;  %v676_v25 = vadd.f32 (!%p923_p11), %v924_v19, %v653_v22  ;;  %v661_v37 = vld [vmem:[#allocation2 + $0x50] sm:$0xff] (!%p923_p11) }
 0x131   : > { %635 = vst [vmem:[#allocation2 + $0x20] sm:$0xff] %v619_v7  ;;  %643 = vst [vmem:[#allocation2 + $0x60] sm:$0xff] %v627_v8  ;;  %v620_v15 = vadd.f32 %v571_v13, %v379_v5  ;;  %v628_v16 = vadd.f32 %v603_v14, %v387_v6  ;;  %v674_v20 = vadd.f32 (!%p923_p11), %v924_v19, %v651_v17  ;;  %v654_v23 = vld [vmem:[#allocation2 + $0x18] sm:$0xff] (!%p923_p11)  ;;  %v659_v35 = vld [vmem:[#allocation2 + $0x40] sm:$0xff] (!%p923_p11) }
 0x132   : > { %638 = vst [vmem:[#allocation2 + $0x38] sm:$0xff] %v622_v11  ;;  %646 = vst [vmem:[#allocation2 + $0x78] sm:$0xff] %v630_v12  ;;  %v652_v18 = vld [vmem:[#allocation2 + $0x8] sm:$0xff] (!%p923_p11)  ;;  %v677_v26 = vadd.f32 (!%p923_p11), %v924_v19, %v654_v23  ;;  %v692_v38 = vmax.f32 (!%p923_p11), %v676_v25, 0.0  ;;  %v662_v42 = vld [vmem:[#allocation2 + $0x58] sm:$0xff] (!%p923_p11)  ;;  %v682_v47 = vadd.f32 (!%p923_p11), %v924_v19, %v659_v35  ;;  %v684_v52 = vadd.f32 (!%p923_p11), %v924_v19, %v661_v37 }
 0x133   : > { %636 = vst [vmem:[#allocation2 + $0x28] sm:$0xff] %v620_v15  ;;  %644 = vst [vmem:[#allocation2 + $0x68] sm:$0xff] %v628_v16  ;;  %v675_v21 = vadd.f32 (!%p923_p11), %v924_v19, %v652_v18  ;;  %v690_v31 = vmax.f32 (!%p923_p11), %v674_v20, 0.0  ;;  %v660_v36 = vld [vmem:[#allocation2 + $0x48] sm:$0xff] (!%p923_p11)  ;;  %v685_v57 = vadd.f32 (!%p923_p11), %v924_v19, %v662_v42 }
 0x134   : > { %v693_v39 = vmax.f32 %v677_v26, 0.0  ;;  %v683_v51 = vadd.f32 %v924_v19, %v660_v36  ;;  %v698_v56 = vmax.f32 %v682_v47, 0.0  ;;  %v700_v61 = vmax.f32 %v684_v52, 0.0 }
 0x135   : > { %v691_v32 = vmax.f32 %v675_v21, 0.0  ;;  %v701_v63 = vmax.f32 %v685_v57, 0.0 }
 0x136   : > { %v969_v49 = vpack.c.bf16 %v693_v39, %v692_v38  ;;  %v699_v60 = vmax.f32 %v683_v51, 0.0 }
 0x137   : > { %v657_v29 = vld [vmem:[#allocation2 + $0x30] sm:$0xff]  ;;  %v964_v44 = vpack.c.bf16 %v691_v32, %v690_v31  ;;  %v989_v5 = vpack.c.bf16 %v701_v63, %v700_v61 }
 0x138   : > { %v655_v24 = vld [vmem:[#allocation2 + $0x20] sm:$0xff]  ;;  %v680_v34 = vadd.f32 %v924_v19, %v657_v29  ;;  %v665_v53 = vld [vmem:[#allocation2 + $0x70] sm:$0xff]  ;;  %1001 = vst [vmem:[%s1325_s3 + $0x8] sm:$0xff] %v969_v49   ;;  %v984_v3 = vpack.c.bf16 %v699_v60, %v698_v56 }
 0x139   : > { %v678_v28 = vadd.f32 %v924_v19, %v655_v24  ;;  %v658_v30 = vld [vmem:[#allocation2 + $0x38] sm:$0xff]  ;;  %v663_v43 = vld [vmem:[#allocation2 + $0x60] sm:$0xff]  ;;  %965 = vst [vmem:[%s1325_s3] sm:$0xff] %v964_v44   ;;  %v688_v1 = vadd.f32 %v924_v19, %v665_v53  ;;  %1005 = vst [vmem:[%s1325_s3 + $0x28] sm:$0xff] %v989_v5  }
 0x13a   : > { %v656_v27 = vld [vmem:[#allocation2 + $0x28] sm:$0xff]  ;;  %v681_v41 = vadd.f32 %v924_v19, %v658_v30  ;;  %v696_v46 = vmax.f32 %v680_v34, 0.0  ;;  %v666_v54 = vld [vmem:[#allocation2 + $0x78] sm:$0xff]  ;;  %v686_v58 = vadd.f32 %v924_v19, %v663_v43  ;;  %1004 = vst [vmem:[%s1325_s3 + $0x20] sm:$0xff] %v984_v3  }
 0x13b   : > { %v679_v33 = vadd.f32 %v924_v19, %v656_v27  ;;  %v694_v40 = vmax.f32 %v678_v28, 0.0  ;;  %v664_v48 = vld [vmem:[#allocation2 + $0x68] sm:$0xff]  ;;  %v689_v2 = vadd.f32 %v924_v19, %v666_v54  ;;  %v704_v6 = vmax.f32 %v688_v1, 0.0 }
 0x13c   : > { %v697_v50 = vmax.f32 %v681_v41, 0.0  ;;  %v687_v62 = vadd.f32 %v924_v19, %v664_v48  ;;  %v702_v0 = vmax.f32 %v686_v58, 0.0 }
 0x13d   : > { %v695_v45 = vmax.f32 %v679_v33, 0.0  ;;  %v705_v7 = vmax.f32 %v689_v2, 0.0 }
 0x13e   : > { %v979_v59 = vpack.c.bf16 %v697_v50, %v696_v46  ;;  %v703_v4 = vmax.f32 %v687_v62, 0.0 }
 0x13f   : > { %v974_v55 = vpack.c.bf16 %v695_v45, %v694_v40  ;;  %v999_v9 = vpack.c.bf16 %v705_v7, %v704_v6 }
 0x140   : > { %1003 = vst [vmem:[%s1325_s3 + $0x18] sm:$0xff] %v979_v59   ;;  %v994_v8 = vpack.c.bf16 %v703_v4, %v702_v0 }
 0x141   : > { %1002 = vst [vmem:[%s1325_s3 + $0x10] sm:$0xff] %v974_v55   ;;  %1007 = vst [vmem:[%s1325_s3 + $0x38] sm:$0xff] %v999_v9  }
 0x142   : > { %1006 = vst [vmem:[%s1325_s3 + $0x30] sm:$0xff] %v994_v8  }
 0x143 PF: > { %s13_s16 = sadd.s32 1, %s1167_s16   ;;  %s1326_s12 = smov %s1155_s13 }
 0x144   : > { %p10_p12 = scmp.ge.s32.totalorder %s13_s16, 7   ;;  %s1327_s13 = smov %s1225_s20 }
 0x145   : > { %s1328_s14 = smov %s1163_s15  ;;  %s1329_s15 = smov %s1331_s17 }
 0x146   :  { %12 = sbr.rel (!%p10_p12) target bundleno = 3 (0x3), region = 122 }

// kernel: dual_grad_loss.39
= control target key start
LH: loop header
LB: loop body
LE: loop exit
PB: predicated region body
PF: predicated region fallthrough
CT: control target
= control target key end

     0   :  { %s1659_s12 = smov 0   ;;  %s1661_s13 = smov 0   ;;  %s1873_s0 = inlined_call_operand.vmem [shape: bf16[128,1152], index: 0, kind: input, shape index: {}]   ;;  %s1874_s1 = inlined_call_operand.vmem [shape: bf16[1152,128], index: 1, kind: input, shape index: {}]   ;;  %s1875_s2 = inlined_call_operand.vmem [shape: f32[1,128], index: 2, kind: input, shape index: {}]   ;;  %s1876_s3 = inlined_call_operand.vmem [shape: bf16[128,128], index: 3, kind: output, shape index: {}]  }
   0x1   :  { %s1663_s14 = smov 0   ;;  %s1665_s15 = smov 0  }
   0x2   :  { %s1667_s16 = smov 0  }
   0x3 LB: > { %s25_s17 = sadd.s32 1, %s1632_s15  ;;  %p48_p1 = scmp.ne.s32.totalorder %s1624_s13, %s1620_s12  ;;  %s1636_s16 = sphi %s1667_s16, %s13_s16   ;;  %s1632_s15 = sphi %s1665_s15, %s1880_s15   ;;  %s1628_s14 = sphi %s1663_s14, %s1879_s14   ;;  %s1624_s13 = sphi %s1661_s13, %s1878_s13   ;;  %s1620_s12 = sphi %s1659_s12, %s1877_s12  }
   0x4   : > { %p26_p0 = scmp.ge.s32.totalorder %s25_s17, 3  ;;  %p49_p2 = scmp.eq.s32.totalorder %s1636_s16, 0 }
   0x5   : > { %s41_s19 = sadd.s32 1, %s1624_s13  ;;  %p1216_p5 = scmp.ge.s32.totalorder %s1636_s16, 3 }
   0x6   : > { %s1882_s17 = smov (%p26_p0, %s25_s17), 0  ;;  %p50_p3 = por %p49_p2, %p48_p1 }
   0x7   : > { %s37_s18 = ssub.s32 %s1632_s15, %s1882_s17  ;;  %162 = sbr.rel (%p1216_p5) target bundleno = 37 (0x25), region = 20 }
   0x8   : > { %p39_p4 = scmp.eq.s32.totalorder %s37_s18, 0 }
   0xa   : > { %s1694_s20 = scalar_select %p39_p4, %s1624_s13, %s41_s19  }
   0xe   : > { %165 = sbr.rel (!%p50_p3) target bundleno = 37 (0x25), region = 24  ;;  %s167_s21 = sand.u32 (%p50_p3), 1, %s1624_s13  }
   0xf   : > { %s1323_s22 = smul.u32 (%p50_p3), 12, %s1632_s15 }
  0x10   : > { %s1499_s23 = smul.u32 (%p50_p3), 192, %s167_s21 }
  0x11   : > { %s1702_s26 = scalar_lea.vmem (%p50_p3), %s1873_s0, %s1323_s22 }
  0x12   : > { %v190_v0 = vld [vmem:[%s1702_s26] sm:$0xff] (%p50_p3)  ;;  %v194_v2 = vld [vmem:[%s1702_s26 + $0x48] sm:$0xff] (%p50_p3)  ;;  %s1707_s27 = scalar_lea.vmem (%p50_p3), [#allocation3], %s1499_s23  ;;  %v198_v4 = vld [vmem:[%s1702_s26 + $0x90] sm:$0xff] (%p50_p3) }
  0x13   : > { %v192_v1 = vld [vmem:[%s1702_s26 + $0x24] sm:$0xff] (%p50_p3)  ;;  %191 = vst [vmem:[%s1707_s27] sm:$0xff] (%p50_p3), %v190_v0  ;;  %195 = vst [vmem:[%s1707_s27 + $0x18] sm:$0xff] (%p50_p3), %v194_v2  ;;  %v196_v3 = vld [vmem:[%s1702_s26 + $0x6c] sm:$0xff] (%p50_p3) }
  0x14   : > { %193 = vst [vmem:[%s1707_s27 + $0xc] sm:$0xff] (%p50_p3), %v192_v1  ;;  %v200_v5 = vld [vmem:[%s1702_s26 + $0xb4] sm:$0xff] (%p50_p3)  ;;  %197 = vst [vmem:[%s1707_s27 + $0x24] sm:$0xff] (%p50_p3), %v196_v3  ;;  %v204_v7 = vld [vmem:[%s1702_s26 + $0xfc] sm:$0xff] (%p50_p3) }
  0x15   : > { %199 = vst [vmem:[%s1707_s27 + $0x30] sm:$0xff] %v198_v4  ;;  %201 = vst [vmem:[%s1707_s27 + $0x3c] sm:$0xff] %v200_v5  ;;  %v202_v6 = vld [vmem:[%s1702_s26 + $0xd8] sm:$0xff]  ;;  %v206_v8 = vld [vmem:[%s1702_s26 + $0x120] sm:$0xff] }
  0x16   : > { %203 = vst [vmem:[%s1707_s27 + $0x48] sm:$0xff] %v202_v6  ;;  %205 = vst [vmem:[%s1707_s27 + $0x54] sm:$0xff] %v204_v7  ;;  %v208_v9 = vld [vmem:[%s1702_s26 + $0x144] sm:$0xff]  ;;  %v212_v11 = vld [vmem:[%s1702_s26 + $0x18c] sm:$0xff] }
  0x17   : > { %207 = vst [vmem:[%s1707_s27 + $0x60] sm:$0xff] %v206_v8  ;;  %v210_v10 = vld [vmem:[%s1702_s26 + $0x168] sm:$0xff]  ;;  %209 = vst [vmem:[%s1707_s27 + $0x6c] sm:$0xff] %v208_v9  ;;  %v214_v12 = vld [vmem:[%s1702_s26 + $0x1b0] sm:$0xff] }
  0x18   : > { %211 = vst [vmem:[%s1707_s27 + $0x78] sm:$0xff] %v210_v10  ;;  %213 = vst [vmem:[%s1707_s27 + $0x84] sm:$0xff] %v212_v11  ;;  %v216_v13 = vld [vmem:[%s1702_s26 + $0x1d4] sm:$0xff]  ;;  %v220_v15 = vld [vmem:[%s1702_s26 + $0x21c] sm:$0xff] }
  0x19   : > { %v218_v14 = vld [vmem:[%s1702_s26 + $0x1f8] sm:$0xff]  ;;  %215 = vst [vmem:[%s1707_s27 + $0x90] sm:$0xff] %v214_v12  ;;  %217 = vst [vmem:[%s1707_s27 + $0x9c] sm:$0xff] %v216_v13  ;;  %v1218_v16 = vld [vmem:[%s1702_s26 + $0x8] sm:$0xf] }
  0x1a   : > { %219 = vst [vmem:[%s1707_s27 + $0xa8] sm:$0xff] %v218_v14  ;;  %v1220_v17 = vld [vmem:[%s1702_s26 + $0x2c] sm:$0xf]  ;;  %221 = vst [vmem:[%s1707_s27 + $0xb4] sm:$0xff] %v220_v15  ;;  %v1222_v18 = vld [vmem:[%s1702_s26 + $0x50] sm:$0xf] }
  0x1b   : > { %1219 = vst [vmem:[%s1707_s27 + $0x8] sm:$0xf] %v1218_v16  ;;  %1221 = vst [vmem:[%s1707_s27 + $0x14] sm:$0xf] %v1220_v17  ;;  %v1224_v19 = vld [vmem:[%s1702_s26 + $0x74] sm:$0xf] }
  0x1c   : > { %v1226_v20 = vld [vmem:[%s1702_s26 + $0x98] sm:$0xf]  ;;  %1223 = vst [vmem:[%s1707_s27 + $0x20] sm:$0xf] %v1222_v18  ;;  %1225 = vst [vmem:[%s1707_s27 + $0x2c] sm:$0xf] %v1224_v19 }
  0x1d   : > { %1227 = vst [vmem:[%s1707_s27 + $0x38] sm:$0xf] %v1226_v20  ;;  %v1228_v21 = vld [vmem:[%s1702_s26 + $0xbc] sm:$0xf]  ;;  %v1230_v22 = vld [vmem:[%s1702_s26 + $0xe0] sm:$0xf] }
  0x1e   : > { %v1232_v23 = vld [vmem:[%s1702_s26 + $0x104] sm:$0xf]  ;;  %1229 = vst [vmem:[%s1707_s27 + $0x44] sm:$0xf] %v1228_v21  ;;  %1231 = vst [vmem:[%s1707_s27 + $0x50] sm:$0xf] %v1230_v22 }
  0x1f   : > { %1233 = vst [vmem:[%s1707_s27 + $0x5c] sm:$0xf] %v1232_v23  ;;  %v1234_v24 = vld [vmem:[%s1702_s26 + $0x128] sm:$0xf]  ;;  %v1236_v25 = vld [vmem:[%s1702_s26 + $0x14c] sm:$0xf] }
  0x20   : > { %v1238_v26 = vld [vmem:[%s1702_s26 + $0x170] sm:$0xf]  ;;  %1235 = vst [vmem:[%s1707_s27 + $0x68] sm:$0xf] %v1234_v24  ;;  %1237 = vst [vmem:[%s1707_s27 + $0x74] sm:$0xf] %v1236_v25 }
  0x21   : > { %1239 = vst [vmem:[%s1707_s27 + $0x80] sm:$0xf] %v1238_v26  ;;  %v1240_v27 = vld [vmem:[%s1702_s26 + $0x194] sm:$0xf]  ;;  %v1242_v28 = vld [vmem:[%s1702_s26 + $0x1b8] sm:$0xf] }
  0x22   : > { %v1244_v29 = vld [vmem:[%s1702_s26 + $0x1dc] sm:$0xf]  ;;  %1241 = vst [vmem:[%s1707_s27 + $0x8c] sm:$0xf] %v1240_v27  ;;  %1243 = vst [vmem:[%s1707_s27 + $0x98] sm:$0xf] %v1242_v28 }
  0x23   : > { %1245 = vst [vmem:[%s1707_s27 + $0xa4] sm:$0xf] %v1244_v29  ;;  %v1246_v30 = vld [vmem:[%s1702_s26 + $0x200] sm:$0xf]  ;;  %v1248_v31 = vld [vmem:[%s1702_s26 + $0x224] sm:$0xf] }
  0x24   : > { %1247 = vst [vmem:[%s1707_s27 + $0xb0] sm:$0xf] %v1246_v30  ;;  %1249 = vst [vmem:[%s1707_s27 + $0xbc] sm:$0xf] %v1248_v31 }
  0x25 PF: > { %p1250_p6 = scmp.ge.s32.totalorder %s1636_s16, 1  ;;  %p277_p7 = scmp.lt.s32.totalorder %s1636_s16, 4 }
  0x27   : > { %p278_p8 = pnand %p1250_p6, %p277_p7 }
  0x28   : > { %s284_s28 = sand.u32 (!%p278_p8), 1, %s1620_s12   ;;  %s323_s29 = smul.u32 (!%p278_p8), 48, %s1628_s14 }
  0x29   : > { %281 = sbr.rel (%p278_p8) target bundleno = 383 (0x17f), region = 54  ;;  %p1252_p10 = scmp.ne.s32.totalorder (!%p278_p8), %s1628_s14, 0 }
  0x2a   : > { %s1500_s30 = smul.u32 (!%p278_p8), 192, %s284_s28  ;;  %p324_p9 = scmp.lt.s32.totalorder (!%p278_p8), %s323_s29, 143 }
  0x2c   : > { %s1779_s8 = scalar_lea.vmem (!%p278_p8), [#allocation3], %s1500_s30 }
  0x30   : > { %s1884_s29 = smov (!%p324_p9, %s323_s29), 143  ;;  %348 = sbr.rel (%p1252_p10) target bundleno = 58 (0x3a), region = 62 }
  0x31   : > { %s1251_s4 = sshll.u32 %s1884_s29, 2  ;;  %v1638_v32 = vmov (!%p1252_p10), 0.0  }
  0x32   : > { %s1777_s7 = scalar_lea.vmem %s1874_s1, %s1251_s4  ;;  %349 = vst [vmem:[#allocation2] sm:$0xff] (!%p1252_p10), %v1638_v32  ;;  %350 = vst [vmem:[#allocation2 + $0x8] sm:$0xff] (!%p1252_p10), %v1638_v32 }
  0x33   : > { %351 = vst [vmem:[#allocation2 + $0x10] sm:$0xff] (!%p1252_p10), %v1638_v32  ;;  %352 = vst [vmem:[#allocation2 + $0x18] sm:$0xff] (!%p1252_p10), %v1638_v32 }
  0x34   : > { %353 = vst [vmem:[#allocation2 + $0x20] sm:$0xff] (!%p1252_p10), %v1638_v32  ;;  %354 = vst [vmem:[#allocation2 + $0x28] sm:$0xff] (!%p1252_p10), %v1638_v32 }
  0x35   : > { %355 = vst [vmem:[#allocation2 + $0x30] sm:$0xff] (!%p1252_p10), %v1638_v32  ;;  %356 = vst [vmem:[#allocation2 + $0x38] sm:$0xff] (!%p1252_p10), %v1638_v32 }
  0x36   : > { %357 = vst [vmem:[#allocation2 + $0x40] sm:$0xff] (!%p1252_p10), %v1638_v32  ;;  %358 = vst [vmem:[#allocation2 + $0x48] sm:$0xff] (!%p1252_p10), %v1638_v32 }
  0x37   : > { %359 = vst [vmem:[#allocation2 + $0x50] sm:$0xff] %v1638_v32  ;;  %360 = vst [vmem:[#allocation2 + $0x58] sm:$0xff] %v1638_v32 }
  0x38   : > { %361 = vst [vmem:[#allocation2 + $0x60] sm:$0xff] %v1638_v32  ;;  %362 = vst [vmem:[#allocation2 + $0x68] sm:$0xff] %v1638_v32 }
  0x39   : > { %363 = vst [vmem:[#allocation2 + $0x70] sm:$0xff] %v1638_v32  ;;  %364 = vst [vmem:[#allocation2 + $0x78] sm:$0xff] %v1638_v32 }
  0x3a PF: > { %v1542_v33 = vld [vmem:[%s1777_s7 + $0x40] sm:$0xff]   ;;  %v1545_v36 = vld [vmem:[%s1777_s7 + $0x48] sm:$0xff]   ;;  %v1548_v39 = vld [vmem:[%s1777_s7 + $0x50] sm:$0xff]   ;;  %p1301_p11 = scmp.ne.s32.totalorder %s1628_s14, 2 }
  0x3b   : > { %v1543_v34 = vld [vmem:[%s1777_s7] sm:$0xff]   ;;  %1387 = vmatprep.subr.bf16.mxu0 %v1542_v33  ;;  %v1546_v37 = vld [vmem:[%s1777_s7 + $0x8] sm:$0xff]   ;;  %v1549_v40 = vld [vmem:[%s1777_s7 + $0x10] sm:$0xff]  }
  0x3c   : > { %v1544_v35 = vld [vmem:[%s1777_s7 + $0x80] sm:$0xff]   ;;  %1388 = vmatpush3.bf16.msra.mxu0 %v1543_v34  ;;  %v1547_v38 = vld [vmem:[%s1777_s7 + $0x88] sm:$0xff]   ;;  %v1550_v41 = vld [vmem:[%s1777_s7 + $0x90] sm:$0xff]  }
  0x3d   : > { %1467 = vmatprep.subr.bf16.mxu1 %v1544_v35  ;;  %1389 = vmatprep.subr.bf16.mxu0 %v1545_v36  ;;  %v1551_v42 = vld [vmem:[%s1777_s7 + $0x58] sm:$0xff]   ;;  %v1554_v45 = vld [vmem:[%s1777_s7 + $0x60] sm:$0xff]   ;;  %v1557_v48 = vld [vmem:[%s1777_s7 + $0x68] sm:$0xff]  }
  0x3e   : > { %1468 = vmatpush3.bf16.msra.mxu1 %v1544_v35  ;;  %v1552_v43 = vld [vmem:[%s1777_s7 + $0x18] sm:$0xff]   ;;  %v1556_v46 = vld [vmem:[%s1777_s7 + $0xa0] sm:$0xff]   ;;  %v1559_v49 = vld [vmem:[%s1777_s7 + $0xa8] sm:$0xff]  }
  0x3f   : > { %1469 = vmatprep.subr.bf16.mxu1 %v1547_v38  ;;  %v1553_v44 = vld [vmem:[%s1777_s7 + $0x98] sm:$0xff]   ;;  %v1555_v47 = vld [vmem:[%s1777_s7 + $0x20] sm:$0xff]   ;;  %v1558_v50 = vld [vmem:[%s1777_s7 + $0x28] sm:$0xff]  }
  0x40   : > { %1390 = vmatpush3.bf16.msra.mxu0 %v1546_v37  ;;  %v1560_v51 = vld [vmem:[%s1777_s7 + $0x70] sm:$0xff]   ;;  %v1563_v54 = vld [vmem:[%s1777_s7 + $0x78] sm:$0xff]   ;;  %v1566_v59 = vld [vmem:[%s1779_s8] ss:$12 sps:$4 sm:$0xff]  }
  0x41   : > { %1391 = vmatprep.subr.bf16.mxu0 %v1548_v39  ;;  %v1561_v52 = vld [vmem:[%s1777_s7 + $0x30] sm:$0xff]   ;;  %v1565_v55 = vld [vmem:[%s1777_s7 + $0xb8] sm:$0xff]   ;;  %v1570_v61 = vld [vmem:[%s1779_s8 + $0x20] ss:$12 sps:$4 sm:$0xff]  }
  0x42   : > { %1470 = vmatpush3.bf16.msra.mxu1 %v1547_v38  ;;  %v1562_v53 = vld [vmem:[%s1777_s7 + $0xb0] sm:$0xff]   ;;  %v1564_v58 = vld [vmem:[%s1777_s7 + $0x38] sm:$0xff]   ;;  %v1586_v5 = vld [vmem:[%s1779_s8 + $0x80] ss:$12 sps:$4 sm:$0xff]  }
  0x43   : > { %1471 = vmatprep.subr.bf16.mxu1 %v1550_v41  ;;  %v1568_v56 = vld [vmem:[%s1779_s8 + $0x4] ss:$12 sps:$4 sm:$0xff]   ;;  %v1569_v57 = vld [vmem:[%s1779_s8 + $0x8] ss:$12 sps:$4 sm:$0xff]   ;;  %v1579_v4 = vld [vmem:[%s1779_s8 + $0x4c] ss:$12 sps:$4 sm:$0xff]  }
  0x44   : > { %1392 = vmatpush3.bf16.msra.mxu0 %v1549_v40  ;;  %765 = vmatprep.mubr.bf16.mxu0 %v1568_v56  ;;  %v1571_v60 = vld [vmem:[%s1779_s8 + $0x1c] ss:$12 sps:$4 sm:$0xff]   ;;  %v1577_v62 = vld [vmem:[%s1779_s8 + $0x38] ss:$12 sps:$4 sm:$0xff]   ;;  %v1574_v0 = vld [vmem:[%s1779_s8 + $0x34] ss:$12 sps:$4 sm:$0xff]  }
  0x45   : > { %1393 = vmatprep.subr.bf16.mxu0 %v1551_v42  ;;  %1483 = vmatprep.mubr.bf16.mxu1 %v1569_v57  ;;  %v1573_v63 = vld [vmem:[%s1779_s8 + $0x18] ss:$12 sps:$4 sm:$0xff]   ;;  %v1578_v1 = vld [vmem:[%s1779_s8 + $0x50] ss:$12 sps:$4 sm:$0xff]   ;;  %v1585_v2 = vld [vmem:[%s1779_s8 + $0x68] ss:$12 sps:$4 sm:$0xff]  }
  0x46   : > { %1472 = vmatpush3.bf16.msra.mxu1 %v1550_v41  ;;  %v1576_v3 = vld [vmem:[%s1779_s8 + $0x30] ss:$12 sps:$4 sm:$0xff]   ;;  %v1593_v6 = vld [vmem:[%s1779_s8 + $0x98] ss:$12 sps:$4 sm:$0xff]   ;;  %v1581_v7 = vld [vmem:[%s1779_s8 + $0x48] ss:$12 sps:$4 sm:$0xff]  }
  0x47   : > { %1473 = vmatprep.subr.bf16.mxu1 %v1553_v44  ;;  %v1582_v8 = vld [vmem:[%s1779_s8 + $0x64] ss:$12 sps:$4 sm:$0xff]   ;;  %v1584_v10 = vld [vmem:[%s1779_s8 + $0x60] ss:$12 sps:$4 sm:$0xff]   ;;  %v1587_v11 = vld [vmem:[%s1779_s8 + $0x7c] ss:$12 sps:$4 sm:$0xff]  }
  0x48   : > { %1394 = vmatpush3.bf16.msra.mxu0 %v1552_v43  ;;  %v1594_v9 = vld [vmem:[%s1779_s8 + $0xb0] ss:$12 sps:$4 sm:$0xff]   ;;  %v1589_v12 = vld [vmem:[%s1779_s8 + $0x78] ss:$12 sps:$4 sm:$0xff]   ;;  %v1590_v13 = vld [vmem:[%s1779_s8 + $0x94] ss:$12 sps:$4 sm:$0xff]  }
  0x49   : > { %1395 = vmatprep.subr.bf16.mxu0 %v1554_v45  ;;  %v1592_v14 = vld [vmem:[%s1779_s8 + $0x90] ss:$12 sps:$4 sm:$0xff]   ;;  %v1595_v15 = vld [vmem:[%s1779_s8 + $0xac] ss:$12 sps:$4 sm:$0xff]   ;;  %v1597_v16 = vld [vmem:[%s1779_s8 + $0xa8] ss:$12 sps:$4 sm:$0xff]  }
  0x4a   : > { %1474 = vmatpush3.bf16.msra.mxu1 %v1553_v44  ;;  %v365_v23 = vld [vmem:[#allocation2] sm:$0xff]  ;;  %v366_v28 = vld [vmem:[#allocation2 + $0x8] sm:$0xff]  ;;  %v367_v38 = vld [vmem:[#allocation2 + $0x10] sm:$0xff] }
  0x4b   : > { %1475 = vmatprep.subr.bf16.mxu1 %v1556_v46  ;;  %v368_v44 = vld [vmem:[#allocation2 + $0x18] sm:$0xff] }
  0x4c   : > { %1396 = vmatpush3.bf16.msra.mxu0 %v1555_v47 }
  0x4d   : > { %1397 = vmatprep.subr.bf16.mxu0 %v1557_v48 }
  0x4e   : > { %1476 = vmatpush3.bf16.msra.mxu1 %v1556_v46 }
  0x4f   : > { %1477 = vmatprep.subr.bf16.mxu1 %v1559_v49 }
  0x50   : > { %1398 = vmatpush3.bf16.msra.mxu0 %v1558_v50 }
  0x51   : > { %1399 = vmatprep.subr.bf16.mxu0 %v1560_v51 }
  0x52   : > { %1478 = vmatpush3.bf16.msra.mxu1 %v1559_v49 }
  0x53   : > { %1479 = vmatprep.subr.bf16.mxu1 %v1562_v53 }
  0x54   : > { %1400 = vmatpush3.bf16.msra.mxu0 %v1561_v52 }
  0x55   : > { %1401 = vmatprep.subr.bf16.mxu0 %v1563_v54 }
  0x56   : > { %1480 = vmatpush3.bf16.msra.mxu1 %v1562_v53 }
  0x57   : > { %1481 = vmatprep.subr.bf16.mxu1 %v1565_v55 }
  0x58   : > { %1402 = vmatpush3.bf16.msra.mxu0 %v1564_v58 }
  0x5a   : > { %1482 = vmatpush3.bf16.msra.mxu1 %v1565_v55  ;;  %v369_v55 = vld [vmem:[#allocation2 + $0x20] sm:$0xff] }
  0x5b   : > { %766 = vmatmul.mubr.bf16.vlgmr.msra.gmra.mrb[0].mxu0 %v1566_v59 }
  0x5c   : > { %773 = vmatprep.mubr.bf16.mxu0 %v1571_v60  ;;  %v370_v60 = vld [vmem:[#allocation2 + $0x28] sm:$0xff] }
  0x5d   : > { %1484 = vmatmul.mubr.bf16.vlgmr.msra.gmra.mrb[0].mxu1 %v1570_v61 }
  0x5e   : > { %1487 = vmatprep.mubr.bf16.mxu1 %v1577_v62 }
  0x63   : > { %774 = vmatmul.mubr.bf16.gmra.mrb[4].mxu0 %v1573_v63 }
  0x64   : > { %781 = vmatprep.mubr.bf16.mxu0 %v1574_v0 }
  0x65   : > { %1488 = vmatmul.mubr.bf16.gmra.mrb[4].mxu1 %v1578_v1 }
  0x66   : > { %1491 = vmatprep.mubr.bf16.mxu1 %v1585_v2 }
  0x6b   : > { %782 = vmatmul.mubr.bf16.gmra.mrb[8].mxu0 %v1576_v3 }
  0x6c   : > { %789 = vmatprep.mubr.bf16.mxu0 %v1579_v4 }
  0x6d   : > { %1492 = vmatmul.mubr.bf16.gmra.mrb[8].mxu1 %v1586_v5 }
  0x6e   : > { %1495 = vmatprep.mubr.bf16.mxu1 %v1593_v6  ;;  %v371_v6 = vld [vmem:[#allocation2 + $0x30] sm:$0xff] }
  0x73   : > { %790 = vmatmul.mubr.bf16.gmra.mrb[12].mxu0 %v1581_v7 }
  0x74   : > { %797 = vmatprep.mubr.bf16.mxu0 %v1582_v8 }
  0x75   : > { %1496 = vmatmul.mubr.bf16.gmra.mrb[12].mxu1 %v1594_v9 }
  0x7b   : > { %798 = vmatmul.mubr.bf16.gmra.mrb[16].mxu0 %v1584_v10 }
  0x7c   : > { %805 = vmatprep.mubr.bf16.mxu0 %v1587_v11 }
  0x83   : > { %806 = vmatmul.mubr.bf16.gmra.mrb[20].mxu0 %v1589_v12  ;;  %v372_v12 = vld [vmem:[#allocation2 + $0x38] sm:$0xff] }
  0x84   : > { %813 = vmatprep.mubr.bf16.mxu0 %v1590_v13 }
  0x8b   : > { %814 = vmatmul.mubr.bf16.gmra.mrb[24].mxu0 %v1592_v14 }
  0x8c   : > { %821 = vmatprep.mubr.bf16.mxu0 %v1595_v15 }
  0x93   : > { %822 = vmatmul.mubr.bf16.gmra.mrb[28].mxu0 %v1597_v16 }
 0x12e   : > { %v1403_v17 = vpop.f32.mrb[0].mxu0 }
 0x12f   : > { %v1404_v18 = vpop.f32.mrb[1].mxu0 }
 0x130   : > { %v1405_v19 = vadd.f32 %v1404_v18, %v1403_v17  ;;  %v1406_v20 = vpop.f32.mrb[2].mxu0  ;;  %v1485_v21 = vpop.f32.mrb[0].mxu1 }
 0x131   : > { %v1407_v22 = vpop.f32.mrb[3].mxu0  ;;  %v864_v24 = vpop.f32.mrb[1].mxu1 }
 0x132   : > { %v1408_v25 = vadd.f32 %v1407_v22, %v1406_v20  ;;  %v865_v26 = vadd.f32 %v1405_v19, %v864_v24  ;;  %v1486_v27 = vpop.f32.mrb[2].mxu1  ;;  %v373_v22 = vld [vmem:[#allocation2 + $0x40] sm:$0xff] }
 0x133   : > { %v867_v29 = vpop.f32.mrb[3].mxu1 }
 0x134   : > { %v927_v30 = vadd.f32 %v865_v26, %v365_v23  ;;  %v868_v31 = vadd.f32 %v1408_v25, %v867_v29  ;;  %v374_v25 = vld [vmem:[#allocation2 + $0x48] sm:$0xff] }
 0x136   : > { %943 = vst [vmem:[#allocation2] sm:$0xff] %v927_v30  ;;  %v928_v32 = vadd.f32 %v868_v31, %v366_v28  ;;  %v1409_v33 = vpop.f32.mrb[4].mxu0 }
 0x137   : > { %v1410_v34 = vpop.f32.mrb[5].mxu0 }
 0x138   : > { %944 = vst [vmem:[#allocation2 + $0x8] sm:$0xff] %v928_v32  ;;  %v1411_v35 = vadd.f32 %v1410_v34, %v1409_v33  ;;  %v1412_v36 = vpop.f32.mrb[6].mxu0  ;;  %v1489_v37 = vpop.f32.mrb[4].mxu1  ;;  %v375_v33 = vld [vmem:[#allocation2 + $0x50] sm:$0xff] }
 0x139   : > { %v1413_v39 = vpop.f32.mrb[7].mxu0  ;;  %v880_v40 = vpop.f32.mrb[5].mxu1 }
 0x13a   : > { %v873_v41 = vadd.f32 %v1485_v21, %v1411_v35  ;;  %v1414_v42 = vadd.f32 %v1413_v39, %v1412_v36  ;;  %v1490_v43 = vpop.f32.mrb[6].mxu1 }
 0x13b   : > { %v883_v45 = vpop.f32.mrb[7].mxu1 }
 0x13c   : > { %v929_v46 = vadd.f32 %v873_v41, %v367_v38  ;;  %v876_v47 = vadd.f32 %v1486_v27, %v1414_v42 }
 0x13e   : > { %945 = vst [vmem:[#allocation2 + $0x10] sm:$0xff] %v929_v46  ;;  %v930_v48 = vadd.f32 %v876_v47, %v368_v44  ;;  %v1415_v49 = vpop.f32.mrb[8].mxu0  ;;  %v377_v46 = vld [vmem:[#allocation2 + $0x60] sm:$0xff] }
 0x13f   : > { %v1416_v50 = vpop.f32.mrb[9].mxu0 }
 0x140   : > { %946 = vst [vmem:[#allocation2 + $0x18] sm:$0xff] %v930_v48  ;;  %v1417_v51 = vadd.f32 %v1416_v50, %v1415_v49  ;;  %v1418_v52 = vpop.f32.mrb[10].mxu0  ;;  %v1493_v53 = vpop.f32.mrb[8].mxu1  ;;  %v378_v49 = vld [vmem:[#allocation2 + $0x68] sm:$0xff] }
 0x141   : > { %v1419_v54 = vpop.f32.mrb[11].mxu0  ;;  %v896_v56 = vpop.f32.mrb[9].mxu1 }
 0x142   : > { %v1420_v57 = vadd.f32 %v1419_v54, %v1418_v52  ;;  %v881_v58 = vadd.f32 %v1417_v51, %v880_v40  ;;  %v1494_v59 = vpop.f32.mrb[10].mxu1 }
 0x143   : > { %v899_v61 = vpop.f32.mrb[11].mxu1 }
 0x144   : > { %v931_v62 = vadd.f32 %v881_v58, %v369_v55  ;;  %v884_v63 = vadd.f32 %v1420_v57, %v883_v45  ;;  %v379_v57 = vld [vmem:[#allocation2 + $0x70] sm:$0xff] }
 0x146   : > { %947 = vst [vmem:[#allocation2 + $0x20] sm:$0xff] %v931_v62  ;;  %v932_v0 = vadd.f32 %v884_v63, %v370_v60  ;;  %v1421_v1 = vpop.f32.mrb[12].mxu0 }
 0x147   : > { %v1422_v2 = vpop.f32.mrb[13].mxu0 }
 0x148   : > { %948 = vst [vmem:[#allocation2 + $0x28] sm:$0xff] %v932_v0  ;;  %v1423_v3 = vadd.f32 %v1422_v2, %v1421_v1  ;;  %v1424_v4 = vpop.f32.mrb[14].mxu0  ;;  %v1497_v5 = vpop.f32.mrb[12].mxu1  ;;  %v963_v1 = vld [vmem:[#allocation2] sm:$0xff] (!%p1301_p11)  ;;  %v964_v2 = vld [vmem:[#allocation2 + $0x8] sm:$0xff] (!%p1301_p11) }
 0x149   : > { %v1425_v7 = vpop.f32.mrb[15].mxu0  ;;  %v912_v8 = vpop.f32.mrb[13].mxu1 }
 0x14a   : > { %v889_v9 = vadd.f32 %v1489_v37, %v1423_v3  ;;  %v1426_v10 = vadd.f32 %v1425_v7, %v1424_v4  ;;  %v1498_v11 = vpop.f32.mrb[14].mxu1  ;;  %v376_v37 = vld [vmem:[#allocation2 + $0x58] sm:$0xff]  ;;  %v1302_v3 = vld [vmem:[%s1875_s2] ss:$0 sm:$0xff] (!%p1301_p11)  ;;  %v965_v7 = vld [vmem:[#allocation2 + $0x10] sm:$0xff] (!%p1301_p11) }
 0x14b   : > { %v915_v13 = vpop.f32.mrb[15].mxu1  ;;  %v986_v4 = vadd.f32 (!%p1301_p11), %v1302_v3, %v963_v1 }
 0x14c   : > { %v933_v14 = vadd.f32 %v889_v9, %v371_v6  ;;  %v892_v15 = vadd.f32 %v1490_v43, %v1426_v10  ;;  %v987_v6 = vadd.f32 (!%p1301_p11), %v1302_v3, %v964_v2  ;;  %v988_v9 = vadd.f32 (!%p1301_p11), %v1302_v3, %v965_v7 }
 0x14e   : > { %949 = vst [vmem:[#allocation2 + $0x30] sm:$0xff] %v933_v14  ;;  %v934_v16 = vadd.f32 %v892_v15, %v372_v12  ;;  %v1427_v17 = vpop.f32.mrb[16].mxu0  ;;  %v1002_v15 = vmax.f32 (!%p1301_p11), %v986_v4, 0.0 }
 0x14f   : > { %v1428_v18 = vpop.f32.mrb[17].mxu0 }
 0x150   : > { %950 = vst [vmem:[#allocation2 + $0x38] sm:$0xff] %v934_v16  ;;  %v1429_v19 = vadd.f32 %v1428_v18, %v1427_v17  ;;  %v1430_v20 = vpop.f32.mrb[18].mxu0  ;;  %v1003_v16 = vmax.f32 (!%p1301_p11), %v987_v6, 0.0 }
 0x151   : > { %v1431_v21 = vpop.f32.mrb[19].mxu0 }
 0x152   : > { %v1432_v23 = vadd.f32 %v1431_v21, %v1430_v20  ;;  %v897_v24 = vadd.f32 %v1429_v19, %v896_v56 }
 0x154   : > { %v935_v26 = vadd.f32 %v897_v24, %v373_v22  ;;  %v900_v27 = vadd.f32 %v1432_v23, %v899_v61  ;;  %v380_v61 = vld [vmem:[#allocation2 + $0x78] sm:$0xff]  ;;  %v1004_v22 = vmax.f32 (!%p1301_p11), %v988_v9, 0.0 }
 0x156   : > { %951 = vst [vmem:[#allocation2 + $0x40] sm:$0xff] %v935_v26  ;;  %v936_v28 = vadd.f32 %v900_v27, %v374_v25  ;;  %v1433_v29 = vpop.f32.mrb[20].mxu0 }
 0x157   : > { %v1434_v30 = vpop.f32.mrb[21].mxu0  ;;  %v970_v14 = vld [vmem:[#allocation2 + $0x38] sm:$0xff] (!%p1301_p11) }
 0x158   : > { %952 = vst [vmem:[#allocation2 + $0x48] sm:$0xff] %v936_v28  ;;  %v1435_v31 = vadd.f32 %v1434_v30, %v1433_v29  ;;  %v1436_v32 = vpop.f32.mrb[22].mxu0  ;;  %v993_v25 = vadd.f32 (!%p1301_p11), %v1302_v3, %v970_v14  ;;  %v1343_v28 = vpack.c.bf16 (!%p1301_p11), %v1003_v16, %v1002_v15 }
 0x159   : > { %v1437_v34 = vpop.f32.mrb[23].mxu0 }
 0x15a   : > { %v905_v35 = vadd.f32 %v1493_v53, %v1435_v31  ;;  %v1438_v36 = vadd.f32 %v1437_v34, %v1436_v32  ;;  %v1009_v34 = vmax.f32 (!%p1301_p11), %v993_v25, 0.0  ;;  %1344 = vst [vmem:[%s1876_s3] sm:$0xff] (!%p1301_p11), %v1343_v28  }
 0x15c   : > { %v937_v38 = vadd.f32 %v905_v35, %v375_v33  ;;  %v908_v39 = vadd.f32 %v1494_v59, %v1438_v36 }
 0x15d   : > { %v971_v19 = vld [vmem:[#allocation2 + $0x40] sm:$0xff] (!%p1301_p11) }
 0x15e   : > { %953 = vst [vmem:[#allocation2 + $0x50] sm:$0xff] %v937_v38  ;;  %v938_v40 = vadd.f32 %v908_v39, %v376_v37  ;;  %v1439_v41 = vpop.f32.mrb[24].mxu0  ;;  %v994_v31 = vadd.f32 (!%p1301_p11), %v1302_v3, %v971_v19 }
 0x15f   : > { %v1440_v42 = vpop.f32.mrb[25].mxu0  ;;  %v972_v20 = vld [vmem:[#allocation2 + $0x48] sm:$0xff] (!%p1301_p11) }
 0x160   : > { %954 = vst [vmem:[#allocation2 + $0x58] sm:$0xff] %v938_v40  ;;  %v1441_v43 = vadd.f32 %v1440_v42, %v1439_v41  ;;  %v1442_v44 = vpop.f32.mrb[26].mxu0  ;;  %v995_v35 = vadd.f32 (!%p1301_p11), %v1302_v3, %v972_v20  ;;  %v1010_v40 = vmax.f32 (!%p1301_p11), %v994_v31, 0.0 }
 0x161   : > { %v1443_v45 = vpop.f32.mrb[27].mxu0 }
 0x162   : > { %v1444_v47 = vadd.f32 %v1443_v45, %v1442_v44  ;;  %v913_v48 = vadd.f32 %v1441_v43, %v912_v8  ;;  %v967_v8 = vld [vmem:[#allocation2 + $0x20] sm:$0xff] (!%p1301_p11)  ;;  %v1011_v44 = vmax.f32 (!%p1301_p11), %v995_v35, 0.0 }
 0x163   : > { %v990_v12 = vadd.f32 (!%p1301_p11), %v1302_v3, %v967_v8 }
 0x164   : > { %v939_v50 = vadd.f32 %v913_v48, %v377_v46  ;;  %v916_v51 = vadd.f32 %v1444_v47, %v915_v13  ;;  %v969_v13 = vld [vmem:[#allocation2 + $0x30] sm:$0xff] (!%p1301_p11) }
 0x165   : > { %v992_v18 = vadd.f32 (!%p1301_p11), %v1302_v3, %v969_v13  ;;  %v973_v21 = vld [vmem:[#allocation2 + $0x50] sm:$0xff] (!%p1301_p11)  ;;  %v1006_v24 = vmax.f32 (!%p1301_p11), %v990_v12, 0.0 }
 0x166   : > { %955 = vst [vmem:[#allocation2 + $0x60] sm:$0xff] %v939_v50  ;;  %v940_v52 = vadd.f32 %v916_v51, %v378_v49  ;;  %v1445_v53 = vpop.f32.mrb[28].mxu0  ;;  %v996_v36 = vadd.f32 (!%p1301_p11), %v1302_v3, %v973_v21  ;;  %v1363_v51 = vpack.c.bf16 (!%p1301_p11), %v1011_v44, %v1010_v40 }
 0x167   : > { %v1446_v54 = vpop.f32.mrb[29].mxu0  ;;  %v974_v26 = vld [vmem:[#allocation2 + $0x58] sm:$0xff] (!%p1301_p11)  ;;  %v1008_v30 = vmax.f32 (!%p1301_p11), %v992_v18, 0.0 }
 0x168   : > { %956 = vst [vmem:[#allocation2 + $0x68] sm:$0xff] %v940_v52  ;;  %v1447_v55 = vadd.f32 %v1446_v54, %v1445_v53  ;;  %v1448_v56 = vpop.f32.mrb[30].mxu0  ;;  %v997_v41 = vadd.f32 (!%p1301_p11), %v1302_v3, %v974_v26  ;;  %v1012_v45 = vmax.f32 (!%p1301_p11), %v996_v36, 0.0  ;;  %1383 = vst [vmem:[%s1876_s3 + $0x20] sm:$0xff] (!%p1301_p11), %v1363_v51  }
 0x169   : > { %v1449_v58 = vpop.f32.mrb[31].mxu0  ;;  %v1358_v43 = vpack.c.bf16 (!%p1301_p11), %v1009_v34, %v1008_v30 }
 0x16a   : > { %v921_v59 = vadd.f32 %v1497_v5, %v1447_v55  ;;  %v1450_v60 = vadd.f32 %v1449_v58, %v1448_v56  ;;  %962 = sbr.rel (%p1301_p11) target bundleno = 383 (0x17f), region = 66  ;;  %v966_v5 = vld [vmem:[#allocation2 + $0x18] sm:$0xff] (!%p1301_p11)  ;;  %v1013_v47 = vmax.f32 (!%p1301_p11), %v997_v41, 0.0 }
 0x16b   : > { %v989_v10 = vadd.f32 (!%p1301_p11), %v1302_v3, %v966_v5  ;;  %1382 = vst [vmem:[%s1876_s3 + $0x18] sm:$0xff] (!%p1301_p11), %v1358_v43  }
 0x16c   : > { %v941_v62 = vadd.f32 %v921_v59, %v379_v57  ;;  %v924_v63 = vadd.f32 %v1498_v11, %v1450_v60  ;;  %v968_v11 = vld [vmem:[#allocation2 + $0x28] sm:$0xff] (!%p1301_p11)  ;;  %v1368_v53 = vpack.c.bf16 (!%p1301_p11), %v1013_v47, %v1012_v45 }
 0x16d   : > { %v991_v17 = vadd.f32 (!%p1301_p11), %v1302_v3, %v968_v11  ;;  %v1005_v23 = vmax.f32 (!%p1301_p11), %v989_v10, 0.0  ;;  %v975_v27 = vld [vmem:[#allocation2 + $0x60] sm:$0xff] (!%p1301_p11) }
 0x16e   : > { %957 = vst [vmem:[#allocation2 + $0x70] sm:$0xff] %v941_v62  ;;  %v942_v0 = vadd.f32 %v924_v63, %v380_v61  ;;  %v998_v42 = vadd.f32 (!%p1301_p11), %v1302_v3, %v975_v27  ;;  %1384 = vst [vmem:[%s1876_s3 + $0x28] sm:$0xff] (!%p1301_p11), %v1368_v53  }
 0x16f   : > { %v1007_v29 = vmax.f32 (!%p1301_p11), %v991_v17, 0.0  ;;  %v976_v32 = vld [vmem:[#allocation2 + $0x68] sm:$0xff] (!%p1301_p11)  ;;  %v1348_v33 = vpack.c.bf16 (!%p1301_p11), %v1005_v23, %v1004_v22 }
 0x170   : > { %958 = vst [vmem:[#allocation2 + $0x78] sm:$0xff] %v942_v0  ;;  %v999_v46 = vadd.f32 (!%p1301_p11), %v1302_v3, %v976_v32  ;;  %v1014_v48 = vmax.f32 (!%p1301_p11), %v998_v42, 0.0 }
 0x171   : > { %v1353_v39 = vpack.c.bf16 %v1007_v29, %v1006_v24  ;;  %1380 = vst [vmem:[%s1876_s3 + $0x8] sm:$0xff] %v1348_v33  }
 0x172   : > { %v1015_v52 = vmax.f32 %v999_v46, 0.0 }
 0x173   : > { %1381 = vst [vmem:[%s1876_s3 + $0x10] sm:$0xff] %v1353_v39  }
 0x174   : > { %v1373_v56 = vpack.c.bf16 %v1015_v52, %v1014_v48 }
 0x175   : > { %v977_v37 = vld [vmem:[#allocation2 + $0x70] sm:$0xff] }
 0x176   : > { %v1000_v49 = vadd.f32 %v1302_v3, %v977_v37  ;;  %1385 = vst [vmem:[%s1876_s3 + $0x30] sm:$0xff] %v1373_v56  }
 0x177   : > { %v978_v38 = vld [vmem:[#allocation2 + $0x78] sm:$0xff] }
 0x178   : > { %v1001_v50 = vadd.f32 %v1302_v3, %v978_v38  ;;  %v1016_v54 = vmax.f32 %v1000_v49, 0.0 }
 0x17a   : > { %v1017_v55 = vmax.f32 %v1001_v50, 0.0 }
 0x17c   : > { %v1378_v57 = vpack.c.bf16 %v1017_v55, %v1016_v54 }
 0x17e   : > { %1386 = vst [vmem:[%s1876_s3 + $0x38] sm:$0xff] %v1378_v57  }
 0x17f PF: > { %s13_s16 = sadd.s32 1, %s1636_s16   ;;  %s1877_s12 = smov %s1624_s13 }
 0x180   : > { %p10_p12 = scmp.ge.s32.totalorder %s13_s16, 5   ;;  %s1878_s13 = smov %s1694_s20 }
 0x181   : > { %s1879_s14 = smov %s1632_s15  ;;  %s1880_s15 = smov %s1882_s17 }
 0x182   :  { %12 = sbr.rel (!%p10_p12) target bundleno = 3 (0x3), region = 113 }

// kernel: dual_grad_loss.40
= control target key start
LH: loop header
LB: loop body
LE: loop exit
PB: predicated region body
PF: predicated region fallthrough
CT: control target
= control target key end

     0   :  { %s1260_s12 = smov 0   ;;  %s1262_s13 = smov 0   ;;  %s1402_s0 = inlined_call_operand.vmem [shape: bf16[32,1152], index: 0, kind: input, shape index: {}]   ;;  %s1403_s1 = inlined_call_operand.vmem [shape: bf16[1152,256], index: 1, kind: input, shape index: {}]   ;;  %s1404_s2 = inlined_call_operand.vmem [shape: f32[1,256], index: 2, kind: input, shape index: {}]   ;;  %s1405_s3 = inlined_call_operand.vmem [shape: bf16[32,256], index: 3, kind: output, shape index: {}]  }
   0x1   :  { %s1264_s14 = smov 0   ;;  %s1266_s15 = smov 0  }
   0x2   :  { %s1268_s16 = smov 0  }
   0x3 LB: > { %s25_s17 = sadd.s32 1, %s1232_s15  ;;  %p48_p1 = scmp.ne.s32.totalorder %s1224_s13, %s1220_s12  ;;  %s1236_s16 = sphi %s1268_s16, %s13_s16   ;;  %s1232_s15 = sphi %s1266_s15, %s1409_s15   ;;  %s1228_s14 = sphi %s1264_s14, %s1408_s14   ;;  %s1224_s13 = sphi %s1262_s13, %s1407_s13   ;;  %s1220_s12 = sphi %s1260_s12, %s1406_s12  }
   0x4   : > { %p26_p0 = scmp.ge.s32.totalorder %s25_s17, 3  ;;  %p49_p2 = scmp.eq.s32.totalorder %s1236_s16, 0 }
   0x5   : > { %s41_s19 = sadd.s32 1, %s1224_s13  ;;  %p983_p5 = scmp.ge.s32.totalorder %s1236_s16, 3 }
   0x6   : > { %s1411_s17 = smov (%p26_p0, %s25_s17), 0  ;;  %p50_p3 = por %p49_p2, %p48_p1 }
   0x7   : > { %s37_s18 = ssub.s32 %s1232_s15, %s1411_s17  ;;  %164 = sbr.rel (%p983_p5) target bundleno = 23 (0x17), region = 20 }
   0x8   : > { %p39_p4 = scmp.eq.s32.totalorder %s37_s18, 0 }
   0xa   : > { %s1295_s20 = scalar_select %p39_p4, %s1224_s13, %s41_s19  }
   0xe   : > { %167 = sbr.rel (!%p50_p3) target bundleno = 23 (0x17), region = 24  ;;  %s169_s21 = sand.u32 (%p50_p3), 1, %s1224_s13  }
   0xf   : > { %s1060_s22 = smul.u32 (%p50_p3), 12, %s1232_s15 }
  0x10   : > { %s1074_s23 = smul.u32 (%p50_p3), 48, %s169_s21 }
  0x11   : > { %s177_s26 = scalar_lea.vmem (%p50_p3), %s1402_s0, %s1060_s22 }
  0x12   : > { %v192_v0 = vld [vmem:[%s177_s26] sm:$0xff] (%p50_p3)  ;;  %v196_v2 = vld [vmem:[%s177_s26 + $0x48] sm:$0xff] (%p50_p3)  ;;  %s171_s27 = scalar_lea.vmem (%p50_p3), [#allocation3], %s1074_s23  ;;  %v989_v6 = vld [vmem:[%s177_s26 + $0x50] sm:$0xf] (%p50_p3) }
  0x13   : > { %v194_v1 = vld [vmem:[%s177_s26 + $0x24] sm:$0xff] (%p50_p3)  ;;  %193 = vst [vmem:[%s171_s27] sm:$0xff] (%p50_p3), %v192_v0  ;;  %197 = vst [vmem:[%s171_s27 + $0x18] sm:$0xff] (%p50_p3), %v196_v2  ;;  %v198_v3 = vld [vmem:[%s177_s26 + $0x6c] sm:$0xff] (%p50_p3) }
  0x14   : > { %195 = vst [vmem:[%s171_s27 + $0xc] sm:$0xff] (%p50_p3), %v194_v1  ;;  %v985_v4 = vld [vmem:[%s177_s26 + $0x8] sm:$0xf] (%p50_p3)  ;;  %v987_v5 = vld [vmem:[%s177_s26 + $0x2c] sm:$0xf] (%p50_p3)  ;;  %199 = vst [vmem:[%s171_s27 + $0x24] sm:$0xff] (%p50_p3), %v198_v3 }
  0x15   : > { %986 = vst [vmem:[%s171_s27 + $0x8] sm:$0xf] %v985_v4  ;;  %988 = vst [vmem:[%s171_s27 + $0x14] sm:$0xf] %v987_v5  ;;  %v991_v7 = vld [vmem:[%s177_s26 + $0x74] sm:$0xf] }
  0x16   : > { %990 = vst [vmem:[%s171_s27 + $0x20] sm:$0xf] %v989_v6  ;;  %992 = vst [vmem:[%s171_s27 + $0x2c] sm:$0xf] %v991_v7 }
  0x17 PF: > { %p993_p6 = scmp.ge.s32.totalorder %s1236_s16, 1  ;;  %p234_p7 = scmp.lt.s32.totalorder %s1236_s16, 4 }
  0x19   : > { %p235_p8 = pnand %p993_p6, %p234_p7 }
  0x1a   : > { %s241_s28 = sand.u32 (!%p235_p8), 1, %s1220_s12   ;;  %s285_s29 = smul.u32 (!%p235_p8), 48, %s1228_s14 }
  0x1b   : > { %238 = sbr.rel (%p235_p8) target bundleno = 348 (0x15c), region = 54  ;;  %p996_p10 = scmp.ne.s32.totalorder (!%p235_p8), %s1228_s14, 0 }
  0x1c   : > { %s1075_s30 = smul.u32 (!%p235_p8), 48, %s241_s28  ;;  %p287_p9 = scmp.lt.s32.totalorder (!%p235_p8), %s285_s29, 143 }
  0x1e   : > { %s1312_s8 = scalar_lea.vmem (!%p235_p8), [#allocation3], %s1075_s30 }
  0x22   : > { %s1413_s29 = smov (!%p287_p9, %s285_s29), 143  ;;  %318 = sbr.rel (%p996_p10) target bundleno = 41 (0x29), region = 62 }
  0x23   : > { %s1061_s4 = sshll.u32 %s1413_s29, 3  ;;  %v1238_v8 = vmov (!%p996_p10), 0.0  }
  0x24   : > { %s1310_s7 = scalar_lea.vmem %s1403_s1, %s1061_s4  ;;  %319 = vst [vmem:[#allocation2] sm:$0xff] (!%p996_p10), %v1238_v8  ;;  %320 = vst [vmem:[#allocation2 + $0x8] sm:$0xff] (!%p996_p10), %v1238_v8 }
  0x25   : > { %321 = vst [vmem:[#allocation2 + $0x10] sm:$0xff] (!%p996_p10), %v1238_v8  ;;  %322 = vst [vmem:[#allocation2 + $0x18] sm:$0xff] (!%p996_p10), %v1238_v8 }
  0x26   : > { %323 = vst [vmem:[#allocation2 + $0x20] sm:$0xff] (!%p996_p10), %v1238_v8  ;;  %324 = vst [vmem:[#allocation2 + $0x28] sm:$0xff] (!%p996_p10), %v1238_v8 }
  0x27   : > { %325 = vst [vmem:[#allocation2 + $0x30] sm:$0xff] (!%p996_p10), %v1238_v8  ;;  %326 = vst [vmem:[#allocation2 + $0x38] sm:$0xff] (!%p996_p10), %v1238_v8 }
  0x29 PF: > { %v1118_v9 = vld [vmem:[%s1310_s7 + $0x4] ss:$8 sps:$4 sm:$0xff]   ;;  %v1120_v10 = vld [vmem:[%s1310_s7] ss:$8 sps:$4 sm:$0xff]   ;;  %v1239_v11 = vmov 0   ;;  %p1051_p11 = scmp.ne.s32.totalorder %s1228_s14, 2 }
  0x2a   : > { %748 = vmatprep.mubr.bf16.mxu0 %v1239_v11  ;;  %663 = vmatprep.subr.bf16.mxu1 %v1118_v9  ;;  %v1121_v12 = vld [vmem:[%s1310_s7 + $0x14] ss:$8 sps:$4 sm:$0xff]   ;;  %v1123_v13 = vld [vmem:[%s1310_s7 + $0x10] ss:$8 sps:$4 sm:$0xff]   ;;  %v1124_v14 = vld [vmem:[%s1310_s7 + $0x24] ss:$8 sps:$4 sm:$0xff]  }
  0x2b   : > { %664 = vmatpush1.bf16.msra.mxu1 %v1120_v10  ;;  %v1126_v15 = vld [vmem:[%s1310_s7 + $0x20] ss:$8 sps:$4 sm:$0xff]   ;;  %v1127_v16 = vld [vmem:[%s1310_s7 + $0x34] ss:$8 sps:$4 sm:$0xff]   ;;  %v1129_v17 = vld [vmem:[%s1310_s7 + $0x30] ss:$8 sps:$4 sm:$0xff]  }
  0x2c   : > { %665 = vmatprep.subr.bf16.mxu1 %v1121_v12  ;;  %v1142_v18 = vld [vmem:[%s1310_s7 + $0x104] ss:$8 sps:$4 sm:$0xff]   ;;  %v1144_v19 = vld [vmem:[%s1310_s7 + $0x100] ss:$8 sps:$4 sm:$0xff]   ;;  %v1148_v21 = vld [vmem:[%s1310_s7 + $0x114] ss:$8 sps:$4 sm:$0xff]  }
  0x2d   : > { %v1130_v20 = vld [vmem:[%s1310_s7 + $0x44] ss:$8 sps:$4 sm:$0xff]   ;;  %716 = vmatprep.subr.bf16.mxu0 %v1142_v18  ;;  %v1150_v22 = vld [vmem:[%s1310_s7 + $0x110] ss:$8 sps:$4 sm:$0xff]   ;;  %v1132_v23 = vld [vmem:[%s1310_s7 + $0x40] ss:$8 sps:$4 sm:$0xff]  }
  0x2e   : > { %717 = vmatpush1.bf16.msra.mxu0 %v1144_v19  ;;  %v1133_v24 = vld [vmem:[%s1310_s7 + $0x54] ss:$8 sps:$4 sm:$0xff]   ;;  %v1154_v25 = vld [vmem:[%s1310_s7 + $0x124] ss:$8 sps:$4 sm:$0xff]   ;;  %v1156_v26 = vld [vmem:[%s1310_s7 + $0x120] ss:$8 sps:$4 sm:$0xff]  }
  0x2f   : > { %666 = vmatpush1.bf16.msra.mxu1 %v1123_v13  ;;  %718 = vmatprep.subr.bf16.mxu0 %v1148_v21  ;;  %v1135_v27 = vld [vmem:[%s1310_s7 + $0x50] ss:$8 sps:$4 sm:$0xff]   ;;  %v1160_v28 = vld [vmem:[%s1310_s7 + $0x134] ss:$8 sps:$4 sm:$0xff]   ;;  %v1136_v29 = vld [vmem:[%s1310_s7 + $0x64] ss:$8 sps:$4 sm:$0xff]  }
  0x30   : > { %667 = vmatprep.subr.bf16.mxu1 %v1124_v14  ;;  %v1162_v30 = vld [vmem:[%s1310_s7 + $0x130] ss:$8 sps:$4 sm:$0xff]   ;;  %v1138_v31 = vld [vmem:[%s1310_s7 + $0x60] ss:$8 sps:$4 sm:$0xff]   ;;  %v1166_v32 = vld [vmem:[%s1310_s7 + $0x144] ss:$8 sps:$4 sm:$0xff]  }
  0x31   : > { %v1139_v33 = vld [vmem:[%s1310_s7 + $0x74] ss:$8 sps:$4 sm:$0xff]   ;;  %v1168_v34 = vld [vmem:[%s1310_s7 + $0x140] ss:$8 sps:$4 sm:$0xff]   ;;  %v1141_v35 = vld [vmem:[%s1310_s7 + $0x70] ss:$8 sps:$4 sm:$0xff]  }
  0x32   : > { %719 = vmatpush1.bf16.msra.mxu0 %v1150_v22  ;;  %v1172_v36 = vld [vmem:[%s1310_s7 + $0x154] ss:$8 sps:$4 sm:$0xff]   ;;  %v1145_v37 = vld [vmem:[%s1310_s7 + $0x84] ss:$8 sps:$4 sm:$0xff]   ;;  %v1174_v38 = vld [vmem:[%s1310_s7 + $0x150] ss:$8 sps:$4 sm:$0xff]  }
  0x33   : > { %668 = vmatpush1.bf16.msra.mxu1 %v1126_v15  ;;  %720 = vmatprep.subr.bf16.mxu0 %v1154_v25  ;;  %v1147_v39 = vld [vmem:[%s1310_s7 + $0x80] ss:$8 sps:$4 sm:$0xff]   ;;  %v1178_v40 = vld [vmem:[%s1310_s7 + $0x164] ss:$8 sps:$4 sm:$0xff]   ;;  %v1151_v41 = vld [vmem:[%s1310_s7 + $0x94] ss:$8 sps:$4 sm:$0xff]  }
  0x34   : > { %669 = vmatprep.subr.bf16.mxu1 %v1127_v16  ;;  %v1153_v42 = vld [vmem:[%s1310_s7 + $0x90] ss:$8 sps:$4 sm:$0xff]   ;;  %v1180_v43 = vld [vmem:[%s1310_s7 + $0x160] ss:$8 sps:$4 sm:$0xff]   ;;  %v1184_v45 = vld [vmem:[%s1310_s7 + $0x174] ss:$8 sps:$4 sm:$0xff]  }
  0x35   : > { %v1193_v44 = vld [vmem:[%s1312_s8 + $0x4] ss:$12 sps:$4 sm:$0xff]   ;;  %v1190_v50 = vld [vmem:[%s1312_s8 + $0x8] ss:$12 sps:$4 sm:$0xff]   ;;  %v1194_v55 = vld [vmem:[%s1312_s8 + $0x20] ss:$12 sps:$4 sm:$0xff]  }
  0x36   : > { %721 = vmatpush1.bf16.msra.mxu0 %v1156_v26  ;;  %v1157_v46 = vld [vmem:[%s1310_s7 + $0xa4] ss:$8 sps:$4 sm:$0xff]   ;;  %695 = vmatprep.mubr.bf16.mxu1 %v1193_v44  ;;  %v1186_v47 = vld [vmem:[%s1310_s7 + $0x170] ss:$8 sps:$4 sm:$0xff]   ;;  %v1159_v48 = vld [vmem:[%s1310_s7 + $0xa0] ss:$8 sps:$4 sm:$0xff]  }
  0x37   : > { %670 = vmatpush1.bf16.msra.mxu1 %v1129_v17  ;;  %722 = vmatprep.subr.bf16.mxu0 %v1160_v28  ;;  %v1163_v49 = vld [vmem:[%s1310_s7 + $0xb4] ss:$8 sps:$4 sm:$0xff]   ;;  %v1165_v51 = vld [vmem:[%s1310_s7 + $0xb0] ss:$8 sps:$4 sm:$0xff]   ;;  %v1169_v52 = vld [vmem:[%s1310_s7 + $0xc4] ss:$8 sps:$4 sm:$0xff]  }
  0x38   : > { %671 = vmatprep.subr.bf16.mxu1 %v1130_v20  ;;  %v1171_v53 = vld [vmem:[%s1310_s7 + $0xc0] ss:$8 sps:$4 sm:$0xff]   ;;  %v1175_v54 = vld [vmem:[%s1310_s7 + $0xd4] ss:$8 sps:$4 sm:$0xff]   ;;  %v1177_v56 = vld [vmem:[%s1310_s7 + $0xd0] ss:$8 sps:$4 sm:$0xff]  }
  0x39   : > { %v1181_v57 = vld [vmem:[%s1310_s7 + $0xe4] ss:$8 sps:$4 sm:$0xff]   ;;  %v1183_v58 = vld [vmem:[%s1310_s7 + $0xe0] ss:$8 sps:$4 sm:$0xff]   ;;  %v1187_v59 = vld [vmem:[%s1310_s7 + $0xf4] ss:$8 sps:$4 sm:$0xff]  }
  0x3a   : > { %723 = vmatpush1.bf16.msra.mxu0 %v1162_v30  ;;  %v1189_v60 = vld [vmem:[%s1310_s7 + $0xf0] ss:$8 sps:$4 sm:$0xff]   ;;  %v327_v8 = vld [vmem:[#allocation2] sm:$0xff] }
  0x3b   : > { %672 = vmatpush1.bf16.msra.mxu1 %v1132_v23  ;;  %724 = vmatprep.subr.bf16.mxu0 %v1166_v32  ;;  %v1191_v61 = vld [vmem:[%s1312_s8] ss:$12 sps:$4 sm:$0xff]   ;;  %v1195_v62 = vld [vmem:[%s1312_s8 + $0x1c] ss:$12 sps:$4 sm:$0xff]   ;;  %v1197_v63 = vld [vmem:[%s1312_s8 + $0x18] ss:$12 sps:$4 sm:$0xff]  }
  0x3c   : > { %673 = vmatprep.subr.bf16.mxu1 %v1133_v24  ;;  %v329_v14 = vld [vmem:[#allocation2 + $0x10] sm:$0xff]  ;;  %v330_v18 = vld [vmem:[#allocation2 + $0x18] sm:$0xff]  ;;  %v331_v24 = vld [vmem:[#allocation2 + $0x20] sm:$0xff] }
  0x3d   : > { %v333_v30 = vld [vmem:[#allocation2 + $0x30] sm:$0xff] }
  0x3e   : > { %725 = vmatpush1.bf16.msra.mxu0 %v1168_v34  ;;  %v334_v34 = vld [vmem:[#allocation2 + $0x38] sm:$0xff] }
  0x3f   : > { %674 = vmatpush1.bf16.msra.mxu1 %v1135_v27  ;;  %726 = vmatprep.subr.bf16.mxu0 %v1172_v36  ;;  %v332_v27 = vld [vmem:[#allocation2 + $0x28] sm:$0xff] }
  0x40   : > { %675 = vmatprep.subr.bf16.mxu1 %v1136_v29 }
  0x42   : > { %727 = vmatpush1.bf16.msra.mxu0 %v1174_v38 }
  0x43   : > { %676 = vmatpush1.bf16.msra.mxu1 %v1138_v31  ;;  %728 = vmatprep.subr.bf16.mxu0 %v1178_v40  ;;  %v799_v40 = vlaneseq (!%p1051_p11) }
  0x44   : > { %677 = vmatprep.subr.bf16.mxu1 %v1139_v33 }
  0x46   : > { %729 = vmatpush1.bf16.msra.mxu0 %v1180_v43 }
  0x47   : > { %678 = vmatpush1.bf16.msra.mxu1 %v1141_v35  ;;  %730 = vmatprep.subr.bf16.mxu0 %v1184_v45 }
  0x48   : > { %679 = vmatprep.subr.bf16.mxu1 %v1145_v37 }
  0x4a   : > { %731 = vmatpush1.bf16.msra.mxu0 %v1186_v47 }
  0x4b   : > { %680 = vmatpush1.bf16.msra.mxu1 %v1147_v39 }
  0x4c   : > { %681 = vmatprep.subr.bf16.mxu1 %v1151_v41  ;;  %v800_v41 = vshrl.u32 (!%p1051_p11), %v799_v40, 7 }
  0x4d   : > { %749 = vmatmul.mubr.bf16.vlgmr.msra.gmra.mrb[0].mxu0 %v1190_v50 }
  0x4e   : > { %758 = vmatprep.mubr.bf16.mxu0 %v1239_v11  ;;  %v328_v11 = vld [vmem:[#allocation2 + $0x8] sm:$0xff]  ;;  %v801_v45 = vsub.s32 (!%p1051_p11), 0, %v800_v41 }
  0x4f   : > { %682 = vmatpush1.bf16.msra.mxu1 %v1153_v42  ;;  %v797_v42 = vld [vmem:[%s1404_s2] sm:$0x3] (!%p1051_p11) }
  0x50   : > { %683 = vmatprep.subr.bf16.mxu1 %v1157_v46  ;;  %v805_v46 = vsub.s32 (!%p1051_p11), 1, %v800_v41  ;;  %v802_v50 = vrot.slane (!%p1051_p11), %v797_v42, %v801_v45 }
  0x53   : > { %684 = vmatpush1.bf16.msra.mxu1 %v1159_v48 }
  0x54   : > { %685 = vmatprep.subr.bf16.mxu1 %v1163_v49 }
  0x55   : > { %759 = vmatmul.mubr.bf16.gmra.mrb[4].mxu0 %v1194_v55 }
  0x57   : > { %686 = vmatpush1.bf16.msra.mxu1 %v1165_v51  ;;  %v806_v51 = vrot.slane (!%p1051_p11), %v797_v42, %v805_v46 }
  0x58   : > { %687 = vmatprep.subr.bf16.mxu1 %v1169_v52 }
  0x5b   : > { %688 = vmatpush1.bf16.msra.mxu1 %v1171_v53 }
  0x5c   : > { %689 = vmatprep.subr.bf16.mxu1 %v1175_v54 }
  0x5f   : > { %690 = vmatpush1.bf16.msra.mxu1 %v1177_v56 }
  0x60   : > { %691 = vmatprep.subr.bf16.mxu1 %v1181_v57 }
  0x63   : > { %692 = vmatpush1.bf16.msra.mxu1 %v1183_v58 }
  0x64   : > { %693 = vmatprep.subr.bf16.mxu1 %v1187_v59 }
  0x67   : > { %694 = vmatpush1.bf16.msra.mxu1 %v1189_v60 }
  0x6a   : > { %696 = vmatmul.mubr.bf16.vlgmr.msra.gmra.mrb[0].mxu1 %v1191_v61 }
  0x6b   : > { %705 = vmatprep.mubr.bf16.mxu1 %v1195_v62 }
  0x72   : > { %706 = vmatmul.mubr.bf16.gmra.mrb[4].mxu1 %v1197_v63 }
 0x120   : > { %v750_v0 = vpop.f32.mrb[0].mxu0 }
 0x121   : > { %v752_v1 = vpop.f32.mrb[1].mxu0 }
 0x122   : > { %v754_v2 = vpop.f32.mrb[2].mxu0 }
 0x123   : > { %v756_v3 = vpop.f32.mrb[3].mxu0 }
 0x128   : > { %v760_v4 = vpop.f32.mrb[4].mxu0 }
 0x129   : > { %v762_v5 = vpop.f32.mrb[5].mxu0 }
 0x12a   : > { %v764_v6 = vpop.f32.mrb[6].mxu0 }
 0x12b   : > { %v766_v7 = vpop.f32.mrb[7].mxu0 }
 0x13d   : > { %v697_v9 = vpop.f32.mrb[0].mxu1 }
 0x13e   : > { %v751_v10 = vadd.f32 %v750_v0, %v697_v9  ;;  %v699_v12 = vpop.f32.mrb[1].mxu1 }
 0x13f   : > { %v753_v13 = vadd.f32 %v752_v1, %v699_v12  ;;  %v701_v15 = vpop.f32.mrb[2].mxu1 }
 0x140   : > { %v769_v16 = vadd.f32 %v751_v10, %v327_v8  ;;  %v755_v17 = vadd.f32 %v754_v2, %v701_v15  ;;  %v703_v19 = vpop.f32.mrb[3].mxu1 }
 0x141   : > { %v770_v20 = vadd.f32 %v753_v13, %v328_v11  ;;  %v757_v21 = vadd.f32 %v756_v3, %v703_v19 }
 0x142   : > { %777 = vst [vmem:[#allocation2] sm:$0xff] %v769_v16  ;;  %v771_v22 = vadd.f32 %v755_v17, %v329_v14 }
 0x143   : > { %778 = vst [vmem:[#allocation2 + $0x8] sm:$0xff] %v770_v20  ;;  %v772_v23 = vadd.f32 %v757_v21, %v330_v18 }
 0x144   : > { %779 = vst [vmem:[#allocation2 + $0x10] sm:$0xff] %v771_v22 }
 0x145   : > { %780 = vst [vmem:[#allocation2 + $0x18] sm:$0xff] %v772_v23  ;;  %v707_v25 = vpop.f32.mrb[4].mxu1 }
 0x146   : > { %v761_v26 = vadd.f32 %v760_v4, %v707_v25  ;;  %v709_v28 = vpop.f32.mrb[5].mxu1 }
 0x147   : > { %v763_v29 = vadd.f32 %v762_v5, %v709_v28  ;;  %v711_v31 = vpop.f32.mrb[6].mxu1  ;;  %788 = sbr.rel (%p1051_p11) target bundleno = 348 (0x15c), region = 66 }
 0x148   : > { %v773_v32 = vadd.f32 %v761_v26, %v331_v24  ;;  %v765_v33 = vadd.f32 %v764_v6, %v711_v31  ;;  %v713_v35 = vpop.f32.mrb[7].mxu1 }
 0x149   : > { %v774_v36 = vadd.f32 %v763_v29, %v332_v27  ;;  %v767_v37 = vadd.f32 %v766_v7, %v713_v35  ;;  %v789_v43 = vld [vmem:[#allocation2] sm:$0xff] (!%p1051_p11) }
 0x14a   : > { %781 = vst [vmem:[#allocation2 + $0x20] sm:$0xff] %v773_v32  ;;  %v775_v38 = vadd.f32 %v765_v33, %v333_v30  ;;  %v790_v44 = vld [vmem:[#allocation2 + $0x8] sm:$0xff] (!%p1051_p11)  ;;  %v809_v55 = vadd.f32 (!%p1051_p11), %v802_v50, %v789_v43 }
 0x14b   : > { %782 = vst [vmem:[#allocation2 + $0x28] sm:$0xff] %v774_v36  ;;  %v776_v39 = vadd.f32 %v767_v37, %v334_v34  ;;  %v791_v47 = vld [vmem:[#allocation2 + $0x10] sm:$0xff] (!%p1051_p11)  ;;  %v810_v56 = vadd.f32 (!%p1051_p11), %v806_v51, %v790_v44 }
 0x14c   : > { %783 = vst [vmem:[#allocation2 + $0x30] sm:$0xff] %v775_v38  ;;  %v792_v48 = vld [vmem:[#allocation2 + $0x18] sm:$0xff] (!%p1051_p11)  ;;  %v811_v57 = vadd.f32 (!%p1051_p11), %v802_v50, %v791_v47  ;;  %v817_v63 = vmax.f32 (!%p1051_p11), %v809_v55, 0.0 }
 0x14d   : > { %784 = vst [vmem:[#allocation2 + $0x38] sm:$0xff] %v776_v39  ;;  %v812_v58 = vadd.f32 (!%p1051_p11), %v806_v51, %v792_v48  ;;  %v818_v0 = vmax.f32 (!%p1051_p11), %v810_v56, 0.0 }
 0x14e   : > { %v819_v1 = vmax.f32 %v811_v57, 0.0 }
 0x14f   : > { %v820_v2 = vmax.f32 %v812_v58, 0.0  ;;  %v1062_v7 = vpack.c.bf16 %v818_v0, %v817_v63 }
 0x151   : > { %v793_v49 = vld [vmem:[#allocation2 + $0x20] sm:$0xff]  ;;  %v1063_v8 = vpack.c.bf16 %v820_v2, %v819_v1  ;;  %849 = vst [vmem:[%s1405_s3] sm:$0xff] %v1062_v7 }
 0x152   : > { %v794_v52 = vld [vmem:[#allocation2 + $0x28] sm:$0xff]  ;;  %v813_v59 = vadd.f32 %v802_v50, %v793_v49 }
 0x153   : > { %v795_v53 = vld [vmem:[#allocation2 + $0x30] sm:$0xff]  ;;  %v814_v60 = vadd.f32 %v806_v51, %v794_v52  ;;  %850 = vst [vmem:[%s1405_s3 + $0x8] sm:$0xff] %v1063_v8 }
 0x154   : > { %v796_v54 = vld [vmem:[#allocation2 + $0x38] sm:$0xff]  ;;  %v815_v61 = vadd.f32 %v802_v50, %v795_v53  ;;  %v821_v3 = vmax.f32 %v813_v59, 0.0 }
 0x155   : > { %v816_v62 = vadd.f32 %v806_v51, %v796_v54  ;;  %v822_v4 = vmax.f32 %v814_v60, 0.0 }
 0x156   : > { %v823_v5 = vmax.f32 %v815_v61, 0.0 }
 0x157   : > { %v824_v6 = vmax.f32 %v816_v62, 0.0  ;;  %v1064_v9 = vpack.c.bf16 %v822_v4, %v821_v3 }
 0x159   : > { %v1065_v10 = vpack.c.bf16 %v824_v6, %v823_v5  ;;  %851 = vst [vmem:[%s1405_s3 + $0x10] sm:$0xff] %v1064_v9 }
 0x15b   : > { %852 = vst [vmem:[%s1405_s3 + $0x18] sm:$0xff] %v1065_v10 }
 0x15c PF: > { %s13_s16 = sadd.s32 1, %s1236_s16   ;;  %s1406_s12 = smov %s1224_s13 }
 0x15d   : > { %p10_p12 = scmp.ge.s32.totalorder %s13_s16, 5   ;;  %s1407_s13 = smov %s1295_s20 }
 0x15e   : > { %s1408_s14 = smov %s1232_s15  ;;  %s1409_s15 = smov %s1411_s17 }
 0x15f   :  { %12 = sbr.rel (!%p10_p12) target bundleno = 3 (0x3), region = 113 }

// kernel: dual_grad_loss.41
= control target key start
LH: loop header
LB: loop body
LE: loop exit
PB: predicated region body
PF: predicated region fallthrough
CT: control target
= control target key end

     0   :  { %s1260_s12 = smov 0   ;;  %s1262_s13 = smov 0   ;;  %s1402_s0 = inlined_call_operand.vmem [shape: bf16[32,2304], index: 0, kind: input, shape index: {}]   ;;  %s1403_s1 = inlined_call_operand.vmem [shape: bf16[2304,256], index: 1, kind: input, shape index: {}]   ;;  %s1404_s2 = inlined_call_operand.vmem [shape: f32[1,256], index: 2, kind: input, shape index: {}]   ;;  %s1405_s3 = inlined_call_operand.vmem [shape: bf16[32,256], index: 3, kind: output, shape index: {}]  }
   0x1   :  { %s1264_s14 = smov 0   ;;  %s1266_s15 = smov 0  }
   0x2   :  { %s1268_s16 = smov 0  }
   0x3 LB: > { %s25_s17 = sadd.s32 1, %s1232_s15  ;;  %p48_p1 = scmp.ne.s32.totalorder %s1224_s13, %s1220_s12  ;;  %s1236_s16 = sphi %s1268_s16, %s13_s16   ;;  %s1232_s15 = sphi %s1266_s15, %s1409_s15   ;;  %s1228_s14 = sphi %s1264_s14, %s1408_s14   ;;  %s1224_s13 = sphi %s1262_s13, %s1407_s13   ;;  %s1220_s12 = sphi %s1260_s12, %s1406_s12  }
   0x4   : > { %p26_p0 = scmp.ge.s32.totalorder %s25_s17, 6  ;;  %p49_p2 = scmp.eq.s32.totalorder %s1236_s16, 0 }
   0x5   : > { %s41_s19 = sadd.s32 1, %s1224_s13  ;;  %p983_p5 = scmp.ge.s32.totalorder %s1236_s16, 6 }
   0x6   : > { %s1411_s17 = smov (%p26_p0, %s25_s17), 0  ;;  %p50_p3 = por %p49_p2, %p48_p1 }
   0x7   : > { %s37_s18 = ssub.s32 %s1232_s15, %s1411_s17  ;;  %164 = sbr.rel (%p983_p5) target bundleno = 23 (0x17), region = 20 }
   0x8   : > { %p39_p4 = scmp.eq.s32.totalorder %s37_s18, 0 }
   0xa   : > { %s1295_s20 = scalar_select %p39_p4, %s1224_s13, %s41_s19  }
   0xe   : > { %167 = sbr.rel (!%p50_p3) target bundleno = 23 (0x17), region = 24  ;;  %s169_s21 = sand.u32 (%p50_p3), 1, %s1224_s13  }
   0xf   : > { %s1060_s22 = smul.u32 (%p50_p3), 12, %s1232_s15 }
  0x10   : > { %s1074_s23 = smul.u32 (%p50_p3), 48, %s169_s21 }
  0x11   : > { %s177_s26 = scalar_lea.vmem (%p50_p3), %s1402_s0, %s1060_s22 }
  0x12   : > { %v192_v0 = vld [vmem:[%s177_s26] sm:$0xff] (%p50_p3)  ;;  %v194_v1 = vld [vmem:[%s177_s26 + $0x48] sm:$0xff] (%p50_p3)  ;;  %v196_v2 = vld [vmem:[%s177_s26 + $0x90] sm:$0xff] (%p50_p3)  ;;  %s171_s27 = scalar_lea.vmem (%p50_p3), [#allocation3], %s1074_s23 }
  0x13   : > { %193 = vst [vmem:[%s171_s27] sm:$0xff] (%p50_p3), %v192_v0  ;;  %195 = vst [vmem:[%s171_s27 + $0xc] sm:$0xff] (%p50_p3), %v194_v1  ;;  %v198_v3 = vld [vmem:[%s177_s26 + $0xd8] sm:$0xff] (%p50_p3)  ;;  %v985_v4 = vld [vmem:[%s177_s26 + $0x8] sm:$0xf] (%p50_p3) }
  0x14   : > { %197 = vst [vmem:[%s171_s27 + $0x18] sm:$0xff] (%p50_p3), %v196_v2  ;;  %v987_v5 = vld [vmem:[%s177_s26 + $0x50] sm:$0xf] (%p50_p3)  ;;  %199 = vst [vmem:[%s171_s27 + $0x24] sm:$0xff] (%p50_p3), %v198_v3  ;;  %v989_v6 = vld [vmem:[%s177_s26 + $0x98] sm:$0xf] (%p50_p3) }
  0x15   : > { %986 = vst [vmem:[%s171_s27 + $0x8] sm:$0xf] %v985_v4  ;;  %988 = vst [vmem:[%s171_s27 + $0x14] sm:$0xf] %v987_v5  ;;  %v991_v7 = vld [vmem:[%s177_s26 + $0xe0] sm:$0xf] }
  0x16   : > { %990 = vst [vmem:[%s171_s27 + $0x20] sm:$0xf] %v989_v6  ;;  %992 = vst [vmem:[%s171_s27 + $0x2c] sm:$0xf] %v991_v7 }
  0x17 PF: > { %p993_p6 = scmp.ge.s32.totalorder %s1236_s16, 1  ;;  %p234_p7 = scmp.lt.s32.totalorder %s1236_s16, 7 }
  0x19   : > { %p235_p8 = pnand %p993_p6, %p234_p7 }
  0x1a   : > { %s241_s28 = sand.u32 (!%p235_p8), 1, %s1220_s12   ;;  %s285_s29 = smul.u32 (!%p235_p8), 48, %s1228_s14 }
  0x1b   : > { %238 = sbr.rel (%p235_p8) target bundleno = 348 (0x15c), region = 54  ;;  %p996_p10 = scmp.ne.s32.totalorder (!%p235_p8), %s1228_s14, 0 }
  0x1c   : > { %s1075_s30 = smul.u32 (!%p235_p8), 48, %s241_s28  ;;  %p287_p9 = scmp.lt.s32.totalorder (!%p235_p8), %s285_s29, 287 }
  0x1e   : > { %s1312_s8 = scalar_lea.vmem (!%p235_p8), [#allocation3], %s1075_s30 }
  0x22   : > { %s1413_s29 = smov (!%p287_p9, %s285_s29), 287  ;;  %318 = sbr.rel (%p996_p10) target bundleno = 41 (0x29), region = 62 }
  0x23   : > { %s1061_s4 = sshll.u32 %s1413_s29, 3  ;;  %v1238_v8 = vmov (!%p996_p10), 0.0  }
  0x24   : > { %s1310_s7 = scalar_lea.vmem %s1403_s1, %s1061_s4  ;;  %319 = vst [vmem:[#allocation2] sm:$0xff] (!%p996_p10), %v1238_v8  ;;  %320 = vst [vmem:[#allocation2 + $0x8] sm:$0xff] (!%p996_p10), %v1238_v8 }
  0x25   : > { %321 = vst [vmem:[#allocation2 + $0x10] sm:$0xff] (!%p996_p10), %v1238_v8  ;;  %322 = vst [vmem:[#allocation2 + $0x18] sm:$0xff] (!%p996_p10), %v1238_v8 }
  0x26   : > { %323 = vst [vmem:[#allocation2 + $0x20] sm:$0xff] (!%p996_p10), %v1238_v8  ;;  %324 = vst [vmem:[#allocation2 + $0x28] sm:$0xff] (!%p996_p10), %v1238_v8 }
  0x27   : > { %325 = vst [vmem:[#allocation2 + $0x30] sm:$0xff] (!%p996_p10), %v1238_v8  ;;  %326 = vst [vmem:[#allocation2 + $0x38] sm:$0xff] (!%p996_p10), %v1238_v8 }
  0x29 PF: > { %v1118_v9 = vld [vmem:[%s1310_s7 + $0x4] ss:$8 sps:$4 sm:$0xff]   ;;  %v1120_v10 = vld [vmem:[%s1310_s7] ss:$8 sps:$4 sm:$0xff]   ;;  %v1239_v11 = vmov 0   ;;  %p1051_p11 = scmp.ne.s32.totalorder %s1228_s14, 5 }
  0x2a   : > { %748 = vmatprep.mubr.bf16.mxu0 %v1239_v11  ;;  %663 = vmatprep.subr.bf16.mxu1 %v1118_v9  ;;  %v1121_v12 = vld [vmem:[%s1310_s7 + $0x14] ss:$8 sps:$4 sm:$0xff]   ;;  %v1123_v13 = vld [vmem:[%s1310_s7 + $0x10] ss:$8 sps:$4 sm:$0xff]   ;;  %v1124_v14 = vld [vmem:[%s1310_s7 + $0x24] ss:$8 sps:$4 sm:$0xff]  }
  0x2b   : > { %664 = vmatpush1.bf16.msra.mxu1 %v1120_v10  ;;  %v1126_v15 = vld [vmem:[%s1310_s7 + $0x20] ss:$8 sps:$4 sm:$0xff]   ;;  %v1127_v16 = vld [vmem:[%s1310_s7 + $0x34] ss:$8 sps:$4 sm:$0xff]   ;;  %v1129_v17 = vld [vmem:[%s1310_s7 + $0x30] ss:$8 sps:$4 sm:$0xff]  }
  0x2c   : > { %665 = vmatprep.subr.bf16.mxu1 %v1121_v12  ;;  %v1142_v18 = vld [vmem:[%s1310_s7 + $0x104] ss:$8 sps:$4 sm:$0xff]   ;;  %v1144_v19 = vld [vmem:[%s1310_s7 + $0x100] ss:$8 sps:$4 sm:$0xff]   ;;  %v1148_v21 = vld [vmem:[%s1310_s7 + $0x114] ss:$8 sps:$4 sm:$0xff]  }
  0x2d   : > { %v1130_v20 = vld [vmem:[%s1310_s7 + $0x44] ss:$8 sps:$4 sm:$0xff]   ;;  %716 = vmatprep.subr.bf16.mxu0 %v1142_v18  ;;  %v1150_v22 = vld [vmem:[%s1310_s7 + $0x110] ss:$8 sps:$4 sm:$0xff]   ;;  %v1132_v23 = vld [vmem:[%s1310_s7 + $0x40] ss:$8 sps:$4 sm:$0xff]  }
  0x2e   : > { %717 = vmatpush1.bf16.msra.mxu0 %v1144_v19  ;;  %v1133_v24 = vld [vmem:[%s1310_s7 + $0x54] ss:$8 sps:$4 sm:$0xff]   ;;  %v1154_v25 = vld [vmem:[%s1310_s7 + $0x124] ss:$8 sps:$4 sm:$0xff]   ;;  %v1156_v26 = vld [vmem:[%s1310_s7 + $0x120] ss:$8 sps:$4 sm:$0xff]  }
  0x2f   : > { %666 = vmatpush1.bf16.msra.mxu1 %v1123_v13  ;;  %718 = vmatprep.subr.bf16.mxu0 %v1148_v21  ;;  %v1135_v27 = vld [vmem:[%s1310_s7 + $0x50] ss:$8 sps:$4 sm:$0xff]   ;;  %v1160_v28 = vld [vmem:[%s1310_s7 + $0x134] ss:$8 sps:$4 sm:$0xff]   ;;  %v1136_v29 = vld [vmem:[%s1310_s7 + $0x64] ss:$8 sps:$4 sm:$0xff]  }
  0x30   : > { %667 = vmatprep.subr.bf16.mxu1 %v1124_v14  ;;  %v1162_v30 = vld [vmem:[%s1310_s7 + $0x130] ss:$8 sps:$4 sm:$0xff]   ;;  %v1138_v31 = vld [vmem:[%s1310_s7 + $0x60] ss:$8 sps:$4 sm:$0xff]   ;;  %v1166_v32 = vld [vmem:[%s1310_s7 + $0x144] ss:$8 sps:$4 sm:$0xff]  }
  0x31   : > { %v1139_v33 = vld [vmem:[%s1310_s7 + $0x74] ss:$8 sps:$4 sm:$0xff]   ;;  %v1168_v34 = vld [vmem:[%s1310_s7 + $0x140] ss:$8 sps:$4 sm:$0xff]   ;;  %v1141_v35 = vld [vmem:[%s1310_s7 + $0x70] ss:$8 sps:$4 sm:$0xff]  }
  0x32   : > { %719 = vmatpush1.bf16.msra.mxu0 %v1150_v22  ;;  %v1172_v36 = vld [vmem:[%s1310_s7 + $0x154] ss:$8 sps:$4 sm:$0xff]   ;;  %v1145_v37 = vld [vmem:[%s1310_s7 + $0x84] ss:$8 sps:$4 sm:$0xff]   ;;  %v1174_v38 = vld [vmem:[%s1310_s7 + $0x150] ss:$8 sps:$4 sm:$0xff]  }
  0x33   : > { %668 = vmatpush1.bf16.msra.mxu1 %v1126_v15  ;;  %720 = vmatprep.subr.bf16.mxu0 %v1154_v25  ;;  %v1147_v39 = vld [vmem:[%s1310_s7 + $0x80] ss:$8 sps:$4 sm:$0xff]   ;;  %v1178_v40 = vld [vmem:[%s1310_s7 + $0x164] ss:$8 sps:$4 sm:$0xff]   ;;  %v1151_v41 = vld [vmem:[%s1310_s7 + $0x94] ss:$8 sps:$4 sm:$0xff]  }
  0x34   : > { %669 = vmatprep.subr.bf16.mxu1 %v1127_v16  ;;  %v1153_v42 = vld [vmem:[%s1310_s7 + $0x90] ss:$8 sps:$4 sm:$0xff]   ;;  %v1180_v43 = vld [vmem:[%s1310_s7 + $0x160] ss:$8 sps:$4 sm:$0xff]   ;;  %v1184_v45 = vld [vmem:[%s1310_s7 + $0x174] ss:$8 sps:$4 sm:$0xff]  }
  0x35   : > { %v1193_v44 = vld [vmem:[%s1312_s8 + $0x4] ss:$12 sps:$4 sm:$0xff]   ;;  %v1190_v50 = vld [vmem:[%s1312_s8 + $0x8] ss:$12 sps:$4 sm:$0xff]   ;;  %v1194_v55 = vld [vmem:[%s1312_s8 + $0x20] ss:$12 sps:$4 sm:$0xff]  }
  0x36   : > { %721 = vmatpush1.bf16.msra.mxu0 %v1156_v26  ;;  %v1157_v46 = vld [vmem:[%s1310_s7 + $0xa4] ss:$8 sps:$4 sm:$0xff]   ;;  %695 = vmatprep.mubr.bf16.mxu1 %v1193_v44  ;;  %v1186_v47 = vld [vmem:[%s1310_s7 + $0x170] ss:$8 sps:$4 sm:$0xff]   ;;  %v1159_v48 = vld [vmem:[%s1310_s7 + $0xa0] ss:$8 sps:$4 sm:$0xff]  }
  0x37   : > { %670 = vmatpush1.bf16.msra.mxu1 %v1129_v17  ;;  %722 = vmatprep.subr.bf16.mxu0 %v1160_v28  ;;  %v1163_v49 = vld [vmem:[%s1310_s7 + $0xb4] ss:$8 sps:$4 sm:$0xff]   ;;  %v1165_v51 = vld [vmem:[%s1310_s7 + $0xb0] ss:$8 sps:$4 sm:$0xff]   ;;  %v1169_v52 = vld [vmem:[%s1310_s7 + $0xc4] ss:$8 sps:$4 sm:$0xff]  }
  0x38   : > { %671 = vmatprep.subr.bf16.mxu1 %v1130_v20  ;;  %v1171_v53 = vld [vmem:[%s1310_s7 + $0xc0] ss:$8 sps:$4 sm:$0xff]   ;;  %v1175_v54 = vld [vmem:[%s1310_s7 + $0xd4] ss:$8 sps:$4 sm:$0xff]   ;;  %v1177_v56 = vld [vmem:[%s1310_s7 + $0xd0] ss:$8 sps:$4 sm:$0xff]  }
  0x39   : > { %v1181_v57 = vld [vmem:[%s1310_s7 + $0xe4] ss:$8 sps:$4 sm:$0xff]   ;;  %v1183_v58 = vld [vmem:[%s1310_s7 + $0xe0] ss:$8 sps:$4 sm:$0xff]   ;;  %v1187_v59 = vld [vmem:[%s1310_s7 + $0xf4] ss:$8 sps:$4 sm:$0xff]  }
  0x3a   : > { %723 = vmatpush1.bf16.msra.mxu0 %v1162_v30  ;;  %v1189_v60 = vld [vmem:[%s1310_s7 + $0xf0] ss:$8 sps:$4 sm:$0xff]   ;;  %v327_v8 = vld [vmem:[#allocation2] sm:$0xff] }
  0x3b   : > { %672 = vmatpush1.bf16.msra.mxu1 %v1132_v23  ;;  %724 = vmatprep.subr.bf16.mxu0 %v1166_v32  ;;  %v1191_v61 = vld [vmem:[%s1312_s8] ss:$12 sps:$4 sm:$0xff]   ;;  %v1195_v62 = vld [vmem:[%s1312_s8 + $0x1c] ss:$12 sps:$4 sm:$0xff]   ;;  %v1197_v63 = vld [vmem:[%s1312_s8 + $0x18] ss:$12 sps:$4 sm:$0xff]  }
  0x3c   : > { %673 = vmatprep.subr.bf16.mxu1 %v1133_v24  ;;  %v329_v14 = vld [vmem:[#allocation2 + $0x10] sm:$0xff]  ;;  %v330_v18 = vld [vmem:[#allocation2 + $0x18] sm:$0xff]  ;;  %v331_v24 = vld [vmem:[#allocation2 + $0x20] sm:$0xff] }
  0x3d   : > { %v333_v30 = vld [vmem:[#allocation2 + $0x30] sm:$0xff] }
  0x3e   : > { %725 = vmatpush1.bf16.msra.mxu0 %v1168_v34  ;;  %v334_v34 = vld [vmem:[#allocation2 + $0x38] sm:$0xff] }
  0x3f   : > { %674 = vmatpush1.bf16.msra.mxu1 %v1135_v27  ;;  %726 = vmatprep.subr.bf16.mxu0 %v1172_v36  ;;  %v332_v27 = vld [vmem:[#allocation2 + $0x28] sm:$0xff] }
  0x40   : > { %675 = vmatprep.subr.bf16.mxu1 %v1136_v29 }
  0x42   : > { %727 = vmatpush1.bf16.msra.mxu0 %v1174_v38 }
  0x43   : > { %676 = vmatpush1.bf16.msra.mxu1 %v1138_v31  ;;  %728 = vmatprep.subr.bf16.mxu0 %v1178_v40  ;;  %v799_v40 = vlaneseq (!%p1051_p11) }
  0x44   : > { %677 = vmatprep.subr.bf16.mxu1 %v1139_v33 }
  0x46   : > { %729 = vmatpush1.bf16.msra.mxu0 %v1180_v43 }
  0x47   : > { %678 = vmatpush1.bf16.msra.mxu1 %v1141_v35  ;;  %730 = vmatprep.subr.bf16.mxu0 %v1184_v45 }
  0x48   : > { %679 = vmatprep.subr.bf16.mxu1 %v1145_v37 }
  0x4a   : > { %731 = vmatpush1.bf16.msra.mxu0 %v1186_v47 }
  0x4b   : > { %680 = vmatpush1.bf16.msra.mxu1 %v1147_v39 }
  0x4c   : > { %681 = vmatprep.subr.bf16.mxu1 %v1151_v41  ;;  %v800_v41 = vshrl.u32 (!%p1051_p11), %v799_v40, 7 }
  0x4d   : > { %749 = vmatmul.mubr.bf16.vlgmr.msra.gmra.mrb[0].mxu0 %v1190_v50 }
  0x4e   : > { %758 = vmatprep.mubr.bf16.mxu0 %v1239_v11  ;;  %v328_v11 = vld [vmem:[#allocation2 + $0x8] sm:$0xff]  ;;  %v801_v45 = vsub.s32 (!%p1051_p11), 0, %v800_v41 }
  0x4f   : > { %682 = vmatpush1.bf16.msra.mxu1 %v1153_v42  ;;  %v797_v42 = vld [vmem:[%s1404_s2] sm:$0x3] (!%p1051_p11) }
  0x50   : > { %683 = vmatprep.subr.bf16.mxu1 %v1157_v46  ;;  %v805_v46 = vsub.s32 (!%p1051_p11), 1, %v800_v41  ;;  %v802_v50 = vrot.slane (!%p1051_p11), %v797_v42, %v801_v45 }
  0x53   : > { %684 = vmatpush1.bf16.msra.mxu1 %v1159_v48 }
  0x54   : > { %685 = vmatprep.subr.bf16.mxu1 %v1163_v49 }
  0x55   : > { %759 = vmatmul.mubr.bf16.gmra.mrb[4].mxu0 %v1194_v55 }
  0x57   : > { %686 = vmatpush1.bf16.msra.mxu1 %v1165_v51  ;;  %v806_v51 = vrot.slane (!%p1051_p11), %v797_v42, %v805_v46 }
  0x58   : > { %687 = vmatprep.subr.bf16.mxu1 %v1169_v52 }
  0x5b   : > { %688 = vmatpush1.bf16.msra.mxu1 %v1171_v53 }
  0x5c   : > { %689 = vmatprep.subr.bf16.mxu1 %v1175_v54 }
  0x5f   : > { %690 = vmatpush1.bf16.msra.mxu1 %v1177_v56 }
  0x60   : > { %691 = vmatprep.subr.bf16.mxu1 %v1181_v57 }
  0x63   : > { %692 = vmatpush1.bf16.msra.mxu1 %v1183_v58 }
  0x64   : > { %693 = vmatprep.subr.bf16.mxu1 %v1187_v59 }
  0x67   : > { %694 = vmatpush1.bf16.msra.mxu1 %v1189_v60 }
  0x6a   : > { %696 = vmatmul.mubr.bf16.vlgmr.msra.gmra.mrb[0].mxu1 %v1191_v61 }
  0x6b   : > { %705 = vmatprep.mubr.bf16.mxu1 %v1195_v62 }
  0x72   : > { %706 = vmatmul.mubr.bf16.gmra.mrb[4].mxu1 %v1197_v63 }
 0x120   : > { %v750_v0 = vpop.f32.mrb[0].mxu0 }
 0x121   : > { %v752_v1 = vpop.f32.mrb[1].mxu0 }
 0x122   : > { %v754_v2 = vpop.f32.mrb[2].mxu0 }
 0x123   : > { %v756_v3 = vpop.f32.mrb[3].mxu0 }
 0x128   : > { %v760_v4 = vpop.f32.mrb[4].mxu0 }
 0x129   : > { %v762_v5 = vpop.f32.mrb[5].mxu0 }
 0x12a   : > { %v764_v6 = vpop.f32.mrb[6].mxu0 }
 0x12b   : > { %v766_v7 = vpop.f32.mrb[7].mxu0 }
 0x13d   : > { %v697_v9 = vpop.f32.mrb[0].mxu1 }
 0x13e   : > { %v751_v10 = vadd.f32 %v750_v0, %v697_v9  ;;  %v699_v12 = vpop.f32.mrb[1].mxu1 }
 0x13f   : > { %v753_v13 = vadd.f32 %v752_v1, %v699_v12  ;;  %v701_v15 = vpop.f32.mrb[2].mxu1 }
 0x140   : > { %v769_v16 = vadd.f32 %v751_v10, %v327_v8  ;;  %v755_v17 = vadd.f32 %v754_v2, %v701_v15  ;;  %v703_v19 = vpop.f32.mrb[3].mxu1 }
 0x141   : > { %v770_v20 = vadd.f32 %v753_v13, %v328_v11  ;;  %v757_v21 = vadd.f32 %v756_v3, %v703_v19 }
 0x142   : > { %777 = vst [vmem:[#allocation2] sm:$0xff] %v769_v16  ;;  %v771_v22 = vadd.f32 %v755_v17, %v329_v14 }
 0x143   : > { %778 = vst [vmem:[#allocation2 + $0x8] sm:$0xff] %v770_v20  ;;  %v772_v23 = vadd.f32 %v757_v21, %v330_v18 }
 0x144   : > { %779 = vst [vmem:[#allocation2 + $0x10] sm:$0xff] %v771_v22 }
 0x145   : > { %780 = vst [vmem:[#allocation2 + $0x18] sm:$0xff] %v772_v23  ;;  %v707_v25 = vpop.f32.mrb[4].mxu1 }
 0x146   : > { %v761_v26 = vadd.f32 %v760_v4, %v707_v25  ;;  %v709_v28 = vpop.f32.mrb[5].mxu1 }
 0x147   : > { %v763_v29 = vadd.f32 %v762_v5, %v709_v28  ;;  %v711_v31 = vpop.f32.mrb[6].mxu1  ;;  %788 = sbr.rel (%p1051_p11) target bundleno = 348 (0x15c), region = 66 }
 0x148   : > { %v773_v32 = vadd.f32 %v761_v26, %v331_v24  ;;  %v765_v33 = vadd.f32 %v764_v6, %v711_v31  ;;  %v713_v35 = vpop.f32.mrb[7].mxu1 }
 0x149   : > { %v774_v36 = vadd.f32 %v763_v29, %v332_v27  ;;  %v767_v37 = vadd.f32 %v766_v7, %v713_v35  ;;  %v789_v43 = vld [vmem:[#allocation2] sm:$0xff] (!%p1051_p11) }
 0x14a   : > { %781 = vst [vmem:[#allocation2 + $0x20] sm:$0xff] %v773_v32  ;;  %v775_v38 = vadd.f32 %v765_v33, %v333_v30  ;;  %v790_v44 = vld [vmem:[#allocation2 + $0x8] sm:$0xff] (!%p1051_p11)  ;;  %v809_v55 = vadd.f32 (!%p1051_p11), %v802_v50, %v789_v43 }
 0x14b   : > { %782 = vst [vmem:[#allocation2 + $0x28] sm:$0xff] %v774_v36  ;;  %v776_v39 = vadd.f32 %v767_v37, %v334_v34  ;;  %v791_v47 = vld [vmem:[#allocation2 + $0x10] sm:$0xff] (!%p1051_p11)  ;;  %v810_v56 = vadd.f32 (!%p1051_p11), %v806_v51, %v790_v44 }
 0x14c   : > { %783 = vst [vmem:[#allocation2 + $0x30] sm:$0xff] %v775_v38  ;;  %v792_v48 = vld [vmem:[#allocation2 + $0x18] sm:$0xff] (!%p1051_p11)  ;;  %v811_v57 = vadd.f32 (!%p1051_p11), %v802_v50, %v791_v47  ;;  %v817_v63 = vmax.f32 (!%p1051_p11), %v809_v55, 0.0 }
 0x14d   : > { %784 = vst [vmem:[#allocation2 + $0x38] sm:$0xff] %v776_v39  ;;  %v812_v58 = vadd.f32 (!%p1051_p11), %v806_v51, %v792_v48  ;;  %v818_v0 = vmax.f32 (!%p1051_p11), %v810_v56, 0.0 }
 0x14e   : > { %v819_v1 = vmax.f32 %v811_v57, 0.0 }
 0x14f   : > { %v820_v2 = vmax.f32 %v812_v58, 0.0  ;;  %v1062_v7 = vpack.c.bf16 %v818_v0, %v817_v63 }
 0x151   : > { %v793_v49 = vld [vmem:[#allocation2 + $0x20] sm:$0xff]  ;;  %v1063_v8 = vpack.c.bf16 %v820_v2, %v819_v1  ;;  %849 = vst [vmem:[%s1405_s3] sm:$0xff] %v1062_v7 }
 0x152   : > { %v794_v52 = vld [vmem:[#allocation2 + $0x28] sm:$0xff]  ;;  %v813_v59 = vadd.f32 %v802_v50, %v793_v49 }
 0x153   : > { %v795_v53 = vld [vmem:[#allocation2 + $0x30] sm:$0xff]  ;;  %v814_v60 = vadd.f32 %v806_v51, %v794_v52  ;;  %850 = vst [vmem:[%s1405_s3 + $0x8] sm:$0xff] %v1063_v8 }
 0x154   : > { %v796_v54 = vld [vmem:[#allocation2 + $0x38] sm:$0xff]  ;;  %v815_v61 = vadd.f32 %v802_v50, %v795_v53  ;;  %v821_v3 = vmax.f32 %v813_v59, 0.0 }
 0x155   : > { %v816_v62 = vadd.f32 %v806_v51, %v796_v54  ;;  %v822_v4 = vmax.f32 %v814_v60, 0.0 }
 0x156   : > { %v823_v5 = vmax.f32 %v815_v61, 0.0 }
 0x157   : > { %v824_v6 = vmax.f32 %v816_v62, 0.0  ;;  %v1064_v9 = vpack.c.bf16 %v822_v4, %v821_v3 }
 0x159   : > { %v1065_v10 = vpack.c.bf16 %v824_v6, %v823_v5  ;;  %851 = vst [vmem:[%s1405_s3 + $0x10] sm:$0xff] %v1064_v9 }
 0x15b   : > { %852 = vst [vmem:[%s1405_s3 + $0x18] sm:$0xff] %v1065_v10 }
 0x15c PF: > { %s13_s16 = sadd.s32 1, %s1236_s16   ;;  %s1406_s12 = smov %s1224_s13 }
 0x15d   : > { %p10_p12 = scmp.ge.s32.totalorder %s13_s16, 8   ;;  %s1407_s13 = smov %s1295_s20 }
 0x15e   : > { %s1408_s14 = smov %s1232_s15  ;;  %s1409_s15 = smov %s1411_s17 }
 0x15f   :  { %12 = sbr.rel (!%p10_p12) target bundleno = 3 (0x3), region = 113 }

// kernel: dual_grad_loss.44
= control target key start
LH: loop header
LB: loop body
LE: loop exit
PB: predicated region body
PF: predicated region fallthrough
CT: control target
= control target key end

     0   :  { %s1813_s0 = inlined_call_operand.vmem [shape: bf16[16,2304], index: 0, kind: input, shape index: {}]   ;;  %s1814_s1 = inlined_call_operand.vmem [shape: bf16[2304,512], index: 1, kind: input, shape index: {}]   ;;  %s1815_s2 = inlined_call_operand.vmem [shape: f32[1,512], index: 2, kind: input, shape index: {}]   ;;  %s1816_s3 = inlined_call_operand.vmem [shape: bf16[16,512], index: 3, kind: output, shape index: {}]  }
   0x1   :  { %1818 = sst [smem:[#allocation7_spill]] %s1813_s0 }
   0x2   :  { %1819 = sst [smem:[#allocation8_spill]] %s1814_s1 }
   0x3   :  { %s1480_s12 = smov 0   ;;  %s1482_s13 = smov 0  }
   0x4   :  { %s1484_s14 = smov 0   ;;  %s1486_s15 = smov 0  }
   0x5   :  { %s1488_s16 = smov 0   ;;  %s1490_s17 = smov 0  }
   0x6   :  { %s1492_s18 = smov 0   ;;  %s1494_s19 = smov 0  }
   0x7   :  { %s1496_s20 = smov 0   ;;  %s1498_s21 = smov 0  }
   0x8   :  { %s1500_s22 = smov 0  }
   0x9 LB: > { %s1116_s23 = sadd.s32 4294967295, %s1456_s22   ;;  %s25_s24 = sadd.s32 1, %s1448_s20  ;;  %s1456_s22 = sphi %s1500_s22, %s13_s22   ;;  %s1452_s21 = sphi %s1498_s21, %s1836_s21   ;;  %s1448_s20 = sphi %s1496_s20, %s1835_s20   ;;  %s1444_s19 = sphi %s1494_s19, %s1834_s19   ;;  %s1440_s18 = sphi %s1492_s18, %s1833_s18   ;;  %s1436_s17 = sphi %s1490_s17, %s1832_s17   ;;  %s1432_s16 = sphi %s1488_s16, %s1831_s16   ;;  %s1428_s15 = sphi %s1486_s15, %s1830_s15   ;;  %s1424_s14 = sphi %s1484_s14, %s1829_s14   ;;  %s1420_s13 = sphi %s1482_s13, %s1828_s13   ;;  %s1416_s12 = sphi %s1480_s12, %s1827_s12  }
   0xa   : > { %p26_p0 = scmp.ge.s32.totalorder %s25_s24, 6  ;;  %s28_s25 = sadd.s32 1, %s1452_s21 }
   0xb   : > { %s41_s26 = sadd.s32 1, %s1436_s17  ;;  %p48_p1 = scmp.ne.s32.totalorder %s1436_s17, %s1432_s16 }
   0xc   : > { %s1838_s24 = smov (%p26_p0, %s25_s24), 0  ;;  %s1840_s25 = smov (!%p26_p0, %s28_s25), %s1452_s21 }
   0xd   : > { %s37_s27 = ssub.s32 %s1448_s20, %s1838_s24  ;;  %p49_p2 = scmp.eq.s32.totalorder %s1456_s22, 0 }
   0xe   : > { %p30_p3 = scmp.ge.s32.totalorder %s1840_s25, 2  ;;  %p39_p4 = scmp.eq.s32.totalorder %s37_s27, 0 }
   0xf   : > { %p1547_p5 = por %p49_p2, %p48_p1  ;;  %s69_s29 = sadd.s32 1, %s1428_s15 }
  0x10   : > { %s1842_s25 = smov (%p30_p3, %s1840_s25), 0  ;;  %p76_p6 = scmp.ne.s32.totalorder %s1428_s15, %s1424_s14 }
  0x11   : > { %1821 = sst [smem:[#allocation6_spill]] %s1842_s25  ;;  %s65_s4 = ssub.s32 %s1452_s21, %s1842_s25 }
  0x12   : > { %s1555_s30 = scalar_select %p39_p4, %s1436_s17, %s41_s26  }
  0x13   : > { %s66_s5 = sor.u32 %s65_s4, %s37_s27  ;;  %p121_p7 = scmp.eq.s32.totalorder %s65_s4, 0 }
  0x14   : > { %p67_p8 = scmp.eq.s32.totalorder %s66_s5, 0  ;;  %p1561_p9 = por %p76_p6, %p49_p2 }
  0x15   : > { %s123_s7 = sadd.s32 1, %s1420_s13  ;;  %p133_p10 = scmp.ne.s32.totalorder %s1420_s13, %s1416_s12 }
  0x16   : > { %s1569_s8 = scalar_select %p67_p8, %s1428_s15, %s69_s29  }
  0x17   : > { %s1572_s9 = scalar_select %p121_p7, %s1420_s13, %s123_s7  }
  0x18   : > { %p134_p11 = scmp.eq.s32.totalorder %s1116_s23, 11  ;;  %p1119_p13 = scmp.ge.s32.totalorder %s1456_s22, 12 }
  0x1a   : > { %p1574_p12 = por %p134_p11, %p133_p10  ;;  %156 = sbr.rel (%p1119_p13) target bundleno = 78 (0x4e), region = 16 }
  0x21   : > { %159 = sbr.rel (!%p1547_p5) target bundleno = 44 (0x2c), region = 20  ;;  %s161_s11 = sand.u32 (%p1547_p5), 1, %s1436_s17  }
  0x22   : > { %s1191_s26 = smul.u32 (%p1547_p5), 12, %s1448_s20  ;;  %s1824_s0 = sld [smem:[#allocation7_spill]] (%p1547_p5) }
  0x23   : > { %s1200_s27 = smul.u32 (%p1547_p5), 24, %s161_s11 }
  0x25   : > { %s163_s23 = scalar_lea.vmem (%p1547_p5), [#allocation3], %s1200_s27 }
  0x28   : > { %s169_s5 = scalar_lea.vmem %s1824_s0, %s1191_s26 }
  0x29   : > { %v184_v0 = vld [vmem:[%s169_s5] sm:$0xff]  ;;  %v186_v1 = vld [vmem:[%s169_s5 + $0x48] sm:$0xff]  ;;  %v1123_v3 = vld [vmem:[%s169_s5 + $0x50] sm:$0xf] }
  0x2a   : > { %v1121_v2 = vld [vmem:[%s169_s5 + $0x8] sm:$0xf]  ;;  %185 = vst [vmem:[%s163_s23] sm:$0xff] %v184_v0  ;;  %187 = vst [vmem:[%s163_s23 + $0xc] sm:$0xff] %v186_v1 }
  0x2b   : > { %1122 = vst [vmem:[%s163_s23 + $0x8] sm:$0xf] %v1121_v2  ;;  %1124 = vst [vmem:[%s163_s23 + $0x14] sm:$0xf] %v1123_v3 }
  0x2c PF: > { %204 = sbr.rel (!%p1561_p9) target bundleno = 78 (0x4e), region = 46  ;;  %s206_s28 = sand.u32 (%p1561_p9), 1, %s1428_s15  }
  0x2d   : > { %s1201_s7 = smul.u32 (%p1561_p9), 384, %s206_s28  ;;  %s1125_s11 = sshll.u32 (%p1561_p9), %s1452_s21, 1 }
  0x2e   : > { %s1192_s26 = smul.u32 (%p1561_p9), 192, %s1448_s20  ;;  %s1825_s1 = sld [smem:[#allocation8_spill]] (%p1561_p9) }
  0x2f   : > { %s1599_s6 = scalar_lea.vmem (%p1561_p9), [#allocation4], %s1201_s7 }
  0x30   : > { %s212_s29 = sadd.s32 (%p1561_p9), %s1192_s26, %s1125_s11 }
  0x31   : > { %s1127_s4 = sshll.u32 (%p1561_p9), %s212_s29, 2 }
  0x34   : > { %s1594_s25 = scalar_lea.vmem %s1825_s1, %s1127_s4 }
  0x35   : > { %v336_v4 = vld [vmem:[%s1594_s25] sm:$0xff]  ;;  %v338_v5 = vld [vmem:[%s1594_s25 + $0x10] sm:$0xff] }
  0x36   : > { %v340_v6 = vld [vmem:[%s1594_s25 + $0x20] sm:$0xff]  ;;  %337 = vst [vmem:[%s1599_s6] sm:$0xff] %v336_v4  ;;  %339 = vst [vmem:[%s1599_s6 + $0x8] sm:$0xff] %v338_v5  ;;  %v342_v7 = vld [vmem:[%s1594_s25 + $0x30] sm:$0xff] }
  0x37   : > { %341 = vst [vmem:[%s1599_s6 + $0x10] sm:$0xff] %v340_v6  ;;  %v344_v8 = vld [vmem:[%s1594_s25 + $0x40] sm:$0xff]  ;;  %v346_v9 = vld [vmem:[%s1594_s25 + $0x50] sm:$0xff]  ;;  %343 = vst [vmem:[%s1599_s6 + $0x18] sm:$0xff] %v342_v7 }
  0x38   : > { %345 = vst [vmem:[%s1599_s6 + $0x20] sm:$0xff] %v344_v8  ;;  %347 = vst [vmem:[%s1599_s6 + $0x28] sm:$0xff] %v346_v9  ;;  %v348_v10 = vld [vmem:[%s1594_s25 + $0x60] sm:$0xff]  ;;  %v350_v11 = vld [vmem:[%s1594_s25 + $0x70] sm:$0xff] }
  0x39   : > { %v352_v12 = vld [vmem:[%s1594_s25 + $0x80] sm:$0xff]  ;;  %349 = vst [vmem:[%s1599_s6 + $0x30] sm:$0xff] %v348_v10  ;;  %351 = vst [vmem:[%s1599_s6 + $0x38] sm:$0xff] %v350_v11  ;;  %v354_v13 = vld [vmem:[%s1594_s25 + $0x90] sm:$0xff] }
  0x3a   : > { %353 = vst [vmem:[%s1599_s6 + $0x40] sm:$0xff] %v352_v12  ;;  %v356_v14 = vld [vmem:[%s1594_s25 + $0xa0] sm:$0xff]  ;;  %v358_v15 = vld [vmem:[%s1594_s25 + $0xb0] sm:$0xff]  ;;  %355 = vst [vmem:[%s1599_s6 + $0x48] sm:$0xff] %v354_v13 }
  0x3b   : > { %357 = vst [vmem:[%s1599_s6 + $0x50] sm:$0xff] %v356_v14  ;;  %359 = vst [vmem:[%s1599_s6 + $0x58] sm:$0xff] %v358_v15  ;;  %v360_v16 = vld [vmem:[%s1594_s25 + $0xc0] sm:$0xff]  ;;  %v362_v17 = vld [vmem:[%s1594_s25 + $0xd0] sm:$0xff] }
  0x3c   : > { %v364_v18 = vld [vmem:[%s1594_s25 + $0xe0] sm:$0xff]  ;;  %361 = vst [vmem:[%s1599_s6 + $0x60] sm:$0xff] %v360_v16  ;;  %363 = vst [vmem:[%s1599_s6 + $0x68] sm:$0xff] %v362_v17  ;;  %v366_v19 = vld [vmem:[%s1594_s25 + $0xf0] sm:$0xff] }
  0x3d   : > { %365 = vst [vmem:[%s1599_s6 + $0x70] sm:$0xff] %v364_v18  ;;  %v368_v20 = vld [vmem:[%s1594_s25 + $0x100] sm:$0xff]  ;;  %v370_v21 = vld [vmem:[%s1594_s25 + $0x110] sm:$0xff]  ;;  %367 = vst [vmem:[%s1599_s6 + $0x78] sm:$0xff] %v366_v19 }
  0x3e   : > { %369 = vst [vmem:[%s1599_s6 + $0x80] sm:$0xff] %v368_v20  ;;  %371 = vst [vmem:[%s1599_s6 + $0x88] sm:$0xff] %v370_v21  ;;  %v372_v22 = vld [vmem:[%s1594_s25 + $0x120] sm:$0xff]  ;;  %v374_v23 = vld [vmem:[%s1594_s25 + $0x130] sm:$0xff] }
  0x3f   : > { %v376_v24 = vld [vmem:[%s1594_s25 + $0x140] sm:$0xff]  ;;  %373 = vst [vmem:[%s1599_s6 + $0x90] sm:$0xff] %v372_v22  ;;  %375 = vst [vmem:[%s1599_s6 + $0x98] sm:$0xff] %v374_v23  ;;  %v378_v25 = vld [vmem:[%s1594_s25 + $0x150] sm:$0xff] }
  0x40   : > { %377 = vst [vmem:[%s1599_s6 + $0xa0] sm:$0xff] %v376_v24  ;;  %v380_v26 = vld [vmem:[%s1594_s25 + $0x160] sm:$0xff]  ;;  %v382_v27 = vld [vmem:[%s1594_s25 + $0x170] sm:$0xff]  ;;  %379 = vst [vmem:[%s1599_s6 + $0xa8] sm:$0xff] %v378_v25 }
  0x41   : > { %381 = vst [vmem:[%s1599_s6 + $0xb0] sm:$0xff] %v380_v26  ;;  %383 = vst [vmem:[%s1599_s6 + $0xb8] sm:$0xff] %v382_v27  ;;  %v384_v28 = vld [vmem:[%s1594_s25 + $0x180] sm:$0xff]  ;;  %v386_v29 = vld [vmem:[%s1594_s25 + $0x190] sm:$0xff] }
  0x42   : > { %v388_v30 = vld [vmem:[%s1594_s25 + $0x1a0] sm:$0xff]  ;;  %385 = vst [vmem:[%s1599_s6 + $0xc0] sm:$0xff] %v384_v28  ;;  %387 = vst [vmem:[%s1599_s6 + $0xc8] sm:$0xff] %v386_v29  ;;  %v390_v31 = vld [vmem:[%s1594_s25 + $0x1b0] sm:$0xff] }
  0x43   : > { %389 = vst [vmem:[%s1599_s6 + $0xd0] sm:$0xff] %v388_v30  ;;  %v392_v32 = vld [vmem:[%s1594_s25 + $0x1c0] sm:$0xff]  ;;  %v394_v33 = vld [vmem:[%s1594_s25 + $0x1d0] sm:$0xff]  ;;  %391 = vst [vmem:[%s1599_s6 + $0xd8] sm:$0xff] %v390_v31 }
  0x44   : > { %393 = vst [vmem:[%s1599_s6 + $0xe0] sm:$0xff] %v392_v32  ;;  %395 = vst [vmem:[%s1599_s6 + $0xe8] sm:$0xff] %v394_v33  ;;  %v396_v34 = vld [vmem:[%s1594_s25 + $0x1e0] sm:$0xff]  ;;  %v398_v35 = vld [vmem:[%s1594_s25 + $0x1f0] sm:$0xff] }
  0x45   : > { %v400_v36 = vld [vmem:[%s1594_s25 + $0x200] sm:$0xff]  ;;  %397 = vst [vmem:[%s1599_s6 + $0xf0] sm:$0xff] %v396_v34  ;;  %399 = vst [vmem:[%s1599_s6 + $0xf8] sm:$0xff] %v398_v35  ;;  %v402_v37 = vld [vmem:[%s1594_s25 + $0x210] sm:$0xff] }
  0x46   : > { %401 = vst [vmem:[%s1599_s6 + $0x100] sm:$0xff] %v400_v36  ;;  %v404_v38 = vld [vmem:[%s1594_s25 + $0x220] sm:$0xff]  ;;  %v406_v39 = vld [vmem:[%s1594_s25 + $0x230] sm:$0xff]  ;;  %403 = vst [vmem:[%s1599_s6 + $0x108] sm:$0xff] %v402_v37 }
  0x47   : > { %405 = vst [vmem:[%s1599_s6 + $0x110] sm:$0xff] %v404_v38  ;;  %407 = vst [vmem:[%s1599_s6 + $0x118] sm:$0xff] %v406_v39  ;;  %v408_v40 = vld [vmem:[%s1594_s25 + $0x240] sm:$0xff]  ;;  %v410_v41 = vld [vmem:[%s1594_s25 + $0x250] sm:$0xff] }
  0x48   : > { %v412_v42 = vld [vmem:[%s1594_s25 + $0x260] sm:$0xff]  ;;  %409 = vst [vmem:[%s1599_s6 + $0x120] sm:$0xff] %v408_v40  ;;  %411 = vst [vmem:[%s1599_s6 + $0x128] sm:$0xff] %v410_v41  ;;  %v414_v43 = vld [vmem:[%s1594_s25 + $0x270] sm:$0xff] }
  0x49   : > { %413 = vst [vmem:[%s1599_s6 + $0x130] sm:$0xff] %v412_v42  ;;  %v416_v44 = vld [vmem:[%s1594_s25 + $0x280] sm:$0xff]  ;;  %v418_v45 = vld [vmem:[%s1594_s25 + $0x290] sm:$0xff]  ;;  %415 = vst [vmem:[%s1599_s6 + $0x138] sm:$0xff] %v414_v43 }
  0x4a   : > { %417 = vst [vmem:[%s1599_s6 + $0x140] sm:$0xff] %v416_v44  ;;  %419 = vst [vmem:[%s1599_s6 + $0x148] sm:$0xff] %v418_v45  ;;  %v420_v46 = vld [vmem:[%s1594_s25 + $0x2a0] sm:$0xff]  ;;  %v422_v47 = vld [vmem:[%s1594_s25 + $0x2b0] sm:$0xff] }
  0x4b   : > { %v424_v48 = vld [vmem:[%s1594_s25 + $0x2c0] sm:$0xff]  ;;  %421 = vst [vmem:[%s1599_s6 + $0x150] sm:$0xff] %v420_v46  ;;  %423 = vst [vmem:[%s1599_s6 + $0x158] sm:$0xff] %v422_v47  ;;  %v426_v49 = vld [vmem:[%s1594_s25 + $0x2d0] sm:$0xff] }
  0x4c   : > { %425 = vst [vmem:[%s1599_s6 + $0x160] sm:$0xff] %v424_v48  ;;  %v428_v50 = vld [vmem:[%s1594_s25 + $0x2e0] sm:$0xff]  ;;  %v430_v51 = vld [vmem:[%s1594_s25 + $0x2f0] sm:$0xff]  ;;  %427 = vst [vmem:[%s1599_s6 + $0x168] sm:$0xff] %v426_v49 }
  0x4d   : > { %429 = vst [vmem:[%s1599_s6 + $0x170] sm:$0xff] %v428_v50  ;;  %431 = vst [vmem:[%s1599_s6 + $0x178] sm:$0xff] %v430_v51 }
  0x4e PF: > { %p1128_p0 = scmp.ge.s32.totalorder %s1456_s22, 1  ;;  %p444_p1 = scmp.lt.s32.totalorder %s1456_s22, 13 }
  0x50   : > { %p445_p2 = pnand %p1128_p0, %p444_p1 }
  0x51   : > { %s451_s0 = sand.u32 (!%p445_p2), 1, %s1432_s16   ;;  %s458_s5 = sand.u32 (!%p445_p2), 1, %s1424_s14  }
  0x52   : > { %448 = sbr.rel (%p445_p2) target bundleno = 403 (0x193), region = 88  ;;  %s485_s28 = sand.u32 (!%p445_p2), 1, %s1416_s12  }
  0x53   : > { %s1202_s23 = smul.u32 (!%p445_p2), 24, %s451_s0  ;;  %s1129_s7 = sshll.u32 (!%p445_p2), %s485_s28, 4 }
  0x54   : > { %s1203_s25 = smul.u32 (!%p445_p2), 384, %s458_s5  ;;  %s1130_s11 = sshll.u32 (!%p445_p2), %s1444_s19, 1 }
  0x55   : > { %p493_p3 = scmp.lt.s32.totalorder (!%p445_p2), %s1130_s11, 3  ;;  %s1706_s27 = scalar_lea.vmem (!%p445_p2), [#allocation3], %s1202_s23 }
  0x56   : > { %s1708_s6 = scalar_lea.vmem (!%p445_p2), [#allocation4], %s1203_s25  ;;  %s1710_s1 = scalar_lea.vmem (!%p445_p2), [#allocation5], %s1129_s7 }
  0x57   : > { %p1131_p4 = scmp.ne.s32.totalorder (!%p445_p2), %s1440_s18, 0 }
  0x59   : > { %s1844_s11 = smov (!%p493_p3, %s1130_s11), 3  ;;  %503 = sbr.rel (%p1131_p4) target bundleno = 96 (0x60), region = 100 }
  0x5a   : > { %s495_s4 = scalar_lea.vmem %s1815_s2, %s1844_s11  ;;  %v1458_v52 = vmov (!%p1131_p4), 0.0  }
  0x5b   : > { %504 = vst [vmem:[#allocation2] sm:$0xff] (!%p1131_p4), %v1458_v52  ;;  %505 = vst [vmem:[#allocation2 + $0x8] sm:$0xff] (!%p1131_p4), %v1458_v52 }
  0x5c   : > { %506 = vst [vmem:[#allocation2 + $0x10] sm:$0xff] (!%p1131_p4), %v1458_v52  ;;  %507 = vst [vmem:[#allocation2 + $0x18] sm:$0xff] (!%p1131_p4), %v1458_v52 }
  0x60 PF: > { %v1294_v53 = vld [vmem:[%s1708_s6 + $0x4] ss:$8 sps:$4 sm:$0xff]   ;;  %v1296_v54 = vld [vmem:[%s1708_s6] ss:$8 sps:$4 sm:$0xff]   ;;  %v1459_v55 = vmov 0   ;;  %p1183_p5 = scmp.ne.s32.totalorder %s1440_s18, 5 }
  0x61   : > { %895 = vmatprep.mubr.bf16.mxu0 %v1459_v55  ;;  %820 = vmatprep.subr.bf16.mxu1 %v1294_v53  ;;  %v1297_v56 = vld [vmem:[%s1708_s6 + $0x14] ss:$8 sps:$4 sm:$0xff]   ;;  %v1299_v57 = vld [vmem:[%s1708_s6 + $0x10] ss:$8 sps:$4 sm:$0xff]   ;;  %v1300_v58 = vld [vmem:[%s1708_s6 + $0x24] ss:$8 sps:$4 sm:$0xff]  }
  0x62   : > { %821 = vmatpush1.bf16.msra.mxu1 %v1296_v54  ;;  %v1302_v59 = vld [vmem:[%s1708_s6 + $0x20] ss:$8 sps:$4 sm:$0xff]   ;;  %v1303_v60 = vld [vmem:[%s1708_s6 + $0x34] ss:$8 sps:$4 sm:$0xff]   ;;  %v1305_v61 = vld [vmem:[%s1708_s6 + $0x30] ss:$8 sps:$4 sm:$0xff]  }
  0x63   : > { %822 = vmatprep.subr.bf16.mxu1 %v1297_v56  ;;  %v1318_v62 = vld [vmem:[%s1708_s6 + $0x104] ss:$8 sps:$4 sm:$0xff]   ;;  %v1320_v63 = vld [vmem:[%s1708_s6 + $0x100] ss:$8 sps:$4 sm:$0xff]   ;;  %v1324_v1 = vld [vmem:[%s1708_s6 + $0x114] ss:$8 sps:$4 sm:$0xff]  }
  0x64   : > { %v1306_v0 = vld [vmem:[%s1708_s6 + $0x44] ss:$8 sps:$4 sm:$0xff]   ;;  %863 = vmatprep.subr.bf16.mxu0 %v1318_v62  ;;  %v1326_v2 = vld [vmem:[%s1708_s6 + $0x110] ss:$8 sps:$4 sm:$0xff]   ;;  %v1308_v3 = vld [vmem:[%s1708_s6 + $0x40] ss:$8 sps:$4 sm:$0xff]  }
  0x65   : > { %864 = vmatpush1.bf16.msra.mxu0 %v1320_v63  ;;  %v1309_v4 = vld [vmem:[%s1708_s6 + $0x54] ss:$8 sps:$4 sm:$0xff]   ;;  %v1330_v5 = vld [vmem:[%s1708_s6 + $0x124] ss:$8 sps:$4 sm:$0xff]   ;;  %v1332_v6 = vld [vmem:[%s1708_s6 + $0x120] ss:$8 sps:$4 sm:$0xff]  }
  0x66   : > { %823 = vmatpush1.bf16.msra.mxu1 %v1299_v57  ;;  %865 = vmatprep.subr.bf16.mxu0 %v1324_v1  ;;  %v1311_v7 = vld [vmem:[%s1708_s6 + $0x50] ss:$8 sps:$4 sm:$0xff]   ;;  %v1336_v8 = vld [vmem:[%s1708_s6 + $0x134] ss:$8 sps:$4 sm:$0xff]   ;;  %v1312_v9 = vld [vmem:[%s1708_s6 + $0x64] ss:$8 sps:$4 sm:$0xff]  }
  0x67   : > { %824 = vmatprep.subr.bf16.mxu1 %v1300_v58  ;;  %v1338_v10 = vld [vmem:[%s1708_s6 + $0x130] ss:$8 sps:$4 sm:$0xff]   ;;  %v1314_v11 = vld [vmem:[%s1708_s6 + $0x60] ss:$8 sps:$4 sm:$0xff]   ;;  %v1342_v12 = vld [vmem:[%s1708_s6 + $0x144] ss:$8 sps:$4 sm:$0xff]  }
  0x68   : > { %v1315_v13 = vld [vmem:[%s1708_s6 + $0x74] ss:$8 sps:$4 sm:$0xff]   ;;  %v1344_v14 = vld [vmem:[%s1708_s6 + $0x140] ss:$8 sps:$4 sm:$0xff]   ;;  %v1317_v15 = vld [vmem:[%s1708_s6 + $0x70] ss:$8 sps:$4 sm:$0xff]  }
  0x69   : > { %866 = vmatpush1.bf16.msra.mxu0 %v1326_v2  ;;  %v1348_v16 = vld [vmem:[%s1708_s6 + $0x154] ss:$8 sps:$4 sm:$0xff]   ;;  %v1321_v17 = vld [vmem:[%s1708_s6 + $0x84] ss:$8 sps:$4 sm:$0xff]   ;;  %v1350_v18 = vld [vmem:[%s1708_s6 + $0x150] ss:$8 sps:$4 sm:$0xff]  }
  0x6a   : > { %825 = vmatpush1.bf16.msra.mxu1 %v1302_v59  ;;  %867 = vmatprep.subr.bf16.mxu0 %v1330_v5  ;;  %v1323_v19 = vld [vmem:[%s1708_s6 + $0x80] ss:$8 sps:$4 sm:$0xff]   ;;  %v1354_v20 = vld [vmem:[%s1708_s6 + $0x164] ss:$8 sps:$4 sm:$0xff]   ;;  %v1327_v21 = vld [vmem:[%s1708_s6 + $0x94] ss:$8 sps:$4 sm:$0xff]  }
  0x6b   : > { %826 = vmatprep.subr.bf16.mxu1 %v1303_v60  ;;  %v1356_v22 = vld [vmem:[%s1708_s6 + $0x160] ss:$8 sps:$4 sm:$0xff]   ;;  %v1329_v24 = vld [vmem:[%s1708_s6 + $0x90] ss:$8 sps:$4 sm:$0xff]   ;;  %v1360_v25 = vld [vmem:[%s1708_s6 + $0x174] ss:$8 sps:$4 sm:$0xff]  }
  0x6c   : > { %v1369_v23 = vld [vmem:[%s1706_s27 + $0x4] ss:$12 sps:$4 sm:$0xff]   ;;  %v1366_v30 = vld [vmem:[%s1706_s27 + $0x8] ss:$12 sps:$4 sm:$0xff]   ;;  %v1367_v40 = vld [vmem:[%s1706_s27] ss:$12 sps:$4 sm:$0xff]  }
  0x6d   : > { %868 = vmatpush1.bf16.msra.mxu0 %v1332_v6  ;;  %v1333_v26 = vld [vmem:[%s1708_s6 + $0xa4] ss:$8 sps:$4 sm:$0xff]   ;;  %852 = vmatprep.mubr.bf16.mxu1 %v1369_v23  ;;  %v1362_v27 = vld [vmem:[%s1708_s6 + $0x170] ss:$8 sps:$4 sm:$0xff]   ;;  %v1335_v28 = vld [vmem:[%s1708_s6 + $0xa0] ss:$8 sps:$4 sm:$0xff]  }
  0x6e   : > { %827 = vmatpush1.bf16.msra.mxu1 %v1305_v61  ;;  %869 = vmatprep.subr.bf16.mxu0 %v1336_v8  ;;  %v1339_v29 = vld [vmem:[%s1708_s6 + $0xb4] ss:$8 sps:$4 sm:$0xff]   ;;  %v1341_v31 = vld [vmem:[%s1708_s6 + $0xb0] ss:$8 sps:$4 sm:$0xff]   ;;  %v1345_v32 = vld [vmem:[%s1708_s6 + $0xc4] ss:$8 sps:$4 sm:$0xff]   ;;  %v924_v61 = vlaneseq (!%p1183_p5) }
  0x6f   : > { %828 = vmatprep.subr.bf16.mxu1 %v1306_v0  ;;  %v1347_v33 = vld [vmem:[%s1708_s6 + $0xc0] ss:$8 sps:$4 sm:$0xff]   ;;  %v1351_v34 = vld [vmem:[%s1708_s6 + $0xd4] ss:$8 sps:$4 sm:$0xff]   ;;  %v1353_v35 = vld [vmem:[%s1708_s6 + $0xd0] ss:$8 sps:$4 sm:$0xff]  }
  0x70   : > { %v1357_v36 = vld [vmem:[%s1708_s6 + $0xe4] ss:$8 sps:$4 sm:$0xff]   ;;  %v1359_v37 = vld [vmem:[%s1708_s6 + $0xe0] ss:$8 sps:$4 sm:$0xff]   ;;  %v1363_v38 = vld [vmem:[%s1708_s6 + $0xf4] ss:$8 sps:$4 sm:$0xff]  }
  0x71   : > { %870 = vmatpush1.bf16.msra.mxu0 %v1338_v10  ;;  %v1365_v39 = vld [vmem:[%s1708_s6 + $0xf0] ss:$8 sps:$4 sm:$0xff]   ;;  %v510_v51 = vld [vmem:[#allocation2 + $0x10] sm:$0xff]  ;;  %v511_v55 = vld [vmem:[#allocation2 + $0x18] sm:$0xff]  ;;  %v925_v62 = vshrl.u32 (!%p1183_p5), %v924_v61, 7 }
  0x72   : > { %829 = vmatpush1.bf16.msra.mxu1 %v1308_v3  ;;  %871 = vmatprep.subr.bf16.mxu0 %v1342_v12  ;;  %v508_v45 = vld [vmem:[#allocation2] sm:$0xff]  ;;  %v509_v48 = vld [vmem:[#allocation2 + $0x8] sm:$0xff] }
  0x73   : > { %830 = vmatprep.subr.bf16.mxu1 %v1309_v4  ;;  %v922_v63 = vld [vmem:[%s495_s4] sm:$0x3] (!%p1183_p5)  ;;  %v926_v1 = vsub.s32 (!%p1183_p5), 0, %v925_v62  ;;  %v930_v2 = vsub.s32 (!%p1183_p5), 1, %v925_v62 }
  0x75   : > { %872 = vmatpush1.bf16.msra.mxu0 %v1344_v14  ;;  %v927_v6 = vrot.slane (!%p1183_p5), %v922_v63, %v926_v1 }
  0x76   : > { %831 = vmatpush1.bf16.msra.mxu1 %v1311_v7  ;;  %873 = vmatprep.subr.bf16.mxu0 %v1348_v16  ;;  %v931_v7 = vrot.slane (!%p1183_p5), %v922_v63, %v930_v2 }
  0x77   : > { %832 = vmatprep.subr.bf16.mxu1 %v1312_v9 }
  0x79   : > { %874 = vmatpush1.bf16.msra.mxu0 %v1350_v18 }
  0x7a   : > { %833 = vmatpush1.bf16.msra.mxu1 %v1314_v11  ;;  %875 = vmatprep.subr.bf16.mxu0 %v1354_v20 }
  0x7b   : > { %834 = vmatprep.subr.bf16.mxu1 %v1315_v13 }
  0x7d   : > { %876 = vmatpush1.bf16.msra.mxu0 %v1356_v22 }
  0x7e   : > { %835 = vmatpush1.bf16.msra.mxu1 %v1317_v15  ;;  %877 = vmatprep.subr.bf16.mxu0 %v1360_v25 }
  0x7f   : > { %836 = vmatprep.subr.bf16.mxu1 %v1321_v17 }
  0x81   : > { %878 = vmatpush1.bf16.msra.mxu0 %v1362_v27 }
  0x82   : > { %837 = vmatpush1.bf16.msra.mxu1 %v1323_v19 }
  0x83   : > { %838 = vmatprep.subr.bf16.mxu1 %v1327_v21 }
  0x84   : > { %896 = vmatmul.mubr.bf16.vlgmr.msra.gmra.mrb[0].mxu0 %v1366_v30 }
  0x86   : > { %839 = vmatpush1.bf16.msra.mxu1 %v1329_v24 }
  0x87   : > { %840 = vmatprep.subr.bf16.mxu1 %v1333_v26 }
  0x8a   : > { %841 = vmatpush1.bf16.msra.mxu1 %v1335_v28 }
  0x8b   : > { %842 = vmatprep.subr.bf16.mxu1 %v1339_v29 }
  0x8e   : > { %843 = vmatpush1.bf16.msra.mxu1 %v1341_v31 }
  0x8f   : > { %844 = vmatprep.subr.bf16.mxu1 %v1345_v32 }
  0x92   : > { %845 = vmatpush1.bf16.msra.mxu1 %v1347_v33 }
  0x93   : > { %846 = vmatprep.subr.bf16.mxu1 %v1351_v34 }
  0x96   : > { %847 = vmatpush1.bf16.msra.mxu1 %v1353_v35 }
  0x97   : > { %848 = vmatprep.subr.bf16.mxu1 %v1357_v36 }
  0x9a   : > { %849 = vmatpush1.bf16.msra.mxu1 %v1359_v37 }
  0x9b   : > { %850 = vmatprep.subr.bf16.mxu1 %v1363_v38 }
  0x9e   : > { %851 = vmatpush1.bf16.msra.mxu1 %v1365_v39 }
  0xa1   : > { %853 = vmatmul.mubr.bf16.vlgmr.msra.gmra.mrb[0].mxu1 %v1367_v40 }
 0x157   : > { %v897_v41 = vpop.f32.mrb[0].mxu0 }
 0x158   : > { %v899_v42 = vpop.f32.mrb[1].mxu0 }
 0x159   : > { %v901_v43 = vpop.f32.mrb[2].mxu0 }
 0x15a   : > { %v903_v44 = vpop.f32.mrb[3].mxu0 }
 0x174   : > { %v854_v46 = vpop.f32.mrb[0].mxu1 }
 0x175   : > { %v898_v47 = vadd.f32 %v897_v41, %v854_v46  ;;  %v856_v49 = vpop.f32.mrb[1].mxu1 }
 0x176   : > { %v900_v50 = vadd.f32 %v899_v42, %v856_v49  ;;  %v858_v52 = vpop.f32.mrb[2].mxu1  ;;  %917 = sbr.rel (%p1183_p5) target bundleno = 395 (0x18b), region = 104 }
 0x177   : > { %v906_v53 = vadd.f32 %v898_v47, %v508_v45  ;;  %v902_v54 = vadd.f32 %v901_v43, %v858_v52  ;;  %v860_v56 = vpop.f32.mrb[3].mxu1 }
 0x178   : > { %v907_v57 = vadd.f32 %v900_v50, %v509_v48  ;;  %v904_v58 = vadd.f32 %v903_v44, %v860_v56 }
 0x179   : > { %910 = vst [vmem:[#allocation2] sm:$0xff] %v906_v53  ;;  %v908_v59 = vadd.f32 %v902_v54, %v510_v51 }
 0x17a   : > { %911 = vst [vmem:[#allocation2 + $0x8] sm:$0xff] %v907_v57  ;;  %v909_v60 = vadd.f32 %v904_v58, %v511_v55 }
 0x17b   : > { %912 = vst [vmem:[#allocation2 + $0x10] sm:$0xff] %v908_v59 }
 0x17c   : > { %913 = vst [vmem:[#allocation2 + $0x18] sm:$0xff] %v909_v60 }
 0x180   : > { %v918_v0 = vld [vmem:[#allocation2] sm:$0xff] }
 0x181   : > { %v919_v3 = vld [vmem:[#allocation2 + $0x8] sm:$0xff]  ;;  %v934_v8 = vadd.f32 %v927_v6, %v918_v0 }
 0x182   : > { %v920_v4 = vld [vmem:[#allocation2 + $0x10] sm:$0xff]  ;;  %v935_v9 = vadd.f32 %v931_v7, %v919_v3 }
 0x183   : > { %v921_v5 = vld [vmem:[#allocation2 + $0x18] sm:$0xff]  ;;  %v936_v10 = vadd.f32 %v927_v6, %v920_v4  ;;  %v938_v12 = vmax.f32 %v934_v8, 0.0 }
 0x184   : > { %v937_v11 = vadd.f32 %v931_v7, %v921_v5  ;;  %v939_v13 = vmax.f32 %v935_v9, 0.0 }
 0x185   : > { %v940_v14 = vmax.f32 %v936_v10, 0.0 }
 0x186   : > { %v941_v15 = vmax.f32 %v937_v11, 0.0  ;;  %v1193_v16 = vpack.c.bf16 %v939_v13, %v938_v12 }
 0x188   : > { %v1194_v17 = vpack.c.bf16 %v941_v15, %v940_v14  ;;  %954 = vst [vmem:[%s1710_s1] sm:$0xff] %v1193_v16 }
 0x18a   : > { %955 = vst [vmem:[%s1710_s1 + $0x8] sm:$0xff] %v1194_v17 }
 0x18b PF: > { %962 = sbr.rel (!%p1574_p12) target bundleno = 403 (0x193), region = 108  ;;  %s1195_s16 = sshll.u32 (%p1574_p12), %s1444_s19, 3 }
 0x18c   : > { %s968_s5 = scalar_lea.vmem (%p1574_p12), %s1816_s3, %s1195_s16 }
 0x18f   : > { %v998_v18 = vld [vmem:[%s1710_s1] sm:$0xff] (%p1574_p12) }
 0x190   : > { %999 = vst [vmem:[%s968_s5] sm:$0xff] (%p1574_p12), %v998_v18 }
 0x191   : > { %v1000_v19 = vld [vmem:[%s1710_s1 + $0x8] sm:$0xff] (%p1574_p12) }
 0x192   : > { %1001 = vst [vmem:[%s968_s5 + $0x10] sm:$0xff] %v1000_v19 }
 0x193 PF: > { %s13_s22 = sadd.s32 1, %s1456_s22   ;;  %s1826_s1 = sld [smem:[#allocation6_spill]] }
 0x194   : > { %p10_p6 = scmp.ge.s32.totalorder %s13_s22, 14   ;;  %s1827_s12 = smov %s1420_s13 }
 0x195   : > { %s1828_s13 = smov %s1572_s9  ;;  %s1829_s14 = smov %s1428_s15 }
 0x196   : > { %s1830_s15 = smov %s1569_s8  ;;  %s1831_s16 = smov %s1436_s17 }
 0x197   : > { %s1832_s17 = smov %s1555_s30  ;;  %s1833_s18 = smov %s1448_s20 }
 0x198   : > { %s1834_s19 = smov %s1452_s21  ;;  %s1835_s20 = smov %s1838_s24 }
 0x199   : > { %s1836_s21 = smov %s1826_s1  ;;  %12 = sbr.rel (!%p10_p6) target bundleno = 9 (0x9), region = 194 }

// kernel: dual_grad_loss.46
= control target key start
LH: loop header
LB: loop body
LE: loop exit
PB: predicated region body
PF: predicated region fallthrough
CT: control target
= control target key end

     0   :  { %s176_s0 = inlined_call_operand.vmem [shape: bf16[16,512], index: 0, kind: input, shape index: {}]   ;;  %s177_s1 = inlined_call_operand.vmem [shape: bf16[16,512], index: 1, kind: input, shape index: {}]   ;;  %s178_s2 = inlined_call_operand.hbm [shape: f32[1,1], index: 2, kind: output, shape index: {}]  }
   0x1   :  { %v18_v0 = vld [vmem:[%s176_s0] sm:$0xff]  ;;  %v19_v1 = vld [vmem:[%s176_s0 + $0x8] sm:$0xff]  ;;  %v20_v2 = vld [vmem:[%s176_s0 + $0x10] sm:$0xff] }
   0x2   :  { %v22_v3 = vunpack.c.l.bf16 %v18_v0  ;;  %v23_v4 = vunpack.c.h.bf16 %v18_v0  ;;  %v24_v5 = vunpack.c.l.bf16 %v19_v1  ;;  %v25_v6 = vunpack.c.h.bf16 %v19_v1  ;;  %v30_v7 = vld [vmem:[%s177_s1] sm:$0xff]  ;;  %v31_v8 = vld [vmem:[%s177_s1 + $0x8] sm:$0xff]  ;;  %v32_v10 = vld [vmem:[%s177_s1 + $0x10] sm:$0xff] }
   0x3   :  { %v26_v9 = vunpack.c.l.bf16 %v20_v2 }
   0x4   :  { %7 = vsyncpa [#allocation3], 0  ;;  %v21_v11 = vld [vmem:[%s176_s0 + $0x18] sm:$0xff]  ;;  %v34_v13 = vunpack.c.l.bf16 %v30_v7  ;;  %v35_v14 = vunpack.c.h.bf16 %v30_v7  ;;  %v36_v15 = vunpack.c.l.bf16 %v31_v8  ;;  %v37_v16 = vunpack.c.h.bf16 %v31_v8  ;;  %s122_s0 = smov [#allocation2]  }
   0x5   :  { %v33_v12 = vld [vmem:[%s177_s1 + $0x18] sm:$0xff]  ;;  %v27_v17 = vunpack.c.h.bf16 %v20_v2  ;;  %v38_v18 = vunpack.c.l.bf16 %v32_v10  ;;  %v39_v19 = vunpack.c.h.bf16 %v32_v10  ;;  %v28_v24 = vunpack.c.l.bf16 %v21_v11  ;;  %s85_s1 = sshll.u32 %s122_s0, 4  ;;  %s86_s1 = int_to_ptr.vmem [resolvable:$true] %s85_s1 }
   0x6   :  { %v42_v20 = vsub.f32 %v22_v3, %v34_v13  ;;  %v43_v21 = vsub.f32 %v23_v4, %v35_v14  ;;  %v44_v22 = vsub.f32 %v24_v5, %v36_v15  ;;  %v45_v23 = vsub.f32 %v25_v6, %v37_v16  ;;  %s97_s26 = scalar_lea.vmem %s86_s1, 16  ;;  %s101_s27 = scalar_lea.vmem %s86_s1, 32 }
   0x7   :  { %v40_v25 = vunpack.c.l.bf16 %v33_v12  ;;  %v46_v26 = vsub.f32 %v26_v9, %v38_v18  ;;  %v29_v30 = vunpack.c.h.bf16 %v21_v11  ;;  %v41_v31 = vunpack.c.h.bf16 %v33_v12  ;;  %p98_p0 = scmp.ne.s32.totalorder %s86_s1, %s97_s26  ;;  %p102_p1 = scmp.lt.s32.totalorder %s86_s1, %s86_s1 }
   0x8   :  { %v51_v27 = vand.u32 2147483647, %v42_v20  ;;  %v52_v28 = vand.u32 2147483647, %v43_v21  ;;  %v53_v29 = vand.u32 2147483647, %v44_v22  ;;  %v47_v32 = vsub.f32 %v27_v17, %v39_v19  ;;  %p103_p2 = scmp.lt.s32.totalorder %s101_s27, %s97_s26 }
   0x9   :  { %v54_v33 = vand.u32 2147483647, %v45_v23  ;;  %v48_v35 = vsub.f32 %v28_v24, %v40_v25  ;;  %v55_v36 = vand.u32 2147483647, %v46_v26  ;;  %v49_v38 = vsub.f32 %v29_v30, %v41_v31 }
   0xa   :  { %v59_v34 = vadd.f32 %v52_v28, %v51_v27  ;;  %v56_v39 = vand.u32 2147483647, %v47_v32  ;;  %vm16_vm0 = vcmask 0   ;;  %v121_v47 = vmov 0.0   ;;  %p104_p3 = por %p103_p2, %p102_p1 }
   0xb   :  { %v57_v41 = vand.u32 2147483647, %v48_v35  ;;  %v58_v43 = vand.u32 2147483647, %v49_v38  ;;  %17 = vst.msk [vmem:[#allocation2] sm:$0x1] %vm16_vm0, %v121_v47 }
   0xc   :  { %v60_v37 = vadd.f32 %v59_v34, %v53_v29  ;;  %p105_p4 = pnand %p104_p3, %p98_p0 }
   0xe   :  { %v61_v40 = vadd.f32 %v60_v37, %v54_v33 }
  0x10   :  { %v62_v42 = vadd.f32 %v61_v40, %v55_v36 }
  0x12   :  { %v63_v44 = vadd.f32 %v62_v42, %v56_v39  ;;  %v50_v55 = vld [vmem:[#allocation2] sm:$0x1] }
  0x14   :  { %v64_v45 = vadd.f32 %v63_v44, %v57_v41 }
  0x16   :  { %v65_v46 = vadd.f32 %v64_v45, %v58_v43 }
  0x18   :  { %66 = vadd.xlane.f32.xlu0 %v65_v46 }
  0xa5   :  { %v67_v48 = vpop.xlane.xlu0 %66 }
  0xa6   :  { %v68_v49 = vrot.slane %v67_v48, 4 }
  0xa8   :  { %v69_v50 = vadd.f32 %v68_v49, %v67_v48 }
  0xaa   :  { %v70_v51 = vrot.slane %v69_v50, 2 }
  0xac   :  { %v71_v52 = vadd.f32 %v70_v51, %v69_v50 }
  0xae   :  { %v72_v53 = vrot.slane %v71_v52, 1 }
  0xb0   :  { %v73_v54 = vadd.f32 %v72_v53, %v71_v52 }
  0xb2   :  { %93 = vpush %v73_v54 }
  0xe3   :  { %s94_s25 = spop %93 }
  0xe4   :  { %v75_v56 = vstv %s94_s25 }
  0xe5   :  { %v76_v57 = vadd.f32 %v75_v56, %v50_v55 }
  0xe7   :  { %78 = vst.msk [vmem:[#allocation2] sm:$0x1] %vm16_vm0, %v76_v57 }
  0xe8   :  { %108 = shalt.err (!%p105_p4)
}
  0xe9   :  { %s109_s30 = scalar_lea.hbm %s178_s2, 16 }
  0xea   :  { %p110_p5 = scmp.ne.s32.totalorder %s178_s2, %s109_s30  ;;  %p113_p6 = scmp.lt.u32.totalorder %s109_s30, %s178_s2 }
  0xec   :  { %p115_p7 = pnand %p113_p6, %p110_p5 }
  0xee   :  { %118 = shalt.err (!%p115_p7)
}
  0xef   :  { %88 = dma.vmem_to_hbm [thread:$0]  %s86_s1, 16, %s178_s2, [#allocation3]  }
  0xf0   :  { %119 = dma.done.wait [#allocation3], 16  }
  0xf1   :  { %120 = vsyncadd [#allocation3], 4294967280 }
  0xf2   :  { %92 = vsyncpa [#allocation3], 1 }

// kernel: dual_grad_loss.25
= control target key start
LH: loop header
LB: loop body
LE: loop exit
PB: predicated region body
PF: predicated region fallthrough
CT: control target
= control target key end

     0   :  { %s192_s0 = inlined_call_operand.vmem [shape: f32[16,512], index: 0, kind: input, shape index: {}]   ;;  %s193_s1 = inlined_call_operand.vmem [shape: f32[16,512], index: 1, kind: input, shape index: {}]   ;;  %s194_s2 = inlined_call_operand.hbm [shape: f32[1,1], index: 2, kind: output, shape index: {}]  }
   0x1   :  { %v18_v0 = vld [vmem:[%s192_s0] sm:$0xff]  ;;  %v19_v1 = vld [vmem:[%s192_s0 + $0x8] sm:$0xff]  ;;  %v20_v2 = vld [vmem:[%s192_s0 + $0x10] sm:$0xff] }
   0x2   :  { %v21_v3 = vld [vmem:[%s192_s0 + $0x18] sm:$0xff]  ;;  %v22_v4 = vld [vmem:[%s192_s0 + $0x20] sm:$0xff]  ;;  %v27_v6 = vld [vmem:[%s193_s1 + $0x8] sm:$0xff] }
   0x3   :  { %v26_v5 = vld [vmem:[%s193_s1] sm:$0xff]  ;;  %v28_v7 = vld [vmem:[%s193_s1 + $0x10] sm:$0xff]  ;;  %v29_v8 = vld [vmem:[%s193_s1 + $0x18] sm:$0xff]  ;;  %v35_v11 = vsub.f32 %v19_v1, %v27_v6 }
   0x4   :  { %v34_v9 = vsub.f32 %v18_v0, %v26_v5  ;;  %v30_v10 = vld [vmem:[%s193_s1 + $0x20] sm:$0xff]  ;;  %v36_v12 = vsub.f32 %v20_v2, %v28_v7  ;;  %v37_v13 = vsub.f32 %v21_v3, %v29_v8  ;;  %v23_v14 = vld [vmem:[%s192_s0 + $0x28] sm:$0xff] }
   0x5   :  { %v31_v15 = vld [vmem:[%s193_s1 + $0x28] sm:$0xff] }
   0x6   :  { %v43_v16 = vand.u32 2147483647, %v34_v9 }
   0x7   :  { %7 = vsyncpa [#allocation3], 0  ;;  %v38_v17 = vsub.f32 %v22_v4, %v30_v10  ;;  %v44_v18 = vand.u32 2147483647, %v35_v11  ;;  %v45_v19 = vand.u32 2147483647, %v36_v12  ;;  %v39_v22 = vsub.f32 %v23_v14, %v31_v15 }
   0x8   :  { %v24_v20 = vld [vmem:[%s192_s0 + $0x30] sm:$0xff]  ;;  %v46_v23 = vand.u32 2147483647, %v37_v13  ;;  %v25_v25 = vld [vmem:[%s192_s0 + $0x38] sm:$0xff]  ;;  %vm16_vm0 = vcmask 0   ;;  %v113_v39 = vmov 0.0  }
   0x9   :  { %v32_v21 = vld [vmem:[%s193_s1 + $0x30] sm:$0xff]  ;;  %v51_v24 = vadd.f32 %v44_v18, %v43_v16  ;;  %v33_v26 = vld [vmem:[%s193_s1 + $0x38] sm:$0xff]  ;;  %v47_v28 = vand.u32 2147483647, %v38_v17  ;;  %v48_v31 = vand.u32 2147483647, %v39_v22 }
   0xa   :  { %v40_v27 = vsub.f32 %v24_v20, %v32_v21  ;;  %v41_v30 = vsub.f32 %v25_v25, %v33_v26  ;;  %17 = vst.msk [vmem:[#allocation2] sm:$0x1] %vm16_vm0, %v113_v39  ;;  %s114_s0 = smov [#allocation2]  }
   0xb   :  { %v52_v29 = vadd.f32 %v51_v24, %v45_v19  ;;  %s77_s1 = sshll.u32 %s114_s0, 4  ;;  %s78_s1 = int_to_ptr.vmem [resolvable:$true] %s77_s1 }
   0xc   :  { %v49_v33 = vand.u32 2147483647, %v40_v27  ;;  %v50_v35 = vand.u32 2147483647, %v41_v30  ;;  %s89_s14 = scalar_lea.vmem %s78_s1, 16  ;;  %s93_s15 = scalar_lea.vmem %s78_s1, 32 }
   0xd   :  { %v53_v32 = vadd.f32 %v52_v29, %v46_v23  ;;  %p90_p0 = scmp.ne.s32.totalorder %s78_s1, %s89_s14  ;;  %p94_p1 = scmp.lt.s32.totalorder %s78_s1, %s78_s1 }
   0xe   :  { %p95_p2 = scmp.lt.s32.totalorder %s93_s15, %s89_s14 }
   0xf   :  { %v54_v34 = vadd.f32 %v53_v32, %v47_v28 }
  0x10   :  { %p96_p3 = por %p95_p2, %p94_p1 }
  0x11   :  { %v55_v36 = vadd.f32 %v54_v34, %v48_v31  ;;  %v42_v47 = vld [vmem:[#allocation2] sm:$0x1] }
  0x12   :  { %p97_p4 = pnand %p96_p3, %p90_p0 }
  0x13   :  { %v56_v37 = vadd.f32 %v55_v36, %v49_v33 }
  0x15   :  { %v57_v38 = vadd.f32 %v56_v37, %v50_v35 }
  0x17   :  { %58 = vadd.xlane.f32.xlu0 %v57_v38 }
  0xa4   :  { %v59_v40 = vpop.xlane.xlu0 %58 }
  0xa5   :  { %v60_v41 = vrot.slane %v59_v40, 4 }
  0xa7   :  { %v61_v42 = vadd.f32 %v60_v41, %v59_v40 }
  0xa9   :  { %v62_v43 = vrot.slane %v61_v42, 2 }
  0xab   :  { %v63_v44 = vadd.f32 %v62_v43, %v61_v42 }
  0xad   :  { %v64_v45 = vrot.slane %v63_v44, 1 }
  0xaf   :  { %v65_v46 = vadd.f32 %v64_v45, %v63_v44 }
  0xb1   :  { %85 = vpush %v65_v46 }
  0xe2   :  { %s86_s13 = spop %85 }
  0xe3   :  { %v67_v48 = vstv %s86_s13 }
  0xe4   :  { %v68_v49 = vadd.f32 %v67_v48, %v42_v47 }
  0xe6   :  { %70 = vst.msk [vmem:[#allocation2] sm:$0x1] %vm16_vm0, %v68_v49 }
  0xe7   :  { %100 = shalt.err (!%p97_p4)
}
  0xe8   :  { %s101_s18 = scalar_lea.hbm %s194_s2, 16 }
  0xe9   :  { %p102_p5 = scmp.ne.s32.totalorder %s194_s2, %s101_s18  ;;  %p105_p6 = scmp.lt.u32.totalorder %s101_s18, %s194_s2 }
  0xeb   :  { %p107_p7 = pnand %p105_p6, %p102_p5 }
  0xed   :  { %110 = shalt.err (!%p107_p7)
}
  0xee   :  { %80 = dma.vmem_to_hbm [thread:$0]  %s78_s1, 16, %s194_s2, [#allocation3]  }
  0xef   :  { %111 = dma.done.wait [#allocation3], 16  }
  0xf0   :  { %112 = vsyncadd [#allocation3], 4294967280 }
  0xf1   :  { %84 = vsyncpa [#allocation3], 1 }

// kernel: dual_grad_loss.45
= control target key start
LH: loop header
LB: loop body
LE: loop exit
PB: predicated region body
PF: predicated region fallthrough
CT: control target
= control target key end

     0   :  { %s2047_s0 = inlined_call_operand.vmem [shape: bf16[16,4608], index: 0, kind: input, shape index: {}]   ;;  %s2048_s1 = inlined_call_operand.vmem [shape: bf16[4608,512], index: 1, kind: input, shape index: {}]   ;;  %s2049_s2 = inlined_call_operand.vmem [shape: f32[1,512], index: 2, kind: input, shape index: {}]   ;;  %s2050_s3 = inlined_call_operand.vmem [shape: bf16[16,512], index: 3, kind: output, shape index: {}]  }
   0x1   :  { %2052 = sst [smem:[#allocation7_spill]] %s2047_s0 }
   0x2   :  { %2053 = sst [smem:[#allocation8_spill]] %s2048_s1 }
   0x3   :  { %s1665_s12 = smov 0   ;;  %s1667_s13 = smov 0  }
   0x4   :  { %s1669_s14 = smov 0   ;;  %s1671_s15 = smov 0  }
   0x5   :  { %s1673_s16 = smov 0   ;;  %s1675_s17 = smov 0  }
   0x6   :  { %s1677_s18 = smov 0   ;;  %s1679_s19 = smov 0  }
   0x7   :  { %s1681_s20 = smov 0   ;;  %s1683_s21 = smov 0  }
   0x8   :  { %s1685_s22 = smov 0  }
   0x9 LB: > { %s1262_s23 = sadd.s32 4294967295, %s1642_s22   ;;  %s25_s24 = sadd.s32 1, %s1634_s20  ;;  %s1642_s22 = sphi %s1685_s22, %s13_s22   ;;  %s1638_s21 = sphi %s1683_s21, %s2070_s21   ;;  %s1634_s20 = sphi %s1681_s20, %s2069_s20   ;;  %s1630_s19 = sphi %s1679_s19, %s2068_s19   ;;  %s1626_s18 = sphi %s1677_s18, %s2067_s18   ;;  %s1622_s17 = sphi %s1675_s17, %s2066_s17   ;;  %s1618_s16 = sphi %s1673_s16, %s2065_s16   ;;  %s1614_s15 = sphi %s1671_s15, %s2064_s15   ;;  %s1610_s14 = sphi %s1669_s14, %s2063_s14   ;;  %s1606_s13 = sphi %s1667_s13, %s2062_s13   ;;  %s1602_s12 = sphi %s1665_s12, %s2061_s12  }
   0xa   : > { %p26_p0 = scmp.ge.s32.totalorder %s25_s24, 9  ;;  %s28_s25 = sadd.s32 1, %s1638_s21 }
   0xb   : > { %s41_s26 = sadd.s32 1, %s1622_s17  ;;  %p48_p1 = scmp.ne.s32.totalorder %s1622_s17, %s1618_s16 }
   0xc   : > { %s2072_s24 = smov (%p26_p0, %s25_s24), 0  ;;  %s2074_s25 = smov (!%p26_p0, %s28_s25), %s1638_s21 }
   0xd   : > { %s37_s27 = ssub.s32 %s1634_s20, %s2072_s24  ;;  %p49_p2 = scmp.eq.s32.totalorder %s1642_s22, 0 }
   0xe   : > { %p30_p3 = scmp.ge.s32.totalorder %s2074_s25, 2  ;;  %p39_p4 = scmp.eq.s32.totalorder %s37_s27, 0 }
   0xf   : > { %p1732_p5 = por %p49_p2, %p48_p1  ;;  %s69_s29 = sadd.s32 1, %s1614_s15 }
  0x10   : > { %s2076_s25 = smov (%p30_p3, %s2074_s25), 0  ;;  %p76_p6 = scmp.ne.s32.totalorder %s1614_s15, %s1610_s14 }
  0x11   : > { %2055 = sst [smem:[#allocation6_spill]] %s2076_s25  ;;  %s65_s4 = ssub.s32 %s1638_s21, %s2076_s25 }
  0x12   : > { %s1740_s30 = scalar_select %p39_p4, %s1622_s17, %s41_s26  }
  0x13   : > { %s66_s5 = sor.u32 %s65_s4, %s37_s27  ;;  %p121_p7 = scmp.eq.s32.totalorder %s65_s4, 0 }
  0x14   : > { %p67_p8 = scmp.eq.s32.totalorder %s66_s5, 0  ;;  %p1746_p9 = por %p76_p6, %p49_p2 }
  0x15   : > { %s123_s7 = sadd.s32 1, %s1606_s13  ;;  %p133_p10 = scmp.ne.s32.totalorder %s1606_s13, %s1602_s12 }
  0x16   : > { %s1754_s8 = scalar_select %p67_p8, %s1614_s15, %s69_s29  }
  0x17   : > { %s1757_s9 = scalar_select %p121_p7, %s1606_s13, %s123_s7  }
  0x18   : > { %p134_p11 = scmp.eq.s32.totalorder %s1262_s23, 17  ;;  %p1265_p13 = scmp.ge.s32.totalorder %s1642_s22, 18 }
  0x1a   : > { %p1759_p12 = por %p134_p11, %p133_p10  ;;  %156 = sbr.rel (%p1265_p13) target bundleno = 87 (0x57), region = 16 }
  0x21   : > { %159 = sbr.rel (!%p1732_p5) target bundleno = 45 (0x2d), region = 20  ;;  %s161_s11 = sand.u32 (%p1732_p5), 1, %s1622_s17  }
  0x22   : > { %s1356_s26 = sshll.u32 (%p1732_p5), %s1634_s20, 4  ;;  %s1266_s27 = sshll.u32 (%p1732_p5), %s161_s11, 5 }
  0x23   : > { %s2058_s0 = sld [smem:[#allocation7_spill]] (%p1732_p5)  ;;  %s163_s23 = scalar_lea.vmem (%p1732_p5), [#allocation3], %s1266_s27 }
  0x29   : > { %s169_s5 = scalar_lea.vmem %s2058_s0, %s1356_s26 }
  0x2a   : > { %v182_v0 = vld [vmem:[%s169_s5] sm:$0xff]  ;;  %v184_v1 = vld [vmem:[%s169_s5 + $0x8] sm:$0xff]  ;;  %v186_v2 = vld [vmem:[%s169_s5 + $0x90] sm:$0xff] }
  0x2b   : > { %183 = vst [vmem:[%s163_s23] sm:$0xff] %v182_v0  ;;  %185 = vst [vmem:[%s163_s23 + $0x8] sm:$0xff] %v184_v1  ;;  %v188_v3 = vld [vmem:[%s169_s5 + $0x98] sm:$0xff] }
  0x2c   : > { %187 = vst [vmem:[%s163_s23 + $0x10] sm:$0xff] %v186_v2  ;;  %189 = vst [vmem:[%s163_s23 + $0x18] sm:$0xff] %v188_v3 }
  0x2d PF: > { %195 = sbr.rel (!%p1746_p9) target bundleno = 87 (0x57), region = 43  ;;  %s197_s28 = sand.u32 (%p1746_p9), 1, %s1614_s15  }
  0x2e   : > { %s1271_s7 = sshll.u32 (%p1746_p9), %s1638_s21, 1  ;;  %s1269_s11 = sshll.u32 (%p1746_p9), %s197_s28, 9 }
  0x2f   : > { %s1357_s26 = sshll.u32 (%p1746_p9), %s1634_s20, 8  ;;  %s2059_s1 = sld [smem:[#allocation8_spill]] (%p1746_p9) }
  0x30   : > { %s203_s29 = sadd.s32 (%p1746_p9), %s1357_s26, %s1271_s7  ;;  %s1784_s6 = scalar_lea.vmem (%p1746_p9), [#allocation4], %s1269_s11 }
  0x31   : > { %s1273_s4 = sshll.u32 (%p1746_p9), %s203_s29, 2 }
  0x35   : > { %s1779_s25 = scalar_lea.vmem %s2059_s1, %s1273_s4 }
  0x36   : > { %v359_v4 = vld [vmem:[%s1779_s25] sm:$0xff]  ;;  %v361_v5 = vld [vmem:[%s1779_s25 + $0x10] sm:$0xff] }
  0x37   : > { %v363_v6 = vld [vmem:[%s1779_s25 + $0x20] sm:$0xff]  ;;  %360 = vst [vmem:[%s1784_s6] sm:$0xff] %v359_v4  ;;  %362 = vst [vmem:[%s1784_s6 + $0x8] sm:$0xff] %v361_v5  ;;  %v365_v7 = vld [vmem:[%s1779_s25 + $0x30] sm:$0xff] }
  0x38   : > { %364 = vst [vmem:[%s1784_s6 + $0x10] sm:$0xff] %v363_v6  ;;  %v367_v8 = vld [vmem:[%s1779_s25 + $0x40] sm:$0xff]  ;;  %v369_v9 = vld [vmem:[%s1779_s25 + $0x50] sm:$0xff]  ;;  %366 = vst [vmem:[%s1784_s6 + $0x18] sm:$0xff] %v365_v7 }
  0x39   : > { %368 = vst [vmem:[%s1784_s6 + $0x20] sm:$0xff] %v367_v8  ;;  %370 = vst [vmem:[%s1784_s6 + $0x28] sm:$0xff] %v369_v9  ;;  %v371_v10 = vld [vmem:[%s1779_s25 + $0x60] sm:$0xff]  ;;  %v373_v11 = vld [vmem:[%s1779_s25 + $0x70] sm:$0xff] }
  0x3a   : > { %v375_v12 = vld [vmem:[%s1779_s25 + $0x80] sm:$0xff]  ;;  %372 = vst [vmem:[%s1784_s6 + $0x30] sm:$0xff] %v371_v10  ;;  %374 = vst [vmem:[%s1784_s6 + $0x38] sm:$0xff] %v373_v11  ;;  %v377_v13 = vld [vmem:[%s1779_s25 + $0x90] sm:$0xff] }
  0x3b   : > { %376 = vst [vmem:[%s1784_s6 + $0x40] sm:$0xff] %v375_v12  ;;  %v379_v14 = vld [vmem:[%s1779_s25 + $0xa0] sm:$0xff]  ;;  %v381_v15 = vld [vmem:[%s1779_s25 + $0xb0] sm:$0xff]  ;;  %378 = vst [vmem:[%s1784_s6 + $0x48] sm:$0xff] %v377_v13 }
  0x3c   : > { %380 = vst [vmem:[%s1784_s6 + $0x50] sm:$0xff] %v379_v14  ;;  %382 = vst [vmem:[%s1784_s6 + $0x58] sm:$0xff] %v381_v15  ;;  %v383_v16 = vld [vmem:[%s1779_s25 + $0xc0] sm:$0xff]  ;;  %v385_v17 = vld [vmem:[%s1779_s25 + $0xd0] sm:$0xff] }
  0x3d   : > { %v387_v18 = vld [vmem:[%s1779_s25 + $0xe0] sm:$0xff]  ;;  %384 = vst [vmem:[%s1784_s6 + $0x60] sm:$0xff] %v383_v16  ;;  %386 = vst [vmem:[%s1784_s6 + $0x68] sm:$0xff] %v385_v17  ;;  %v389_v19 = vld [vmem:[%s1779_s25 + $0xf0] sm:$0xff] }
  0x3e   : > { %388 = vst [vmem:[%s1784_s6 + $0x70] sm:$0xff] %v387_v18  ;;  %v391_v20 = vld [vmem:[%s1779_s25 + $0x100] sm:$0xff]  ;;  %v393_v21 = vld [vmem:[%s1779_s25 + $0x110] sm:$0xff]  ;;  %390 = vst [vmem:[%s1784_s6 + $0x78] sm:$0xff] %v389_v19 }
  0x3f   : > { %392 = vst [vmem:[%s1784_s6 + $0x80] sm:$0xff] %v391_v20  ;;  %394 = vst [vmem:[%s1784_s6 + $0x88] sm:$0xff] %v393_v21  ;;  %v395_v22 = vld [vmem:[%s1779_s25 + $0x120] sm:$0xff]  ;;  %v397_v23 = vld [vmem:[%s1779_s25 + $0x130] sm:$0xff] }
  0x40   : > { %v399_v24 = vld [vmem:[%s1779_s25 + $0x140] sm:$0xff]  ;;  %396 = vst [vmem:[%s1784_s6 + $0x90] sm:$0xff] %v395_v22  ;;  %398 = vst [vmem:[%s1784_s6 + $0x98] sm:$0xff] %v397_v23  ;;  %v401_v25 = vld [vmem:[%s1779_s25 + $0x150] sm:$0xff] }
  0x41   : > { %400 = vst [vmem:[%s1784_s6 + $0xa0] sm:$0xff] %v399_v24  ;;  %v403_v26 = vld [vmem:[%s1779_s25 + $0x160] sm:$0xff]  ;;  %v405_v27 = vld [vmem:[%s1779_s25 + $0x170] sm:$0xff]  ;;  %402 = vst [vmem:[%s1784_s6 + $0xa8] sm:$0xff] %v401_v25 }
  0x42   : > { %404 = vst [vmem:[%s1784_s6 + $0xb0] sm:$0xff] %v403_v26  ;;  %406 = vst [vmem:[%s1784_s6 + $0xb8] sm:$0xff] %v405_v27  ;;  %v407_v28 = vld [vmem:[%s1779_s25 + $0x180] sm:$0xff]  ;;  %v409_v29 = vld [vmem:[%s1779_s25 + $0x190] sm:$0xff] }
  0x43   : > { %v411_v30 = vld [vmem:[%s1779_s25 + $0x1a0] sm:$0xff]  ;;  %408 = vst [vmem:[%s1784_s6 + $0xc0] sm:$0xff] %v407_v28  ;;  %410 = vst [vmem:[%s1784_s6 + $0xc8] sm:$0xff] %v409_v29  ;;  %v413_v31 = vld [vmem:[%s1779_s25 + $0x1b0] sm:$0xff] }
  0x44   : > { %412 = vst [vmem:[%s1784_s6 + $0xd0] sm:$0xff] %v411_v30  ;;  %v415_v32 = vld [vmem:[%s1779_s25 + $0x1c0] sm:$0xff]  ;;  %v417_v33 = vld [vmem:[%s1779_s25 + $0x1d0] sm:$0xff]  ;;  %414 = vst [vmem:[%s1784_s6 + $0xd8] sm:$0xff] %v413_v31 }
  0x45   : > { %416 = vst [vmem:[%s1784_s6 + $0xe0] sm:$0xff] %v415_v32  ;;  %418 = vst [vmem:[%s1784_s6 + $0xe8] sm:$0xff] %v417_v33  ;;  %v419_v34 = vld [vmem:[%s1779_s25 + $0x1e0] sm:$0xff]  ;;  %v421_v35 = vld [vmem:[%s1779_s25 + $0x1f0] sm:$0xff] }
  0x46   : > { %v423_v36 = vld [vmem:[%s1779_s25 + $0x200] sm:$0xff]  ;;  %420 = vst [vmem:[%s1784_s6 + $0xf0] sm:$0xff] %v419_v34  ;;  %422 = vst [vmem:[%s1784_s6 + $0xf8] sm:$0xff] %v421_v35  ;;  %v425_v37 = vld [vmem:[%s1779_s25 + $0x210] sm:$0xff] }
  0x47   : > { %424 = vst [vmem:[%s1784_s6 + $0x100] sm:$0xff] %v423_v36  ;;  %v427_v38 = vld [vmem:[%s1779_s25 + $0x220] sm:$0xff]  ;;  %v429_v39 = vld [vmem:[%s1779_s25 + $0x230] sm:$0xff]  ;;  %426 = vst [vmem:[%s1784_s6 + $0x108] sm:$0xff] %v425_v37 }
  0x48   : > { %428 = vst [vmem:[%s1784_s6 + $0x110] sm:$0xff] %v427_v38  ;;  %430 = vst [vmem:[%s1784_s6 + $0x118] sm:$0xff] %v429_v39  ;;  %v431_v40 = vld [vmem:[%s1779_s25 + $0x240] sm:$0xff]  ;;  %v433_v41 = vld [vmem:[%s1779_s25 + $0x250] sm:$0xff] }
  0x49   : > { %v435_v42 = vld [vmem:[%s1779_s25 + $0x260] sm:$0xff]  ;;  %432 = vst [vmem:[%s1784_s6 + $0x120] sm:$0xff] %v431_v40  ;;  %434 = vst [vmem:[%s1784_s6 + $0x128] sm:$0xff] %v433_v41  ;;  %v437_v43 = vld [vmem:[%s1779_s25 + $0x270] sm:$0xff] }
  0x4a   : > { %436 = vst [vmem:[%s1784_s6 + $0x130] sm:$0xff] %v435_v42  ;;  %v439_v44 = vld [vmem:[%s1779_s25 + $0x280] sm:$0xff]  ;;  %v441_v45 = vld [vmem:[%s1779_s25 + $0x290] sm:$0xff]  ;;  %438 = vst [vmem:[%s1784_s6 + $0x138] sm:$0xff] %v437_v43 }
  0x4b   : > { %440 = vst [vmem:[%s1784_s6 + $0x140] sm:$0xff] %v439_v44  ;;  %442 = vst [vmem:[%s1784_s6 + $0x148] sm:$0xff] %v441_v45  ;;  %v443_v46 = vld [vmem:[%s1779_s25 + $0x2a0] sm:$0xff]  ;;  %v445_v47 = vld [vmem:[%s1779_s25 + $0x2b0] sm:$0xff] }
  0x4c   : > { %v447_v48 = vld [vmem:[%s1779_s25 + $0x2c0] sm:$0xff]  ;;  %444 = vst [vmem:[%s1784_s6 + $0x150] sm:$0xff] %v443_v46  ;;  %446 = vst [vmem:[%s1784_s6 + $0x158] sm:$0xff] %v445_v47  ;;  %v449_v49 = vld [vmem:[%s1779_s25 + $0x2d0] sm:$0xff] }
  0x4d   : > { %448 = vst [vmem:[%s1784_s6 + $0x160] sm:$0xff] %v447_v48  ;;  %v451_v50 = vld [vmem:[%s1779_s25 + $0x2e0] sm:$0xff]  ;;  %v453_v51 = vld [vmem:[%s1779_s25 + $0x2f0] sm:$0xff]  ;;  %450 = vst [vmem:[%s1784_s6 + $0x168] sm:$0xff] %v449_v49 }
  0x4e   : > { %452 = vst [vmem:[%s1784_s6 + $0x170] sm:$0xff] %v451_v50  ;;  %454 = vst [vmem:[%s1784_s6 + $0x178] sm:$0xff] %v453_v51  ;;  %v455_v52 = vld [vmem:[%s1779_s25 + $0x300] sm:$0xff]  ;;  %v457_v53 = vld [vmem:[%s1779_s25 + $0x310] sm:$0xff] }
  0x4f   : > { %v459_v54 = vld [vmem:[%s1779_s25 + $0x320] sm:$0xff]  ;;  %456 = vst [vmem:[%s1784_s6 + $0x180] sm:$0xff] %v455_v52  ;;  %458 = vst [vmem:[%s1784_s6 + $0x188] sm:$0xff] %v457_v53  ;;  %v461_v55 = vld [vmem:[%s1779_s25 + $0x330] sm:$0xff] }
  0x50   : > { %460 = vst [vmem:[%s1784_s6 + $0x190] sm:$0xff] %v459_v54  ;;  %v463_v56 = vld [vmem:[%s1779_s25 + $0x340] sm:$0xff]  ;;  %v465_v57 = vld [vmem:[%s1779_s25 + $0x350] sm:$0xff]  ;;  %462 = vst [vmem:[%s1784_s6 + $0x198] sm:$0xff] %v461_v55 }
  0x51   : > { %464 = vst [vmem:[%s1784_s6 + $0x1a0] sm:$0xff] %v463_v56  ;;  %466 = vst [vmem:[%s1784_s6 + $0x1a8] sm:$0xff] %v465_v57  ;;  %v467_v58 = vld [vmem:[%s1779_s25 + $0x360] sm:$0xff]  ;;  %v469_v59 = vld [vmem:[%s1779_s25 + $0x370] sm:$0xff] }
  0x52   : > { %v471_v60 = vld [vmem:[%s1779_s25 + $0x380] sm:$0xff]  ;;  %468 = vst [vmem:[%s1784_s6 + $0x1b0] sm:$0xff] %v467_v58  ;;  %470 = vst [vmem:[%s1784_s6 + $0x1b8] sm:$0xff] %v469_v59  ;;  %v473_v61 = vld [vmem:[%s1779_s25 + $0x390] sm:$0xff] }
  0x53   : > { %472 = vst [vmem:[%s1784_s6 + $0x1c0] sm:$0xff] %v471_v60  ;;  %v475_v62 = vld [vmem:[%s1779_s25 + $0x3a0] sm:$0xff]  ;;  %v477_v63 = vld [vmem:[%s1779_s25 + $0x3b0] sm:$0xff]  ;;  %474 = vst [vmem:[%s1784_s6 + $0x1c8] sm:$0xff] %v473_v61 }
  0x54   : > { %476 = vst [vmem:[%s1784_s6 + $0x1d0] sm:$0xff] %v475_v62  ;;  %478 = vst [vmem:[%s1784_s6 + $0x1d8] sm:$0xff] %v477_v63  ;;  %v479_v0 = vld [vmem:[%s1779_s25 + $0x3c0] sm:$0xff]  ;;  %v481_v1 = vld [vmem:[%s1779_s25 + $0x3d0] sm:$0xff] }
  0x55   : > { %v483_v2 = vld [vmem:[%s1779_s25 + $0x3e0] sm:$0xff]  ;;  %480 = vst [vmem:[%s1784_s6 + $0x1e0] sm:$0xff] %v479_v0  ;;  %482 = vst [vmem:[%s1784_s6 + $0x1e8] sm:$0xff] %v481_v1  ;;  %v485_v3 = vld [vmem:[%s1779_s25 + $0x3f0] sm:$0xff] }
  0x56   : > { %484 = vst [vmem:[%s1784_s6 + $0x1f0] sm:$0xff] %v483_v2  ;;  %486 = vst [vmem:[%s1784_s6 + $0x1f8] sm:$0xff] %v485_v3 }
  0x57 PF: > { %p1274_p0 = scmp.ge.s32.totalorder %s1642_s22, 1  ;;  %p499_p1 = scmp.lt.s32.totalorder %s1642_s22, 19 }
  0x59   : > { %p500_p2 = pnand %p1274_p0, %p499_p1 }
  0x5a   : > { %s506_s0 = sand.u32 (!%p500_p2), 1, %s1618_s16   ;;  %s513_s5 = sand.u32 (!%p500_p2), 1, %s1610_s14  }
  0x5b   : > { %503 = sbr.rel (%p500_p2) target bundleno = 411 (0x19b), region = 85  ;;  %s1275_s23 = sshll.u32 (!%p500_p2), %s506_s0, 5 }
  0x5c   : > { %s1276_s28 = sshll.u32 (!%p500_p2), %s513_s5, 9  ;;  %s540_s7 = sand.u32 (!%p500_p2), 1, %s1602_s12  }
  0x5d   : > { %s1278_s11 = sshll.u32 (!%p500_p2), %s1630_s19, 1  ;;  %s1277_s25 = sshll.u32 (!%p500_p2), %s540_s7, 4 }
  0x5e   : > { %p548_p3 = scmp.lt.s32.totalorder (!%p500_p2), %s1278_s11, 3  ;;  %s1923_s27 = scalar_lea.vmem (!%p500_p2), [#allocation3], %s1275_s23 }
  0x5f   : > { %s1925_s6 = scalar_lea.vmem (!%p500_p2), [#allocation4], %s1276_s28  ;;  %s1927_s1 = scalar_lea.vmem (!%p500_p2), [#allocation5], %s1277_s25 }
  0x60   : > { %p1279_p4 = scmp.ne.s32.totalorder (!%p500_p2), %s1626_s18, 0 }
  0x62   : > { %s2078_s11 = smov (!%p548_p3, %s1278_s11), 3  ;;  %557 = sbr.rel (%p1279_p4) target bundleno = 105 (0x69), region = 97 }
  0x63   : > { %s550_s4 = scalar_lea.vmem %s2049_s2, %s2078_s11  ;;  %v1644_v4 = vmov (!%p1279_p4), 0.0  }
  0x64   : > { %558 = vst [vmem:[#allocation2] sm:$0xff] (!%p1279_p4), %v1644_v4  ;;  %559 = vst [vmem:[#allocation2 + $0x8] sm:$0xff] (!%p1279_p4), %v1644_v4 }
  0x65   : > { %560 = vst [vmem:[#allocation2 + $0x10] sm:$0xff] (!%p1279_p4), %v1644_v4  ;;  %561 = vst [vmem:[#allocation2 + $0x18] sm:$0xff] (!%p1279_p4), %v1644_v4 }
  0x69 PF: > { %v1454_v5 = vld [vmem:[%s1925_s6 + $0x4] ss:$8 sps:$4 sm:$0xff]   ;;  %v1458_v7 = vld [vmem:[%s1925_s6] ss:$8 sps:$4 sm:$0xff]   ;;  %v1460_v9 = vld [vmem:[%s1925_s6 + $0x14] ss:$8 sps:$4 sm:$0xff]  }
  0x6a   : > { %v1456_v6 = vld [vmem:[%s1925_s6 + $0x104] ss:$8 sps:$4 sm:$0xff]   ;;  %974 = vmatprep.subr.bf16.mxu1 %v1454_v5  ;;  %v1459_v8 = vld [vmem:[%s1925_s6 + $0x100] ss:$8 sps:$4 sm:$0xff]   ;;  %v1462_v10 = vld [vmem:[%s1925_s6 + $0x114] ss:$8 sps:$4 sm:$0xff]  }
  0x6b   : > { %1017 = vmatprep.subr.bf16.mxu0 %v1456_v6  ;;  %975 = vmatpush1.bf16.msra.mxu1 %v1458_v7  ;;  %v1464_v11 = vld [vmem:[%s1925_s6 + $0x10] ss:$8 sps:$4 sm:$0xff]   ;;  %v1466_v13 = vld [vmem:[%s1925_s6 + $0x24] ss:$8 sps:$4 sm:$0xff]   ;;  %v1470_v15 = vld [vmem:[%s1925_s6 + $0x20] ss:$8 sps:$4 sm:$0xff]  }
  0x6c   : > { %1018 = vmatpush1.bf16.msra.mxu0 %v1459_v8  ;;  %976 = vmatprep.subr.bf16.mxu1 %v1460_v9  ;;  %v1465_v12 = vld [vmem:[%s1925_s6 + $0x110] ss:$8 sps:$4 sm:$0xff]   ;;  %v1468_v14 = vld [vmem:[%s1925_s6 + $0x124] ss:$8 sps:$4 sm:$0xff]   ;;  %v1471_v16 = vld [vmem:[%s1925_s6 + $0x120] ss:$8 sps:$4 sm:$0xff]  }
  0x6d   : > { %1019 = vmatprep.subr.bf16.mxu0 %v1462_v10  ;;  %v1472_v17 = vld [vmem:[%s1925_s6 + $0x34] ss:$8 sps:$4 sm:$0xff]   ;;  %v1476_v19 = vld [vmem:[%s1925_s6 + $0x30] ss:$8 sps:$4 sm:$0xff]   ;;  %v1478_v21 = vld [vmem:[%s1925_s6 + $0x44] ss:$8 sps:$4 sm:$0xff]  }
  0x6e   : > { %v1474_v18 = vld [vmem:[%s1925_s6 + $0x134] ss:$8 sps:$4 sm:$0xff]   ;;  %v1477_v20 = vld [vmem:[%s1925_s6 + $0x130] ss:$8 sps:$4 sm:$0xff]   ;;  %v1480_v22 = vld [vmem:[%s1925_s6 + $0x144] ss:$8 sps:$4 sm:$0xff]  }
  0x6f   : > { %977 = vmatpush1.bf16.msra.mxu1 %v1464_v11  ;;  %v1482_v23 = vld [vmem:[%s1925_s6 + $0x40] ss:$8 sps:$4 sm:$0xff]   ;;  %v1484_v25 = vld [vmem:[%s1925_s6 + $0x54] ss:$8 sps:$4 sm:$0xff]   ;;  %v1488_v27 = vld [vmem:[%s1925_s6 + $0x50] ss:$8 sps:$4 sm:$0xff]  }
  0x70   : > { %1020 = vmatpush1.bf16.msra.mxu0 %v1465_v12  ;;  %978 = vmatprep.subr.bf16.mxu1 %v1466_v13  ;;  %v1483_v24 = vld [vmem:[%s1925_s6 + $0x140] ss:$8 sps:$4 sm:$0xff]   ;;  %v1486_v26 = vld [vmem:[%s1925_s6 + $0x154] ss:$8 sps:$4 sm:$0xff]   ;;  %v1489_v28 = vld [vmem:[%s1925_s6 + $0x150] ss:$8 sps:$4 sm:$0xff]  }
  0x71   : > { %1021 = vmatprep.subr.bf16.mxu0 %v1468_v14  ;;  %v1490_v29 = vld [vmem:[%s1925_s6 + $0x64] ss:$8 sps:$4 sm:$0xff]   ;;  %v1494_v31 = vld [vmem:[%s1925_s6 + $0x60] ss:$8 sps:$4 sm:$0xff]   ;;  %v1496_v33 = vld [vmem:[%s1925_s6 + $0x74] ss:$8 sps:$4 sm:$0xff]  }
  0x72   : > { %v1492_v30 = vld [vmem:[%s1925_s6 + $0x164] ss:$8 sps:$4 sm:$0xff]   ;;  %v1495_v32 = vld [vmem:[%s1925_s6 + $0x160] ss:$8 sps:$4 sm:$0xff]   ;;  %v1498_v34 = vld [vmem:[%s1925_s6 + $0x174] ss:$8 sps:$4 sm:$0xff]  }
  0x73   : > { %979 = vmatpush1.bf16.msra.mxu1 %v1470_v15  ;;  %v1500_v35 = vld [vmem:[%s1925_s6 + $0x70] ss:$8 sps:$4 sm:$0xff]   ;;  %v1502_v37 = vld [vmem:[%s1925_s6 + $0x84] ss:$8 sps:$4 sm:$0xff]   ;;  %v1506_v39 = vld [vmem:[%s1925_s6 + $0x80] ss:$8 sps:$4 sm:$0xff]  }
  0x74   : > { %1022 = vmatpush1.bf16.msra.mxu0 %v1471_v16  ;;  %980 = vmatprep.subr.bf16.mxu1 %v1472_v17  ;;  %v1501_v36 = vld [vmem:[%s1925_s6 + $0x170] ss:$8 sps:$4 sm:$0xff]   ;;  %v1504_v38 = vld [vmem:[%s1925_s6 + $0x184] ss:$8 sps:$4 sm:$0xff]   ;;  %v1507_v40 = vld [vmem:[%s1925_s6 + $0x180] ss:$8 sps:$4 sm:$0xff]  }
  0x75   : > { %1023 = vmatprep.subr.bf16.mxu0 %v1474_v18  ;;  %v1508_v41 = vld [vmem:[%s1925_s6 + $0x94] ss:$8 sps:$4 sm:$0xff]   ;;  %v1512_v43 = vld [vmem:[%s1925_s6 + $0x90] ss:$8 sps:$4 sm:$0xff]   ;;  %v1514_v45 = vld [vmem:[%s1925_s6 + $0xa4] ss:$8 sps:$4 sm:$0xff]  }
  0x76   : > { %v1510_v42 = vld [vmem:[%s1925_s6 + $0x194] ss:$8 sps:$4 sm:$0xff]   ;;  %v1513_v44 = vld [vmem:[%s1925_s6 + $0x190] ss:$8 sps:$4 sm:$0xff]   ;;  %v1516_v46 = vld [vmem:[%s1925_s6 + $0x1a4] ss:$8 sps:$4 sm:$0xff]  }
  0x77   : > { %981 = vmatpush1.bf16.msra.mxu1 %v1476_v19  ;;  %v1518_v47 = vld [vmem:[%s1925_s6 + $0xa0] ss:$8 sps:$4 sm:$0xff]   ;;  %v1520_v49 = vld [vmem:[%s1925_s6 + $0xb4] ss:$8 sps:$4 sm:$0xff]   ;;  %v1524_v51 = vld [vmem:[%s1925_s6 + $0xb0] ss:$8 sps:$4 sm:$0xff]  }
  0x78   : > { %1024 = vmatpush1.bf16.msra.mxu0 %v1477_v20  ;;  %982 = vmatprep.subr.bf16.mxu1 %v1478_v21  ;;  %v1519_v48 = vld [vmem:[%s1925_s6 + $0x1a0] ss:$8 sps:$4 sm:$0xff]   ;;  %v1522_v50 = vld [vmem:[%s1925_s6 + $0x1b4] ss:$8 sps:$4 sm:$0xff]   ;;  %v1525_v53 = vld [vmem:[%s1925_s6 + $0x1b0] ss:$8 sps:$4 sm:$0xff]  }
  0x79   : > { %1025 = vmatprep.subr.bf16.mxu0 %v1480_v22  ;;  %v1552_v52 = vld [vmem:[%s1923_s27 + $0x4] ss:$16 sps:$4 sm:$0xff]   ;;  %v1555_v56 = vld [vmem:[%s1923_s27 + $0xc] ss:$16 sps:$4 sm:$0xff]   ;;  %v1530_v57 = vld [vmem:[%s1925_s6 + $0xc0] ss:$8 sps:$4 sm:$0xff]  }
  0x7a   : > { %v1526_v54 = vld [vmem:[%s1925_s6 + $0xc4] ss:$8 sps:$4 sm:$0xff]   ;;  %1006 = vmatprep.mubr.bf16.mxu1 %v1552_v52  ;;  %1049 = vmatprep.mubr.bf16.mxu0 %v1555_v56  ;;  %v1531_v58 = vld [vmem:[%s1925_s6 + $0x1c0] ss:$8 sps:$4 sm:$0xff]   ;;  %v1532_v59 = vld [vmem:[%s1925_s6 + $0xd4] ss:$8 sps:$4 sm:$0xff]  }
  0x7b   : > { %983 = vmatpush1.bf16.msra.mxu1 %v1482_v23  ;;  %v1528_v55 = vld [vmem:[%s1925_s6 + $0x1c4] ss:$8 sps:$4 sm:$0xff]   ;;  %v1534_v60 = vld [vmem:[%s1925_s6 + $0x1d4] ss:$8 sps:$4 sm:$0xff]   ;;  %v1536_v61 = vld [vmem:[%s1925_s6 + $0xd0] ss:$8 sps:$4 sm:$0xff]  }
  0x7c   : > { %1026 = vmatpush1.bf16.msra.mxu0 %v1483_v24  ;;  %984 = vmatprep.subr.bf16.mxu1 %v1484_v25  ;;  %v1537_v62 = vld [vmem:[%s1925_s6 + $0x1d0] ss:$8 sps:$4 sm:$0xff]   ;;  %v1538_v63 = vld [vmem:[%s1925_s6 + $0xe4] ss:$8 sps:$4 sm:$0xff]   ;;  %v1542_v1 = vld [vmem:[%s1925_s6 + $0xe0] ss:$8 sps:$4 sm:$0xff]  }
  0x7d   : > { %1027 = vmatprep.subr.bf16.mxu0 %v1486_v26  ;;  %v1540_v0 = vld [vmem:[%s1925_s6 + $0x1e4] ss:$8 sps:$4 sm:$0xff]   ;;  %v1543_v2 = vld [vmem:[%s1925_s6 + $0x1e0] ss:$8 sps:$4 sm:$0xff]   ;;  %v1544_v3 = vld [vmem:[%s1925_s6 + $0xf4] ss:$8 sps:$4 sm:$0xff]  }
  0x7e   : > { %v1546_v4 = vld [vmem:[%s1925_s6 + $0x1f4] ss:$8 sps:$4 sm:$0xff]   ;;  %v1548_v5 = vld [vmem:[%s1925_s6 + $0xf0] ss:$8 sps:$4 sm:$0xff]   ;;  %v562_v10 = vld [vmem:[#allocation2] sm:$0xff]  ;;  %p1348_p5 = scmp.ne.s32.totalorder %s1626_s18, 8 }
  0x7f   : > { %985 = vmatpush1.bf16.msra.mxu1 %v1488_v27  ;;  %v1549_v6 = vld [vmem:[%s1925_s6 + $0x1f0] ss:$8 sps:$4 sm:$0xff]   ;;  %v563_v14 = vld [vmem:[#allocation2 + $0x8] sm:$0xff] }
  0x80   : > { %1028 = vmatpush1.bf16.msra.mxu0 %v1489_v28  ;;  %986 = vmatprep.subr.bf16.mxu1 %v1490_v29  ;;  %v1550_v7 = vld [vmem:[%s1923_s27] ss:$16 sps:$4 sm:$0xff]   ;;  %v1553_v8 = vld [vmem:[%s1923_s27 + $0x8] ss:$16 sps:$4 sm:$0xff]   ;;  %v1078_v29 = vlaneseq (!%p1348_p5) }
  0x81   : > { %1029 = vmatprep.subr.bf16.mxu0 %v1492_v30  ;;  %v564_v18 = vld [vmem:[#allocation2 + $0x10] sm:$0xff]  ;;  %v565_v23 = vld [vmem:[#allocation2 + $0x18] sm:$0xff] }
  0x82   : > { %v1079_v30 = vshrl.u32 (!%p1348_p5), %v1078_v29, 7 }
  0x83   : > { %987 = vmatpush1.bf16.msra.mxu1 %v1494_v31  ;;  %v1076_v31 = vld [vmem:[%s550_s4] sm:$0x3] (!%p1348_p5) }
  0x84   : > { %1030 = vmatpush1.bf16.msra.mxu0 %v1495_v32  ;;  %988 = vmatprep.subr.bf16.mxu1 %v1496_v33  ;;  %v1080_v33 = vsub.s32 (!%p1348_p5), 0, %v1079_v30 }
  0x85   : > { %1031 = vmatprep.subr.bf16.mxu0 %v1498_v34  ;;  %v1084_v34 = vsub.s32 (!%p1348_p5), 1, %v1079_v30 }
  0x87   : > { %989 = vmatpush1.bf16.msra.mxu1 %v1500_v35 }
  0x88   : > { %1032 = vmatpush1.bf16.msra.mxu0 %v1501_v36  ;;  %990 = vmatprep.subr.bf16.mxu1 %v1502_v37 }
  0x89   : > { %1033 = vmatprep.subr.bf16.mxu0 %v1504_v38  ;;  %v1081_v38 = vrot.slane (!%p1348_p5), %v1076_v31, %v1080_v33 }
  0x8b   : > { %991 = vmatpush1.bf16.msra.mxu1 %v1506_v39  ;;  %v1085_v39 = vrot.slane (!%p1348_p5), %v1076_v31, %v1084_v34 }
  0x8c   : > { %1034 = vmatpush1.bf16.msra.mxu0 %v1507_v40  ;;  %992 = vmatprep.subr.bf16.mxu1 %v1508_v41 }
  0x8d   : > { %1035 = vmatprep.subr.bf16.mxu0 %v1510_v42 }
  0x8f   : > { %993 = vmatpush1.bf16.msra.mxu1 %v1512_v43 }
  0x90   : > { %1036 = vmatpush1.bf16.msra.mxu0 %v1513_v44  ;;  %994 = vmatprep.subr.bf16.mxu1 %v1514_v45 }
  0x91   : > { %1037 = vmatprep.subr.bf16.mxu0 %v1516_v46 }
  0x93   : > { %995 = vmatpush1.bf16.msra.mxu1 %v1518_v47 }
  0x94   : > { %1038 = vmatpush1.bf16.msra.mxu0 %v1519_v48  ;;  %996 = vmatprep.subr.bf16.mxu1 %v1520_v49 }
  0x95   : > { %1039 = vmatprep.subr.bf16.mxu0 %v1522_v50 }
  0x97   : > { %997 = vmatpush1.bf16.msra.mxu1 %v1524_v51 }
  0x98   : > { %1040 = vmatpush1.bf16.msra.mxu0 %v1525_v53  ;;  %998 = vmatprep.subr.bf16.mxu1 %v1526_v54 }
  0x99   : > { %1041 = vmatprep.subr.bf16.mxu0 %v1528_v55 }
  0x9b   : > { %999 = vmatpush1.bf16.msra.mxu1 %v1530_v57 }
  0x9c   : > { %1042 = vmatpush1.bf16.msra.mxu0 %v1531_v58  ;;  %1000 = vmatprep.subr.bf16.mxu1 %v1532_v59 }
  0x9d   : > { %1043 = vmatprep.subr.bf16.mxu0 %v1534_v60 }
  0x9f   : > { %1001 = vmatpush1.bf16.msra.mxu1 %v1536_v61 }
  0xa0   : > { %1044 = vmatpush1.bf16.msra.mxu0 %v1537_v62  ;;  %1002 = vmatprep.subr.bf16.mxu1 %v1538_v63 }
  0xa1   : > { %1045 = vmatprep.subr.bf16.mxu0 %v1540_v0 }
  0xa3   : > { %1003 = vmatpush1.bf16.msra.mxu1 %v1542_v1 }
  0xa4   : > { %1046 = vmatpush1.bf16.msra.mxu0 %v1543_v2  ;;  %1004 = vmatprep.subr.bf16.mxu1 %v1544_v3 }
  0xa5   : > { %1047 = vmatprep.subr.bf16.mxu0 %v1546_v4 }
  0xa7   : > { %1005 = vmatpush1.bf16.msra.mxu1 %v1548_v5 }
  0xa8   : > { %1048 = vmatpush1.bf16.msra.mxu0 %v1549_v6 }
  0xaa   : > { %1007 = vmatmul.mubr.bf16.vlgmr.msra.gmra.mrb[0].mxu1 %v1550_v7 }
  0xab   : > { %1050 = vmatmul.mubr.bf16.vlgmr.msra.gmra.mrb[0].mxu0 %v1553_v8 }
 0x17d   : > { %v1008_v9 = vpop.f32.mrb[0].mxu1 }
 0x17e   : > { %v1051_v11 = vpop.f32.mrb[0].mxu0  ;;  %v1010_v13 = vpop.f32.mrb[1].mxu1 }
 0x17f   : > { %v1052_v12 = vadd.f32 %v1051_v11, %v1008_v9  ;;  %v1053_v15 = vpop.f32.mrb[1].mxu0  ;;  %v1012_v17 = vpop.f32.mrb[2].mxu1 }
 0x180   : > { %v1054_v16 = vadd.f32 %v1053_v15, %v1010_v13  ;;  %v1055_v19 = vpop.f32.mrb[2].mxu0  ;;  %v1014_v22 = vpop.f32.mrb[3].mxu1  ;;  %1071 = sbr.rel (%p1348_p5) target bundleno = 403 (0x193), region = 101 }
 0x181   : > { %v1060_v20 = vadd.f32 %v1052_v12, %v562_v10  ;;  %v1056_v21 = vadd.f32 %v1055_v19, %v1012_v17  ;;  %v1057_v24 = vpop.f32.mrb[3].mxu0 }
 0x182   : > { %v1061_v25 = vadd.f32 %v1054_v16, %v563_v14  ;;  %v1058_v26 = vadd.f32 %v1057_v24, %v1014_v22 }
 0x183   : > { %1064 = vst [vmem:[#allocation2] sm:$0xff] %v1060_v20  ;;  %v1062_v27 = vadd.f32 %v1056_v21, %v564_v18 }
 0x184   : > { %1065 = vst [vmem:[#allocation2 + $0x8] sm:$0xff] %v1061_v25  ;;  %v1063_v28 = vadd.f32 %v1058_v26, %v565_v23 }
 0x185   : > { %1066 = vst [vmem:[#allocation2 + $0x10] sm:$0xff] %v1062_v27 }
 0x186   : > { %1067 = vst [vmem:[#allocation2 + $0x18] sm:$0xff] %v1063_v28 }
 0x18a   : > { %v1072_v32 = vld [vmem:[#allocation2] sm:$0xff] }
 0x18b   : > { %v1073_v35 = vld [vmem:[#allocation2 + $0x8] sm:$0xff]  ;;  %v1088_v40 = vadd.f32 %v1081_v38, %v1072_v32 }
 0x18c   : > { %v1074_v36 = vld [vmem:[#allocation2 + $0x10] sm:$0xff]  ;;  %v1089_v41 = vadd.f32 %v1085_v39, %v1073_v35 }
 0x18d   : > { %v1075_v37 = vld [vmem:[#allocation2 + $0x18] sm:$0xff]  ;;  %v1090_v42 = vadd.f32 %v1081_v38, %v1074_v36 }
 0x18e   : > { %v1091_v43 = vadd.f32 %v1085_v39, %v1075_v37  ;;  %v1358_v44 = vpack.c.bf16 %v1089_v41, %v1088_v40 }
 0x190   : > { %v1359_v45 = vpack.c.bf16 %v1091_v43, %v1090_v42  ;;  %1104 = vst [vmem:[%s1927_s1] sm:$0xff] %v1358_v44 }
 0x192   : > { %1105 = vst [vmem:[%s1927_s1 + $0x8] sm:$0xff] %v1359_v45 }
 0x193 PF: > { %1112 = sbr.rel (!%p1759_p12) target bundleno = 411 (0x19b), region = 105  ;;  %s1360_s16 = sshll.u32 (%p1759_p12), %s1630_s19, 3 }
 0x194   : > { %s1118_s5 = scalar_lea.vmem (%p1759_p12), %s2050_s3, %s1360_s16 }
 0x197   : > { %v1148_v46 = vld [vmem:[%s1927_s1] sm:$0xff] (%p1759_p12) }
 0x198   : > { %1149 = vst [vmem:[%s1118_s5] sm:$0xff] (%p1759_p12), %v1148_v46 }
 0x199   : > { %v1150_v47 = vld [vmem:[%s1927_s1 + $0x8] sm:$0xff] (%p1759_p12) }
 0x19a   : > { %1151 = vst [vmem:[%s1118_s5 + $0x10] sm:$0xff] %v1150_v47 }
 0x19b PF: > { %s13_s22 = sadd.s32 1, %s1642_s22   ;;  %s2060_s1 = sld [smem:[#allocation6_spill]] }
 0x19c   : > { %p10_p6 = scmp.ge.s32.totalorder %s13_s22, 20   ;;  %s2061_s12 = smov %s1606_s13 }
 0x19d   : > { %s2062_s13 = smov %s1757_s9  ;;  %s2063_s14 = smov %s1614_s15 }
 0x19e   : > { %s2064_s15 = smov %s1754_s8  ;;  %s2065_s16 = smov %s1622_s17 }
 0x19f   : > { %s2066_s17 = smov %s1740_s30  ;;  %s2067_s18 = smov %s1634_s20 }
 0x1a0   : > { %s2068_s19 = smov %s1638_s21  ;;  %s2069_s20 = smov %s2072_s24 }
 0x1a1   : > { %s2070_s21 = smov %s2060_s1  ;;  %12 = sbr.rel (!%p10_p6) target bundleno = 9 (0x9), region = 185 }

// kernel: dual_grad_loss.47
= control target key start
LH: loop header
LB: loop body
LE: loop exit
PB: predicated region body
PF: predicated region fallthrough
CT: control target
= control target key end

     0   :  { %s266_s11 = smov 1   ;;  %s267_s12 = smov 127   ;;  %s364_s0 = inlined_call_operand.vmem [shape: f32[8,256], index: 0, kind: input, shape index: {}]   ;;  %s365_s1 = inlined_call_operand.vmem [shape: f32[8,256], index: 1, kind: input, shape index: {}]   ;;  %s366_s2 = inlined_call_operand.hbm [shape: f32[1,1], index: 2, kind: output, shape index: {}]  }
   0x1   :  { %v18_v0 = vld [vmem:[%s364_s0] sm:$0xff] }
   0x2   :  { %51 = vrot.lane.b32.xlu1 %v18_v0, %s266_s11  ;;  %42 = vrot.lane.b32.xlu0 %v18_v0, %s267_s12 }
   0x3   :  { %7 = vsyncpa [#allocation3], 0  ;;  %v19_v1 = vld [vmem:[%s364_s0 + $0x8] sm:$0xff]  ;;  %v20_v3 = vld [vmem:[%s365_s1] sm:$0xff]  ;;  %s268_s19 = smov 112   ;;  %s269_s20 = smov 16   ;;  %v60_v4 = vlaneseq }
   0x4   :  { %v21_v2 = vld [vmem:[%s365_s1 + $0x8] sm:$0xff]  ;;  %vm46_vm0 = vcmask 1039360   ;;  %vm55_vm1 = vcmask 7168   ;;  %vm28_vm6 = vcmask 916480   ;;  %vm37_vm7 = vcmask 130048   ;;  %s271_s0 = smov [#allocation2]  }
   0x5   :  { %v61_v7 = vand.u32 127, %v60_v4  ;;  %s218_s1 = sshll.u32 %s271_s0, 4  ;;  %s219_s1 = int_to_ptr.vmem [resolvable:$true] %s218_s1 }
   0x6   :  { %53 = vrot.lane.b32.xlu1 %v19_v1, %s266_s11  ;;  %44 = vrot.lane.b32.xlu0 %v19_v1, %s267_s12  ;;  %s242_s22 = scalar_lea.vmem %s219_s1, 16  ;;  %s246_s23 = scalar_lea.vmem %s219_s1, 32 }
   0x7   :  { %v62_v8 = vadd.s32 128, %v61_v7  ;;  %v67_v14 = vand.u32 15, %v61_v7  ;;  %p243_p0 = scmp.ne.s32.totalorder %s219_s1, %s242_s22  ;;  %p247_p1 = scmp.lt.s32.totalorder %s219_s1, %s219_s1 }
   0x8   :  { %p248_p2 = scmp.lt.s32.totalorder %s246_s23, %s242_s22 }
   0x9   :  { %v74_v11 = vand.u32 15, %v62_v8  ;;  %vm304_vm3 = vcmp.eq.s32.totalorder %v67_v14, 15  ;;  %vm315_vm5 = vcmp.eq.s32.totalorder %v67_v14, 0 }
   0xa   :  { %141 = vrot.lane.b32.xlu1 %v21_v2, %s267_s12  ;;  %139 = vrot.lane.b32.xlu0 %v20_v3, %s267_s12  ;;  %p249_p3 = por %p248_p2, %p247_p1 }
   0xb   :  { %vm300_vm2 = vcmp.eq.s32.totalorder %v74_v11, 0  ;;  %vm309_vm4 = vcmp.eq.s32.totalorder %v74_v11, 15 }
   0xc   :  { %p250_p4 = pnand %p249_p3, %p243_p0 }
   0xe   :  { %149 = vrot.lane.b32.xlu1 %v21_v2, %s266_s11  ;;  %147 = vrot.lane.b32.xlu0 %v20_v3, %s266_s11 }
  0x12   :  { %26 = vrot.lane.b32.xlu1 %v19_v1, %s268_s19  ;;  %24 = vrot.lane.b32.xlu0 %v18_v0, %s268_s19 }
  0x16   :  { %35 = vrot.lane.b32.xlu1 %v19_v1, %s269_s20  ;;  %33 = vrot.lane.b32.xlu0 %v18_v0, %s269_s20 }
  0x1a   :  { %125 = vrot.lane.b32.xlu1 %v21_v2, %s268_s19  ;;  %123 = vrot.lane.b32.xlu0 %v20_v3, %s268_s19 }
  0x1e   :  { %133 = vrot.lane.b32.xlu1 %v21_v2, %s269_s20  ;;  %131 = vrot.lane.b32.xlu0 %v20_v3, %s269_s20 }
  0x74   :  { %v52_v5 = vpop.permute.xlu1 %51  ;;  %v43_v6 = vpop.permute.xlu0 %42 }
  0x75   :  { %v59_v24 = vsel %vm55_vm1, 0.0, %v52_v5 }
  0x76   :  { %v93_v30 = vsel %vm315_vm5, 0.0, %v59_v24 }
  0x78   :  { %v54_v9 = vpop.permute.xlu1 %53  ;;  %v45_v10 = vpop.permute.xlu0 %44 }
  0x79   :  { %v56_v19 = vsel %vm55_vm1, %v52_v5, %v54_v9  ;;  %v47_v21 = vsel %vm46_vm0, %v43_v6, %v45_v10  ;;  %v50_v22 = vsel %vm46_vm0, %v45_v10, 0.0 }
  0x7a   :  { %v94_v25 = vsel %vm300_vm2, 0.0, %v56_v19  ;;  %v89_v26 = vsel %vm304_vm3, 0.0, %v47_v21  ;;  %v90_v27 = vsel %vm309_vm4, 0.0, %v50_v22 }
  0x7b   :  { %v97_v31 = vsub.f32 %v89_v26, %v93_v30  ;;  %v98_v32 = vsub.f32 %v90_v27, %v94_v25 }
  0x7c   :  { %v142_v12 = vpop.permute.xlu1 %141  ;;  %v140_v13 = vpop.permute.xlu0 %139 }
  0x7d   :  { %v101_v43 = vmul.f32 %v97_v31, %v97_v31  ;;  %v102_v44 = vmul.f32 %v98_v32, %v98_v32  ;;  %v143_v45 = vsel %vm46_vm0, %v140_v13, %v142_v12  ;;  %v146_v46 = vsel %vm46_vm0, %v142_v12, 0.0 }
  0x7e   :  { %v155_v53 = vsel %vm304_vm3, 0.0, %v143_v45  ;;  %v156_v56 = vsel %vm309_vm4, 0.0, %v146_v46 }
  0x80   :  { %v150_v17 = vpop.permute.xlu1 %149  ;;  %v148_v18 = vpop.permute.xlu0 %147 }
  0x81   :  { %v154_v33 = vsel %vm55_vm1, 0.0, %v148_v18  ;;  %v151_v40 = vsel %vm55_vm1, %v148_v18, %v150_v17  ;;  %v187_v18 = vshrl.u32 %v60_v4, 7  ;;  %vm16_vm1 = vcmask 0  }
  0x82   :  { %v157_v47 = vsel %vm315_vm5, 0.0, %v154_v33  ;;  %v158_v52 = vsel %vm300_vm2, 0.0, %v151_v40 }
  0x83   :  { %v161_v57 = vsub.f32 %v155_v53, %v157_v47  ;;  %v162_v58 = vsub.f32 %v156_v56, %v158_v52  ;;  %vm190_vm0 = vcmp.lt.s32.totalorder %v187_v18, 6 }
  0x84   :  { %v27_v28 = vpop.permute.xlu1 %26  ;;  %v25_v29 = vpop.permute.xlu0 %24 }
  0x85   :  { %v32_v36 = vsel %vm28_vm6, %v27_v28, 0.0  ;;  %v29_v37 = vsel %vm28_vm6, %v25_v29, %v27_v28  ;;  %v165_v6 = vmul.f32 %v161_v57, %v161_v57  ;;  %v166_v7 = vmul.f32 %v162_v58, %v162_v58 }
  0x88   :  { %v36_v34 = vpop.permute.xlu1 %35  ;;  %v34_v35 = vpop.permute.xlu0 %33 }
  0x89   :  { %v38_v38 = vsel %vm37_vm7, %v34_v35, %v36_v34  ;;  %v41_v39 = vsel %vm37_vm7, 0.0, %v34_v35 }
  0x8a   :  { %v95_v41 = vsub.f32 %v29_v37, %v41_v39  ;;  %v96_v42 = vsub.f32 %v32_v36, %v38_v38 }
  0x8c   :  { %v99_v48 = vmul.f32 %v95_v41, %v95_v41  ;;  %v100_v49 = vmul.f32 %v96_v42, %v96_v42  ;;  %v126_v50 = vpop.permute.xlu1 %125  ;;  %v124_v51 = vpop.permute.xlu0 %123  ;;  %v270_v41 = vmov 0.0  }
  0x8d   :  { %v130_v60 = vsel %vm28_vm6, %v126_v50, 0.0  ;;  %v127_v0 = vsel %vm28_vm6, %v124_v51, %v126_v50  ;;  %17 = vst.msk [vmem:[#allocation2] sm:$0x1] %vm16_vm1, %v270_v41 }
  0x8e   :  { %v103_v54 = vadd.f32 %v101_v43, %v99_v48  ;;  %v104_v55 = vadd.f32 %v102_v44, %v100_v49 }
  0x90   :  { %v105_v59 = vadd.f32 1e-06, %v103_v54  ;;  %v134_v61 = vpop.permute.xlu1 %133  ;;  %v132_v62 = vpop.permute.xlu0 %131  ;;  %v106_v63 = vadd.f32 1e-06, %v104_v55 }
  0x91   :  { %v135_v1 = vsel %vm37_vm7, %v132_v62, %v134_v61  ;;  %v138_v2 = vsel %vm37_vm7, 0.0, %v132_v62 }
  0x92   :  { %v159_v3 = vsub.f32 %v127_v0, %v138_v2  ;;  %v160_v5 = vsub.f32 %v130_v60, %v135_v1  ;;  %234 = vrsqrt.f32 %v105_v59  ;;  %vm109_vm8 = vcmp.eq.f32.partialorder %v105_v59, inf }
  0x93   :  { %236 = vrsqrt.f32 %v106_v63  ;;  %vm111_vm9 = vcmp.eq.f32.partialorder %v105_v59, 0.0  ;;  %v112_v20 = vand.u32 2147483648, %v105_v59  ;;  %vm116_vm10 = vcmp.eq.f32.partialorder %v106_v63, inf }
  0x94   :  { %v163_v8 = vmul.f32 %v159_v3, %v159_v3  ;;  %v164_v9 = vmul.f32 %v160_v5, %v160_v5  ;;  %vm118_vm11 = vcmp.eq.f32.partialorder %v106_v63, 0.0  ;;  %v119_v23 = vand.u32 2147483648, %v106_v63  ;;  %v197_v49 = vld [vmem:[#allocation2] sm:$0x1] }
  0x96   :  { %v167_v10 = vadd.f32 %v165_v6, %v163_v8  ;;  %v168_v11 = vadd.f32 %v166_v7, %v164_v9 }
  0x98   :  { %v169_v12 = vadd.f32 1e-06, %v167_v10  ;;  %v170_v13 = vadd.f32 1e-06, %v168_v11 }
  0x9a   :  { %238 = vrsqrt.f32 %v169_v12  ;;  %vm173_vm12 = vcmp.eq.f32.partialorder %v169_v12, inf  ;;  %v176_v26 = vand.u32 2147483648, %v169_v12  ;;  %vm175_vm13 = vcmp.eq.f32.partialorder %v169_v12, 0.0 }
  0x9b   :  { %240 = vrsqrt.f32 %v170_v13  ;;  %vm180_vm14 = vcmp.eq.f32.partialorder %v170_v13, inf  ;;  %v183_v29 = vand.u32 2147483648, %v170_v13  ;;  %vm182_vm15 = vcmp.eq.f32.partialorder %v170_v13, 0.0 }
  0x9c   :  { %v235_v14 = vpop.eup %234 }
  0x9d   :  { %v237_v15 = vpop.eup %236  ;;  %v108_v16 = vmul.f32 %v235_v14, %v105_v59 }
  0x9e   :  { %v115_v17 = vmul.f32 %v237_v15, %v106_v63 }
  0x9f   :  { %v110_v22 = vsel %vm109_vm8, %v105_v59, %v108_v16 }
  0xa0   :  { %v117_v25 = vsel %vm116_vm10, %v106_v63, %v115_v17  ;;  %v113_v4 = vsel %vm111_vm9, %v112_v20, %v110_v22 }
  0xa1   :  { %v120_v32 = vsel %vm118_vm11, %v119_v23, %v117_v25 }
  0xa4   :  { %v239_v19 = vpop.eup %238 }
  0xa5   :  { %v241_v21 = vpop.eup %240  ;;  %v172_v24 = vmul.f32 %v239_v19, %v169_v12 }
  0xa6   :  { %v179_v27 = vmul.f32 %v241_v21, %v170_v13 }
  0xa7   :  { %v174_v28 = vsel %vm173_vm12, %v169_v12, %v172_v24 }
  0xa8   :  { %v177_v30 = vsel %vm175_vm13, %v176_v26, %v174_v28  ;;  %v181_v31 = vsel %vm180_vm14, %v170_v13, %v179_v27 }
  0xa9   :  { %v184_v33 = vsel %vm182_vm15, %v183_v29, %v181_v31  ;;  %v191_v34 = vsub.f32 %v113_v4, %v177_v30 }
  0xaa   :  { %v192_v35 = vsub.f32 %v120_v32, %v184_v33 }
  0xab   :  { %v193_v36 = vand.u32 2147483647, %v191_v34 }
  0xac   :  { %v194_v37 = vand.u32 2147483647, %v192_v35 }
  0xad   :  { %v195_v38 = vsel %vm190_vm0, %v193_v36, 0.0 }
  0xae   :  { %v196_v39 = vsel %vm190_vm0, %v194_v37, 0.0 }
  0xaf   :  { %v198_v40 = vadd.f32 %v196_v39, %v195_v38 }
  0xb1   :  { %199 = vadd.xlane.f32.xlu0 %v198_v40 }
 0x13e   :  { %v200_v42 = vpop.xlane.xlu0 %199 }
 0x13f   :  { %v201_v43 = vrot.slane %v200_v42, 4 }
 0x141   :  { %v202_v44 = vadd.f32 %v201_v43, %v200_v42 }
 0x143   :  { %v203_v45 = vrot.slane %v202_v44, 2 }
 0x145   :  { %v204_v46 = vadd.f32 %v203_v45, %v202_v44 }
 0x147   :  { %v205_v47 = vrot.slane %v204_v46, 1 }
 0x149   :  { %v206_v48 = vadd.f32 %v205_v47, %v204_v46 }
 0x14b   :  { %226 = vpush %v206_v48 }
 0x17c   :  { %s227_s21 = spop %226 }
 0x17d   :  { %v208_v50 = vstv %s227_s21 }
 0x17e   :  { %v209_v51 = vadd.f32 %v208_v50, %v197_v49 }
 0x180   :  { %211 = vst.msk [vmem:[#allocation2] sm:$0x1] %vm16_vm1, %v209_v51 }
 0x181   :  { %253 = shalt.err (!%p250_p4)
}
 0x182   :  { %s254_s26 = scalar_lea.hbm %s366_s2, 16 }
 0x183   :  { %p255_p5 = scmp.ne.s32.totalorder %s366_s2, %s254_s26  ;;  %p258_p6 = scmp.lt.u32.totalorder %s254_s26, %s366_s2 }
 0x185   :  { %p260_p7 = pnand %p258_p6, %p255_p5 }
 0x187   :  { %263 = shalt.err (!%p260_p7)
}
 0x188   :  { %221 = dma.vmem_to_hbm [thread:$0]  %s219_s1, 16, %s366_s2, [#allocation3]  }
 0x189   :  { %264 = dma.done.wait [#allocation3], 16  }
 0x18a   :  { %265 = vsyncadd [#allocation3], 4294967280 }
 0x18b   :  { %225 = vsyncpa [#allocation3], 1 }

// kernel: dual_grad_loss.49
= control target key start
LH: loop header
LB: loop body
LE: loop exit
PB: predicated region body
PF: predicated region fallthrough
CT: control target
= control target key end

     0   :  { %s198_s11 = smov 1   ;;  %s199_s12 = smov 127   ;;  %s251_s0 = inlined_call_operand.vmem [shape: f32[8,256], index: 0, kind: input, shape index: {}]   ;;  %s252_s1 = inlined_call_operand.vmem [shape: f32[8,256], index: 1, kind: input, shape index: {}]   ;;  %s253_s2 = inlined_call_operand.hbm [shape: f32[1,1], index: 2, kind: output, shape index: {}]  }
   0x1   :  { %v20_v0 = vld [vmem:[%s252_s1] sm:$0xff] }
   0x2   :  { %51 = vrot.lane.b32.xlu1 %v20_v0, %s198_s11  ;;  %42 = vrot.lane.b32.xlu0 %v20_v0, %s199_s12 }
   0x3   :  { %7 = vsyncpa [#allocation3], 0  ;;  %v21_v1 = vld [vmem:[%s252_s1 + $0x8] sm:$0xff]  ;;  %s200_s15 = smov 112   ;;  %s201_s16 = smov 16   ;;  %v60_v2 = vlaneseq  ;;  %vm46_vm0 = vcmask 1039360  }
   0x4   :  { %vm55_vm1 = vcmask 7168   ;;  %vm28_vm6 = vcmask 916480   ;;  %vm37_vm7 = vcmask 130048   ;;  %v18_v43 = vld [vmem:[%s251_s0] sm:$0xff]  ;;  %v19_v47 = vld [vmem:[%s251_s0 + $0x8] sm:$0xff]  ;;  %vm16_vm13 = vcmask 0  }
   0x5   :  { %v61_v3 = vand.u32 127, %v60_v2  ;;  %v123_v46 = vshrl.u32 %v60_v2, 7  ;;  %v202_v60 = vmov 0.0   ;;  %s203_s0 = smov [#allocation2]  }
   0x6   :  { %53 = vrot.lane.b32.xlu1 %v21_v1, %s198_s11  ;;  %44 = vrot.lane.b32.xlu0 %v21_v1, %s199_s12  ;;  %17 = vst.msk [vmem:[#allocation2] sm:$0x1] %vm16_vm13, %v202_v60  ;;  %s154_s20 = sshll.u32 %s203_s0, 4  ;;  %s155_s20 = int_to_ptr.vmem [resolvable:$true] %s154_s20 }
   0x7   :  { %v62_v4 = vadd.s32 128, %v61_v3  ;;  %v67_v8 = vand.u32 15, %v61_v3  ;;  %vm126_vm12 = vcmp.lt.s32.totalorder %v123_v46, 2  ;;  %s174_s22 = scalar_lea.vmem %s155_s20, 16  ;;  %s178_s23 = scalar_lea.vmem %s155_s20, 32 }
   0x8   :  { %p175_p0 = scmp.ne.s32.totalorder %s155_s20, %s174_s22  ;;  %p179_p1 = scmp.lt.s32.totalorder %s155_s20, %s155_s20 }
   0x9   :  { %v74_v7 = vand.u32 15, %v62_v4  ;;  %vm87_vm3 = vcmp.eq.s32.totalorder %v67_v8, 15  ;;  %vm91_vm5 = vcmp.eq.s32.totalorder %v67_v8, 0  ;;  %p180_p2 = scmp.lt.s32.totalorder %s178_s23, %s174_s22 }
   0xa   :  { %26 = vrot.lane.b32.xlu1 %v21_v1, %s200_s15  ;;  %24 = vrot.lane.b32.xlu0 %v20_v0, %s200_s15 }
   0xb   :  { %vm225_vm2 = vcmp.eq.s32.totalorder %v74_v7, 0  ;;  %vm88_vm4 = vcmp.eq.s32.totalorder %v74_v7, 15  ;;  %p181_p3 = por %p180_p2, %p179_p1 }
   0xd   :  { %v133_v4 = vld [vmem:[#allocation2] sm:$0x1]  ;;  %p182_p4 = pnand %p181_p3, %p175_p0 }
   0xe   :  { %35 = vrot.lane.b32.xlu1 %v21_v1, %s201_s16  ;;  %33 = vrot.lane.b32.xlu0 %v20_v0, %s201_s16 }
  0x74   :  { %v52_v5 = vpop.permute.xlu1 %51  ;;  %v43_v6 = vpop.permute.xlu0 %42 }
  0x75   :  { %v59_v15 = vsel %vm55_vm1, 0.0, %v52_v5 }
  0x76   :  { %v93_v21 = vsel %vm91_vm5, 0.0, %v59_v15 }
  0x78   :  { %v54_v9 = vpop.permute.xlu1 %53  ;;  %v45_v10 = vpop.permute.xlu0 %44 }
  0x79   :  { %v56_v12 = vsel %vm55_vm1, %v52_v5, %v54_v9  ;;  %v47_v13 = vsel %vm46_vm0, %v43_v6, %v45_v10  ;;  %v50_v14 = vsel %vm46_vm0, %v45_v10, 0.0 }
  0x7a   :  { %v94_v18 = vsel %vm225_vm2, 0.0, %v56_v12  ;;  %v89_v19 = vsel %vm87_vm3, 0.0, %v47_v13  ;;  %v90_v20 = vsel %vm88_vm4, 0.0, %v50_v14 }
  0x7b   :  { %v97_v22 = vsub.f32 %v89_v19, %v93_v21  ;;  %v98_v23 = vsub.f32 %v90_v20, %v94_v18 }
  0x7c   :  { %v27_v16 = vpop.permute.xlu1 %26  ;;  %v25_v17 = vpop.permute.xlu0 %24 }
  0x7d   :  { %v32_v26 = vsel %vm28_vm6, %v27_v16, 0.0  ;;  %v29_v27 = vsel %vm28_vm6, %v25_v17, %v27_v16  ;;  %v101_v32 = vmul.f32 %v97_v22, %v97_v22  ;;  %v102_v33 = vmul.f32 %v98_v23, %v98_v23 }
  0x80   :  { %v36_v24 = vpop.permute.xlu1 %35  ;;  %v34_v25 = vpop.permute.xlu0 %33 }
  0x81   :  { %v38_v28 = vsel %vm37_vm7, %v34_v25, %v36_v24  ;;  %v41_v29 = vsel %vm37_vm7, 0.0, %v34_v25 }
  0x82   :  { %v95_v30 = vsub.f32 %v29_v27, %v41_v29  ;;  %v96_v31 = vsub.f32 %v32_v26, %v38_v28 }
  0x84   :  { %v99_v34 = vmul.f32 %v95_v30, %v95_v30  ;;  %v100_v35 = vmul.f32 %v96_v31, %v96_v31 }
  0x86   :  { %v103_v36 = vadd.f32 %v101_v32, %v99_v34  ;;  %v104_v37 = vadd.f32 %v102_v33, %v100_v35 }
  0x88   :  { %v105_v38 = vadd.f32 1e-06, %v103_v36  ;;  %v106_v39 = vadd.f32 1e-06, %v104_v37 }
  0x8a   :  { %170 = vrsqrt.f32 %v105_v38  ;;  %vm109_vm8 = vcmp.eq.f32.partialorder %v105_v38, inf  ;;  %v112_v44 = vand.u32 2147483648, %v105_v38  ;;  %vm111_vm9 = vcmp.eq.f32.partialorder %v105_v38, 0.0 }
  0x8b   :  { %172 = vrsqrt.f32 %v106_v39  ;;  %vm116_vm10 = vcmp.eq.f32.partialorder %v106_v39, inf  ;;  %v119_v49 = vand.u32 2147483648, %v106_v39  ;;  %vm118_vm11 = vcmp.eq.f32.partialorder %v106_v39, 0.0 }
  0x94   :  { %v171_v40 = vpop.eup %170 }
  0x95   :  { %v173_v41 = vpop.eup %172  ;;  %v108_v42 = vmul.f32 %v171_v40, %v105_v38 }
  0x96   :  { %v115_v45 = vmul.f32 %v173_v41, %v106_v39 }
  0x97   :  { %v110_v48 = vsel %vm109_vm8, %v105_v38, %v108_v42 }
  0x98   :  { %v113_v50 = vsel %vm111_vm9, %v112_v44, %v110_v48  ;;  %v117_v51 = vsel %vm116_vm10, %v106_v39, %v115_v45 }
  0x99   :  { %v120_v52 = vsel %vm118_vm11, %v119_v49, %v117_v51  ;;  %v127_v53 = vsub.f32 %v18_v43, %v113_v50 }
  0x9a   :  { %v128_v54 = vsub.f32 %v19_v47, %v120_v52 }
  0x9b   :  { %v129_v55 = vand.u32 2147483647, %v127_v53 }
  0x9c   :  { %v130_v56 = vand.u32 2147483647, %v128_v54 }
  0x9d   :  { %v131_v57 = vsel %vm126_vm12, %v129_v55, 0.0 }
  0x9e   :  { %v132_v58 = vsel %vm126_vm12, %v130_v56, 0.0 }
  0x9f   :  { %v134_v59 = vadd.f32 %v132_v58, %v131_v57 }
  0xa1   :  { %135 = vadd.xlane.f32.xlu0 %v134_v59 }
 0x12e   :  { %v136_v61 = vpop.xlane.xlu0 %135 }
 0x12f   :  { %v137_v62 = vrot.slane %v136_v61, 4 }
 0x131   :  { %v138_v63 = vadd.f32 %v137_v62, %v136_v61 }
 0x133   :  { %v139_v0 = vrot.slane %v138_v63, 2 }
 0x135   :  { %v140_v1 = vadd.f32 %v139_v0, %v138_v63 }
 0x137   :  { %v141_v2 = vrot.slane %v140_v1, 1 }
 0x139   :  { %v142_v3 = vadd.f32 %v141_v2, %v140_v1 }
 0x13b   :  { %162 = vpush %v142_v3 }
 0x16c   :  { %s163_s21 = spop %162 }
 0x16d   :  { %v144_v5 = vstv %s163_s21 }
 0x16e   :  { %v145_v6 = vadd.f32 %v144_v5, %v133_v4 }
 0x170   :  { %147 = vst.msk [vmem:[#allocation2] sm:$0x1] %vm16_vm13, %v145_v6 }
 0x171   :  { %185 = shalt.err (!%p182_p4)
}
 0x172   :  { %s186_s26 = scalar_lea.hbm %s253_s2, 16 }
 0x173   :  { %p187_p5 = scmp.ne.s32.totalorder %s253_s2, %s186_s26  ;;  %p190_p6 = scmp.lt.u32.totalorder %s186_s26, %s253_s2 }
 0x175   :  { %p192_p7 = pnand %p190_p6, %p187_p5 }
 0x177   :  { %195 = shalt.err (!%p192_p7)
}
 0x178   :  { %157 = dma.vmem_to_hbm [thread:$0]  %s155_s20, 16, %s253_s2, [#allocation3]  }
 0x179   :  { %196 = dma.done.wait [#allocation3], 16  }
 0x17a   :  { %197 = vsyncadd [#allocation3], 4294967280 }
 0x17b   :  { %161 = vsyncpa [#allocation3], 1 }

</bundles_post_ra>
